<compile_context>
chip_gen: v5e
topology: v5e:2x2
jax: 0.10.0
libtpu: 0.0.40
codegen_flags: <defaults>
</compile_context>

<pallas_src>
import numpy as np
import jax
import jax.numpy as jnp
from jax.experimental import pallas as pl
from jax.experimental.pallas import tpu as pltpu


LPAD = 8  # column offset of the interior inside the padded VMEM halo buffers


def _const_index_map(ndim):
    return lambda b: (0,) * ndim


# ----------------------------------------------------------------------------
# Fused encoder forward: NCHW in, NCHW out.
# ----------------------------------------------------------------------------
def encoder_unet_forward(x_nchw, params):
    """x_nchw: (B, C_in, H, W) -> (B, 32*2**depth, H/2**depth, W/2**depth)."""
    x = jnp.transpose(x_nchw, (0, 2, 3, 1)).astype(jnp.float32)   # NCHW -> NHWC
    B, H, W, cin = x.shape
    nstages = len(params)
    depth = nstages - 1
    mid = [int(params[s][0][0].shape[-1]) for s in range(nstages)]
    assert H % (2 ** depth) == 0 and W % (2 ** depth) == 0, \
        "spatial dims must be divisible by 2**depth"
    # TODO(synk): PyTorch MaxPool2d(2,2) silently floors odd spatial dims; not supported here.

    # per-stage static dims: (Hs, Ws, Cin_s, Cout_s)
    stage_dims = []
    prev = cin
    for s in range(nstages):
        stage_dims.append((H >> s, W >> s, prev, mid[s]))
        prev = mid[s]
    Hd, Wd, Cf = H >> depth, W >> depth, mid[-1]

    # Weights: HWIO (3,3,Ci,Co) -> kx-major (3, 3*Ci, Co) bf16 so the 3 ky taps
    # fold into a single K=3*Ci contraction per kx.  Biases: one packed f32
    # blob, sliced at static lane offsets inside the kernel.
    w_flat, b_list, b_off = [], [], []
    off = 0
    for s in range(nstages):
        for j in range(2):
            w, b = params[s][j]
            ci, co = int(w.shape[2]), int(w.shape[3])
            w_flat.append(jnp.transpose(w, (1, 0, 2, 3))
                          .reshape(3, 3 * ci, co).astype(jnp.bfloat16))
            b_list.append(b.reshape(1, co).astype(jnp.float32))
            b_off.append(off)
            off += co
    bias_blob = jnp.concatenate(b_list, axis=-1)          # (1, sum Co) f32

    # bf16 VMEM halo buffers: one per conv input, interior at (row 1, col LPAD).
    pad_shapes = []
    for (Hs, Ws, ci, co) in stage_dims:
        pad_shapes.append((Hs + 2, Ws + 2 * LPAD, ci))     # input of conv (s, 0)
        pad_shapes.append((Hs + 2, Ws + 2 * LPAD, co))     # input of conv (s, 1)

    n_conv = 2 * nstages

    def kernel(*refs):
        x_ref = refs[0]
        w_refs = refs[1:1 + n_conv]
        b_ref = refs[1 + n_conv]
        o_ref = refs[2 + n_conv]
        pad_refs = refs[3 + n_conv:]

        def write_padded(buf, val3):
            # val3: (Hs, Ws, C) activation; buf: (Hs+2, Ws+2*LPAD, C) bf16 halo
            # buffer.  Zero only the halo ring the conv reads (rows 0 / Hs+1
            # over cols [LPAD-1, LPAD+Ws], plus the two side columns); the
            # interior is fully overwritten.  Done every grid iteration so it
            # stays safe under megacore batch sharding.
            Hs, Ws, C = val3.shape
            z_row = jnp.zeros((1, Ws + 2, C), buf.dtype)
            z_col = jnp.zeros((Hs, 1, C), buf.dtype)
            buf[0:1, LPAD - 1:LPAD + Ws + 1, :] = z_row
            buf[Hs + 1:Hs + 2, LPAD - 1:LPAD + Ws + 1, :] = z_row
            buf[1:Hs + 1, LPAD - 1:LPAD, :] = z_col
            buf[1:Hs + 1, LPAD + Ws:LPAD + Ws + 1, :] = z_col
            buf[1:Hs + 1, LPAD:LPAD + Ws, :] = val3.astype(buf.dtype)

        def conv3x3_relu(buf, w_ref, boff, Hs, Ws, Ci, Co):
            # 3x3 / pad=1 conv + bias + ReLU: 3 MXU matmuls (one per kx shift)
            # with the ky taps folded into the contraction (K = 3*Ci), bf16
            # inputs, f32 accumulation.  ky taps are free row-block slices of
            # the flattened kx-shifted slab.
            # TODO(synk): derive the kx=0/2 shifts with pltpu.roll (XLU) instead
            # of unaligned sublane slices; tile M for realistic sizes.
            xpb = buf[...]                                  # (Hs+2, Ws+2*LPAD, Ci) bf16
            acc = None
            for kx in range(3):
                c0 = LPAD - 1 + kx
                xs = xpb[:, c0:c0 + Ws, :].reshape((Hs + 2) * Ws, Ci)
                patch = jnp.concatenate(
                    [xs[ky * Ws:ky * Ws + Hs * Ws, :] for ky in range(3)],
                    axis=-1)                                # (Hs*Ws, 3*Ci) bf16
                d = jnp.dot(patch, w_ref[kx],
                            preferred_element_type=jnp.float32)
                acc = d if acc is None else acc + d
            bias = b_ref[:, boff:boff + Co]                 # (1, Co) f32
            return jnp.maximum(acc + bias, 0.0)             # (Hs*Ws, Co) f32

        def maxpool2x2(a, Hs, Ws, Co):
            # a: (Hs*Ws, Co), rows ordered (h, w) row-major -> (Hs/2, Ws/2, Co),
            # entirely in registers (no staging buffer).
            Ho, Wo = Hs // 2, Ws // 2
            ah = a.reshape(Ho, 2, Ws, Co)                   # split h into (ho, hp)
            mh = jnp.maximum(ah[:, 0], ah[:, 1])            # (Ho, Ws, Co)
            mw = mh.reshape(Ho, Wo, 2, Co)                  # split w into (wo, wp)
            return jnp.maximum(mw[:, :, 0, :], mw[:, :, 1, :])   # (Ho, Wo, Co)

        # ---- stage 0: raw NHWC input goes straight into the first halo buffer
        write_padded(pad_refs[0], x_ref[0])

        for s in range(nstages):
            Hs, Ws, Ci, Co = stage_dims[s]
            a = conv3x3_relu(pad_refs[2 * s], w_refs[2 * s], b_off[2 * s],
                             Hs, Ws, Ci, Co)
            write_padded(pad_refs[2 * s + 1], a.reshape(Hs, Ws, Co))
            a = conv3x3_relu(pad_refs[2 * s + 1], w_refs[2 * s + 1],
                             b_off[2 * s + 1], Hs, Ws, Co, Co)
            if s < depth:
                pooled = maxpool2x2(a, Hs, Ws, Co)          # (Hs/2, Ws/2, Co) f32
                write_padded(pad_refs[2 * (s + 1)], pooled)
            else:
                o_ref[0] = a.astype(o_ref.dtype)            # (Hd*Wd, Cf), lane-dense

    in_specs = [pl.BlockSpec((1, H, W, cin), lambda b: (b, 0, 0, 0))]
    for wf in w_flat:
        in_specs.append(pl.BlockSpec(wf.shape, _const_index_map(wf.ndim)))
    in_specs.append(pl.BlockSpec(bias_blob.shape, _const_index_map(bias_blob.ndim)))

    out = pl.pallas_call(
        kernel,
        out_shape=jax.ShapeDtypeStruct((B, Hd * Wd, Cf), jnp.float32),
        grid=(B,),
        in_specs=in_specs,
        out_specs=pl.BlockSpec((1, Hd * Wd, Cf), lambda b: (b, 0, 0)),
        scratch_shapes=[pltpu.VMEM(shp, jnp.bfloat16) for shp in pad_shapes],
        compiler_params=pltpu.CompilerParams(
            dimension_semantics=("parallel",),
            vmem_limit_bytes=32 * 1024 * 1024),
    )(x, *w_flat, bias_blob)

    return jnp.transpose(out.reshape(B, Hd, Wd, Cf), (0, 3, 1, 2))   # -> NCHW


# ----------------------------------------------------------------------------
# Parameter init (deterministic, PyTorch Conv2d-like uniform bounds).
# Weights stored as HWIO = (3, 3, Cin, Cout), float32.
# ----------------------------------------------------------------------------
def init_encoder_params(key, in_channels, depth):
    mid_channels = [32 * 2 ** i for i in range(depth + 1)]
    params = []
    prev = in_channels
    for stage in range(depth + 1):
        cout = mid_channels[stage]
        convs = []
        cin = prev
        for _ in range(2):
            key, kw, kb = jax.random.split(key, 3)
            bound = 1.0 / np.sqrt(cin * 9)
            w = jax.random.uniform(kw, (3, 3, cin, cout), jnp.float32, -bound, bound)
            b = jax.random.uniform(kb, (cout,), jnp.float32, -bound, bound)
            convs.append((w, b))
            cin = cout
        params.append(convs)
        prev = cout
    return params


# ----------------------------------------------------------------------------
# Pure-JAX reference (XLA convs) mirroring the kernel numerics: bf16 conv
# inputs / weights, f32 accumulation, f32 bias + ReLU, f32 pooling.
# ----------------------------------------------------------------------------
def reference_forward(x_nchw, params):
    def conv(x, w, b):
        y = jax.lax.conv_general_dilated(
            x.astype(jnp.bfloat16), w.astype(jnp.bfloat16), (1, 1),
            ((1, 1), (1, 1)),
            dimension_numbers=("NCHW", "HWIO", "NCHW"),
            preferred_element_type=jnp.float32)
        return jax.nn.relu(y + b[None, :, None, None])

    x = x_nchw.astype(jnp.float32)
    for i, block in enumerate(params):
        if i > 0:
            x = jax.lax.reduce_window(x, -jnp.inf, jax.lax.max,
                                      (1, 1, 2, 2), (1, 1, 2, 2), "VALID")
        for (w, b) in block:
            x = conv(x, w, b)
    return x


if __name__ == "__main__":
    # Small shapes: batch=2, in_channels=4, spatial 16x16, depth=2
    # mid_channels_list = [32, 64, 128]; output = (2, 128, 4, 4)
    B, C_IN, H, W, DEPTH = 2, 4, 16, 16, 2

    key = jax.random.PRNGKey(0)
    key, kx = jax.random.split(key)
    x = jax.random.normal(kx, (B, C_IN, H, W), dtype=jnp.float32)
    params = init_encoder_params(key, C_IN, DEPTH)

    fwd = jax.jit(encoder_unet_forward)
    out = jax.block_until_ready(fwd(x, params))
    print(out.shape)   # mirrors the `print(x.shape)` in the PyTorch forward

    ref = jax.block_until_ready(reference_forward(x, params))
    np.testing.assert_allclose(np.asarray(out), np.asarray(ref),
                               rtol=2e-3, atol=2e-3)
    print("KERNEL_OK")
</pallas_src>

<mosaic_0001>
module attributes {stable_mosaic.version = 11 : i64} {
  func.func @kernel(%arg0: i32, %arg1: memref<1x16x16x4xf32, #tpu.memory_space<vmem>>, %arg2: memref<3x12x32xbf16, #tpu.memory_space<vmem>>, %arg3: memref<3x96x32xbf16, #tpu.memory_space<vmem>>, %arg4: memref<3x96x64xbf16, #tpu.memory_space<vmem>>, %arg5: memref<3x192x64xbf16, #tpu.memory_space<vmem>>, %arg6: memref<3x192x128xbf16, #tpu.memory_space<vmem>>, %arg7: memref<3x384x128xbf16, #tpu.memory_space<vmem>>, %arg8: memref<1x448xf32, #tpu.memory_space<vmem>>, %arg9: memref<1x16x128xf32, #tpu.memory_space<vmem>>, %arg10: memref<18x32x4xbf16, #tpu.memory_space<vmem>>, %arg11: memref<18x32x32xbf16, #tpu.memory_space<vmem>>, %arg12: memref<10x24x32xbf16, #tpu.memory_space<vmem>>, %arg13: memref<10x24x64xbf16, #tpu.memory_space<vmem>>, %arg14: memref<6x20x64xbf16, #tpu.memory_space<vmem>>, %arg15: memref<6x20x128xbf16, #tpu.memory_space<vmem>>) attributes {dimension_semantics = [#tpu.dimension_semantics<parallel>], iteration_bounds = array<i64: 2>, scalar_prefetch = 0 : i64, scratch_operands = 6 : i64, tpu.core_type = #tpu.core_type<tc>, window_params = [{transform_indices = @transform_0, window_bounds = array<i64: 1, 16, 16, 4>}, {pipeline_mode = #tpu.pipeline_mode<synchronous>, transform_indices = @transform_1, window_bounds = array<i64: 3, 12, 32>}, {pipeline_mode = #tpu.pipeline_mode<synchronous>, transform_indices = @transform_2, window_bounds = array<i64: 3, 96, 32>}, {pipeline_mode = #tpu.pipeline_mode<synchronous>, transform_indices = @transform_3, window_bounds = array<i64: 3, 96, 64>}, {pipeline_mode = #tpu.pipeline_mode<synchronous>, transform_indices = @transform_4, window_bounds = array<i64: 3, 192, 64>}, {pipeline_mode = #tpu.pipeline_mode<synchronous>, transform_indices = @transform_5, window_bounds = array<i64: 3, 192, 128>}, {pipeline_mode = #tpu.pipeline_mode<synchronous>, transform_indices = @transform_6, window_bounds = array<i64: 3, 384, 128>}, {pipeline_mode = #tpu.pipeline_mode<synchronous>, transform_indices = @transform_7, window_bounds = array<i64: 1, 448>}, {transform_indices = @transform_8, window_bounds = array<i64: 1, 16, 128>}]} {
    %c0 = arith.constant 0 : index
    %c0_0 = arith.constant 0 : index
    %c0_1 = arith.constant 0 : index
    %c0_2 = arith.constant 0 : index
    %0 = vector.load %arg1[%c0, %c0_0, %c0_1, %c0_2] : memref<1x16x16x4xf32, #tpu.memory_space<vmem>>, vector<1x16x16x4xf32>
    %1 = vector.shape_cast %0 : vector<1x16x16x4xf32> to vector<16x16x4xf32>
    %cst = arith.constant 0.000000e+00 : bf16
    %2 = vector.broadcast %cst : bf16 to vector<1x18x4xbf16>
    %cst_3 = arith.constant 0.000000e+00 : bf16
    %3 = vector.broadcast %cst_3 : bf16 to vector<16x1x4xbf16>
    %c0_4 = arith.constant 0 : index
    %c7 = arith.constant 7 : index
    %c0_5 = arith.constant 0 : index
    %4 = vector.load %arg10[%c0_4, %c7, %c0_5] : memref<18x32x4xbf16, #tpu.memory_space<vmem>>, vector<1x18x4xbf16>
    tpu.vector_store %arg10[%c0_4, %c7, %c0_5], %2 {strides = array<i32>} : memref<18x32x4xbf16, #tpu.memory_space<vmem>>, vector<1x18x4xbf16>,
    %c17 = arith.constant 17 : index
    %c7_6 = arith.constant 7 : index
    %c0_7 = arith.constant 0 : index
    %5 = vector.load %arg10[%c17, %c7_6, %c0_7] : memref<18x32x4xbf16, #tpu.memory_space<vmem>>, vector<1x18x4xbf16>
    tpu.vector_store %arg10[%c17, %c7_6, %c0_7], %2 {strides = array<i32>} : memref<18x32x4xbf16, #tpu.memory_space<vmem>>, vector<1x18x4xbf16>,
    %c1 = arith.constant 1 : index
    %c7_8 = arith.constant 7 : index
    %c0_9 = arith.constant 0 : index
    %6 = vector.load %arg10[%c1, %c7_8, %c0_9] : memref<18x32x4xbf16, #tpu.memory_space<vmem>>, vector<16x1x4xbf16>
    tpu.vector_store %arg10[%c1, %c7_8, %c0_9], %3 {strides = array<i32>} : memref<18x32x4xbf16, #tpu.memory_space<vmem>>, vector<16x1x4xbf16>,
    %c1_10 = arith.constant 1 : index
    %c24 = arith.constant 24 : index
    %c0_11 = arith.constant 0 : index
    %7 = vector.load %arg10[%c1_10, %c24, %c0_11] : memref<18x32x4xbf16, #tpu.memory_space<vmem>>, vector<16x1x4xbf16>
    tpu.vector_store %arg10[%c1_10, %c24, %c0_11], %3 {strides = array<i32>} : memref<18x32x4xbf16, #tpu.memory_space<vmem>>, vector<16x1x4xbf16>,
    %8 = arith.truncf %1 : vector<16x16x4xf32> to vector<16x16x4xbf16>
    %c1_12 = arith.constant 1 : index
    %c8 = arith.constant 8 : index
    %c0_13 = arith.constant 0 : index
    %9 = vector.load %arg10[%c1_12, %c8, %c0_13] : memref<18x32x4xbf16, #tpu.memory_space<vmem>>, vector<16x16x4xbf16>
    tpu.vector_store %arg10[%c1_12, %c8, %c0_13], %8 {strides = array<i32>} : memref<18x32x4xbf16, #tpu.memory_space<vmem>>, vector<16x16x4xbf16>,
    %c0_14 = arith.constant 0 : index
    %c0_15 = arith.constant 0 : index
    %c0_16 = arith.constant 0 : index
    %10 = vector.load %arg10[%c0_14, %c0_15, %c0_16] : memref<18x32x4xbf16, #tpu.memory_space<vmem>>, vector<18x32x4xbf16>
    %11 = vector.extract_strided_slice %10 {offsets = [0, 7, 0], sizes = [18, 16, 4], strides = [1, 1, 1]} : vector<18x32x4xbf16> to vector<18x16x4xbf16>
    %12 = vector.shape_cast %11 : vector<18x16x4xbf16> to vector<288x4xbf16>
    %13 = vector.extract_strided_slice %12 {offsets = [0, 0], sizes = [256, 4], strides = [1, 1]} : vector<288x4xbf16> to vector<256x4xbf16>
    %14 = vector.extract_strided_slice %12 {offsets = [16, 0], sizes = [256, 4], strides = [1, 1]} : vector<288x4xbf16> to vector<256x4xbf16>
    %15 = vector.extract_strided_slice %12 {offsets = [32, 0], sizes = [256, 4], strides = [1, 1]} : vector<288x4xbf16> to vector<256x4xbf16>
    %16 = tpu.concatenate %13, %14, %15 in 1 : vector<256x4xbf16>, vector<256x4xbf16>, vector<256x4xbf16> -> vector<256x12xbf16>
    %c0_17 = arith.constant 0 : index
    %c0_18 = arith.constant 0 : index
    %c0_19 = arith.constant 0 : index
    %17 = vector.load %arg2[%c0_17, %c0_18, %c0_19] : memref<3x12x32xbf16, #tpu.memory_space<vmem>>, vector<1x12x32xbf16>
    %18 = vector.shape_cast %17 : vector<1x12x32xbf16> to vector<12x32xbf16>
    %cst_20 = arith.constant dense<0.000000e+00> : vector<256x32xf32>
    %19 = tpu.matmul %16, %18, %cst_20 {dimension_numbers = #tpu.dot_dimension_numbers<[1], [0], [0], [1], [0, 0, 1, 1], [], []>} : vector<256x12xbf16>, vector<12x32xbf16>, vector<256x32xf32> -> vector<256x32xf32>
    %20 = vector.extract_strided_slice %10 {offsets = [0, 8, 0], sizes = [18, 16, 4], strides = [1, 1, 1]} : vector<18x32x4xbf16> to vector<18x16x4xbf16>
    %21 = vector.shape_cast %20 : vector<18x16x4xbf16> to vector<288x4xbf16>
    %22 = vector.extract_strided_slice %21 {offsets = [0, 0], sizes = [256, 4], strides = [1, 1]} : vector<288x4xbf16> to vector<256x4xbf16>
    %23 = vector.extract_strided_slice %21 {offsets = [16, 0], sizes = [256, 4], strides = [1, 1]} : vector<288x4xbf16> to vector<256x4xbf16>
    %24 = vector.extract_strided_slice %21 {offsets = [32, 0], sizes = [256, 4], strides = [1, 1]} : vector<288x4xbf16> to vector<256x4xbf16>
    %25 = tpu.concatenate %22, %23, %24 in 1 : vector<256x4xbf16>, vector<256x4xbf16>, vector<256x4xbf16> -> vector<256x12xbf16>
    %c1_21 = arith.constant 1 : index
    %c0_22 = arith.constant 0 : index
    %c0_23 = arith.constant 0 : index
    %26 = vector.load %arg2[%c1_21, %c0_22, %c0_23] : memref<3x12x32xbf16, #tpu.memory_space<vmem>>, vector<1x12x32xbf16>
    %27 = vector.shape_cast %26 : vector<1x12x32xbf16> to vector<12x32xbf16>
    %cst_24 = arith.constant dense<0.000000e+00> : vector<256x32xf32>
    %28 = tpu.matmul %25, %27, %cst_24 {dimension_numbers = #tpu.dot_dimension_numbers<[1], [0], [0], [1], [0, 0, 1, 1], [], []>} : vector<256x12xbf16>, vector<12x32xbf16>, vector<256x32xf32> -> vector<256x32xf32>
    %29 = arith.addf %19, %28 : vector<256x32xf32>
    %30 = vector.extract_strided_slice %10 {offsets = [0, 9, 0], sizes = [18, 16, 4], strides = [1, 1, 1]} : vector<18x32x4xbf16> to vector<18x16x4xbf16>
    %31 = vector.shape_cast %30 : vector<18x16x4xbf16> to vector<288x4xbf16>
    %32 = vector.extract_strided_slice %31 {offsets = [0, 0], sizes = [256, 4], strides = [1, 1]} : vector<288x4xbf16> to vector<256x4xbf16>
    %33 = vector.extract_strided_slice %31 {offsets = [16, 0], sizes = [256, 4], strides = [1, 1]} : vector<288x4xbf16> to vector<256x4xbf16>
    %34 = vector.extract_strided_slice %31 {offsets = [32, 0], sizes = [256, 4], strides = [1, 1]} : vector<288x4xbf16> to vector<256x4xbf16>
    %35 = tpu.concatenate %32, %33, %34 in 1 : vector<256x4xbf16>, vector<256x4xbf16>, vector<256x4xbf16> -> vector<256x12xbf16>
    %c2 = arith.constant 2 : index
    %c0_25 = arith.constant 0 : index
    %c0_26 = arith.constant 0 : index
    %36 = vector.load %arg2[%c2, %c0_25, %c0_26] : memref<3x12x32xbf16, #tpu.memory_space<vmem>>, vector<1x12x32xbf16>
    %37 = vector.shape_cast %36 : vector<1x12x32xbf16> to vector<12x32xbf16>
    %cst_27 = arith.constant dense<0.000000e+00> : vector<256x32xf32>
    %38 = tpu.matmul %35, %37, %cst_27 {dimension_numbers = #tpu.dot_dimension_numbers<[1], [0], [0], [1], [0, 0, 1, 1], [], []>} : vector<256x12xbf16>, vector<12x32xbf16>, vector<256x32xf32> -> vector<256x32xf32>
    %39 = arith.addf %29, %38 : vector<256x32xf32>
    %c0_28 = arith.constant 0 : index
    %c0_29 = arith.constant 0 : index
    %40 = vector.load %arg8[%c0_28, %c0_29] : memref<1x448xf32, #tpu.memory_space<vmem>>, vector<1x32xf32>
    %41 = vector.broadcast %40 : vector<1x32xf32> to vector<256x32xf32>
    %42 = arith.addf %39, %41 : vector<256x32xf32>
    %cst_30 = arith.constant 0.000000e+00 : f32
    %43 = vector.broadcast %cst_30 : f32 to vector<256x32xf32>
    %44 = arith.maximumf %42, %43 : vector<256x32xf32>
    %45 = vector.shape_cast %44 : vector<256x32xf32> to vector<16x16x32xf32>
    %cst_31 = arith.constant 0.000000e+00 : bf16
    %46 = vector.broadcast %cst_31 : bf16 to vector<1x18x32xbf16>
    %cst_32 = arith.constant 0.000000e+00 : bf16
    %47 = vector.broadcast %cst_32 : bf16 to vector<16x1x32xbf16>
    %c0_33 = arith.constant 0 : index
    %c7_34 = arith.constant 7 : index
    %c0_35 = arith.constant 0 : index
    %48 = vector.load %arg11[%c0_33, %c7_34, %c0_35] : memref<18x32x32xbf16, #tpu.memory_space<vmem>>, vector<1x18x32xbf16>
    tpu.vector_store %arg11[%c0_33, %c7_34, %c0_35], %46 {strides = array<i32>} : memref<18x32x32xbf16, #tpu.memory_space<vmem>>, vector<1x18x32xbf16>,
    %c17_36 = arith.constant 17 : index
    %c7_37 = arith.constant 7 : index
    %c0_38 = arith.constant 0 : index
    %49 = vector.load %arg11[%c17_36, %c7_37, %c0_38] : memref<18x32x32xbf16, #tpu.memory_space<vmem>>, vector<1x18x32xbf16>
    tpu.vector_store %arg11[%c17_36, %c7_37, %c0_38], %46 {strides = array<i32>} : memref<18x32x32xbf16, #tpu.memory_space<vmem>>, vector<1x18x32xbf16>,
    %c1_39 = arith.constant 1 : index
    %c7_40 = arith.constant 7 : index
    %c0_41 = arith.constant 0 : index
    %50 = vector.load %arg11[%c1_39, %c7_40, %c0_41] : memref<18x32x32xbf16, #tpu.memory_space<vmem>>, vector<16x1x32xbf16>
    tpu.vector_store %arg11[%c1_39, %c7_40, %c0_41], %47 {strides = array<i32>} : memref<18x32x32xbf16, #tpu.memory_space<vmem>>, vector<16x1x32xbf16>,
    %c1_42 = arith.constant 1 : index
    %c24_43 = arith.constant 24 : index
    %c0_44 = arith.constant 0 : index
    %51 = vector.load %arg11[%c1_42, %c24_43, %c0_44] : memref<18x32x32xbf16, #tpu.memory_space<vmem>>, vector<16x1x32xbf16>
    tpu.vector_store %arg11[%c1_42, %c24_43, %c0_44], %47 {strides = array<i32>} : memref<18x32x32xbf16, #tpu.memory_space<vmem>>, vector<16x1x32xbf16>,
    %52 = arith.truncf %45 : vector<16x16x32xf32> to vector<16x16x32xbf16>
    %c1_45 = arith.constant 1 : index
    %c8_46 = arith.constant 8 : index
    %c0_47 = arith.constant 0 : index
    %53 = vector.load %arg11[%c1_45, %c8_46, %c0_47] : memref<18x32x32xbf16, #tpu.memory_space<vmem>>, vector<16x16x32xbf16>
    tpu.vector_store %arg11[%c1_45, %c8_46, %c0_47], %52 {strides = array<i32>} : memref<18x32x32xbf16, #tpu.memory_space<vmem>>, vector<16x16x32xbf16>,
    %c0_48 = arith.constant 0 : index
    %c0_49 = arith.constant 0 : index
    %c0_50 = arith.constant 0 : index
    %54 = vector.load %arg11[%c0_48, %c0_49, %c0_50] : memref<18x32x32xbf16, #tpu.memory_space<vmem>>, vector<18x32x32xbf16>
    %55 = vector.extract_strided_slice %54 {offsets = [0, 7, 0], sizes = [18, 16, 32], strides = [1, 1, 1]} : vector<18x32x32xbf16> to vector<18x16x32xbf16>
    %56 = vector.shape_cast %55 : vector<18x16x32xbf16> to vector<288x32xbf16>
    %57 = vector.extract_strided_slice %56 {offsets = [0, 0], sizes = [256, 32], strides = [1, 1]} : vector<288x32xbf16> to vector<256x32xbf16>
    %58 = vector.extract_strided_slice %56 {offsets = [16, 0], sizes = [256, 32], strides = [1, 1]} : vector<288x32xbf16> to vector<256x32xbf16>
    %59 = vector.extract_strided_slice %56 {offsets = [32, 0], sizes = [256, 32], strides = [1, 1]} : vector<288x32xbf16> to vector<256x32xbf16>
    %60 = tpu.concatenate %57, %58, %59 in 1 : vector<256x32xbf16>, vector<256x32xbf16>, vector<256x32xbf16> -> vector<256x96xbf16>
    %c0_51 = arith.constant 0 : index
    %c0_52 = arith.constant 0 : index
    %c0_53 = arith.constant 0 : index
    %61 = vector.load %arg3[%c0_51, %c0_52, %c0_53] : memref<3x96x32xbf16, #tpu.memory_space<vmem>>, vector<1x96x32xbf16>
    %62 = vector.shape_cast %61 : vector<1x96x32xbf16> to vector<96x32xbf16>
    %cst_54 = arith.constant dense<0.000000e+00> : vector<256x32xf32>
    %63 = tpu.matmul %60, %62, %cst_54 {dimension_numbers = #tpu.dot_dimension_numbers<[1], [0], [0], [1], [0, 0, 1, 1], [], []>} : vector<256x96xbf16>, vector<96x32xbf16>, vector<256x32xf32> -> vector<256x32xf32>
    %64 = vector.extract_strided_slice %54 {offsets = [0, 8, 0], sizes = [18, 16, 32], strides = [1, 1, 1]} : vector<18x32x32xbf16> to vector<18x16x32xbf16>
    %65 = vector.shape_cast %64 : vector<18x16x32xbf16> to vector<288x32xbf16>
    %66 = vector.extract_strided_slice %65 {offsets = [0, 0], sizes = [256, 32], strides = [1, 1]} : vector<288x32xbf16> to vector<256x32xbf16>
    %67 = vector.extract_strided_slice %65 {offsets = [16, 0], sizes = [256, 32], strides = [1, 1]} : vector<288x32xbf16> to vector<256x32xbf16>
    %68 = vector.extract_strided_slice %65 {offsets = [32, 0], sizes = [256, 32], strides = [1, 1]} : vector<288x32xbf16> to vector<256x32xbf16>
    %69 = tpu.concatenate %66, %67, %68 in 1 : vector<256x32xbf16>, vector<256x32xbf16>, vector<256x32xbf16> -> vector<256x96xbf16>
    %c1_55 = arith.constant 1 : index
    %c0_56 = arith.constant 0 : index
    %c0_57 = arith.constant 0 : index
    %70 = vector.load %arg3[%c1_55, %c0_56, %c0_57] : memref<3x96x32xbf16, #tpu.memory_space<vmem>>, vector<1x96x32xbf16>
    %71 = vector.shape_cast %70 : vector<1x96x32xbf16> to vector<96x32xbf16>
    %cst_58 = arith.constant dense<0.000000e+00> : vector<256x32xf32>
    %72 = tpu.matmul %69, %71, %cst_58 {dimension_numbers = #tpu.dot_dimension_numbers<[1], [0], [0], [1], [0, 0, 1, 1], [], []>} : vector<256x96xbf16>, vector<96x32xbf16>, vector<256x32xf32> -> vector<256x32xf32>
    %73 = arith.addf %63, %72 : vector<256x32xf32>
    %74 = vector.extract_strided_slice %54 {offsets = [0, 9, 0], sizes = [18, 16, 32], strides = [1, 1, 1]} : vector<18x32x32xbf16> to vector<18x16x32xbf16>
    %75 = vector.shape_cast %74 : vector<18x16x32xbf16> to vector<288x32xbf16>
    %76 = vector.extract_strided_slice %75 {offsets = [0, 0], sizes = [256, 32], strides = [1, 1]} : vector<288x32xbf16> to vector<256x32xbf16>
    %77 = vector.extract_strided_slice %75 {offsets = [16, 0], sizes = [256, 32], strides = [1, 1]} : vector<288x32xbf16> to vector<256x32xbf16>
    %78 = vector.extract_strided_slice %75 {offsets = [32, 0], sizes = [256, 32], strides = [1, 1]} : vector<288x32xbf16> to vector<256x32xbf16>
    %79 = tpu.concatenate %76, %77, %78 in 1 : vector<256x32xbf16>, vector<256x32xbf16>, vector<256x32xbf16> -> vector<256x96xbf16>
    %c2_59 = arith.constant 2 : index
    %c0_60 = arith.constant 0 : index
    %c0_61 = arith.constant 0 : index
    %80 = vector.load %arg3[%c2_59, %c0_60, %c0_61] : memref<3x96x32xbf16, #tpu.memory_space<vmem>>, vector<1x96x32xbf16>
    %81 = vector.shape_cast %80 : vector<1x96x32xbf16> to vector<96x32xbf16>
    %cst_62 = arith.constant dense<0.000000e+00> : vector<256x32xf32>
    %82 = tpu.matmul %79, %81, %cst_62 {dimension_numbers = #tpu.dot_dimension_numbers<[1], [0], [0], [1], [0, 0, 1, 1], [], []>} : vector<256x96xbf16>, vector<96x32xbf16>, vector<256x32xf32> -> vector<256x32xf32>
    %83 = arith.addf %73, %82 : vector<256x32xf32>
    %c0_63 = arith.constant 0 : index
    %c32 = arith.constant 32 : index
    %84 = vector.load %arg8[%c0_63, %c32] : memref<1x448xf32, #tpu.memory_space<vmem>>, vector<1x32xf32>
    %85 = vector.broadcast %84 : vector<1x32xf32> to vector<256x32xf32>
    %86 = arith.addf %83, %85 : vector<256x32xf32>
    %cst_64 = arith.constant 0.000000e+00 : f32
    %87 = vector.broadcast %cst_64 : f32 to vector<256x32xf32>
    %88 = arith.maximumf %86, %87 : vector<256x32xf32>
    %89 = vector.shape_cast %88 : vector<256x32xf32> to vector<8x2x16x32xf32>
    %90 = vector.extract_strided_slice %89 {offsets = [0, 0, 0, 0], sizes = [8, 1, 16, 32], strides = [1, 1, 1, 1]} : vector<8x2x16x32xf32> to vector<8x1x16x32xf32>
    %91 = vector.shape_cast %90 : vector<8x1x16x32xf32> to vector<8x16x32xf32>
    %92 = vector.extract_strided_slice %89 {offsets = [0, 1, 0, 0], sizes = [8, 1, 16, 32], strides = [1, 1, 1, 1]} : vector<8x2x16x32xf32> to vector<8x1x16x32xf32>
    %93 = vector.shape_cast %92 : vector<8x1x16x32xf32> to vector<8x16x32xf32>
    %94 = arith.maximumf %91, %93 : vector<8x16x32xf32>
    %95 = vector.shape_cast %94 : vector<8x16x32xf32> to vector<8x8x2x32xf32>
    %96 = vector.extract_strided_slice %95 {offsets = [0, 0, 0, 0], sizes = [8, 8, 1, 32], strides = [1, 1, 1, 1]} : vector<8x8x2x32xf32> to vector<8x8x1x32xf32>
    %97 = vector.shape_cast %96 : vector<8x8x1x32xf32> to vector<8x8x32xf32>
    %98 = vector.extract_strided_slice %95 {offsets = [0, 0, 1, 0], sizes = [8, 8, 1, 32], strides = [1, 1, 1, 1]} : vector<8x8x2x32xf32> to vector<8x8x1x32xf32>
    %99 = vector.shape_cast %98 : vector<8x8x1x32xf32> to vector<8x8x32xf32>
    %100 = arith.maximumf %97, %99 : vector<8x8x32xf32>
    %cst_65 = arith.constant 0.000000e+00 : bf16
    %101 = vector.broadcast %cst_65 : bf16 to vector<1x10x32xbf16>
    %cst_66 = arith.constant 0.000000e+00 : bf16
    %102 = vector.broadcast %cst_66 : bf16 to vector<8x1x32xbf16>
    %c0_67 = arith.constant 0 : index
    %c7_68 = arith.constant 7 : index
    %c0_69 = arith.constant 0 : index
    %103 = vector.load %arg12[%c0_67, %c7_68, %c0_69] : memref<10x24x32xbf16, #tpu.memory_space<vmem>>, vector<1x10x32xbf16>
    tpu.vector_store %arg12[%c0_67, %c7_68, %c0_69], %101 {strides = array<i32>} : memref<10x24x32xbf16, #tpu.memory_space<vmem>>, vector<1x10x32xbf16>,
    %c9 = arith.constant 9 : index
    %c7_70 = arith.constant 7 : index
    %c0_71 = arith.constant 0 : index
    %104 = vector.load %arg12[%c9, %c7_70, %c0_71] : memref<10x24x32xbf16, #tpu.memory_space<vmem>>, vector<1x10x32xbf16>
    tpu.vector_store %arg12[%c9, %c7_70, %c0_71], %101 {strides = array<i32>} : memref<10x24x32xbf16, #tpu.memory_space<vmem>>, vector<1x10x32xbf16>,
    %c1_72 = arith.constant 1 : index
    %c7_73 = arith.constant 7 : index
    %c0_74 = arith.constant 0 : index
    %105 = vector.load %arg12[%c1_72, %c7_73, %c0_74] : memref<10x24x32xbf16, #tpu.memory_space<vmem>>, vector<8x1x32xbf16>
    tpu.vector_store %arg12[%c1_72, %c7_73, %c0_74], %102 {strides = array<i32>} : memref<10x24x32xbf16, #tpu.memory_space<vmem>>, vector<8x1x32xbf16>,
    %c1_75 = arith.constant 1 : index
    %c16 = arith.constant 16 : index
    %c0_76 = arith.constant 0 : index
    %106 = vector.load %arg12[%c1_75, %c16, %c0_76] : memref<10x24x32xbf16, #tpu.memory_space<vmem>>, vector<8x1x32xbf16>
    tpu.vector_store %arg12[%c1_75, %c16, %c0_76], %102 {strides = array<i32>} : memref<10x24x32xbf16, #tpu.memory_space<vmem>>, vector<8x1x32xbf16>,
    %107 = arith.truncf %100 : vector<8x8x32xf32> to vector<8x8x32xbf16>
    %c1_77 = arith.constant 1 : index
    %c8_78 = arith.constant 8 : index
    %c0_79 = arith.constant 0 : index
    %108 = vector.load %arg12[%c1_77, %c8_78, %c0_79] : memref<10x24x32xbf16, #tpu.memory_space<vmem>>, vector<8x8x32xbf16>
    tpu.vector_store %arg12[%c1_77, %c8_78, %c0_79], %107 {strides = array<i32>} : memref<10x24x32xbf16, #tpu.memory_space<vmem>>, vector<8x8x32xbf16>,
    %c0_80 = arith.constant 0 : index
    %c0_81 = arith.constant 0 : index
    %c0_82 = arith.constant 0 : index
    %109 = vector.load %arg12[%c0_80, %c0_81, %c0_82] : memref<10x24x32xbf16, #tpu.memory_space<vmem>>, vector<10x24x32xbf16>
    %110 = vector.extract_strided_slice %109 {offsets = [0, 7, 0], sizes = [10, 8, 32], strides = [1, 1, 1]} : vector<10x24x32xbf16> to vector<10x8x32xbf16>
    %111 = vector.shape_cast %110 : vector<10x8x32xbf16> to vector<80x32xbf16>
    %112 = vector.extract_strided_slice %111 {offsets = [0, 0], sizes = [64, 32], strides = [1, 1]} : vector<80x32xbf16> to vector<64x32xbf16>
    %113 = vector.extract_strided_slice %111 {offsets = [8, 0], sizes = [64, 32], strides = [1, 1]} : vector<80x32xbf16> to vector<64x32xbf16>
    %114 = vector.extract_strided_slice %111 {offsets = [16, 0], sizes = [64, 32], strides = [1, 1]} : vector<80x32xbf16> to vector<64x32xbf16>
    %115 = tpu.concatenate %112, %113, %114 in 1 : vector<64x32xbf16>, vector<64x32xbf16>, vector<64x32xbf16> -> vector<64x96xbf16>
    %c0_83 = arith.constant 0 : index
    %c0_84 = arith.constant 0 : index
    %c0_85 = arith.constant 0 : index
    %116 = vector.load %arg4[%c0_83, %c0_84, %c0_85] : memref<3x96x64xbf16, #tpu.memory_space<vmem>>, vector<1x96x64xbf16>
    %117 = vector.shape_cast %116 : vector<1x96x64xbf16> to vector<96x64xbf16>
    %cst_86 = arith.constant dense<0.000000e+00> : vector<64x64xf32>
    %118 = tpu.matmul %115, %117, %cst_86 {dimension_numbers = #tpu.dot_dimension_numbers<[1], [0], [0], [1], [0, 0, 1, 1], [], []>} : vector<64x96xbf16>, vector<96x64xbf16>, vector<64x64xf32> -> vector<64x64xf32>
    %119 = vector.extract_strided_slice %109 {offsets = [0, 8, 0], sizes = [10, 8, 32], strides = [1, 1, 1]} : vector<10x24x32xbf16> to vector<10x8x32xbf16>
    %120 = vector.shape_cast %119 : vector<10x8x32xbf16> to vector<80x32xbf16>
    %121 = vector.extract_strided_slice %120 {offsets = [0, 0], sizes = [64, 32], strides = [1, 1]} : vector<80x32xbf16> to vector<64x32xbf16>
    %122 = vector.extract_strided_slice %120 {offsets = [8, 0], sizes = [64, 32], strides = [1, 1]} : vector<80x32xbf16> to vector<64x32xbf16>
    %123 = vector.extract_strided_slice %120 {offsets = [16, 0], sizes = [64, 32], strides = [1, 1]} : vector<80x32xbf16> to vector<64x32xbf16>
    %124 = tpu.concatenate %121, %122, %123 in 1 : vector<64x32xbf16>, vector<64x32xbf16>, vector<64x32xbf16> -> vector<64x96xbf16>
    %c1_87 = arith.constant 1 : index
    %c0_88 = arith.constant 0 : index
    %c0_89 = arith.constant 0 : index
    %125 = vector.load %arg4[%c1_87, %c0_88, %c0_89] : memref<3x96x64xbf16, #tpu.memory_space<vmem>>, vector<1x96x64xbf16>
    %126 = vector.shape_cast %125 : vector<1x96x64xbf16> to vector<96x64xbf16>
    %cst_90 = arith.constant dense<0.000000e+00> : vector<64x64xf32>
    %127 = tpu.matmul %124, %126, %cst_90 {dimension_numbers = #tpu.dot_dimension_numbers<[1], [0], [0], [1], [0, 0, 1, 1], [], []>} : vector<64x96xbf16>, vector<96x64xbf16>, vector<64x64xf32> -> vector<64x64xf32>
    %128 = arith.addf %118, %127 : vector<64x64xf32>
    %129 = vector.extract_strided_slice %109 {offsets = [0, 9, 0], sizes = [10, 8, 32], strides = [1, 1, 1]} : vector<10x24x32xbf16> to vector<10x8x32xbf16>
    %130 = vector.shape_cast %129 : vector<10x8x32xbf16> to vector<80x32xbf16>
    %131 = vector.extract_strided_slice %130 {offsets = [0, 0], sizes = [64, 32], strides = [1, 1]} : vector<80x32xbf16> to vector<64x32xbf16>
    %132 = vector.extract_strided_slice %130 {offsets = [8, 0], sizes = [64, 32], strides = [1, 1]} : vector<80x32xbf16> to vector<64x32xbf16>
    %133 = vector.extract_strided_slice %130 {offsets = [16, 0], sizes = [64, 32], strides = [1, 1]} : vector<80x32xbf16> to vector<64x32xbf16>
    %134 = tpu.concatenate %131, %132, %133 in 1 : vector<64x32xbf16>, vector<64x32xbf16>, vector<64x32xbf16> -> vector<64x96xbf16>
    %c2_91 = arith.constant 2 : index
    %c0_92 = arith.constant 0 : index
    %c0_93 = arith.constant 0 : index
    %135 = vector.load %arg4[%c2_91, %c0_92, %c0_93] : memref<3x96x64xbf16, #tpu.memory_space<vmem>>, vector<1x96x64xbf16>
    %136 = vector.shape_cast %135 : vector<1x96x64xbf16> to vector<96x64xbf16>
    %cst_94 = arith.constant dense<0.000000e+00> : vector<64x64xf32>
    %137 = tpu.matmul %134, %136, %cst_94 {dimension_numbers = #tpu.dot_dimension_numbers<[1], [0], [0], [1], [0, 0, 1, 1], [], []>} : vector<64x96xbf16>, vector<96x64xbf16>, vector<64x64xf32> -> vector<64x64xf32>
    %138 = arith.addf %128, %137 : vector<64x64xf32>
    %c0_95 = arith.constant 0 : index
    %c64 = arith.constant 64 : index
    %139 = vector.load %arg8[%c0_95, %c64] : memref<1x448xf32, #tpu.memory_space<vmem>>, vector<1x64xf32>
    %140 = vector.broadcast %139 : vector<1x64xf32> to vector<64x64xf32>
    %141 = arith.addf %138, %140 : vector<64x64xf32>
    %cst_96 = arith.constant 0.000000e+00 : f32
    %142 = vector.broadcast %cst_96 : f32 to vector<64x64xf32>
    %143 = arith.maximumf %141, %142 : vector<64x64xf32>
    %144 = vector.shape_cast %143 : vector<64x64xf32> to vector<8x8x64xf32>
    %cst_97 = arith.constant 0.000000e+00 : bf16
    %145 = vector.broadcast %cst_97 : bf16 to vector<1x10x64xbf16>
    %cst_98 = arith.constant 0.000000e+00 : bf16
    %146 = vector.broadcast %cst_98 : bf16 to vector<8x1x64xbf16>
    %c0_99 = arith.constant 0 : index
    %c7_100 = arith.constant 7 : index
    %c0_101 = arith.constant 0 : index
    %147 = vector.load %arg13[%c0_99, %c7_100, %c0_101] : memref<10x24x64xbf16, #tpu.memory_space<vmem>>, vector<1x10x64xbf16>
    tpu.vector_store %arg13[%c0_99, %c7_100, %c0_101], %145 {strides = array<i32>} : memref<10x24x64xbf16, #tpu.memory_space<vmem>>, vector<1x10x64xbf16>,
    %c9_102 = arith.constant 9 : index
    %c7_103 = arith.constant 7 : index
    %c0_104 = arith.constant 0 : index
    %148 = vector.load %arg13[%c9_102, %c7_103, %c0_104] : memref<10x24x64xbf16, #tpu.memory_space<vmem>>, vector<1x10x64xbf16>
    tpu.vector_store %arg13[%c9_102, %c7_103, %c0_104], %145 {strides = array<i32>} : memref<10x24x64xbf16, #tpu.memory_space<vmem>>, vector<1x10x64xbf16>,
    %c1_105 = arith.constant 1 : index
    %c7_106 = arith.constant 7 : index
    %c0_107 = arith.constant 0 : index
    %149 = vector.load %arg13[%c1_105, %c7_106, %c0_107] : memref<10x24x64xbf16, #tpu.memory_space<vmem>>, vector<8x1x64xbf16>
    tpu.vector_store %arg13[%c1_105, %c7_106, %c0_107], %146 {strides = array<i32>} : memref<10x24x64xbf16, #tpu.memory_space<vmem>>, vector<8x1x64xbf16>,
    %c1_108 = arith.constant 1 : index
    %c16_109 = arith.constant 16 : index
    %c0_110 = arith.constant 0 : index
    %150 = vector.load %arg13[%c1_108, %c16_109, %c0_110] : memref<10x24x64xbf16, #tpu.memory_space<vmem>>, vector<8x1x64xbf16>
    tpu.vector_store %arg13[%c1_108, %c16_109, %c0_110], %146 {strides = array<i32>} : memref<10x24x64xbf16, #tpu.memory_space<vmem>>, vector<8x1x64xbf16>,
    %151 = arith.truncf %144 : vector<8x8x64xf32> to vector<8x8x64xbf16>
    %c1_111 = arith.constant 1 : index
    %c8_112 = arith.constant 8 : index
    %c0_113 = arith.constant 0 : index
    %152 = vector.load %arg13[%c1_111, %c8_112, %c0_113] : memref<10x24x64xbf16, #tpu.memory_space<vmem>>, vector<8x8x64xbf16>
    tpu.vector_store %arg13[%c1_111, %c8_112, %c0_113], %151 {strides = array<i32>} : memref<10x24x64xbf16, #tpu.memory_space<vmem>>, vector<8x8x64xbf16>,
    %c0_114 = arith.constant 0 : index
    %c0_115 = arith.constant 0 : index
    %c0_116 = arith.constant 0 : index
    %153 = vector.load %arg13[%c0_114, %c0_115, %c0_116] : memref<10x24x64xbf16, #tpu.memory_space<vmem>>, vector<10x24x64xbf16>
    %154 = vector.extract_strided_slice %153 {offsets = [0, 7, 0], sizes = [10, 8, 64], strides = [1, 1, 1]} : vector<10x24x64xbf16> to vector<10x8x64xbf16>
    %155 = vector.shape_cast %154 : vector<10x8x64xbf16> to vector<80x64xbf16>
    %156 = vector.extract_strided_slice %155 {offsets = [0, 0], sizes = [64, 64], strides = [1, 1]} : vector<80x64xbf16> to vector<64x64xbf16>
    %157 = vector.extract_strided_slice %155 {offsets = [8, 0], sizes = [64, 64], strides = [1, 1]} : vector<80x64xbf16> to vector<64x64xbf16>
    %158 = vector.extract_strided_slice %155 {offsets = [16, 0], sizes = [64, 64], strides = [1, 1]} : vector<80x64xbf16> to vector<64x64xbf16>
    %159 = tpu.concatenate %156, %157, %158 in 1 : vector<64x64xbf16>, vector<64x64xbf16>, vector<64x64xbf16> -> vector<64x192xbf16>
    %c0_117 = arith.constant 0 : index
    %c0_118 = arith.constant 0 : index
    %c0_119 = arith.constant 0 : index
    %160 = vector.load %arg5[%c0_117, %c0_118, %c0_119] : memref<3x192x64xbf16, #tpu.memory_space<vmem>>, vector<1x192x64xbf16>
    %161 = vector.shape_cast %160 : vector<1x192x64xbf16> to vector<192x64xbf16>
    %cst_120 = arith.constant dense<0.000000e+00> : vector<64x64xf32>
    %162 = tpu.matmul %159, %161, %cst_120 {dimension_numbers = #tpu.dot_dimension_numbers<[1], [0], [0], [1], [0, 0, 1, 1], [], []>} : vector<64x192xbf16>, vector<192x64xbf16>, vector<64x64xf32> -> vector<64x64xf32>
    %163 = vector.extract_strided_slice %153 {offsets = [0, 8, 0], sizes = [10, 8, 64], strides = [1, 1, 1]} : vector<10x24x64xbf16> to vector<10x8x64xbf16>
    %164 = vector.shape_cast %163 : vector<10x8x64xbf16> to vector<80x64xbf16>
    %165 = vector.extract_strided_slice %164 {offsets = [0, 0], sizes = [64, 64], strides = [1, 1]} : vector<80x64xbf16> to vector<64x64xbf16>
    %166 = vector.extract_strided_slice %164 {offsets = [8, 0], sizes = [64, 64], strides = [1, 1]} : vector<80x64xbf16> to vector<64x64xbf16>
    %167 = vector.extract_strided_slice %164 {offsets = [16, 0], sizes = [64, 64], strides = [1, 1]} : vector<80x64xbf16> to vector<64x64xbf16>
    %168 = tpu.concatenate %165, %166, %167 in 1 : vector<64x64xbf16>, vector<64x64xbf16>, vector<64x64xbf16> -> vector<64x192xbf16>
    %c1_121 = arith.constant 1 : index
    %c0_122 = arith.constant 0 : index
    %c0_123 = arith.constant 0 : index
    %169 = vector.load %arg5[%c1_121, %c0_122, %c0_123] : memref<3x192x64xbf16, #tpu.memory_space<vmem>>, vector<1x192x64xbf16>
    %170 = vector.shape_cast %169 : vector<1x192x64xbf16> to vector<192x64xbf16>
    %cst_124 = arith.constant dense<0.000000e+00> : vector<64x64xf32>
    %171 = tpu.matmul %168, %170, %cst_124 {dimension_numbers = #tpu.dot_dimension_numbers<[1], [0], [0], [1], [0, 0, 1, 1], [], []>} : vector<64x192xbf16>, vector<192x64xbf16>, vector<64x64xf32> -> vector<64x64xf32>
    %172 = arith.addf %162, %171 : vector<64x64xf32>
    %173 = vector.extract_strided_slice %153 {offsets = [0, 9, 0], sizes = [10, 8, 64], strides = [1, 1, 1]} : vector<10x24x64xbf16> to vector<10x8x64xbf16>
    %174 = vector.shape_cast %173 : vector<10x8x64xbf16> to vector<80x64xbf16>
    %175 = vector.extract_strided_slice %174 {offsets = [0, 0], sizes = [64, 64], strides = [1, 1]} : vector<80x64xbf16> to vector<64x64xbf16>
    %176 = vector.extract_strided_slice %174 {offsets = [8, 0], sizes = [64, 64], strides = [1, 1]} : vector<80x64xbf16> to vector<64x64xbf16>
    %177 = vector.extract_strided_slice %174 {offsets = [16, 0], sizes = [64, 64], strides = [1, 1]} : vector<80x64xbf16> to vector<64x64xbf16>
    %178 = tpu.concatenate %175, %176, %177 in 1 : vector<64x64xbf16>, vector<64x64xbf16>, vector<64x64xbf16> -> vector<64x192xbf16>
    %c2_125 = arith.constant 2 : index
    %c0_126 = arith.constant 0 : index
    %c0_127 = arith.constant 0 : index
    %179 = vector.load %arg5[%c2_125, %c0_126, %c0_127] : memref<3x192x64xbf16, #tpu.memory_space<vmem>>, vector<1x192x64xbf16>
    %180 = vector.shape_cast %179 : vector<1x192x64xbf16> to vector<192x64xbf16>
    %cst_128 = arith.constant dense<0.000000e+00> : vector<64x64xf32>
    %181 = tpu.matmul %178, %180, %cst_128 {dimension_numbers = #tpu.dot_dimension_numbers<[1], [0], [0], [1], [0, 0, 1, 1], [], []>} : vector<64x192xbf16>, vector<192x64xbf16>, vector<64x64xf32> -> vector<64x64xf32>
    %182 = arith.addf %172, %181 : vector<64x64xf32>
    %c0_129 = arith.constant 0 : index
    %c128 = arith.constant 128 : index
    %183 = vector.load %arg8[%c0_129, %c128] : memref<1x448xf32, #tpu.memory_space<vmem>>, vector<1x64xf32>
    %184 = vector.broadcast %183 : vector<1x64xf32> to vector<64x64xf32>
    %185 = arith.addf %182, %184 : vector<64x64xf32>
    %cst_130 = arith.constant 0.000000e+00 : f32
    %186 = vector.broadcast %cst_130 : f32 to vector<64x64xf32>
    %187 = arith.maximumf %185, %186 : vector<64x64xf32>
    %188 = vector.shape_cast %187 : vector<64x64xf32> to vector<4x2x8x64xf32>
    %189 = vector.extract_strided_slice %188 {offsets = [0, 0, 0, 0], sizes = [4, 1, 8, 64], strides = [1, 1, 1, 1]} : vector<4x2x8x64xf32> to vector<4x1x8x64xf32>
    %190 = vector.shape_cast %189 : vector<4x1x8x64xf32> to vector<4x8x64xf32>
    %191 = vector.extract_strided_slice %188 {offsets = [0, 1, 0, 0], sizes = [4, 1, 8, 64], strides = [1, 1, 1, 1]} : vector<4x2x8x64xf32> to vector<4x1x8x64xf32>
    %192 = vector.shape_cast %191 : vector<4x1x8x64xf32> to vector<4x8x64xf32>
    %193 = arith.maximumf %190, %192 : vector<4x8x64xf32>
    %194 = vector.shape_cast %193 : vector<4x8x64xf32> to vector<4x4x2x64xf32>
    %195 = vector.extract_strided_slice %194 {offsets = [0, 0, 0, 0], sizes = [4, 4, 1, 64], strides = [1, 1, 1, 1]} : vector<4x4x2x64xf32> to vector<4x4x1x64xf32>
    %196 = vector.shape_cast %195 : vector<4x4x1x64xf32> to vector<4x4x64xf32>
    %197 = vector.extract_strided_slice %194 {offsets = [0, 0, 1, 0], sizes = [4, 4, 1, 64], strides = [1, 1, 1, 1]} : vector<4x4x2x64xf32> to vector<4x4x1x64xf32>
    %198 = vector.shape_cast %197 : vector<4x4x1x64xf32> to vector<4x4x64xf32>
    %199 = arith.maximumf %196, %198 : vector<4x4x64xf32>
    %cst_131 = arith.constant 0.000000e+00 : bf16
    %200 = vector.broadcast %cst_131 : bf16 to vector<1x6x64xbf16>
    %cst_132 = arith.constant 0.000000e+00 : bf16
    %201 = vector.broadcast %cst_132 : bf16 to vector<4x1x64xbf16>
    %c0_133 = arith.constant 0 : index
    %c7_134 = arith.constant 7 : index
    %c0_135 = arith.constant 0 : index
    %202 = vector.load %arg14[%c0_133, %c7_134, %c0_135] : memref<6x20x64xbf16, #tpu.memory_space<vmem>>, vector<1x6x64xbf16>
    tpu.vector_store %arg14[%c0_133, %c7_134, %c0_135], %200 {strides = array<i32>} : memref<6x20x64xbf16, #tpu.memory_space<vmem>>, vector<1x6x64xbf16>,
    %c5 = arith.constant 5 : index
    %c7_136 = arith.constant 7 : index
    %c0_137 = arith.constant 0 : index
    %203 = vector.load %arg14[%c5, %c7_136, %c0_137] : memref<6x20x64xbf16, #tpu.memory_space<vmem>>, vector<1x6x64xbf16>
    tpu.vector_store %arg14[%c5, %c7_136, %c0_137], %200 {strides = array<i32>} : memref<6x20x64xbf16, #tpu.memory_space<vmem>>, vector<1x6x64xbf16>,
    %c1_138 = arith.constant 1 : index
    %c7_139 = arith.constant 7 : index
    %c0_140 = arith.constant 0 : index
    %204 = vector.load %arg14[%c1_138, %c7_139, %c0_140] : memref<6x20x64xbf16, #tpu.memory_space<vmem>>, vector<4x1x64xbf16>
    tpu.vector_store %arg14[%c1_138, %c7_139, %c0_140], %201 {strides = array<i32>} : memref<6x20x64xbf16, #tpu.memory_space<vmem>>, vector<4x1x64xbf16>,
    %c1_141 = arith.constant 1 : index
    %c12 = arith.constant 12 : index
    %c0_142 = arith.constant 0 : index
    %205 = vector.load %arg14[%c1_141, %c12, %c0_142] : memref<6x20x64xbf16, #tpu.memory_space<vmem>>, vector<4x1x64xbf16>
    tpu.vector_store %arg14[%c1_141, %c12, %c0_142], %201 {strides = array<i32>} : memref<6x20x64xbf16, #tpu.memory_space<vmem>>, vector<4x1x64xbf16>,
    %206 = arith.truncf %199 : vector<4x4x64xf32> to vector<4x4x64xbf16>
    %c1_143 = arith.constant 1 : index
    %c8_144 = arith.constant 8 : index
    %c0_145 = arith.constant 0 : index
    %207 = vector.load %arg14[%c1_143, %c8_144, %c0_145] : memref<6x20x64xbf16, #tpu.memory_space<vmem>>, vector<4x4x64xbf16>
    tpu.vector_store %arg14[%c1_143, %c8_144, %c0_145], %206 {strides = array<i32>} : memref<6x20x64xbf16, #tpu.memory_space<vmem>>, vector<4x4x64xbf16>,
    %c0_146 = arith.constant 0 : index
    %c0_147 = arith.constant 0 : index
    %c0_148 = arith.constant 0 : index
    %208 = vector.load %arg14[%c0_146, %c0_147, %c0_148] : memref<6x20x64xbf16, #tpu.memory_space<vmem>>, vector<6x20x64xbf16>
    %209 = vector.extract_strided_slice %208 {offsets = [0, 7, 0], sizes = [6, 4, 64], strides = [1, 1, 1]} : vector<6x20x64xbf16> to vector<6x4x64xbf16>
    %210 = vector.shape_cast %209 : vector<6x4x64xbf16> to vector<24x64xbf16>
    %211 = vector.extract_strided_slice %210 {offsets = [0, 0], sizes = [16, 64], strides = [1, 1]} : vector<24x64xbf16> to vector<16x64xbf16>
    %212 = vector.extract_strided_slice %210 {offsets = [4, 0], sizes = [16, 64], strides = [1, 1]} : vector<24x64xbf16> to vector<16x64xbf16>
    %213 = vector.extract_strided_slice %210 {offsets = [8, 0], sizes = [16, 64], strides = [1, 1]} : vector<24x64xbf16> to vector<16x64xbf16>
    %214 = tpu.concatenate %211, %212, %213 in 1 : vector<16x64xbf16>, vector<16x64xbf16>, vector<16x64xbf16> -> vector<16x192xbf16>
    %c0_149 = arith.constant 0 : index
    %c0_150 = arith.constant 0 : index
    %c0_151 = arith.constant 0 : index
    %215 = vector.load %arg6[%c0_149, %c0_150, %c0_151] : memref<3x192x128xbf16, #tpu.memory_space<vmem>>, vector<1x192x128xbf16>
    %216 = vector.shape_cast %215 : vector<1x192x128xbf16> to vector<192x128xbf16>
    %cst_152 = arith.constant dense<0.000000e+00> : vector<16x128xf32>
    %217 = tpu.matmul %214, %216, %cst_152 {dimension_numbers = #tpu.dot_dimension_numbers<[1], [0], [0], [1], [0, 0, 1, 1], [], []>} : vector<16x192xbf16>, vector<192x128xbf16>, vector<16x128xf32> -> vector<16x128xf32>
    %218 = vector.extract_strided_slice %208 {offsets = [0, 8, 0], sizes = [6, 4, 64], strides = [1, 1, 1]} : vector<6x20x64xbf16> to vector<6x4x64xbf16>
    %219 = vector.shape_cast %218 : vector<6x4x64xbf16> to vector<24x64xbf16>
    %220 = vector.extract_strided_slice %219 {offsets = [0, 0], sizes = [16, 64], strides = [1, 1]} : vector<24x64xbf16> to vector<16x64xbf16>
    %221 = vector.extract_strided_slice %219 {offsets = [4, 0], sizes = [16, 64], strides = [1, 1]} : vector<24x64xbf16> to vector<16x64xbf16>
    %222 = vector.extract_strided_slice %219 {offsets = [8, 0], sizes = [16, 64], strides = [1, 1]} : vector<24x64xbf16> to vector<16x64xbf16>
    %223 = tpu.concatenate %220, %221, %222 in 1 : vector<16x64xbf16>, vector<16x64xbf16>, vector<16x64xbf16> -> vector<16x192xbf16>
    %c1_153 = arith.constant 1 : index
    %c0_154 = arith.constant 0 : index
    %c0_155 = arith.constant 0 : index
    %224 = vector.load %arg6[%c1_153, %c0_154, %c0_155] : memref<3x192x128xbf16, #tpu.memory_space<vmem>>, vector<1x192x128xbf16>
    %225 = vector.shape_cast %224 : vector<1x192x128xbf16> to vector<192x128xbf16>
    %cst_156 = arith.constant dense<0.000000e+00> : vector<16x128xf32>
    %226 = tpu.matmul %223, %225, %cst_156 {dimension_numbers = #tpu.dot_dimension_numbers<[1], [0], [0], [1], [0, 0, 1, 1], [], []>} : vector<16x192xbf16>, vector<192x128xbf16>, vector<16x128xf32> -> vector<16x128xf32>
    %227 = arith.addf %217, %226 : vector<16x128xf32>
    %228 = vector.extract_strided_slice %208 {offsets = [0, 9, 0], sizes = [6, 4, 64], strides = [1, 1, 1]} : vector<6x20x64xbf16> to vector<6x4x64xbf16>
    %229 = vector.shape_cast %228 : vector<6x4x64xbf16> to vector<24x64xbf16>
    %230 = vector.extract_strided_slice %229 {offsets = [0, 0], sizes = [16, 64], strides = [1, 1]} : vector<24x64xbf16> to vector<16x64xbf16>
    %231 = vector.extract_strided_slice %229 {offsets = [4, 0], sizes = [16, 64], strides = [1, 1]} : vector<24x64xbf16> to vector<16x64xbf16>
    %232 = vector.extract_strided_slice %229 {offsets = [8, 0], sizes = [16, 64], strides = [1, 1]} : vector<24x64xbf16> to vector<16x64xbf16>
    %233 = tpu.concatenate %230, %231, %232 in 1 : vector<16x64xbf16>, vector<16x64xbf16>, vector<16x64xbf16> -> vector<16x192xbf16>
    %c2_157 = arith.constant 2 : index
    %c0_158 = arith.constant 0 : index
    %c0_159 = arith.constant 0 : index
    %234 = vector.load %arg6[%c2_157, %c0_158, %c0_159] : memref<3x192x128xbf16, #tpu.memory_space<vmem>>, vector<1x192x128xbf16>
    %235 = vector.shape_cast %234 : vector<1x192x128xbf16> to vector<192x128xbf16>
    %cst_160 = arith.constant dense<0.000000e+00> : vector<16x128xf32>
    %236 = tpu.matmul %233, %235, %cst_160 {dimension_numbers = #tpu.dot_dimension_numbers<[1], [0], [0], [1], [0, 0, 1, 1], [], []>} : vector<16x192xbf16>, vector<192x128xbf16>, vector<16x128xf32> -> vector<16x128xf32>
    %237 = arith.addf %227, %236 : vector<16x128xf32>
    %c0_161 = arith.constant 0 : index
    %c192 = arith.constant 192 : index
    %238 = vector.load %arg8[%c0_161, %c192] : memref<1x448xf32, #tpu.memory_space<vmem>>, vector<1x128xf32>
    %239 = vector.broadcast %238 : vector<1x128xf32> to vector<16x128xf32>
    %240 = arith.addf %237, %239 : vector<16x128xf32>
    %cst_162 = arith.constant 0.000000e+00 : f32
    %241 = vector.broadcast %cst_162 : f32 to vector<16x128xf32>
    %242 = arith.maximumf %240, %241 : vector<16x128xf32>
    %243 = vector.shape_cast %242 : vector<16x128xf32> to vector<4x4x128xf32>
    %cst_163 = arith.constant 0.000000e+00 : bf16
    %244 = vector.broadcast %cst_163 : bf16 to vector<1x6x128xbf16>
    %cst_164 = arith.constant 0.000000e+00 : bf16
    %245 = vector.broadcast %cst_164 : bf16 to vector<4x1x128xbf16>
    %c0_165 = arith.constant 0 : index
    %c7_166 = arith.constant 7 : index
    %c0_167 = arith.constant 0 : index
    %246 = vector.load %arg15[%c0_165, %c7_166, %c0_167] : memref<6x20x128xbf16, #tpu.memory_space<vmem>>, vector<1x6x128xbf16>
    tpu.vector_store %arg15[%c0_165, %c7_166, %c0_167], %244 {strides = array<i32>} : memref<6x20x128xbf16, #tpu.memory_space<vmem>>, vector<1x6x128xbf16>,
    %c5_168 = arith.constant 5 : index
    %c7_169 = arith.constant 7 : index
    %c0_170 = arith.constant 0 : index
    %247 = vector.load %arg15[%c5_168, %c7_169, %c0_170] : memref<6x20x128xbf16, #tpu.memory_space<vmem>>, vector<1x6x128xbf16>
    tpu.vector_store %arg15[%c5_168, %c7_169, %c0_170], %244 {strides = array<i32>} : memref<6x20x128xbf16, #tpu.memory_space<vmem>>, vector<1x6x128xbf16>,
    %c1_171 = arith.constant 1 : index
    %c7_172 = arith.constant 7 : index
    %c0_173 = arith.constant 0 : index
    %248 = vector.load %arg15[%c1_171, %c7_172, %c0_173] : memref<6x20x128xbf16, #tpu.memory_space<vmem>>, vector<4x1x128xbf16>
    tpu.vector_store %arg15[%c1_171, %c7_172, %c0_173], %245 {strides = array<i32>} : memref<6x20x128xbf16, #tpu.memory_space<vmem>>, vector<4x1x128xbf16>,
    %c1_174 = arith.constant 1 : index
    %c12_175 = arith.constant 12 : index
    %c0_176 = arith.constant 0 : index
    %249 = vector.load %arg15[%c1_174, %c12_175, %c0_176] : memref<6x20x128xbf16, #tpu.memory_space<vmem>>, vector<4x1x128xbf16>
    tpu.vector_store %arg15[%c1_174, %c12_175, %c0_176], %245 {strides = array<i32>} : memref<6x20x128xbf16, #tpu.memory_space<vmem>>, vector<4x1x128xbf16>,
    %250 = arith.truncf %243 : vector<4x4x128xf32> to vector<4x4x128xbf16>
    %c1_177 = arith.constant 1 : index
    %c8_178 = arith.constant 8 : index
    %c0_179 = arith.constant 0 : index
    %251 = vector.load %arg15[%c1_177, %c8_178, %c0_179] : memref<6x20x128xbf16, #tpu.memory_space<vmem>>, vector<4x4x128xbf16>
    tpu.vector_store %arg15[%c1_177, %c8_178, %c0_179], %250 {strides = array<i32>} : memref<6x20x128xbf16, #tpu.memory_space<vmem>>, vector<4x4x128xbf16>,
    %c0_180 = arith.constant 0 : index
    %c0_181 = arith.constant 0 : index
    %c0_182 = arith.constant 0 : index
    %252 = vector.load %arg15[%c0_180, %c0_181, %c0_182] : memref<6x20x128xbf16, #tpu.memory_space<vmem>>, vector<6x20x128xbf16>
    %253 = vector.extract_strided_slice %252 {offsets = [0, 7, 0], sizes = [6, 4, 128], strides = [1, 1, 1]} : vector<6x20x128xbf16> to vector<6x4x128xbf16>
    %254 = vector.shape_cast %253 : vector<6x4x128xbf16> to vector<24x128xbf16>
    %255 = vector.extract_strided_slice %254 {offsets = [0, 0], sizes = [16, 128], strides = [1, 1]} : vector<24x128xbf16> to vector<16x128xbf16>
    %256 = vector.extract_strided_slice %254 {offsets = [4, 0], sizes = [16, 128], strides = [1, 1]} : vector<24x128xbf16> to vector<16x128xbf16>
    %257 = vector.extract_strided_slice %254 {offsets = [8, 0], sizes = [16, 128], strides = [1, 1]} : vector<24x128xbf16> to vector<16x128xbf16>
    %258 = tpu.concatenate %255, %256, %257 in 1 : vector<16x128xbf16>, vector<16x128xbf16>, vector<16x128xbf16> -> vector<16x384xbf16>
    %c0_183 = arith.constant 0 : index
    %c0_184 = arith.constant 0 : index
    %c0_185 = arith.constant 0 : index
    %259 = vector.load %arg7[%c0_183, %c0_184, %c0_185] : memref<3x384x128xbf16, #tpu.memory_space<vmem>>, vector<1x384x128xbf16>
    %260 = vector.shape_cast %259 : vector<1x384x128xbf16> to vector<384x128xbf16>
    %cst_186 = arith.constant dense<0.000000e+00> : vector<16x128xf32>
    %261 = tpu.matmul %258, %260, %cst_186 {dimension_numbers = #tpu.dot_dimension_numbers<[1], [0], [0], [1], [0, 0, 1, 1], [], []>} : vector<16x384xbf16>, vector<384x128xbf16>, vector<16x128xf32> -> vector<16x128xf32>
    %262 = vector.extract_strided_slice %252 {offsets = [0, 8, 0], sizes = [6, 4, 128], strides = [1, 1, 1]} : vector<6x20x128xbf16> to vector<6x4x128xbf16>
    %263 = vector.shape_cast %262 : vector<6x4x128xbf16> to vector<24x128xbf16>
    %264 = vector.extract_strided_slice %263 {offsets = [0, 0], sizes = [16, 128], strides = [1, 1]} : vector<24x128xbf16> to vector<16x128xbf16>
    %265 = vector.extract_strided_slice %263 {offsets = [4, 0], sizes = [16, 128], strides = [1, 1]} : vector<24x128xbf16> to vector<16x128xbf16>
    %266 = vector.extract_strided_slice %263 {offsets = [8, 0], sizes = [16, 128], strides = [1, 1]} : vector<24x128xbf16> to vector<16x128xbf16>
    %267 = tpu.concatenate %264, %265, %266 in 1 : vector<16x128xbf16>, vector<16x128xbf16>, vector<16x128xbf16> -> vector<16x384xbf16>
    %c1_187 = arith.constant 1 : index
    %c0_188 = arith.constant 0 : index
    %c0_189 = arith.constant 0 : index
    %268 = vector.load %arg7[%c1_187, %c0_188, %c0_189] : memref<3x384x128xbf16, #tpu.memory_space<vmem>>, vector<1x384x128xbf16>
    %269 = vector.shape_cast %268 : vector<1x384x128xbf16> to vector<384x128xbf16>
    %cst_190 = arith.constant dense<0.000000e+00> : vector<16x128xf32>
    %270 = tpu.matmul %267, %269, %cst_190 {dimension_numbers = #tpu.dot_dimension_numbers<[1], [0], [0], [1], [0, 0, 1, 1], [], []>} : vector<16x384xbf16>, vector<384x128xbf16>, vector<16x128xf32> -> vector<16x128xf32>
    %271 = arith.addf %261, %270 : vector<16x128xf32>
    %272 = vector.extract_strided_slice %252 {offsets = [0, 9, 0], sizes = [6, 4, 128], strides = [1, 1, 1]} : vector<6x20x128xbf16> to vector<6x4x128xbf16>
    %273 = vector.shape_cast %272 : vector<6x4x128xbf16> to vector<24x128xbf16>
    %274 = vector.extract_strided_slice %273 {offsets = [0, 0], sizes = [16, 128], strides = [1, 1]} : vector<24x128xbf16> to vector<16x128xbf16>
    %275 = vector.extract_strided_slice %273 {offsets = [4, 0], sizes = [16, 128], strides = [1, 1]} : vector<24x128xbf16> to vector<16x128xbf16>
    %276 = vector.extract_strided_slice %273 {offsets = [8, 0], sizes = [16, 128], strides = [1, 1]} : vector<24x128xbf16> to vector<16x128xbf16>
    %277 = tpu.concatenate %274, %275, %276 in 1 : vector<16x128xbf16>, vector<16x128xbf16>, vector<16x128xbf16> -> vector<16x384xbf16>
    %c2_191 = arith.constant 2 : index
    %c0_192 = arith.constant 0 : index
    %c0_193 = arith.constant 0 : index
    %278 = vector.load %arg7[%c2_191, %c0_192, %c0_193] : memref<3x384x128xbf16, #tpu.memory_space<vmem>>, vector<1x384x128xbf16>
    %279 = vector.shape_cast %278 : vector<1x384x128xbf16> to vector<384x128xbf16>
    %cst_194 = arith.constant dense<0.000000e+00> : vector<16x128xf32>
    %280 = tpu.matmul %277, %279, %cst_194 {dimension_numbers = #tpu.dot_dimension_numbers<[1], [0], [0], [1], [0, 0, 1, 1], [], []>} : vector<16x384xbf16>, vector<384x128xbf16>, vector<16x128xf32> -> vector<16x128xf32>
    %281 = arith.addf %271, %280 : vector<16x128xf32>
    %c0_195 = arith.constant 0 : index
    %c320 = arith.constant 320 : index
    %282 = vector.load %arg8[%c0_195, %c320] : memref<1x448xf32, #tpu.memory_space<vmem>>, vector<1x128xf32>
    %283 = vector.broadcast %282 : vector<1x128xf32> to vector<16x128xf32>
    %284 = arith.addf %281, %283 : vector<16x128xf32>
    %cst_196 = arith.constant 0.000000e+00 : f32
    %285 = vector.broadcast %cst_196 : f32 to vector<16x128xf32>
    %286 = arith.maximumf %284, %285 : vector<16x128xf32>
    %c0_197 = arith.constant 0 : index
    %c0_198 = arith.constant 0 : index
    %c0_199 = arith.constant 0 : index
    %287 = vector.load %arg9[%c0_197, %c0_198, %c0_199] : memref<1x16x128xf32, #tpu.memory_space<vmem>>, vector<1x16x128xf32>
    %288 = vector.shape_cast %287 : vector<1x16x128xf32> to vector<16x128xf32>
    %289 = vector.shape_cast %286 : vector<16x128xf32> to vector<1x16x128xf32>
    tpu.vector_store %arg9[%c0_197, %c0_198, %c0_199], %289 {strides = array<i32>} : memref<1x16x128xf32, #tpu.memory_space<vmem>>, vector<1x16x128xf32>,
    return
  }
  func.func @transform_0(%arg0: i32) -> (i32, i32, i32, i32) {
    %c0_i32 = arith.constant 0 : i32
    %c0_i32_0 = arith.constant 0 : i32
    %c0_i32_1 = arith.constant 0 : i32
    %c0_i32_2 = arith.constant 0 : i32
    return %arg0, %c0_i32, %c0_i32_0, %c0_i32_1 : i32, i32, i32, i32
  }
  func.func @transform_1(%arg0: i32) -> (i32, i32, i32) {
    %c0_i32 = arith.constant 0 : i32
    %c0_i32_0 = arith.constant 0 : i32
    %c0_i32_1 = arith.constant 0 : i32
    %c0_i32_2 = arith.constant 0 : i32
    return %c0_i32, %c0_i32_0, %c0_i32_1 : i32, i32, i32
  }
  func.func @transform_2(%arg0: i32) -> (i32, i32, i32) {
    %c0_i32 = arith.constant 0 : i32
    %c0_i32_0 = arith.constant 0 : i32
    %c0_i32_1 = arith.constant 0 : i32
    %c0_i32_2 = arith.constant 0 : i32
    return %c0_i32, %c0_i32_0, %c0_i32_1 : i32, i32, i32
  }
  func.func @transform_3(%arg0: i32) -> (i32, i32, i32) {
    %c0_i32 = arith.constant 0 : i32
    %c0_i32_0 = arith.constant 0 : i32
    %c0_i32_1 = arith.constant 0 : i32
    %c0_i32_2 = arith.constant 0 : i32
    return %c0_i32, %c0_i32_0, %c0_i32_1 : i32, i32, i32
  }
  func.func @transform_4(%arg0: i32) -> (i32, i32, i32) {
    %c0_i32 = arith.constant 0 : i32
    %c0_i32_0 = arith.constant 0 : i32
    %c0_i32_1 = arith.constant 0 : i32
    %c0_i32_2 = arith.constant 0 : i32
    return %c0_i32, %c0_i32_0, %c0_i32_1 : i32, i32, i32
  }
  func.func @transform_5(%arg0: i32) -> (i32, i32, i32) {
    %c0_i32 = arith.constant 0 : i32
    %c0_i32_0 = arith.constant 0 : i32
    %c0_i32_1 = arith.constant 0 : i32
    %c0_i32_2 = arith.constant 0 : i32
    return %c0_i32, %c0_i32_0, %c0_i32_1 : i32, i32, i32
  }
  func.func @transform_6(%arg0: i32) -> (i32, i32, i32) {
    %c0_i32 = arith.constant 0 : i32
    %c0_i32_0 = arith.constant 0 : i32
    %c0_i32_1 = arith.constant 0 : i32
    %c0_i32_2 = arith.constant 0 : i32
    return %c0_i32, %c0_i32_0, %c0_i32_1 : i32, i32, i32
  }
  func.func @transform_7(%arg0: i32) -> (i32, i32) {
    %c0_i32 = arith.constant 0 : i32
    %c0_i32_0 = arith.constant 0 : i32
    %c0_i32_1 = arith.constant 0 : i32
    return %c0_i32, %c0_i32_0 : i32, i32
  }
  func.func @transform_8(%arg0: i32) -> (i32, i32, i32) {
    %c0_i32 = arith.constant 0 : i32
    %c0_i32_0 = arith.constant 0 : i32
    %c0_i32_1 = arith.constant 0 : i32
    return %arg0, %c0_i32, %c0_i32_0 : i32, i32, i32
  }
}

</mosaic_0001>

<bundles_post_ra>
// kernel: encoder_unet_forward.1
= control target key start
LH: loop header
LB: loop body
LE: loop exit
PB: predicated region body
PF: predicated region fallthrough
CT: control target
= control target key end

     0   :  { %13 = vsyncpa [#allocation9], 0  ;;  %s15437_s0 = inlined_call_operand.vmem [shape: f32[2,16,16,4], index: 0, kind: input, shape index: {}]   ;;  %s15438_s1 = inlined_call_operand.vmem [shape: bf16[3,12,32], index: 1, kind: input, shape index: {}]   ;;  %s15439_s2 = inlined_call_operand.vmem [shape: bf16[3,96,32], index: 2, kind: input, shape index: {}]   ;;  %s15440_s3 = inlined_call_operand.vmem [shape: bf16[3,96,64], index: 3, kind: input, shape index: {}]   ;;  %s15441_s4 = inlined_call_operand.vmem [shape: bf16[3,192,64], index: 4, kind: input, shape index: {}]   ;;  %s15442_s5 = inlined_call_operand.vmem [shape: bf16[3,192,128], index: 5, kind: input, shape index: {}]   ;;  %s15443_s6 = inlined_call_operand.vmem [shape: bf16[3,384,128], index: 6, kind: input, shape index: {}]   ;;  %s15444_s7 = inlined_call_operand.vmem [shape: f32[1,448], index: 7, kind: input, shape index: {}]   ;;  %s15445_s8 = inlined_call_operand.hbm [shape: f32[2,16,128], index: 8, kind: output, shape index: {}]  }
   0x1   :  { %15 = vsyncpa [#allocation9 + $0x1], 0  ;;  %s10991_s27 = smov 0   ;;  %s10993_s28 = smov 0  }
   0x2   :  { %s10995_s29 = smov 0   ;;  %s10997_s30 = smov 0  }
   0x3 LB: > { %s11012_s9 = sadd.s32 4294967295, %s10937_s30   ;;  %s9174_s10 = sadd.s32 4294967294, %s10937_s30   ;;  %s10937_s30 = sphi %s10997_s30, %s15517_s30   ;;  %s10933_s29 = sphi %s10995_s29, %s15516_s29   ;;  %s10929_s28 = sphi %s10993_s28, %s15515_s28   ;;  %s10925_s27 = sphi %s10991_s27, %s15514_s27  }
   0x4   : > { %s11016_s11 = sadd.s32 1, %s10937_s30   ;;  %s201_s12 = sadd.s32 1, %s10933_s29 }
   0x5   : > { %s198_s13 = ssub.s32 %s10937_s30, %s11016_s11  ;;  %p211_p0 = scmp.ne.s32.totalorder %s10933_s29, %s10929_s28 }
   0x6   : > { %p199_p1 = scmp.eq.s32.totalorder %s198_s13, 0  ;;  %p212_p2 = scmp.eq.s32.totalorder %s11012_s9, 1 }
   0x7   : > { %p217_p3 = scmp.ne.s32.totalorder %s10929_s28, %s10925_s27  ;;  %p218_p4 = scmp.eq.s32.totalorder %s9174_s10, 1 }
   0x8   : > { %s11027_s14 = scalar_select %p199_p1, %s10933_s29, %s201_s12  }
   0x9   : > { %p11029_p5 = por %p212_p2, %p211_p0  ;;  %p11033_p6 = por %p218_p4, %p217_p3 }
   0xa   : > { %p9177_p7 = scmp.ge.s32.totalorder %s10937_s30, 1  ;;  %p265_p8 = scmp.lt.s32.totalorder %s10937_s30, 3 }
   0xc   : > { %p266_p9 = pnand %p9177_p7, %p265_p8 }
   0xe   : > { %269 = sbr.rel (%p266_p9) target bundleno = 2416 (0x970), region = 52 }
  0x13   : > { %p299_p10 = scmp.lt.s32.totalorder %s11012_s9, 1  ;;  %vm337_vm0 = vcmask 27651   ;;  %vm15459_vm1 = vsmask.f32 7950  ;;  %v362_v1 = vld [vmem:[#allocation2 + $0x10] sm:$0x8] }
  0x14   : > { %vm11041_vm2 = vmand %vm337_vm0, %vm15459_vm1  ;;  %vm347_vm3 = vsmask.f32 256  ;;  %v365_v3 = vld [vmem:[#allocation2 + $0x20] sm:$0x8]  ;;  %v368_v5 = vld [vmem:[#allocation2 + $0x30] sm:$0x8] }
  0x15   : > { %s300_s17 = scalar_select %p299_p10, %s11012_s9, 1  ;;  %v363_v2 = vsel %vm11041_vm2, 0, %v362_v1  ;;  %v366_v4 = vsel %vm11041_vm2, 0, %v365_v3  ;;  %vm346_vm4 = vcmask 24576   ;;  %v369_v6 = vsel %vm11041_vm2, 0, %v368_v5 }
  0x16   : > { %364 = vst [vmem:[#allocation2 + $0x10] sm:$0x8] %v363_v2  ;;  %vm11053_vm5 = vmand %vm346_vm4, %vm347_vm3  ;;  %v410_v8 = vld [vmem:[#allocation2 + $0x1c] sm:$0x1]  ;;  %vm343_vm6 = vcmask 27648   ;;  %s10939_s22 = smov 4  }
  0x17   : > { %s10577_s18 = sshll.u32 %s300_s17, 8  ;;  %367 = vst [vmem:[#allocation2 + $0x20] sm:$0x8] %v366_v4  ;;  %v411_v9 = vsel %vm11053_vm5, 0, %v410_v8  ;;  %v413_v10 = vld [vmem:[#allocation2 + $0x2c] sm:$0x1] }
  0x18   : > { %s11060_s21 = scalar_lea.vmem %s15437_s0, %s10577_s18  ;;  %370 = vst [vmem:[#allocation2 + $0x30] sm:$0x8] %v369_v6  ;;  %v414_v14 = vsel %vm11053_vm5, 0, %v413_v10  ;;  %v371_v29 = vld [vmem:[#allocation2 + $0x40] sm:$0x8]  ;;  %v15466_v48 = vmov 0 }
  0x19   : > { %v305_v11 = vld [vmem:[%s11060_s21] sm:$0xff]  ;;  %v306_v12 = vld [vmem:[%s11060_s21 + $0x8] sm:$0xff]  ;;  %v307_v13 = vld [vmem:[%s11060_s21 + $0x10] sm:$0xff]  ;;  %412 = vst [vmem:[#allocation2 + $0x1c] sm:$0x1] %v411_v9  ;;  %v372_v33 = vsel %vm11041_vm2, 0, %v371_v29 }
  0x1a   : > { %v458_v15 = vpack.c.bf16 %v305_v11, %v305_v11  ;;  %v459_v16 = vpack.c.bf16 %v306_v12, %v306_v12  ;;  %v308_v17 = vld [vmem:[%s11060_s21 + $0x18] sm:$0xff]  ;;  %v460_v18 = vpack.c.bf16 %v307_v13, %v307_v13  ;;  %v311_v19 = vld [vmem:[%s11060_s21 + $0x30] sm:$0xff]  ;;  %415 = vst [vmem:[#allocation2 + $0x2c] sm:$0x1] %v414_v14  ;;  %v309_v22 = vld [vmem:[%s11060_s21 + $0x20] sm:$0xff]  ;;  %s10940_s23 = smov 8  }
  0x1b   : > { %v312_v20 = vld [vmem:[%s11060_s21 + $0x38] sm:$0xff]  ;;  %v461_v21 = vpack.c.bf16 %v308_v17, %v308_v17  ;;  %v310_v23 = vld [vmem:[%s11060_s21 + $0x28] sm:$0xff]  ;;  %v464_v24 = vpack.c.bf16 %v311_v19, %v311_v19  ;;  %v462_v26 = vpack.c.bf16 %v309_v22, %v309_v22  ;;  %vm15458_vm7 = vsmask.f32 4368  ;;  %373 = vst [vmem:[#allocation2 + $0x40] sm:$0x8] %v372_v33 }
  0x1c   : > { %490 = vst.msk [vmem:[#allocation2 + $0x14] sm:$0xf] %vm343_vm6, %v458_v15  ;;  %v465_v25 = vpack.c.bf16 %v312_v20, %v312_v20  ;;  %v463_v28 = vpack.c.bf16 %v310_v23, %v310_v23  ;;  %vm11095_vm8 = vmor %vm347_vm3, %vm15458_vm7  ;;  %vm1691_vm9 = vsmask.f32 3328  ;;  %vm1692_vm10 = vsmask.f32 7440 }
  0x1d   : > { %491 = vst.msk [vmem:[#allocation2 + $0x18] sm:$0xf] %vm343_vm6, %v459_v16  ;;  %v526_v27 = vld [vmem:[#allocation2 + $0x10] sm:$0xf]  ;;  %v15467_v48 = vsel %vm11095_vm8, 4294967295, %v15466_v48  ;;  %vm11157_vm11 = vmor %vm1691_vm9, %vm1692_vm10  ;;  %vm1469_vm12 = vcmask 1045504  }
  0x1e   : > { %492 = vst.msk [vmem:[#allocation2 + $0x24] sm:$0xf] %vm343_vm6, %v460_v18  ;;  %v530_v30 = vld [vmem:[#allocation2 + $0x20] sm:$0xf]  ;;  %v619_v31 = vshrl.u32 %v526_v27, 16  ;;  %vm1110_vm13 = vcmask 31744  }
  0x1f   : > { %493 = vst.msk [vmem:[#allocation2 + $0x28] sm:$0xf] %vm343_vm6, %v461_v21  ;;  %v641_v38 = vshrl.u32 %v530_v30, 16  ;;  %v534_v42 = vld [vmem:[#allocation2 + $0x30] sm:$0xf]  ;;  %vm1159_vm14 = vcmask 64512  }
  0x20   : > { %496 = vst.msk [vmem:[#allocation2 + $0x44] sm:$0xf] %vm343_vm6, %v464_v24  ;;  %v9182_v44 = vrot.slane %v619_v31, 11  ;;  %v663_v60 = vshrl.u32 %v534_v42, 16  ;;  %vm1436_vm15 = vcmask 97280   ;;  %vm2376_vm0 = vcmask 257027  }
  0x21   : > { %497 = vst.msk [vmem:[#allocation2 + $0x48] sm:$0xf] %vm343_vm6, %v465_v25  ;;  %v9183_v55 = vrot.slane %v641_v38, 11  ;;  %v533_v24 = vld [vmem:[#allocation2 + $0x2c] sm:$0xf]  ;;  %vm12177_vm4 = vmand %vm2376_vm0, %vm15459_vm1  ;;  %s10942_s25 = smov 32  }
  0x22   : > { %494 = vst.msk [vmem:[#allocation2 + $0x34] sm:$0xf] %vm343_vm6, %v462_v26  ;;  %v9184_v17 = vrot.slane %v663_v60, 11  ;;  %vm3194_vm10 = vcmask 523264   ;;  %s10944_s13 = smov 96   ;;  %vm5167_vm0 = vcmask 1042434  }
  0x23   : > { %v11081_v32 = vld [vmem:[#allocation2 + $0x14] sm:$0xf]  ;;  %495 = vst.msk [vmem:[#allocation2 + $0x38] sm:$0xf] %vm343_vm6, %v463_v28  ;;  %v529_v28 = vld [vmem:[#allocation2 + $0x1c] sm:$0xf] }
  0x24   : > { %v10579_v34 = vld [vmem:[#allocation2 + $0x14] sm:$0xff]  ;;  %v624_v36 = vshrl.u32 %v11081_v32, 16  ;;  %v627_v37 = vshll.u32 %v11081_v32, 16  ;;  %15468 = vst [vmem:[#allocation11_spill] sm:$0xff] %v15467_v48  ;;  %vm5179_vm7 = vcmask 1046534  }
  0x25   : > { %v11086_v35 = vld [vmem:[#allocation2 + $0x18] sm:$0xf]  ;;  %v531_v41 = vld [vmem:[#allocation2 + $0x24] sm:$0xf]  ;;  %1279 = vrot.lane.b32.xlu0 %v10579_v34, %s10939_s22 }
  0x26   : > { %v633_v39 = vshrl.u32 %v11086_v35, 16  ;;  %v636_v40 = vshll.u32 %v11086_v35, 16  ;;  %v10580_v43 = vld [vmem:[#allocation2 + $0x24] sm:$0xff]  ;;  %v626_v45 = vrot.slane %v624_v36, 7  ;;  %v646_v47 = vshrl.u32 %v531_v41, 16 }
  0x27   : > { %v532_v46 = vld [vmem:[#allocation2 + $0x28] sm:$0xf]  ;;  %v649_v50 = vshll.u32 %v531_v41, 16  ;;  %1281 = vrot.lane.b32.xlu2 %v10580_v43, %s10939_s22  ;;  %v1709_v16 = vrot.slane %v627_v37, 5  ;;  %v1708_v29 = vrot.slane %v624_v36, 4 }
  0x28   : > { %v635_v49 = vrot.slane %v633_v39, 7  ;;  %v655_v51 = vshrl.u32 %v532_v46, 16  ;;  %v658_v52 = vshll.u32 %v532_v46, 16  ;;  %v629_v53 = vor.u32 %v627_v37, %v626_v45  ;;  %v11134_v32 = vld [vmem:[#allocation2 + $0x44] sm:$0xff] }
  0x29   : > { %v631_v54 = vrot.slane %v626_v45, 4  ;;  %v648_v56 = vrot.slane %v646_v47, 7  ;;  %v11100_v59 = vld [vmem:[#allocation2 + $0x34] sm:$0xf]  ;;  %v1722_v21 = vrot.slane %v646_v47, 4  ;;  %v1723_v25 = vrot.slane %v649_v50, 5 }
  0x2a   : > { %v638_v57 = vor.u32 %v636_v40, %v635_v49  ;;  %v657_v58 = vrot.slane %v655_v51, 7  ;;  %v630_v61 = vsel %vm11095_vm8, %v9182_v44, %v629_v53  ;;  %v11104_v1 = vld [vmem:[#allocation2 + $0x38] sm:$0xf]  ;;  %v668_v2 = vshrl.u32 %v11100_v59, 16  ;;  %v11138_v38 = vld [vmem:[#allocation2 + $0x44] sm:$0xf] }
  0x2b   : > { %v651_v62 = vor.u32 %v649_v50, %v648_v56  ;;  %v653_v63 = vrot.slane %v648_v56, 4  ;;  %v994_v4 = vunpack.c.l.b16 %v630_v61  ;;  %v671_v6 = vshll.u32 %v11100_v59, 16  ;;  %v10581_v12 = vld [vmem:[#allocation2 + $0x34] sm:$0xff]  ;;  %v11146_v44 = vld [vmem:[#allocation2 + $0x48] sm:$0xf]  ;;  %v314_v46 = vld [vmem:[%s11060_s21 + $0x48] sm:$0xff] }
  0x2c   : > { %v639_v3 = vsel %vm11095_vm8, %v631_v54, %v638_v57  ;;  %v660_v5 = vor.u32 %v658_v52, %v657_v58  ;;  %v670_v10 = vrot.slane %v668_v2, 7  ;;  %v677_v11 = vshrl.u32 %v11104_v1, 16  ;;  %v313_v45 = vld [vmem:[%s11060_s21 + $0x40] sm:$0xff]  ;;  %v538_v49 = vld [vmem:[#allocation2 + $0x40] sm:$0xf] }
  0x2d   : > { %v995_v8 = vunpack.c.l.b16 %v639_v3  ;;  %v652_v9 = vsel %vm11095_vm8, %v9183_v55, %v651_v62  ;;  %v680_v14 = vshll.u32 %v11104_v1, 16  ;;  %1316 = vrot.lane.b32.xlu0 %v10580_v43, %s10940_s23  ;;  %v11128_v26 = vrot.slane %v658_v52, 5  ;;  %v374_v62 = vld [vmem:[#allocation2 + $0x50] sm:$0x8] }
  0x2e   : > { %v661_v13 = vsel %vm11095_vm8, %v653_v63, %v660_v5  ;;  %v996_v18 = vunpack.c.l.b16 %v652_v9  ;;  %v673_v19 = vor.u32 %v671_v6, %v670_v10  ;;  %v679_v20 = vrot.slane %v677_v11, 7  ;;  %v316_v9 = vld [vmem:[%s11060_s21 + $0x58] sm:$0xff] }
  0x2f   : > { %v11119_v15 = vpack.c.b16 %v995_v8, %v994_v4  ;;  %v997_v22 = vunpack.c.l.b16 %v661_v13  ;;  %v675_v23 = vrot.slane %v670_v10, 4  ;;  %1318 = vrot.lane.b32.xlu2 %v10581_v12, %s10940_s23  ;;  %v11132_v30 = vrot.slane %v636_v40, 5  ;;  %v315_v8 = vld [vmem:[%s11060_s21 + $0x50] sm:$0xff] }
  0x30   : > { %v682_v27 = vor.u32 %v680_v14, %v679_v20  ;;  %v1714_v31 = vrot.slane %v633_v39, 4  ;;  %v1728_v33 = vrot.slane %v655_v51, 4  ;;  %v674_v34 = vsel %vm11095_vm8, %v9184_v17, %v673_v19  ;;  %v416_v51 = vld [vmem:[#allocation2 + $0x3c] sm:$0x1] }
  0x31   : > { %1043 = vrot.lane.b32.xlu1 %v11119_v15, %s10939_s22  ;;  %v1724_v35 = vor.u32 %v1723_v25, %v1722_v21  ;;  %v1732_v37 = vshll.u32 %v533_v24, 16  ;;  %v11140_v41 = vpack.c.b16 %v997_v22, %v996_v18  ;;  %v1718_v40 = vshll.u32 %v529_v28, 16  ;;  %v377_v28 = vld [vmem:[#allocation2 + $0x60] sm:$0x8] }
  0x32   : > { %v683_v36 = vsel %vm11095_vm8, %v675_v23, %v682_v27  ;;  %v1729_v39 = vor.u32 %v1728_v33, %v11128_v26  ;;  %v1710_v42 = vor.u32 %v1709_v16, %v1708_v29  ;;  %v1715_v43 = vor.u32 %v1714_v31, %v11132_v30 }
  0x33   : > { %v998_v47 = vunpack.c.l.b16 %v674_v34  ;;  %v690_v50 = vshrl.u32 %v11138_v38, 16  ;;  %v999_v52 = vunpack.c.l.b16 %v683_v36  ;;  %v1725_v53 = vrot.slane %v1724_v35, 4 }
  0x34   : > { %v1730_v54 = vrot.slane %v1729_v39, 4  ;;  %v1734_v55 = vrot.slane %v1732_v37, 5  ;;  %v15469_v56 = vmov 0  ;;  %v1720_v57 = vrot.slane %v1718_v40, 5 }
  0x35   : > { %1320 = vrot.lane.b32.xlu0 %v11134_v32, %s10940_s23  ;;  %v15470_v56 = vsel %vm11157_vm11, 4294967295, %v15469_v56  ;;  %v699_v58 = vshrl.u32 %v11146_v44, 16  ;;  %v466_v60 = vpack.c.bf16 %v313_v45, %v313_v45  ;;  %v467_v61 = vpack.c.bf16 %v314_v46, %v314_v46 }
  0x36   : > { %15471 = vst [vmem:[#allocation12_spill] sm:$0xff] %v15470_v56  ;;  %v1711_v63 = vrot.slane %v1710_v42, 4  ;;  %v1716_v3 = vrot.slane %v1715_v43, 4  ;;  %v685_v4 = vshrl.u32 %v538_v49, 16  ;;  %v417_v5 = vsel %vm11053_vm5, 0, %v416_v51 }
  0x37   : > { %1283 = vrot.lane.b32.xlu2 %v10581_v12, %s10939_s22  ;;  %v692_v10 = vrot.slane %v690_v50, 7  ;;  %v693_v13 = vshll.u32 %v11138_v38, 16  ;;  %498 = vst.msk [vmem:[#allocation2 + $0x54] sm:$0xf] %vm343_vm6, %v466_v60  ;;  %v419_v12 = vld [vmem:[#allocation2 + $0x4c] sm:$0x1]  ;;  %v11171_v16 = vpack.c.b16 %v999_v52, %v998_v47  ;;  %v1727_v17 = vsel %vm11157_vm11, %v1725_v53, %v11128_v26 }
  0x38   : > { %v1735_v18 = vsel %vm11157_vm11, %v1730_v54, %v1734_v55  ;;  %499 = vst.msk [vmem:[#allocation2 + $0x58] sm:$0xf] %vm343_vm6, %v467_v61  ;;  %v375_v19 = vsel %vm11041_vm2, 0, %v374_v62  ;;  %v701_v20 = vrot.slane %v699_v58, 7  ;;  %v702_v21 = vshll.u32 %v11146_v44, 16  ;;  %v317_v61 = vld [vmem:[%s11060_s21 + $0x60] sm:$0xff] }
  0x39   : > { %1078 = vrot.lane.b32.xlu1 %v11140_v41, %s10940_s23  ;;  %418 = vst [vmem:[#allocation2 + $0x3c] sm:$0x1] %v417_v5  ;;  %v468_v22 = vpack.c.bf16 %v315_v8, %v315_v8  ;;  %v469_v23 = vpack.c.bf16 %v316_v9, %v316_v9  ;;  %v1713_v24 = vsel %vm11157_vm11, %v1711_v63, %v11132_v30  ;;  %v9185_v26 = vrot.slane %v685_v4, 11  ;;  %v318_v62 = vld [vmem:[%s11060_s21 + $0x68] sm:$0xff]  ;;  %v422_v4 = vld [vmem:[#allocation2 + $0x5c] sm:$0x1] }
  0x3a   : > { %v1721_v25 = vsel %vm11157_vm11, %v1716_v3, %v1720_v57  ;;  %376 = vst [vmem:[#allocation2 + $0x50] sm:$0x8] %v375_v19  ;;  %v420_v27 = vsel %vm11053_vm5, 0, %v419_v12  ;;  %v1950_v29 = vunpack.c.l.b16 %v1727_v17  ;;  %v1951_v31 = vunpack.c.l.b16 %v1735_v18 }
  0x3b   : > { %v695_v33 = vor.u32 %v693_v13, %v692_v10  ;;  %v1736_v30 = vrot.slane %v668_v2, 4  ;;  %500 = vst.msk [vmem:[#allocation2 + $0x64] sm:$0xf] %vm343_vm6, %v468_v22  ;;  %v1737_v34 = vrot.slane %v671_v6, 5  ;;  %v1740_v35 = vrot.slane %v680_v14, 5 }
  0x3c   : > { %v1742_v37 = vrot.slane %v677_v11, 4  ;;  %501 = vst.msk [vmem:[#allocation2 + $0x68] sm:$0xf] %vm343_vm6, %v469_v23  ;;  %v378_v36 = vsel %vm11041_vm2, 0, %v377_v28  ;;  %v1948_v2 = vunpack.c.l.b16 %v1713_v24  ;;  %v1949_v40 = vunpack.c.l.b16 %v1721_v25  ;;  %v380_v23 = vld [vmem:[#allocation2 + $0x70] sm:$0x8] }
  0x3d   : > { %1045 = vrot.lane.b32.xlu0 %v11140_v41, %s10939_s22  ;;  %v697_v39 = vrot.slane %v692_v10, 4  ;;  %v704_v59 = vor.u32 %v702_v21, %v701_v20  ;;  %421 = vst [vmem:[#allocation2 + $0x4c] sm:$0x1] %v420_v27  ;;  %v11213_v1 = vpack.c.b16 %v1951_v31, %v1950_v29  ;;  %v696_v6 = vsel %vm11095_vm8, %v9185_v26, %v695_v33 }
  0x3e   : > { %379 = vst [vmem:[#allocation2 + $0x60] sm:$0x8] %v378_v36  ;;  %v1738_v14 = vor.u32 %v1737_v34, %v1736_v30  ;;  %v1743_v42 = vor.u32 %v1742_v37, %v1740_v35  ;;  %v11217_v43 = vpack.c.b16 %v1949_v40, %v1948_v2  ;;  %v1000_v47 = vunpack.c.l.b16 %v696_v6  ;;  %v11223_v49 = vld [vmem:[#allocation2 + $0x54] sm:$0xf]  ;;  %v319_v36 = vld [vmem:[%s11060_s21 + $0x70] sm:$0xff] }
  0x3f   : > { %1047 = vrot.lane.b32.xlu2 %v11171_v16, %s10939_s22  ;;  %v705_v45 = vsel %vm11095_vm8, %v697_v39, %v704_v59  ;;  %v11225_v51 = vld [vmem:[#allocation2 + $0x58] sm:$0xf]  ;;  %v712_v57 = vshrl.u32 %v11223_v49, 16  ;;  %v715_v10 = vshll.u32 %v11223_v49, 16  ;;  %v470_v12 = vpack.c.bf16 %v317_v61, %v317_v61  ;;  %v320_v2 = vld [vmem:[%s11060_s21 + $0x78] sm:$0xff] }
  0x40   : > { %v537_v11 = vld [vmem:[#allocation2 + $0x3c] sm:$0xf]  ;;  %v1001_v52 = vunpack.c.l.b16 %v705_v45  ;;  %v1739_v53 = vrot.slane %v1738_v14, 4  ;;  %v1744_v54 = vrot.slane %v1743_v42, 4  ;;  %v721_v60 = vshrl.u32 %v11225_v51, 16  ;;  %v10583_v63 = vld [vmem:[#allocation2 + $0x54] sm:$0xff] }
  0x41   : > { %1080 = vrot.lane.b32.xlu1 %v11171_v16, %s10940_s23  ;;  %v1746_v46 = vshll.u32 %v537_v11, 16  ;;  %v542_v3 = vld [vmem:[#allocation2 + $0x50] sm:$0xf]  ;;  %v471_v17 = vpack.c.bf16 %v318_v62, %v318_v62  ;;  %v714_v19 = vrot.slane %v712_v57, 7  ;;  %v423_v22 = vsel %vm11053_vm5, 0, %v422_v4 }
  0x42   : > { %v11235_v5 = vpack.c.b16 %v1001_v52, %v1000_v47  ;;  %v1741_v8 = vsel %vm11157_vm11, %v1739_v53, %v1740_v35  ;;  %v707_v18 = vshrl.u32 %v542_v3, 16  ;;  %v723_v20 = vrot.slane %v721_v60, 7  ;;  %502 = vst.msk [vmem:[#allocation2 + $0x74] sm:$0xf] %vm343_vm6, %v470_v12  ;;  %v11280_v40 = vld [vmem:[#allocation2 + $0x64] sm:$0xf] }
  0x43   : > { %v1748_v55 = vrot.slane %v1746_v46, 5  ;;  %v1952_v24 = vunpack.c.l.b16 %v1741_v8  ;;  %v1750_v26 = vrot.slane %v690_v50, 4  ;;  %v1751_v27 = vrot.slane %v693_v13, 5  ;;  %503 = vst.msk [vmem:[#allocation2 + $0x78] sm:$0xf] %vm343_vm6, %v471_v17 }
  0x44   : > { %v1754_v28 = vrot.slane %v702_v21, 5  ;;  %v1756_v29 = vrot.slane %v699_v58, 4  ;;  %v381_v31 = vsel %vm11041_vm2, 0, %v380_v23  ;;  %v541_v50 = vld [vmem:[#allocation2 + $0x4c] sm:$0xf]  ;;  %v9186_v38 = vrot.slane %v707_v18, 11 }
  0x45   : > { %2032 = vrot.lane.b32.xlu0 %v11213_v1, %s10940_s23  ;;  %v1749_v9 = vsel %vm11157_vm11, %v1744_v54, %v1748_v55  ;;  %424 = vst [vmem:[#allocation2 + $0x5c] sm:$0x1] %v423_v22  ;;  %v717_v44 = vor.u32 %v715_v10, %v714_v19  ;;  %v719_v58 = vrot.slane %v714_v19, 4  ;;  %v1752_v33 = vor.u32 %v1751_v27, %v1750_v26  ;;  %v11282_v39 = vld [vmem:[#allocation2 + $0x68] sm:$0xf] }
  0x46   : > { %v1953_v25 = vunpack.c.l.b16 %v1749_v9  ;;  %382 = vst [vmem:[#allocation2 + $0x70] sm:$0x8] %v381_v31  ;;  %v1757_v30 = vor.u32 %v1756_v29, %v1754_v28  ;;  %v1760_v34 = vshll.u32 %v541_v50, 16  ;;  %v472_v59 = vpack.c.bf16 %v319_v36, %v319_v36  ;;  %v425_v11 = vld [vmem:[#allocation2 + $0x6c] sm:$0x1]  ;;  %v10584_v55 = vld [vmem:[#allocation2 + $0x64] sm:$0xff] }
  0x47   : > { %1285 = vrot.lane.b32.xlu2 %v11134_v32, %s10939_s22  ;;  %v724_v32 = vshll.u32 %v11225_v51, 16  ;;  %v718_v35 = vsel %vm11095_vm8, %v9186_v38, %v717_v44  ;;  %v473_v6 = vpack.c.bf16 %v320_v2, %v320_v2  ;;  %v1753_v14 = vrot.slane %v1752_v33, 4  ;;  %v546_v61 = vld [vmem:[#allocation2 + $0x60] sm:$0xf]  ;;  %v321_v44 = vld [vmem:[%s11060_s21 + $0x80] sm:$0xff] }
  0x48   : > { %v11270_v21 = vpack.c.b16 %v1953_v25, %v1952_v24  ;;  %v1758_v42 = vrot.slane %v1757_v30, 4  ;;  %v1762_v45 = vrot.slane %v1760_v34, 5  ;;  %v426_v46 = vsel %vm11053_vm5, 0, %v425_v11  ;;  %504 = vst.msk [vmem:[#allocation2 + $0x84] sm:$0xf] %vm343_vm6, %v472_v59 }
  0x49   : > { %1997 = vrot.lane.b32.xlu1 %v11217_v43, %s10939_s22  ;;  %v726_v13 = vor.u32 %v724_v32, %v723_v20  ;;  %v1002_v47 = vunpack.c.l.b16 %v718_v35  ;;  %v734_v53 = vshrl.u32 %v11280_v40, 16  ;;  %v743_v54 = vshrl.u32 %v11282_v39, 16  ;;  %505 = vst.msk [vmem:[#allocation2 + $0x88] sm:$0xf] %vm343_vm6, %v473_v6  ;;  %v383_v18 = vld [vmem:[#allocation2 + $0x80] sm:$0x8] }
  0x4a   : > { %427 = vst [vmem:[#allocation2 + $0x6c] sm:$0x1] %v426_v46  ;;  %v1755_v62 = vsel %vm11157_vm11, %v1753_v14, %v1754_v28  ;;  %v1763_v3 = vsel %vm11157_vm11, %v1758_v42, %v1762_v45  ;;  %v729_v8 = vshrl.u32 %v546_v61, 16  ;;  %v746_v17 = vshll.u32 %v11282_v39, 16  ;;  %v11322_v31 = vld [vmem:[#allocation2 + $0x74] sm:$0xf] }
  0x4b   : > { %v727_v37 = vsel %vm11095_vm8, %v719_v58, %v726_v13  ;;  %v736_v9 = vrot.slane %v734_v53, 7  ;;  %v745_v12 = vrot.slane %v743_v54, 7  ;;  %v1954_v19 = vunpack.c.l.b16 %v1755_v62  ;;  %v322_v58 = vld [vmem:[%s11060_s21 + $0x88] sm:$0xff]  ;;  %v11332_v13 = vld [vmem:[#allocation2 + $0x78] sm:$0xf] }
  0x4c   : > { %v1003_v52 = vunpack.c.l.b16 %v727_v37  ;;  %v1955_v20 = vunpack.c.l.b16 %v1763_v3  ;;  %v1764_v22 = vrot.slane %v712_v57, 4  ;;  %v1765_v23 = vrot.slane %v715_v10, 5  ;;  %v545_v27 = vld [vmem:[#allocation2 + $0x5c] sm:$0xf]  ;;  %v10585_v42 = vld [vmem:[#allocation2 + $0x74] sm:$0xff] }
  0x4d   : > { %1322 = vrot.lane.b32.xlu0 %v10583_v63, %s10940_s23  ;;  %v1768_v24 = vrot.slane %v724_v32, 5  ;;  %v1770_v25 = vrot.slane %v721_v60, 4  ;;  %v384_v26 = vsel %vm11041_vm2, 0, %v383_v18  ;;  %v9187_v49 = vrot.slane %v729_v8, 11  ;;  %v428_v34 = vld [vmem:[#allocation2 + $0x7c] sm:$0x1] }
  0x4e   : > { %v11297_v4 = vpack.c.b16 %v1003_v52, %v1002_v47  ;;  %385 = vst [vmem:[#allocation2 + $0x80] sm:$0x8] %v384_v26  ;;  %v741_v10 = vrot.slane %v736_v9, 4  ;;  %v748_v32 = vor.u32 %v746_v17, %v745_v12  ;;  %v11320_v28 = vpack.c.b16 %v1955_v20, %v1954_v19  ;;  %v550_v45 = vld [vmem:[#allocation2 + $0x70] sm:$0xf] }
  0x4f   : > { %1049 = vrot.lane.b32.xlu2 %v11235_v5, %s10939_s22  ;;  %v1766_v51 = vor.u32 %v1765_v23, %v1764_v22  ;;  %v1771_v60 = vor.u32 %v1770_v25, %v1768_v24  ;;  %v1774_v29 = vshll.u32 %v545_v27, 16  ;;  %v474_v33 = vpack.c.bf16 %v321_v44, %v321_v44  ;;  %v386_v20 = vld [vmem:[#allocation2 + $0x90] sm:$0x8] }
  0x50   : > { %v749_v38 = vsel %vm11095_vm8, %v741_v10, %v748_v32  ;;  %v475_v30 = vpack.c.bf16 %v322_v58, %v322_v58  ;;  %v756_v2 = vshrl.u32 %v11322_v31, 16  ;;  %v429_v11 = vsel %vm11053_vm5, 0, %v428_v34  ;;  %v11378_v10 = vld [vmem:[#allocation2 + $0x84] sm:$0xf]  ;;  %v324_v44 = vld [vmem:[%s11060_s21 + $0x98] sm:$0xff] }
  0x51   : > { %1082 = vrot.lane.b32.xlu1 %v11235_v5, %s10940_s23  ;;  %v1767_v35 = vrot.slane %v1766_v51, 4  ;;  %v1772_v37 = vrot.slane %v1771_v60, 4  ;;  %v1776_v36 = vrot.slane %v1774_v29, 5  ;;  %v1005_v6 = vunpack.c.l.b16 %v749_v38  ;;  %506 = vst.msk [vmem:[#allocation2 + $0x94] sm:$0xf] %vm343_vm6, %v474_v33  ;;  %v323_v38 = vld [vmem:[%s11060_s21 + $0x90] sm:$0xff] }
  0x52   : > { %v765_v14 = vshrl.u32 %v11332_v13, 16  ;;  %507 = vst.msk [vmem:[#allocation2 + $0x98] sm:$0xf] %vm343_vm6, %v475_v30  ;;  %v758_v52 = vrot.slane %v756_v2, 7  ;;  %v759_v61 = vshll.u32 %v11322_v31, 16  ;;  %v768_v62 = vshll.u32 %v11332_v13, 16 }
  0x53   : > { %430 = vst [vmem:[#allocation2 + $0x7c] sm:$0x1] %v429_v11  ;;  %v1769_v46 = vsel %vm11157_vm11, %v1767_v35, %v1768_v24  ;;  %v1777_v47 = vsel %vm11157_vm11, %v1772_v37, %v1776_v36  ;;  %v751_v3 = vshrl.u32 %v550_v45, 16  ;;  %v1782_v23 = vrot.slane %v746_v17, 5  ;;  %v549_v26 = vld [vmem:[#allocation2 + $0x6c] sm:$0xf] }
  0x54   : > { %v767_v8 = vrot.slane %v765_v14, 7  ;;  %v1956_v18 = vunpack.c.l.b16 %v1769_v46  ;;  %v1957_v19 = vunpack.c.l.b16 %v1777_v47  ;;  %v763_v22 = vrot.slane %v758_v52, 4  ;;  %v431_v11 = vld [vmem:[#allocation2 + $0x8c] sm:$0x1]  ;;  %v9275_v46 = vld [vmem:[%s15438_s1 + $0x8] sm:$0xf] }
  0x55   : > { %2034 = vrot.lane.b32.xlu0 %v11270_v21, %s10940_s23  ;;  %v1784_v24 = vrot.slane %v743_v54, 4  ;;  %v761_v25 = vor.u32 %v759_v61, %v758_v52  ;;  %v387_v17 = vsel %vm11041_vm2, 0, %v386_v20  ;;  %v778_v58 = vshrl.u32 %v11378_v10, 16  ;;  %v554_v37 = vld [vmem:[#allocation2 + $0x80] sm:$0xf]  ;;  %v10586_v52 = vld [vmem:[#allocation2 + $0x84] sm:$0xff] }
  0x56   : > { %v770_v39 = vor.u32 %v768_v62, %v767_v8  ;;  %v11374_v27 = vpack.c.b16 %v1957_v19, %v1956_v18  ;;  %388 = vst [vmem:[#allocation2 + $0x90] sm:$0x8] %v387_v17  ;;  %v476_v33 = vpack.c.bf16 %v323_v38, %v323_v38  ;;  %v477_v30 = vpack.c.bf16 %v324_v44, %v324_v44  ;;  %v10597_v47 = vld [vmem:[%s15438_s1 + $0x8] sm:$0x30] }
  0x57   : > { %1287 = vrot.lane.b32.xlu2 %v10583_v63, %s10939_s22  ;;  %v737_v63 = vshll.u32 %v11280_v40, 16  ;;  %v15446_v40 = vmov 0   ;;  %v781_v8 = vshll.u32 %v11378_v10, 16  ;;  %v432_v18 = vsel %vm11053_vm5, 0, %v431_v11 }
  0x58   : > { %344 = vst.msk [vmem:[#allocation2 + $0x4] sm:$0xf] %vm343_vm6, %v15446_v40  ;;  %v771_v60 = vsel %vm11095_vm8, %v763_v22, %v770_v39  ;;  %v1792_v39 = vrot.slane %v756_v2, 4  ;;  %v11431_v17 = vrot.slane %v768_v62, 5 }
  0x59   : > { %1999 = vrot.lane.b32.xlu1 %v11213_v1, %s10939_s22  ;;  %v739_v57 = vor.u32 %v737_v63, %v736_v9  ;;  %v1778_v9 = vrot.slane %v734_v53, 4  ;;  %v1779_v12 = vrot.slane %v737_v63, 5  ;;  %v340_v53 = vld [vmem:[#allocation2] sm:$0x8]  ;;  %v9188_v63 = vrot.slane %v751_v3, 11 }
  0x5a   : > { %345 = vst.msk [vmem:[#allocation2 + $0x8] sm:$0xf] %vm343_vm6, %v15446_v40  ;;  %v341_v32 = vsel %vm11041_vm2, 0, %v340_v53  ;;  %v773_v3 = vshrl.u32 %v554_v37, 16  ;;  %v11454_v44 = vld [vmem:[#allocation2 + $0x98] sm:$0xf] }
  0x5b   : > { %v740_v50 = vsel %vm11095_vm8, %v9187_v49, %v739_v57  ;;  %v1780_v54 = vor.u32 %v1779_v12, %v1778_v9  ;;  %356 = vst.msk [vmem:[#allocation2 + $0x114] sm:$0xf] %vm343_vm6, %v15446_v40  ;;  %v1785_v49 = vor.u32 %v1784_v24, %v1782_v23  ;;  %v1788_v57 = vshll.u32 %v549_v26, 16 }
  0x5c   : > { %v1004_v59 = vunpack.c.l.b16 %v740_v50  ;;  %357 = vst.msk [vmem:[#allocation2 + $0x118] sm:$0xf] %vm343_vm6, %v15446_v40  ;;  %v762_v51 = vsel %vm11095_vm8, %v9188_v63, %v761_v25  ;;  %v11388_v50 = vld [vmem:[#allocation2 + $0x88] sm:$0xf]  ;;  %v9276_v9 = vor.u32 %v10597_v47, %v9275_v46  ;;  %v389_v25 = vld [vmem:[#allocation2 + $0xa0] sm:$0x8] }
  0x5d   : > { %1324 = vrot.lane.b32.xlu0 %v10584_v55, %s10940_s23  ;;  %v1781_v29 = vrot.slane %v1780_v54, 4  ;;  %342 = vst [vmem:[#allocation2] sm:$0x8] %v341_v32  ;;  %v1786_v34 = vrot.slane %v1785_v49, 4  ;;  %v1790_v35 = vrot.slane %v1788_v57, 5  ;;  %v1006_v36 = vunpack.c.l.b16 %v762_v51  ;;  %v326_v47 = vld [vmem:[%s11060_s21 + $0xa8] sm:$0xff] }
  0x5e   : > { %508 = vst.msk [vmem:[#allocation2 + $0xa4] sm:$0xf] %vm343_vm6, %v476_v33  ;;  %v790_v22 = vshll.u32 %v11388_v50, 16  ;;  %v9189_v53 = vrot.slane %v773_v3, 11  ;;  %v1793_v54 = vrot.slane %v759_v61, 5  ;;  %v1798_v49 = vrot.slane %v765_v14, 4 }
  0x5f   : > { %1051 = vrot.lane.b32.xlu2 %v11297_v4, %s10939_s22  ;;  %v1783_v45 = vsel %vm11157_vm11, %v1781_v29, %v1782_v23  ;;  %509 = vst.msk [vmem:[#allocation2 + $0xa8] sm:$0xf] %vm343_vm6, %v477_v30  ;;  %v1791_v12 = vsel %vm11157_vm11, %v1786_v34, %v1790_v35  ;;  %v1471_v23 = vsel %vm1469_vm12, %v9276_v9, 0  ;;  %v390_v57 = vsel %vm11041_vm2, 0, %v389_v25  ;;  %v553_v51 = vld [vmem:[#allocation2 + $0x7c] sm:$0xf] }
  0x60   : > { %433 = vst [vmem:[#allocation2 + $0x8c] sm:$0x1] %v432_v18  ;;  %v1958_v24 = vunpack.c.l.b16 %v1783_v45  ;;  %1480 = vmatpush.bf16.msra.mxu0 %v1471_v23  ;;  %v1959_v26 = vunpack.c.l.b16 %v1791_v12  ;;  %v11447_v14 = vld [vmem:[#allocation2 + $0x94] sm:$0xf]  ;;  %v1794_v62 = vor.u32 %v1793_v54, %v1792_v39  ;;  %v1802_v29 = vshll.u32 %v553_v51, 16 }
  0x61   : > { %1084 = vrot.lane.b32.xlu1 %v11297_v4, %s10940_s23  ;;  %391 = vst [vmem:[#allocation2 + $0xa0] sm:$0x8] %v390_v57  ;;  %v800_v33 = vshrl.u32 %v11447_v14, 16  ;;  %v9295_v30 = vld [vmem:[%s15438_s1] sm:$0xf] }
  0x62   : > { %v11443_v31 = vpack.c.b16 %v1959_v26, %v1958_v24  ;;  %v10596_v34 = vld [vmem:[%s15438_s1] sm:$0x30]  ;;  %v1795_v11 = vrot.slane %v1794_v62, 4  ;;  %v1804_v46 = vrot.slane %v1802_v29, 5  ;;  %v349_v18 = vld [vmem:[#allocation2 + $0xc] sm:$0x1] }
  0x63   : > { %v9296_v37 = vor.u32 %v10596_v34, %v9295_v30  ;;  %v434_v3 = vld [vmem:[#allocation2 + $0x9c] sm:$0x1]  ;;  %v802_v23 = vrot.slane %v800_v33, 7  ;;  %v803_v24 = vshll.u32 %v11447_v14, 16  ;;  %v11475_v25 = vld [vmem:[#allocation2 + $0x94] sm:$0xff]  ;;  %v812_v26 = vshll.u32 %v11454_v44, 16 }
  0x64   : > { %v1797_v54 = vsel %vm11157_vm11, %v1795_v11, %v11431_v17  ;;  %v11490_v57 = vld [vmem:[#allocation2 + $0x4] sm:$0xf]  ;;  %v1806_v62 = vrot.slane %v778_v58, 4 }
  0x65   : > { %2036 = vrot.lane.b32.xlu0 %v11320_v28, %s10940_s23  ;;  %v1600_v9 = vsel %vm1469_vm12, %v9296_v37, 0  ;;  %v1960_v30 = vunpack.c.l.b16 %v1797_v54  ;;  %v805_v37 = vor.u32 %v803_v24, %v802_v23 }
  0x66   : > { %1609 = vmatpush.bf16.msra.mxu1 %v1600_v9  ;;  %v605_v9 = vshll.u32 %v11490_v57, 16 }
  0x67   : > { %1289 = vrot.lane.b32.xlu2 %v10584_v55, %s10939_s22  ;;  %v11349_v55 = vpack.c.b16 %v1005_v6, %v1004_v59  ;;  %v1007_v59 = vunpack.c.l.b16 %v771_v60  ;;  %v787_v6 = vshrl.u32 %v11388_v50, 16  ;;  %v1799_v60 = vor.u32 %v1798_v49, %v11431_v17  ;;  %v557_v10 = vld [vmem:[#allocation2 + $0x8c] sm:$0xf] }
  0x68   : > { %v1807_v17 = vrot.slane %v781_v8, 5 }
  0x69   : > { %2001 = vrot.lane.b32.xlu1 %v11270_v21, %s10939_s22  ;;  %v11416_v19 = vpack.c.b16 %v1007_v59, %v1006_v36  ;;  %v789_v20 = vrot.slane %v787_v6, 7  ;;  %v325_v36 = vld [vmem:[%s11060_s21 + $0xa0] sm:$0xff]  ;;  %v1800_v45 = vrot.slane %v1799_v60, 4  ;;  %v11505_v60 = vrot.slane %v790_v22, 5 }
  0x6a   : > { %v478_v12 = vpack.c.bf16 %v325_v36, %v325_v36  ;;  %v1812_v29 = vrot.slane %v787_v6, 4  ;;  %v522_v36 = vld [vmem:[#allocation2] sm:$0xf] }
  0x6b   : > { %v792_v2 = vor.u32 %v790_v22, %v789_v20  ;;  %v558_v20 = vld [vmem:[#allocation2 + $0x90] sm:$0xf]  ;;  %v1805_v49 = vsel %vm11157_vm11, %v1800_v45, %v1804_v46  ;;  %v807_v22 = vrot.slane %v802_v23, 4  ;;  %v1816_v46 = vshll.u32 %v557_v10, 16 }
  0x6c   : > { %510 = vst.msk [vmem:[#allocation2 + $0xb4] sm:$0xf] %vm343_vm6, %v478_v12  ;;  %v1961_v34 = vunpack.c.l.b16 %v1805_v49  ;;  %v1813_v11 = vor.u32 %v1812_v29, %v11505_v60  ;;  %v11531_v12 = vld [vmem:[#allocation2 + $0xa8] sm:$0xf] }
  0x6d   : > { %1326 = vrot.lane.b32.xlu0 %v10585_v42, %s10940_s23  ;;  %v9317_v29 = vld [vmem:[%s15438_s1 + $0x10] sm:$0xf] }
  0x6e   : > { %v11524_v45 = vpack.c.b16 %v1961_v34, %v1960_v30  ;;  %v1814_v54 = vrot.slane %v1813_v11, 4  ;;  %v328_v11 = vld [vmem:[%s11060_s21 + $0xb8] sm:$0xff] }
  0x6f   : > { %1053 = vrot.lane.b32.xlu2 %v11349_v55, %s10939_s22 }
  0x71   : > { %1086 = vrot.lane.b32.xlu1 %v11349_v55, %s10940_s23 }
  0x75   : > { %2038 = vrot.lane.b32.xlu0 %v11374_v27, %s10940_s23 }
  0x77   : > { %1291 = vrot.lane.b32.xlu2 %v10585_v42, %s10939_s22  ;;  %v780_v42 = vrot.slane %v778_v58, 7  ;;  %v602_v58 = vshrl.u32 %v11490_v57, 16 }
  0x79   : > { %2003 = vrot.lane.b32.xlu1 %v11320_v28, %s10939_s22  ;;  %v783_v63 = vor.u32 %v781_v8, %v780_v42  ;;  %v785_v32 = vrot.slane %v780_v42, 4  ;;  %v809_v42 = vshrl.u32 %v11454_v44, 16 }
  0x7b   : > { %v784_v61 = vsel %vm11095_vm8, %v9189_v53, %v783_v63  ;;  %v793_v38 = vsel %vm11095_vm8, %v785_v32, %v792_v2  ;;  %v479_v53 = vpack.c.bf16 %v326_v47, %v326_v47  ;;  %v435_v63 = vsel %vm11053_vm5, 0, %v434_v3  ;;  %v11492_v32 = vld [vmem:[#allocation2 + $0x8] sm:$0xf]  ;;  %v11526_v47 = vld [vmem:[#allocation2 + $0xa4] sm:$0xf] }
  0x7c   : > { %v1008_v35 = vunpack.c.l.b16 %v784_v61  ;;  %v1009_v59 = vunpack.c.l.b16 %v793_v38  ;;  %436 = vst [vmem:[#allocation2 + $0x9c] sm:$0x1] %v435_v63  ;;  %v795_v2 = vshrl.u32 %v558_v20, 16  ;;  %v811_v51 = vrot.slane %v809_v42, 7  ;;  %v392_v38 = vld [vmem:[#allocation2 + $0xb0] sm:$0x8] }
  0x7d   : > { %1328 = vrot.lane.b32.xlu0 %v10586_v52, %s10940_s23  ;;  %511 = vst.msk [vmem:[#allocation2 + $0xb8] sm:$0xf] %vm343_vm6, %v479_v53  ;;  %v393_v8 = vsel %vm11041_vm2, 0, %v392_v38  ;;  %v611_v6 = vshrl.u32 %v11492_v32, 16  ;;  %v604_v3 = vrot.slane %v602_v58, 7  ;;  %v597_v20 = vshrl.u32 %v522_v36, 16 }
  0x7e   : > { %v11483_v39 = vpack.c.b16 %v1009_v59, %v1008_v35  ;;  %v814_v50 = vor.u32 %v812_v26, %v811_v51  ;;  %394 = vst [vmem:[#allocation2 + $0xb0] sm:$0x8] %v393_v8  ;;  %v9190_v35 = vrot.slane %v795_v2, 11  ;;  %v1808_v59 = vor.u32 %v1807_v17, %v1806_v62  ;;  %v327_v2 = vld [vmem:[%s11060_s21 + $0xb0] sm:$0xff] }
  0x7f   : > { %1055 = vrot.lane.b32.xlu2 %v11416_v19, %s10939_s22  ;;  %v613_v23 = vrot.slane %v611_v6, 7  ;;  %v614_v53 = vshll.u32 %v11492_v32, 16  ;;  %v822_v49 = vshrl.u32 %v11526_v47, 16  ;;  %v1818_v51 = vrot.slane %v1816_v46, 5  ;;  %v10598_v38 = vld [vmem:[%s15438_s1 + $0x10] sm:$0x30] }
  0x80   : > { %v806_v63 = vsel %vm11095_vm8, %v9190_v35, %v805_v37  ;;  %v831_v17 = vshrl.u32 %v11531_v12, 16  ;;  %v480_v30 = vpack.c.bf16 %v327_v2, %v327_v2  ;;  %v607_v34 = vor.u32 %v605_v9, %v604_v3 }
  0x81   : > { %1088 = vrot.lane.b32.xlu1 %v11416_v19, %s10940_s23  ;;  %v11445_v13 = vpop.permute.xlu2 %1281  ;;  %v609_v10 = vrot.slane %v604_v3, 4  ;;  %v9318_v8 = vor.u32 %v10598_v38, %v9317_v29  ;;  %v9181_v37 = vrot.slane %v597_v20, 11  ;;  %v616_v36 = vor.u32 %v614_v53, %v613_v23  ;;  %v437_v20 = vld [vmem:[#allocation2 + $0xac] sm:$0x1] }
  0x82   : > { %512 = vst.msk [vmem:[#allocation2 + $0xc4] sm:$0xf] %vm343_vm6, %v480_v30  ;;  %v824_v3 = vrot.slane %v822_v49, 7  ;;  %v1819_v23 = vsel %vm11157_vm11, %v1814_v54, %v1818_v51  ;;  %v833_v2 = vrot.slane %v831_v17, 7  ;;  %v834_v29 = vshll.u32 %v11531_v12, 16 }
  0x83   : > { %v1821_v38 = vrot.slane %v803_v24, 5  ;;  %v481_v30 = vpack.c.bf16 %v328_v11, %v328_v11  ;;  %v617_v54 = vsel %vm11095_vm8, %v609_v10, %v616_v36  ;;  %v438_v51 = vsel %vm11053_vm5, 0, %v437_v20  ;;  %v395_v24 = vld [vmem:[#allocation2 + $0xc0] sm:$0x8] }
  0x84   : > { %v1826_v14 = vrot.slane %v809_v42, 4  ;;  %v1963_v10 = vunpack.c.l.b16 %v1819_v23  ;;  %439 = vst [vmem:[#allocation2 + $0xac] sm:$0x1] %v438_v51  ;;  %v1694_v36 = vrot.slane %v602_v58, 4  ;;  %v396_v11 = vsel %vm11041_vm2, 0, %v395_v24 }
  0x85   : > { %2040 = vrot.lane.b32.xlu0 %v11443_v31, %s10940_s23  ;;  %513 = vst.msk [vmem:[#allocation2 + $0xc8] sm:$0xf] %vm343_vm6, %v481_v30  ;;  %v1695_v20 = vrot.slane %v605_v9, 5  ;;  %v11615_v23 = vrot.slane %v614_v53, 5  ;;  %v11630_v30 = vld [vmem:[#allocation2 + $0xb8] sm:$0xf] }
  0x86   : > { %397 = vst [vmem:[#allocation2 + $0xc0] sm:$0x8] %v396_v11  ;;  %v330_v11 = vld [vmem:[%s11060_s21 + $0xc8] sm:$0xff] }
  0x87   : > { %1293 = vrot.lane.b32.xlu2 %v10586_v52, %s10939_s22  ;;  %v350_v52 = vsel %vm11053_vm5, 0, %v349_v18  ;;  %v815_v18 = vsel %vm11095_vm8, %v807_v22, %v814_v50  ;;  %v1010_v50 = vunpack.c.l.b16 %v806_v63  ;;  %v11569_v63 = vld [vmem:[#allocation2 + $0xa4] sm:$0xff] }
  0x88   : > { %351 = vst [vmem:[#allocation2 + $0xc] sm:$0x1] %v350_v52  ;;  %v1809_v52 = vrot.slane %v1808_v59, 4  ;;  %v1011_v35 = vunpack.c.l.b16 %v815_v18  ;;  %v562_v59 = vld [vmem:[#allocation2 + $0xa0] sm:$0xf]  ;;  %v2185_v18 = vsel %vm1469_vm12, %v9318_v8, 0 }
  0x89   : > { %2005 = vrot.lane.b32.xlu1 %v11374_v27, %s10939_s22  ;;  %v11496_v61 = vpop.permute.xlu2 %1318  ;;  %2194 = vmatpush.bf16.msra.mxu2 %v2185_v18  ;;  %v10578_v8 = vld [vmem:[#allocation2 + $0x4] sm:$0xff]  ;;  %vm3522_vm12 = vcmask 785408  }
  0x8a   : > { %v1811_v46 = vsel %vm11157_vm11, %v1809_v52, %v11505_v60  ;;  %v817_v60 = vshrl.u32 %v562_v59, 16  ;;  %v1820_v52 = vrot.slane %v800_v33, 4  ;;  %v11581_v40 = vpack.c.b16 %v1011_v35, %v1010_v50 }
  0x8b   : > { %v608_v59 = vsel %vm11095_vm8, %v9181_v37, %v607_v34  ;;  %v1962_v18 = vunpack.c.l.b16 %v1811_v46  ;;  %v11591_v33 = vrot.slane %v812_v26, 5  ;;  %v829_v35 = vrot.slane %v824_v3, 4  ;;  %v561_v37 = vld [vmem:[#allocation2 + $0x9c] sm:$0xf] }
  0x8c   : > { %v836_v34 = vor.u32 %v834_v29, %v833_v2  ;;  %v9191_v44 = vrot.slane %v817_v60, 11  ;;  %v1822_v42 = vor.u32 %v1821_v38, %v1820_v52  ;;  %v1700_v2 = vrot.slane %v611_v6, 4  ;;  %v11626_v6 = vld [vmem:[#allocation2 + $0xb4] sm:$0xf] }
  0x8d   : > { %1330 = vrot.lane.b32.xlu0 %v11475_v25, %s10940_s23  ;;  %v1830_v60 = vshll.u32 %v561_v37, 16  ;;  %v992_v52 = vunpack.c.l.b16 %v608_v59  ;;  %v993_v38 = vunpack.c.l.b16 %v617_v54  ;;  %v11624_v9 = vpack.c.b16 %v1963_v10, %v1962_v18  ;;  %v329_v10 = vld [vmem:[%s11060_s21 + $0xc0] sm:$0xff] }
  0x8e   : > { %v837_v53 = vsel %vm11095_vm8, %v829_v35, %v836_v34  ;;  %v1823_v51 = vrot.slane %v1822_v42, 4  ;;  %v1696_v54 = vor.u32 %v1695_v20, %v1694_v36  ;;  %v1701_v59 = vor.u32 %v1700_v2, %v11615_v23  ;;  %v566_v35 = vld [vmem:[#allocation2 + $0xb0] sm:$0xf]  ;;  %v10848_v42 = vld [vmem:[#allocation2 + $0x14] sm:$0xff] }
  0x8f   : > { %1057 = vrot.lane.b32.xlu2 %v11483_v39, %s10939_s22  ;;  %v525_v32 = vld [vmem:[#allocation2 + $0xc] sm:$0xf]  ;;  %v1832_v24 = vrot.slane %v1830_v60, 5  ;;  %v844_v18 = vshrl.u32 %v11626_v6, 16  ;;  %v853_v34 = vshrl.u32 %v11630_v30, 16  ;;  %v1353_v36 = vsel %vm1110_vm13, %v10848_v42, %v11445_v13 }
  0x90   : > { %v1704_v37 = vshll.u32 %v525_v32, 16  ;;  %v1013_v2 = vunpack.c.l.b16 %v837_v53  ;;  %v1697_v60 = vrot.slane %v1696_v54, 4 }
  0x91   : > { %1090 = vrot.lane.b32.xlu1 %v11483_v39, %s10940_s23  ;;  %v11544_v62 = vpop.permute.xlu2 %1283 }
  0x92   : > { %v1706_v53 = vrot.slane %v1704_v37, 5  ;;  %v1399_v37 = vsel %vm1159_vm14, %v1353_v36, %v11496_v61  ;;  %v1834_v36 = vrot.slane %v822_v49, 4 }
  0x95   : > { %2042 = vrot.lane.b32.xlu0 %v11524_v45, %s10940_s23 }
  0x97   : > { %v1280_v22 = vpop.permute.xlu0 %1279  ;;  %1295 = vrot.lane.b32.xlu2 %v11475_v25, %s10939_s22  ;;  %v825_v25 = vshll.u32 %v11526_v47, 16 }
  0x98   : > { %v1350_v46 = vsel %vm1110_vm13, %v10578_v8, %v1280_v22  ;;  %v1827_v22 = vor.u32 %v1826_v14, %v11591_v33 }
  0x99   : > { %2007 = vrot.lane.b32.xlu1 %v11443_v31, %s10939_s22  ;;  %v827_v50 = vor.u32 %v825_v25, %v824_v3  ;;  %v11602_v26 = vpop.permute.xlu2 %1047 }
  0x9a   : > { %v1828_v14 = vrot.slane %v1827_v22, 4  ;;  %v1825_v22 = vsel %vm11157_vm11, %v1823_v51, %v11591_v33  ;;  %v846_v33 = vrot.slane %v844_v18, 7 }
  0x9b   : > { %v828_v8 = vsel %vm11095_vm8, %v9191_v44, %v827_v50  ;;  %v483_v50 = vpack.c.bf16 %v330_v11, %v330_v11  ;;  %v440_v44 = vld [vmem:[#allocation2 + $0xbc] sm:$0x1]  ;;  %v856_v11 = vshll.u32 %v11630_v30, 16 }
  0x9c   : > { %v1012_v20 = vunpack.c.l.b16 %v828_v8  ;;  %v441_v13 = vsel %vm11053_vm5, 0, %v440_v44  ;;  %v1833_v32 = vsel %vm11157_vm11, %v1828_v14, %v1832_v24  ;;  %v839_v8 = vshrl.u32 %v566_v35, 16  ;;  %v398_v44 = vld [vmem:[#allocation2 + $0xd0] sm:$0x8] }
  0x9d   : > { %1332 = vrot.lane.b32.xlu0 %v11569_v63, %s10940_s23  ;;  %515 = vst.msk [vmem:[#allocation2 + $0xd8] sm:$0xf] %vm343_vm6, %v483_v50  ;;  %v1699_v35 = vsel %vm11157_vm11, %v1697_v60, %v11615_v23  ;;  %v1835_v23 = vrot.slane %v825_v25, 5  ;;  %v399_v60 = vsel %vm11041_vm2, 0, %v398_v44 }
  0x9e   : > { %442 = vst [vmem:[#allocation2 + $0xbc] sm:$0x1] %v441_v13  ;;  %v11669_v24 = vpack.c.b16 %v1013_v2, %v1012_v20  ;;  %v9192_v50 = vrot.slane %v839_v8, 11  ;;  %v851_v20 = vrot.slane %v846_v33, 4  ;;  %v11689_v2 = vrot.slane %v834_v29, 5 }
  0x9f   : > { %v1317_v3 = vpop.permute.xlu0 %1316  ;;  %1059 = vrot.lane.b32.xlu2 %v11581_v40, %s10939_s22  ;;  %v565_v13 = vld [vmem:[#allocation2 + $0xac] sm:$0xf]  ;;  %400 = vst [vmem:[#allocation2 + $0xd0] sm:$0x8] %v399_v60 }
  0xa0   : > { %v1397_v58 = vsel %vm1159_vm14, %v1350_v46, %v1317_v3  ;;  %v1024_v46 = vpack.c.b16 %v993_v38, %v992_v52  ;;  %v482_v3 = vpack.c.bf16 %v329_v10, %v329_v10  ;;  %v1702_v52 = vrot.slane %v1701_v59, 4  ;;  %v10589_v59 = vld [vmem:[#allocation2 + $0xb4] sm:$0xff] }
  0xa1   : > { %1092 = vrot.lane.b32.xlu1 %v11581_v40, %s10940_s23  ;;  %9277 = vmatmul.msk.bf16.vlgmr.msra.gmra.mxu0 %vm1436_vm15, %v1397_v58  ;;  %v11650_v38 = vpop.permute.xlu2 %1285  ;;  %v855_v10 = vrot.slane %v853_v34, 7 }
  0xa2   : > { %514 = vst.msk [vmem:[#allocation2 + $0xd4] sm:$0xf] %vm343_vm6, %v482_v3  ;;  %v1707_v3 = vsel %vm11157_vm11, %v1702_v52, %v1706_v53  ;;  %v1836_v53 = vor.u32 %v1835_v23, %v1834_v36 }
  0xa3   : > { %v1044_v57 = vpop.permute.xlu1 %1043  ;;  %v858_v61 = vor.u32 %v856_v11, %v855_v10  ;;  %v1947_v25 = vunpack.c.l.b16 %v1707_v3  ;;  %v331_v10 = vld [vmem:[%s11060_s21 + $0xd0] sm:$0xff] }
  0xa4   : > { %v1113_v51 = vsel %vm1110_vm13, %v1024_v46, %v1044_v57  ;;  %v1964_v57 = vunpack.c.l.b16 %v1825_v22  ;;  %v1965_v46 = vunpack.c.l.b16 %v1833_v32  ;;  %v1840_v22 = vrot.slane %v831_v17, 4  ;;  %v443_v3 = vld [vmem:[#allocation2 + $0xcc] sm:$0x1] }
  0xa5   : > { %2044 = vrot.lane.b32.xlu0 %v11624_v9, %s10940_s23  ;;  %v1946_v17 = vunpack.c.l.b16 %v1699_v35  ;;  %v859_v32 = vsel %vm11095_vm8, %v851_v20, %v858_v61  ;;  %v1837_v44 = vrot.slane %v1836_v53, 4 }
  0xa6   : > { %v11702_v12 = vpack.c.b16 %v1965_v46, %v1964_v57  ;;  %v1841_v8 = vor.u32 %v1840_v22, %v11689_v2  ;;  %v1015_v57 = vunpack.c.l.b16 %v859_v32  ;;  %v484_v46 = vpack.c.bf16 %v331_v10, %v331_v10  ;;  %v570_v32 = vld [vmem:[#allocation2 + $0xc0] sm:$0xf] }
  0xa7   : > { %v11645_v58 = vpop.permute.xlu0 %1320  ;;  %1297 = vrot.lane.b32.xlu2 %v11569_v63, %s10939_s22  ;;  %v847_v63 = vshll.u32 %v11626_v6, 16 }
  0xa8   : > { %516 = vst.msk [vmem:[#allocation2 + $0xe4] sm:$0xf] %vm343_vm6, %v484_v46 }
  0xa9   : > { %2009 = vrot.lane.b32.xlu1 %v11524_v45, %s10939_s22  ;;  %v849_v42 = vor.u32 %v847_v63, %v846_v33  ;;  %v11697_v49 = vpop.permute.xlu2 %1049  ;;  %v1844_v33 = vshll.u32 %v565_v13, 16  ;;  %v444_v13 = vsel %vm11053_vm5, 0, %v443_v3  ;;  %v1849_v46 = vrot.slane %v847_v63, 5 }
  0xaa   : > { %445 = vst [vmem:[#allocation2 + $0xcc] sm:$0x1] %v444_v13 }
  0xab   : > { %v1079_v54 = vpop.permute.xlu1 %1078  ;;  %v850_v29 = vsel %vm11095_vm8, %v9192_v50, %v849_v42  ;;  %v1978_v50 = vpack.c.b16 %v1947_v25, %v1946_v17  ;;  %v1842_v42 = vrot.slane %v1841_v8, 4  ;;  %v1846_v20 = vrot.slane %v1844_v33, 5 }
  0xac   : > { %v1161_v14 = vsel %vm1159_vm14, %v1113_v51, %v1079_v54  ;;  %v11709_v51 = vld [vmem:[#allocation2 + $0xc4] sm:$0xf]  ;;  %v11711_v54 = vld [vmem:[#allocation2 + $0xc8] sm:$0xf]  ;;  %v1839_v8 = vsel %vm11157_vm11, %v1837_v44, %v11689_v2  ;;  %v11757_v44 = vrot.slane %v856_v11, 5 }
  0xad   : > { %9297 = vmatmul.msk.bf16.vlgmr.msra.gmra.mxu1 %vm1436_vm15, %v1161_v14  ;;  %1334 = vrot.lane.b32.xlu0 %v10589_v59, %s10940_s23  ;;  %v332_v14 = vld [vmem:[%s11060_s21 + $0xd8] sm:$0xff]  ;;  %v866_v23 = vshrl.u32 %v11709_v51, 16  ;;  %v875_v22 = vshrl.u32 %v11711_v54, 16  ;;  %v1847_v33 = vsel %vm11157_vm11, %v1842_v42, %v1846_v20  ;;  %v878_v2 = vshll.u32 %v11711_v54, 16  ;;  %v569_v20 = vld [vmem:[#allocation2 + $0xbc] sm:$0xf] }
  0xae   : > { %v485_v35 = vpack.c.bf16 %v332_v14, %v332_v14  ;;  %v869_v14 = vshll.u32 %v11709_v51, 16  ;;  %v1966_v3 = vunpack.c.l.b16 %v1839_v8  ;;  %v1854_v42 = vrot.slane %v853_v34, 4 }
  0xaf   : > { %v1046_v52 = vpop.permute.xlu0 %1045  ;;  %1061 = vrot.lane.b32.xlu2 %v11669_v24, %s10939_s22  ;;  %v868_v10 = vrot.slane %v866_v23, 7 }
  0xb0   : > { %v1116_v61 = vsel %vm1110_vm13, %v11119_v15, %v1046_v52  ;;  %517 = vst.msk [vmem:[#allocation2 + $0xe8] sm:$0xf] %vm343_vm6, %v485_v35  ;;  %v10849_v15 = vld [vmem:[#allocation2 + $0x24] sm:$0xff]  ;;  %v401_v35 = vld [vmem:[#allocation2 + $0xe0] sm:$0x8] }
  0xb1   : > { %1094 = vrot.lane.b32.xlu1 %v11669_v24, %s10940_s23  ;;  %9278 = vmatmul.msk.bf16.gmra.mxu0 %vm1436_vm15, %v1399_v37  ;;  %v1014_v37 = vunpack.c.l.b16 %v850_v29  ;;  %v11723_v60 = vpop.permute.xlu2 %1287  ;;  %v1356_v52 = vsel %vm1110_vm13, %v10849_v15, %v11544_v62  ;;  %v10590_v29 = vld [vmem:[#allocation2 + $0xc4] sm:$0xff]  ;;  %v871_v63 = vor.u32 %v869_v14, %v868_v10  ;;  %v873_v34 = vrot.slane %v868_v10, 4  ;;  %v333_v10 = vld [vmem:[%s11060_s21 + $0xe0] sm:$0xff]  ;;  %v573_v51 = vld [vmem:[#allocation2 + $0xcc] sm:$0xf] }
  0xb3   : > { %v1081_v47 = vpop.permute.xlu1 %1080  ;;  %v11732_v25 = vpack.c.b16 %v1015_v57, %v1014_v37  ;;  %v877_v37 = vrot.slane %v875_v22, 7  ;;  %v1848_v57 = vrot.slane %v844_v18, 4  ;;  %v1401_v18 = vsel %vm1159_vm14, %v1356_v52, %v11645_v58 }
  0xb4   : > { %v1855_v52 = vor.u32 %v1854_v42, %v11757_v44 }
  0xb5   : > { %2046 = vrot.lane.b32.xlu0 %v11702_v12, %s10940_s23  ;;  %v1850_v13 = vor.u32 %v1849_v46, %v1848_v57  ;;  %v486_v46 = vpack.c.bf16 %v333_v10, %v333_v10 }
  0xb7   : > { %v2033_v36 = vpop.permute.xlu0 %2032  ;;  %1299 = vrot.lane.b32.xlu2 %v10589_v59, %s10939_s22  ;;  %v1163_v59 = vsel %vm1159_vm14, %v1116_v61, %v1081_v47  ;;  %v861_v47 = vshrl.u32 %v570_v32, 16  ;;  %v402_v61 = vsel %vm11041_vm2, 0, %v401_v35  ;;  %v11781_v32 = vld [vmem:[#allocation2 + $0xd4] sm:$0xf]  ;;  %518 = vst.msk [vmem:[#allocation2 + $0xf4] sm:$0xf] %vm343_vm6, %v486_v46 }
  0xb8   : > { %403 = vst [vmem:[#allocation2 + $0xe0] sm:$0x8] %v402_v61 }
  0xb9   : > { %2011 = vrot.lane.b32.xlu1 %v11624_v9, %s10939_s22  ;;  %v11771_v11 = vpop.permute.xlu2 %1051  ;;  %v9193_v30 = vrot.slane %v861_v47, 11  ;;  %v1856_v47 = vrot.slane %v1855_v52, 4 }
  0xbb   : > { %v1998_v17 = vpop.permute.xlu1 %1997 }
  0xbc   : > { %v2066_v53 = vsel %vm1110_vm13, %v1978_v50, %v1998_v17  ;;  %v1967_v50 = vunpack.c.l.b16 %v1847_v33  ;;  %v1858_v17 = vshll.u32 %v569_v20, 16  ;;  %v1851_v33 = vrot.slane %v1850_v13, 4  ;;  %v10591_v13 = vld [vmem:[#allocation2 + $0xd4] sm:$0xff] }
  0xbd   : > { %9298 = vmatmul.msk.bf16.gmra.mxu1 %vm1436_vm15, %v1163_v59  ;;  %v2113_v62 = vsel %vm1159_vm14, %v2066_v53, %v2033_v36  ;;  %1336 = vrot.lane.b32.xlu0 %v10590_v29, %s10940_s23  ;;  %v880_v36 = vor.u32 %v878_v2, %v877_v37  ;;  %v11783_v53 = vld [vmem:[#allocation2 + $0xd8] sm:$0xf]  ;;  %v872_v59 = vsel %vm11095_vm8, %v9193_v30, %v871_v63  ;;  %v334_v37 = vld [vmem:[%s11060_s21 + $0xe8] sm:$0xff] }
  0xbe   : > { %9319 = vmatmul.msk.bf16.vlgmr.msra.gmra.mxu2 %vm1436_vm15, %v2113_v62  ;;  %v11778_v58 = vpack.c.b16 %v1967_v50, %v1966_v3  ;;  %v888_v62 = vshrl.u32 %v11781_v32, 16  ;;  %v1860_v57 = vrot.slane %v1858_v17, 5  ;;  %v487_v35 = vpack.c.bf16 %v334_v37, %v334_v37  ;;  %v446_v3 = vld [vmem:[#allocation2 + $0xdc] sm:$0x1]  ;;  %v574_v50 = vld [vmem:[#allocation2 + $0xd0] sm:$0xf] }
  0xbf   : > { %v11765_v6 = vpop.permute.xlu0 %1322  ;;  %1063 = vrot.lane.b32.xlu2 %v11732_v25, %s10939_s22  ;;  %v881_v8 = vsel %vm11095_vm8, %v873_v34, %v880_v36  ;;  %v897_v42 = vshrl.u32 %v11783_v53, 16  ;;  %v1119_v20 = vsel %vm1110_vm13, %v11140_v41, %v11602_v26  ;;  %v447_v34 = vsel %vm11053_vm5, 0, %v446_v3 }
  0xc0   : > { %v1017_v63 = vunpack.c.l.b16 %v881_v8  ;;  %v890_v36 = vrot.slane %v888_v62, 7  ;;  %v891_v41 = vshll.u32 %v11781_v32, 16  ;;  %519 = vst.msk [vmem:[#allocation2 + $0xf8] sm:$0xf] %vm343_vm6, %v487_v35  ;;  %v1853_v52 = vsel %vm11157_vm11, %v1851_v33, %v11757_v44  ;;  %v10850_v33 = vld [vmem:[#allocation2 + $0x34] sm:$0xff] }
  0xc1   : > { %1096 = vrot.lane.b32.xlu1 %v11732_v25, %s10940_s23  ;;  %9279 = vmatmul.msk.bf16.gmra.mxu0 %vm1436_vm15, %v1401_v18  ;;  %v1016_v18 = vunpack.c.l.b16 %v872_v59  ;;  %v11800_v30 = vpop.permute.xlu2 %1289  ;;  %v883_v17 = vshrl.u32 %v574_v50, 16  ;;  %448 = vst [vmem:[#allocation2 + $0xdc] sm:$0x1] %v447_v34  ;;  %v899_v10 = vrot.slane %v897_v42, 7  ;;  %v900_v37 = vshll.u32 %v11783_v53, 16 }
  0xc2   : > { %v404_v35 = vld [vmem:[#allocation2 + $0xf0] sm:$0x8]  ;;  %v895_v50 = vrot.slane %v890_v36, 4 }
  0xc3   : > { %v1083_v15 = vpop.permute.xlu1 %1082  ;;  %v11823_v44 = vpack.c.b16 %v1017_v63, %v1016_v18  ;;  %v9194_v3 = vrot.slane %v883_v17, 11  ;;  %v11839_v18 = vrot.slane %v878_v2, 5  ;;  %v1868_v63 = vrot.slane %v875_v22, 4 }
  0xc4   : > { %v1165_v8 = vsel %vm1159_vm14, %v1119_v20, %v1083_v15  ;;  %v893_v15 = vor.u32 %v891_v41, %v890_v36  ;;  %v1862_v20 = vrot.slane %v866_v23, 4  ;;  %v405_v34 = vsel %vm11041_vm2, 0, %v404_v35  ;;  %v449_v35 = vld [vmem:[#allocation2 + $0xec] sm:$0x1] }
  0xc5   : > { %2048 = vrot.lane.b32.xlu0 %v11778_v58, %s10940_s23  ;;  %406 = vst [vmem:[#allocation2 + $0xf0] sm:$0x8] %v405_v34  ;;  %v1872_v17 = vshll.u32 %v573_v51, 16  ;;  %v578_v34 = vld [vmem:[#allocation2 + $0xe0] sm:$0xf]  ;;  %v10851_v51 = vld [vmem:[#allocation2 + $0x44] sm:$0xff] }
  0xc6   : > { %v894_v36 = vsel %vm11095_vm8, %v9194_v3, %v893_v15 }
  0xc7   : > { %v2035_v61 = vpop.permute.xlu0 %2034  ;;  %1301 = vrot.lane.b32.xlu2 %v10590_v29, %s10939_s22  ;;  %v1861_v29 = vsel %vm11157_vm11, %v1856_v47, %v1860_v57  ;;  %v1359_v47 = vsel %vm1110_vm13, %v10850_v33, %v11650_v38  ;;  %v902_v38 = vor.u32 %v900_v37, %v899_v10  ;;  %v11868_v10 = vld [vmem:[#allocation2 + $0xe8] sm:$0xf]  ;;  %v336_v33 = vld [vmem:[%s11060_s21 + $0xf8] sm:$0xff] }
  0xc8   : > { %v1969_v57 = vunpack.c.l.b16 %v1861_v29  ;;  %v1403_v54 = vsel %vm1159_vm14, %v1359_v47, %v11765_v6  ;;  %v1869_v29 = vor.u32 %v1868_v63, %v11839_v18  ;;  %v1122_v6 = vsel %vm1110_vm13, %v11171_v16, %v11697_v49 }
  0xc9   : > { %2013 = vrot.lane.b32.xlu1 %v11702_v12, %s10939_s22  ;;  %v489_v15 = vpack.c.bf16 %v336_v33, %v336_v33  ;;  %v919_v49 = vshrl.u32 %v11868_v10, 16  ;;  %v1877_v33 = vrot.slane %v891_v41, 5 }
  0xca   : > { %v1870_v3 = vrot.slane %v1869_v29, 4 }
  0xcb   : > { %v2000_v26 = vpop.permute.xlu1 %1999  ;;  %521 = vst.msk [vmem:[#allocation2 + $0x108] sm:$0xf] %vm343_vm6, %v489_v15 }
  0xcc   : > { %v2069_v59 = vsel %vm1110_vm13, %v11217_v43, %v2000_v26  ;;  %v1968_v43 = vunpack.c.l.b16 %v1853_v52  ;;  %v903_v52 = vsel %vm11095_vm8, %v895_v50, %v902_v38  ;;  %v1874_v50 = vrot.slane %v1872_v17, 5 }
  0xcd   : > { %9299 = vmatmul.msk.bf16.gmra.mxu1 %vm1436_vm15, %v1165_v8  ;;  %v2115_v46 = vsel %vm1159_vm14, %v2069_v59, %v2035_v61  ;;  %1338 = vrot.lane.b32.xlu0 %v10591_v13, %s10940_s23  ;;  %v1863_v61 = vrot.slane %v869_v14, 5  ;;  %v11849_v14 = vpop.permute.xlu2 %1053  ;;  %v11863_v59 = vld [vmem:[#allocation2 + $0xe4] sm:$0xf]  ;;  %v1018_v8 = vunpack.c.l.b16 %v894_v36  ;;  %v1019_v47 = vunpack.c.l.b16 %v903_v52 }
  0xce   : > { %9320 = vmatmul.msk.bf16.gmra.mxu2 %vm1436_vm15, %v2115_v46  ;;  %v11856_v2 = vpack.c.b16 %v1969_v57, %v1968_v43  ;;  %v335_v46 = vld [vmem:[%s11060_s21 + $0xf0] sm:$0xff]  ;;  %v450_v38 = vsel %vm11053_vm5, 0, %v449_v35  ;;  %s10943_s21 = smov 64  }
  0xcf   : > { %v11847_v23 = vpop.permute.xlu0 %1324  ;;  %1065 = vrot.lane.b32.xlu2 %v11823_v44, %s10939_s22  ;;  %v1864_v26 = vor.u32 %v1863_v61, %v1862_v20  ;;  %v488_v57 = vpack.c.bf16 %v335_v46, %v335_v46  ;;  %v910_v20 = vshrl.u32 %v11863_v59, 16  ;;  %v10592_v52 = vld [vmem:[#allocation2 + $0xe4] sm:$0xff]  ;;  %451 = vst [vmem:[#allocation2 + $0xec] sm:$0x1] %v450_v38  ;;  %v922_v46 = vshll.u32 %v11868_v10, 16 }
  0xd1   : > { %1098 = vrot.lane.b32.xlu1 %v11823_v44, %s10940_s23  ;;  %9280 = vmatmul.msk.bf16.gmra.mxu0 %vm1436_vm15, %v1403_v54  ;;  %v1865_v43 = vrot.slane %v1864_v26, 4  ;;  %520 = vst.msk [vmem:[#allocation2 + $0x104] sm:$0xf] %vm343_vm6, %v488_v57  ;;  %v1362_v54 = vsel %vm1110_vm13, %v10851_v51, %v11723_v60  ;;  %v11888_v26 = vpack.c.b16 %v1019_v47, %v1018_v8  ;;  %v912_v17 = vrot.slane %v910_v20, 7  ;;  %v407_v57 = vld [vmem:[#allocation2 + $0x100] sm:$0x8] }
  0xd2   : > { %v913_v60 = vshll.u32 %v11863_v59, 16  ;;  %v905_v8 = vshrl.u32 %v578_v34, 16  ;;  %v1880_v47 = vrot.slane %v900_v37, 5  ;;  %v1405_v37 = vsel %vm1159_vm14, %v1362_v54, %v11847_v23 }
  0xd3   : > { %v1085_v22 = vpop.permute.xlu1 %1084  ;;  %v917_v53 = vrot.slane %v912_v17, 4  ;;  %vm2384_vm6 = vcmask 253952  }
  0xd4   : > { %v1167_v63 = vsel %vm1159_vm14, %v1122_v6, %v1085_v22  ;;  %v1875_v22 = vsel %vm11157_vm11, %v1870_v3, %v1874_v50  ;;  %v577_v3 = vld [vmem:[#allocation2 + $0xdc] sm:$0xf]  ;;  %v915_v50 = vor.u32 %v913_v60, %v912_v17  ;;  %v9195_v41 = vrot.slane %v905_v8, 11  ;;  %v11938_v17 = vld [vmem:[#allocation2 + $0xf4] sm:$0xf]  ;;  %vm12212_vm9 = vmand %vm2384_vm6, %vm347_vm3 }
  0xd5   : > { %2050 = vrot.lane.b32.xlu0 %v11856_v2, %s10940_s23  ;;  %v11878_v61 = vpop.permute.xlu2 %1291  ;;  %v1971_v35 = vunpack.c.l.b16 %v1875_v22  ;;  %v1886_v34 = vshll.u32 %v577_v3, 16  ;;  %v11945_v8 = vld [vmem:[#allocation2 + $0xf8] sm:$0xf]  ;;  %vm5173_vm6 = vcmask 1044484  }
  0xd6   : > { %v941_v3 = vshrl.u32 %v11945_v8, 16 }
  0xd7   : > { %v2037_v16 = vpop.permute.xlu0 %2036  ;;  %1303 = vrot.lane.b32.xlu2 %v10591_v13, %s10939_s22  ;;  %v1867_v13 = vsel %vm11157_vm11, %v1865_v43, %v11839_v18  ;;  %v921_v18 = vrot.slane %v919_v49, 7  ;;  %v1882_v43 = vrot.slane %v897_v42, 4  ;;  %v1888_v22 = vrot.slane %v1886_v34, 5 }
  0xd8   : > { %v1970_v15 = vunpack.c.l.b16 %v1867_v13  ;;  %v916_v13 = vsel %vm11095_vm8, %v9195_v41, %v915_v50  ;;  %v10593_v41 = vld [vmem:[#allocation2 + $0xf4] sm:$0xff] }
  0xd9   : > { %2015 = vrot.lane.b32.xlu1 %v11778_v58, %s10939_s22  ;;  %v924_v42 = vor.u32 %v922_v46, %v921_v18  ;;  %v452_v18 = vld [vmem:[#allocation2 + $0xfc] sm:$0x1] }
  0xdb   : > { %v2002_v36 = vpop.permute.xlu1 %2001  ;;  %v925_v23 = vsel %vm11095_vm8, %v917_v53, %v924_v42  ;;  %v582_v53 = vld [vmem:[#allocation2 + $0xf0] sm:$0xf]  ;;  %v10852_v42 = vld [vmem:[#allocation2 + $0x54] sm:$0xff] }
  0xdc   : > { %v2072_v29 = vsel %vm1110_vm13, %v11213_v1, %v2002_v36  ;;  %v1876_v1 = vrot.slane %v888_v62, 4  ;;  %v408_v62 = vsel %vm11041_vm2, 0, %v407_v57  ;;  %v11931_v36 = vpack.c.b16 %v1971_v35, %v1970_v15 }
  0xdd   : > { %9300 = vmatmul.msk.bf16.gmra.mxu1 %vm1436_vm15, %v1167_v63  ;;  %v2117_v6 = vsel %vm1159_vm14, %v2072_v29, %v2037_v16  ;;  %1340 = vrot.lane.b32.xlu0 %v10592_v52, %s10940_s23  ;;  %v11927_v16 = vpop.permute.xlu2 %1055  ;;  %409 = vst [vmem:[#allocation2 + $0x100] sm:$0x8] %v408_v62  ;;  %v1883_v63 = vor.u32 %v1882_v43, %v1880_v47  ;;  %v932_v57 = vshrl.u32 %v11938_v17, 16 }
  0xde   : > { %9321 = vmatmul.msk.bf16.gmra.mxu2 %vm1436_vm15, %v2117_v6  ;;  %v1878_v38 = vor.u32 %v1877_v33, %v1876_v1  ;;  %v1125_v6 = vsel %vm1110_vm13, %v11235_v5, %v11771_v11  ;;  %v1020_v1 = vunpack.c.l.b16 %v916_v13  ;;  %v1021_v33 = vunpack.c.l.b16 %v925_v23 }
  0xdf   : > { %v11921_v32 = vpop.permute.xlu0 %1326  ;;  %1067 = vrot.lane.b32.xlu2 %v11888_v26, %s10939_s22  ;;  %v1884_v29 = vrot.slane %v1883_v63, 4  ;;  %v453_v5 = vsel %vm11053_vm5, 0, %v452_v18  ;;  %v927_v13 = vshrl.u32 %v582_v53, 16  ;;  %v935_v23 = vshll.u32 %v11938_v17, 16  ;;  %v353_v18 = vld [vmem:[#allocation2 + $0x110] sm:$0x8] }
  0xe0   : > { %v1879_v54 = vrot.slane %v1878_v38, 4  ;;  %454 = vst [vmem:[#allocation2 + $0xfc] sm:$0x1] %v453_v5  ;;  %v11965_v38 = vpack.c.b16 %v1021_v33, %v1020_v1  ;;  %v581_v1 = vld [vmem:[#allocation2 + $0xec] sm:$0xf]  ;;  %v354_v33 = vsel %vm11041_vm2, 0, %v353_v18 }
  0xe1   : > { %1100 = vrot.lane.b32.xlu1 %v11888_v26, %s10940_s23  ;;  %9281 = vmatmul.msk.bf16.gmra.mxu0 %vm1436_vm15, %v1405_v37  ;;  %v1889_v35 = vsel %vm11157_vm11, %v1884_v29, %v1888_v22  ;;  %v1891_v29 = vrot.slane %v913_v60, 5  ;;  %v1894_v22 = vrot.slane %v922_v46, 5  ;;  %355 = vst [vmem:[#allocation2 + $0x110] sm:$0x8] %v354_v33  ;;  %v9196_v10 = vrot.slane %v927_v13, 11 }
  0xe2   : > { %v1881_v11 = vsel %vm11157_vm11, %v1879_v54, %v1880_v47  ;;  %v1973_v34 = vunpack.c.l.b16 %v1889_v35  ;;  %v1890_v54 = vrot.slane %v910_v20, 4  ;;  %vm2381_vm2 = vcmask 257024  }
  0xe3   : > { %v1087_v51 = vpop.permute.xlu1 %1086  ;;  %v1972_v63 = vunpack.c.l.b16 %v1881_v11 }
  0xe4   : > { %v1169_v50 = vsel %vm1159_vm14, %v1125_v6, %v1087_v51  ;;  %v934_v51 = vrot.slane %v932_v57, 7  ;;  %v1896_v6 = vrot.slane %v919_v49, 4  ;;  %v1892_v11 = vor.u32 %v1891_v29, %v1890_v54  ;;  %v586_v13 = vld [vmem:[#allocation2 + $0x100] sm:$0xf] }
  0xe5   : > { %2052 = vrot.lane.b32.xlu0 %v11931_v36, %s10940_s23  ;;  %v11950_v15 = vpop.permute.xlu2 %1293  ;;  %v12001_v5 = vpack.c.b16 %v1973_v34, %v1972_v63 }
  0xe6   : > { %v937_v49 = vor.u32 %v935_v23, %v934_v51  ;;  %v939_v0 = vrot.slane %v934_v51, 4  ;;  %v1897_v35 = vor.u32 %v1896_v6, %v1894_v22  ;;  %v455_v51 = vld [vmem:[#allocation2 + $0x10c] sm:$0x1] }
  0xe7   : > { %v2039_v43 = vpop.permute.xlu0 %2038  ;;  %1305 = vrot.lane.b32.xlu2 %v10592_v52, %s10939_s22  ;;  %v1365_v52 = vsel %vm1110_vm13, %v10852_v42, %v11800_v30  ;;  %v943_v30 = vrot.slane %v941_v3, 7  ;;  %v456_v54 = vsel %vm11053_vm5, 0, %v455_v51 }
  0xe8   : > { %v1407_v59 = vsel %vm1159_vm14, %v1365_v52, %v11921_v32  ;;  %v1900_v32 = vshll.u32 %v581_v1, 16  ;;  %v938_v53 = vsel %vm11095_vm8, %v9196_v10, %v937_v49  ;;  %v1898_v63 = vrot.slane %v1897_v35, 4  ;;  %457 = vst [vmem:[#allocation2 + $0x10c] sm:$0x1] %v456_v54  ;;  %v10594_v10 = vld [vmem:[#allocation2 + $0x104] sm:$0xff] }
  0xe9   : > { %2017 = vrot.lane.b32.xlu1 %v11856_v2, %s10939_s22  ;;  %v1022_v6 = vunpack.c.l.b16 %v938_v53  ;;  %v1910_v54 = vrot.slane %v941_v3, 4 }
  0xea   : > { %v1902_v34 = vrot.slane %v1900_v32, 5  ;;  %v10853_v32 = vld [vmem:[#allocation2 + $0x64] sm:$0xff] }
  0xeb   : > { %v2004_v62 = vpop.permute.xlu1 %2003 }
  0xec   : > { %v2075_v37 = vsel %vm1110_vm13, %v11270_v21, %v2004_v62  ;;  %v944_v21 = vshll.u32 %v11945_v8, 16  ;;  %v12006_v62 = vld [vmem:[#allocation2 + $0x108] sm:$0xf] }
  0xed   : > { %v2119_v47 = vsel %vm1159_vm14, %v2075_v37, %v2039_v43  ;;  %9301 = vmatmul.msk.bf16.gmra.mxu1 %vm1436_vm15, %v1169_v50  ;;  %1342 = vrot.lane.b32.xlu0 %v10593_v41, %s10940_s23  ;;  %v11993_v20 = vpop.permute.xlu2 %1057  ;;  %v12003_v50 = vld [vmem:[#allocation2 + $0x104] sm:$0xf]  ;;  %v1128_v37 = vsel %vm1110_vm13, %v11297_v4, %v11849_v14  ;;  %v966_v35 = vshll.u32 %v12006_v62, 16 }
  0xee   : > { %9322 = vmatmul.msk.bf16.gmra.mxu2 %vm1436_vm15, %v2119_v47  ;;  %v946_v60 = vor.u32 %v944_v21, %v943_v30  ;;  %v954_v52 = vshrl.u32 %v12003_v50, 16  ;;  %v1893_v47 = vrot.slane %v1892_v11, 4  ;;  %v963_v30 = vshrl.u32 %v12006_v62, 16 }
  0xef   : > { %v11989_v43 = vpop.permute.xlu0 %1328  ;;  %1069 = vrot.lane.b32.xlu2 %v11965_v38, %s10939_s22  ;;  %v957_v1 = vshll.u32 %v12003_v50, 16  ;;  %v1134_v62 = vsel %vm1110_vm13, %v11416_v19, %v11993_v20 }
  0xf0   : > { %v947_v42 = vsel %vm11095_vm8, %v939_v0, %v946_v60  ;;  %v956_v14 = vrot.slane %v954_v52, 7  ;;  %v1895_v49 = vsel %vm11157_vm11, %v1893_v47, %v1894_v22  ;;  %v1903_v0 = vsel %vm11157_vm11, %v1898_v63, %v1902_v34 }
  0xf1   : > { %1102 = vrot.lane.b32.xlu1 %v11965_v38, %s10940_s23  ;;  %9282 = vmatmul.msk.bf16.gmra.mxu0 %vm1436_vm15, %v1407_v59  ;;  %v1023_v18 = vunpack.c.l.b16 %v947_v42  ;;  %v949_v60 = vshrl.u32 %v586_v13, 16  ;;  %v965_v11 = vrot.slane %v963_v30, 7  ;;  %v1974_v22 = vunpack.c.l.b16 %v1895_v49 }
  0xf2   : > { %v961_v63 = vrot.slane %v956_v14, 4  ;;  %v1905_v34 = vrot.slane %v935_v23, 5  ;;  %v1908_v13 = vrot.slane %v944_v21, 5  ;;  %v1131_v49 = vsel %vm1110_vm13, %v11349_v55, %v11927_v16  ;;  %v10854_v16 = vld [vmem:[#allocation2 + $0x74] sm:$0xff] }
  0xf3   : > { %v1089_v46 = vpop.permute.xlu1 %1088  ;;  %v12042_v42 = vpack.c.b16 %v1023_v18, %v1022_v6  ;;  %v9197_v47 = vrot.slane %v949_v60, 11  ;;  %v968_v51 = vor.u32 %v966_v35, %v965_v11 }
  0xf4   : > { %v1171_v33 = vsel %vm1159_vm14, %v1128_v37, %v1089_v46  ;;  %v1368_v46 = vsel %vm1110_vm13, %v10853_v32, %v11878_v61  ;;  %v1975_v37 = vunpack.c.l.b16 %v1903_v0  ;;  %v1904_v61 = vrot.slane %v932_v57, 4  ;;  %v585_v57 = vld [vmem:[#allocation2 + $0xfc] sm:$0xf] }
  0xf5   : > { %2054 = vrot.lane.b32.xlu0 %v12001_v5, %s10940_s23  ;;  %v12023_v4 = vpop.permute.xlu2 %1295  ;;  %v969_v3 = vsel %vm11095_vm8, %v961_v63, %v968_v51 }
  0xf6   : > { %v12067_v23 = vpack.c.b16 %v1975_v37, %v1974_v22  ;;  %v1906_v21 = vor.u32 %v1905_v34, %v1904_v61  ;;  %v1041_v60 = vunpack.c.l.b16 %v969_v3  ;;  %v590_v22 = vld [vmem:[#allocation2 + $0x110] sm:$0xf]  ;;  %v10595_v61 = vld [vmem:[#allocation2 + $0x114] sm:$0xff] }
  0xf7   : > { %v2041_v29 = vpop.permute.xlu0 %2040  ;;  %1307 = vrot.lane.b32.xlu2 %v10593_v41, %s10939_s22 }
  0xf9   : > { %2019 = vrot.lane.b32.xlu1 %v11931_v36, %s10939_s22 }
  0xfb   : > { %v2006_v59 = vpop.permute.xlu1 %2005 }
  0xfc   : > { %v2078_v41 = vsel %vm1110_vm13, %v11320_v28, %v2006_v59  ;;  %v959_v28 = vor.u32 %v957_v1, %v956_v14  ;;  %v1914_v14 = vshll.u32 %v585_v57, 16  ;;  %v12076_v59 = vld [vmem:[#allocation2 + $0x118] sm:$0xf] }
  0xfd   : > { %v2121_v53 = vsel %vm1159_vm14, %v2078_v41, %v2041_v29  ;;  %9302 = vmatmul.msk.bf16.gmra.mxu1 %vm1436_vm15, %v1171_v33  ;;  %1344 = vrot.lane.b32.xlu0 %v10594_v10, %s10940_s23  ;;  %v1409_v29 = vsel %vm1159_vm14, %v1368_v46, %v11989_v43  ;;  %v12063_v18 = vpop.permute.xlu2 %1059  ;;  %v1911_v43 = vor.u32 %v1910_v54, %v1908_v13  ;;  %v12074_v33 = vld [vmem:[#allocation2 + $0x114] sm:$0xf]  ;;  %v1907_v41 = vrot.slane %v1906_v21, 4 }
  0xfe   : > { %9323 = vmatmul.msk.bf16.gmra.mxu2 %vm1436_vm15, %v2121_v53  ;;  %v960_v8 = vsel %vm11095_vm8, %v9197_v47, %v959_v28  ;;  %v1916_v32 = vrot.slane %v1914_v14, 5  ;;  %v976_v46 = vshrl.u32 %v12074_v33, 16  ;;  %v985_v37 = vshrl.u32 %v12076_v59, 16 }
  0xff   : > { %v1331_v6 = vpop.permute.xlu0 %1330  ;;  %1071 = vrot.lane.b32.xlu2 %v12042_v42, %s10939_s22  ;;  %v1040_v0 = vunpack.c.l.b16 %v960_v8  ;;  %v1912_v11 = vrot.slane %v1911_v43, 4  ;;  %v1371_v28 = vsel %vm1110_vm13, %v10854_v16, %v11950_v15  ;;  %v1909_v34 = vsel %vm11157_vm11, %v1907_v41, %v1908_v13 }
 0x100   : > { %v978_v57 = vrot.slane %v976_v46, 7  ;;  %v987_v21 = vrot.slane %v985_v37, 7  ;;  %v988_v13 = vshll.u32 %v12076_v59, 16  ;;  %v1411_v3 = vsel %vm1159_vm14, %v1371_v28, %v1331_v6 }
 0x101   : > { %1104 = vrot.lane.b32.xlu1 %v12042_v42, %s10940_s23  ;;  %9283 = vmatmul.msk.bf16.gmra.mxu0 %vm1436_vm15, %v1409_v29  ;;  %v1042_v63 = vpack.c.b16 %v1041_v60, %v1040_v0  ;;  %v971_v29 = vshrl.u32 %v590_v22, 16  ;;  %v1918_v41 = vrot.slane %v954_v52, 4  ;;  %v1922_v6 = vrot.slane %v966_v35, 5 }
 0x102   : > { %v983_v0 = vrot.slane %v978_v57, 4  ;;  %v990_v60 = vor.u32 %v988_v13, %v987_v21 }
 0x103   : > { %v1091_v17 = vpop.permute.xlu1 %1090  ;;  %v9198_v14 = vrot.slane %v971_v29, 11 }
 0x104   : > { %v1173_v55 = vsel %vm1159_vm14, %v1131_v49, %v1091_v17  ;;  %v979_v17 = vshll.u32 %v12074_v33, 16  ;;  %v991_v50 = vsel %vm11095_vm8, %v983_v0, %v990_v60 }
 0x105   : > { %2056 = vrot.lane.b32.xlu0 %v12067_v23, %s10940_s23  ;;  %v12093_v51 = vpop.permute.xlu2 %1297 }
 0x106   : > { %v981_v49 = vor.u32 %v979_v17, %v978_v57  ;;  %v10622_v57 = vld [vmem:[%s15439_s2 + $0x28] sm:$0xff] }
 0x107   : > { %v2043_v53 = vpop.permute.xlu0 %2042  ;;  %1309 = vrot.lane.b32.xlu2 %v10594_v10, %s10939_s22  ;;  %v1917_v10 = vsel %vm11157_vm11, %v1912_v11, %v1916_v32  ;;  %v1919_v11 = vrot.slane %v957_v1, 5  ;;  %v1924_v32 = vrot.slane %v963_v30, 4  ;;  %3714 = vmatpush.bf16.msrb.mxu0 %v10622_v57 }
 0x108   : > { %v1977_v8 = vunpack.c.l.b16 %v1917_v10  ;;  %v982_v52 = vsel %vm11095_vm8, %v9198_v14, %v981_v49  ;;  %v10634_v14 = vld [vmem:[%s15439_s2 + $0x88] sm:$0xff] }
 0x109   : > { %2021 = vrot.lane.b32.xlu1 %v12001_v5, %s10939_s22  ;;  %v1920_v1 = vor.u32 %v1919_v11, %v1918_v41  ;;  %v1925_v28 = vor.u32 %v1924_v32, %v1922_v6  ;;  %4334 = vmatpush.bf16.msrb.mxu1 %v10634_v14 }
 0x10b   : > { %v2008_v47 = vpop.permute.xlu1 %2007 }
 0x10c   : > { %v2081_v54 = vsel %vm1110_vm13, %v11374_v27, %v2008_v47  ;;  %v1976_v27 = vunpack.c.l.b16 %v1909_v34  ;;  %v1075_v47 = vunpack.c.l.b16 %v982_v52  ;;  %v1926_v34 = vrot.slane %v1925_v28, 4 }
 0x10d   : > { %v2123_v15 = vsel %vm1159_vm14, %v2081_v54, %v2043_v53  ;;  %9303 = vmatmul.msk.bf16.gmra.mxu1 %vm1436_vm15, %v1173_v55  ;;  %1346 = vrot.lane.b32.xlu0 %v10595_v61, %s10940_s23  ;;  %v589_v55 = vld [vmem:[#allocation2 + $0x10c] sm:$0xf]  ;;  %v12127_v16 = vpop.permute.xlu2 %1061  ;;  %v1921_v61 = vrot.slane %v1920_v1, 4  ;;  %v15473_v52 = vmov 0  ;;  %v2399_v1 = vld [vmem:[#allocation3 + $0x10] sm:$0x8] }
 0x10e   : > { %9324 = vmatmul.msk.bf16.gmra.mxu2 %vm1436_vm15, %v2123_v15  ;;  %v12124_v22 = vpack.c.b16 %v1977_v8, %v1976_v27  ;;  %v1928_v35 = vshll.u32 %v589_v55, 16  ;;  %v10855_v27 = vld [vmem:[#allocation2 + $0x84] sm:$0xff]  ;;  %v15472_v55 = vmov 0   ;;  %v15474_v52 = vsel %vm12177_vm4, 4294967295, %v15473_v52 }
 0x10f   : > { %v1333_v43 = vpop.permute.xlu0 %1332  ;;  %1073 = vrot.lane.b32.xlu2 %v1042_v63, %s10939_s22  ;;  %v1374_v8 = vsel %vm1110_vm13, %v10855_v27, %v12023_v4  ;;  %2382 = vst.msk [vmem:[#allocation3 + $0x4] sm:$0xf] %vm2381_vm2, %v15472_v55 }
 0x110   : > { %v1930_v54 = vrot.slane %v1928_v35, 5  ;;  %v1413_v41 = vsel %vm1159_vm14, %v1374_v8, %v1333_v43  ;;  %15475 = vst [vmem:[#allocation13_spill] sm:$0xff] %v15474_v52  ;;  %v2400_v35 = vsel %vm12177_vm4, 0, %v2399_v1 }
 0x111   : > { %1106 = vrot.lane.b32.xlu1 %v1042_v63, %s10940_s23  ;;  %9284 = vmatmul.msk.bf16.gmra.mxu0 %vm1436_vm15, %v1411_v3  ;;  %v1076_v63 = vunpack.c.l.b16 %v991_v50  ;;  %2383 = vst.msk [vmem:[#allocation3 + $0x8] sm:$0xf] %vm2381_vm2, %v15472_v55 }
 0x112   : > { %v1931_v3 = vsel %vm11157_vm11, %v1926_v34, %v1930_v54  ;;  %2393 = vst.msk [vmem:[#allocation3 + $0x114] sm:$0xf] %vm2381_vm2, %v15472_v55 }
 0x113   : > { %v1093_v53 = vpop.permute.xlu1 %1092  ;;  %v1077_v21 = vpack.c.b16 %v1076_v63, %v1075_v47  ;;  %v1995_v60 = vunpack.c.l.b16 %v1931_v3  ;;  %2394 = vst.msk [vmem:[#allocation3 + $0x118] sm:$0xf] %vm2381_vm2, %v15472_v55  ;;  %v10856_v47 = vld [vmem:[#allocation2 + $0x94] sm:$0xff] }
 0x114   : > { %v1175_v10 = vsel %vm1159_vm14, %v1134_v62, %v1093_v53  ;;  %v1137_v53 = vsel %vm1110_vm13, %v11483_v39, %v12063_v18  ;;  %4910 = vst.msk [vmem:[#allocation4 + $0x4] sm:$0xf] %vm2381_vm2, %v15472_v55  ;;  %v1377_v63 = vsel %vm1110_vm13, %v10856_v47, %v12093_v51  ;;  %v2447_v51 = vld [vmem:[#allocation3 + $0x1c] sm:$0x1] }
 0x115   : > { %2058 = vrot.lane.b32.xlu0 %v12124_v22, %s10940_s23  ;;  %v12145_v20 = vpop.permute.xlu2 %1299  ;;  %4918 = vst.msk [vmem:[#allocation4 + $0x70] sm:$0xf] %vm2381_vm2, %v15472_v55  ;;  %v2448_v57 = vsel %vm12212_vm9, 0, %v2447_v51 }
 0x116   : > { %2401 = vst [vmem:[#allocation3 + $0x10] sm:$0x8] %v2400_v35 }
 0x117   : > { %v2045_v30 = vpop.permute.xlu0 %2044  ;;  %2025 = vrot.lane.b32.xlu2 %v12124_v22, %s10939_s22  ;;  %2449 = vst [vmem:[#allocation3 + $0x1c] sm:$0x1] %v2448_v57 }
 0x119   : > { %2023 = vrot.lane.b32.xlu1 %v12067_v23, %s10939_s22 }
 0x11b   : > { %v2010_v29 = vpop.permute.xlu1 %2009 }
 0x11c   : > { %v2084_v19 = vsel %vm1110_vm13, %v11443_v31, %v2010_v29  ;;  %v1923_v31 = vsel %vm11157_vm11, %v1921_v61, %v1922_v6 }
 0x11d   : > { %v2125_v15 = vsel %vm1159_vm14, %v2084_v19, %v2045_v30  ;;  %9304 = vmatmul.msk.bf16.gmra.mxu1 %vm1436_vm15, %v1175_v10  ;;  %v1994_v4 = vunpack.c.l.b16 %v1923_v31  ;;  %v12169_v32 = vpop.permute.xlu2 %1063  ;;  %v15476_v19 = vmov 0 }
 0x11e   : > { %9325 = vmatmul.msk.bf16.gmra.mxu2 %vm1436_vm15, %v2125_v15  ;;  %v12162_v49 = vpop.f32.mrf.mxu0  ;;  %v15477_v19 = vsel %vm12212_vm9, 4294967295, %v15476_v19  ;;  %v1140_v15 = vsel %vm1110_vm13, %v11581_v40, %v12127_v16  ;;  %v10857_v40 = vld [vmem:[#allocation2 + $0xa4] sm:$0xff] }
 0x11f   : > { %v1335_v0 = vpop.permute.xlu0 %1334  ;;  %v12167_v6 = vpack.c.b16 %v1995_v60, %v1994_v4  ;;  %15478 = vst [vmem:[#allocation14_spill] sm:$0xff] %v15477_v19  ;;  %v1380_v16 = vsel %vm1110_vm13, %v10857_v40, %v12145_v20 }
 0x121   : > { %1108 = vrot.lane.b32.xlu1 %v1077_v21, %s10940_s23  ;;  %9285 = vmatmul.msk.bf16.gmra.mxu0 %vm1436_vm15, %v1413_v41 }
 0x123   : > { %v1095_v11 = vpop.permute.xlu1 %1094 }
 0x124   : > { %v1177_v18 = vsel %vm1159_vm14, %v1137_v53, %v1095_v11 }
 0x125   : > { %v12207_v34 = vpop.permute.xlu2 %1301 }
 0x126   : > { %v12181_v43 = vpop.f32.mrf.mxu0 }
 0x127   : > { %v2047_v50 = vpop.permute.xlu0 %2046 }
 0x129   : > { %2060 = vrot.lane.b32.xlu1 %v12167_v6, %s10940_s23 }
 0x12a   : > { %v1611_v39 = vpop.f32.mrf.mxu1 }
 0x12b   : > { %v2012_v28 = vpop.permute.xlu1 %2011  ;;  %v1612_v11 = vadd.f32 %v1611_v39, %v12162_v49  ;;  %v2450_v49 = vld [vmem:[#allocation3 + $0x2c] sm:$0x1] }
 0x12c   : > { %v2087_v62 = vsel %vm1110_vm13, %v11524_v45, %v2012_v28  ;;  %v1415_v45 = vsel %vm1159_vm14, %v1377_v63, %v1335_v0  ;;  %v2402_v0 = vld [vmem:[#allocation3 + $0x20] sm:$0x8]  ;;  %v2451_v47 = vsel %vm12212_vm9, 0, %v2450_v49  ;;  %v1143_v63 = vsel %vm1110_vm13, %v11669_v24, %v12169_v32  ;;  %v2405_v32 = vld [vmem:[#allocation3 + $0x30] sm:$0x8] }
 0x12d   : > { %v2127_v30 = vsel %vm1159_vm14, %v2087_v62, %v2047_v50  ;;  %9305 = vmatmul.msk.bf16.gmra.mxu1 %vm1436_vm15, %v1177_v18  ;;  %v12224_v3 = vpop.permute.xlu2 %1065  ;;  %v2403_v60 = vsel %vm12177_vm4, 0, %v2402_v0  ;;  %2452 = vst [vmem:[#allocation3 + $0x2c] sm:$0x1] %v2451_v47  ;;  %v2406_v0 = vsel %vm12177_vm4, 0, %v2405_v32 }
 0x12e   : > { %9326 = vmatmul.msk.bf16.gmra.mxu2 %vm1436_vm15, %v2127_v30  ;;  %v12205_v61 = vpop.f32.mrf.mxu0  ;;  %2404 = vst [vmem:[#allocation3 + $0x20] sm:$0x8] %v2403_v60 }
 0x12f   : > { %v1337_v54 = vpop.permute.xlu0 %1336  ;;  %2407 = vst [vmem:[#allocation3 + $0x30] sm:$0x8] %v2406_v0  ;;  %v2566_v0 = vld [vmem:[#allocation3 + $0x1c] sm:$0xf] }
 0x130   : > { %v1417_v1 = vsel %vm1159_vm14, %v1380_v16, %v1337_v54 }
 0x131   : > { %9286 = vmatmul.msk.bf16.gmra.mxu0 %vm1436_vm15, %v1415_v45 }
 0x132   : > { %v1613_v10 = vpop.f32.mrf.mxu1 }
 0x133   : > { %v1097_v29 = vpop.permute.xlu1 %1096  ;;  %v1614_v54 = vadd.f32 %v1613_v10, %v12181_v43 }
 0x134   : > { %v1179_v31 = vsel %vm1159_vm14, %v1140_v15, %v1097_v29 }
 0x135   : > { %v12246_v30 = vpop.permute.xlu2 %1303 }
 0x136   : > { %v12221_v21 = vpop.f32.mrf.mxu0 }
 0x137   : > { %v2049_v27 = vpop.permute.xlu0 %2048 }
 0x13a   : > { %v1616_v8 = vpop.f32.mrf.mxu1 }
 0x13b   : > { %v2014_v14 = vpop.permute.xlu1 %2013  ;;  %v1617_v40 = vadd.f32 %v1616_v8, %v12205_v61  ;;  %v10633_v61 = vld [vmem:[%s15439_s2 + $0x80] sm:$0xff] }
 0x13c   : > { %v2090_v4 = vsel %vm1110_vm13, %v11624_v9, %v2014_v14  ;;  %v12241_v9 = vld [vmem:[%s15444_s7] ss:$0 sm:$0xff]  ;;  %4335 = vmatpush.bf16.msrb.mxu1 %v10633_v61  ;;  %v358_v61 = vld [vmem:[#allocation2 + $0x11c] sm:$0x1] }
 0x13d   : > { %v2129_v41 = vsel %vm1159_vm14, %v2090_v4, %v2049_v27  ;;  %9306 = vmatmul.msk.bf16.gmra.mxu1 %vm1436_vm15, %v1179_v31  ;;  %v10621_v14 = vld [vmem:[%s15439_s2 + $0x20] sm:$0xff] }
 0x13e   : > { %9327 = vmatmul.msk.bf16.gmra.mxu2 %vm1436_vm15, %v2129_v41  ;;  %v12236_v53 = vpop.f32.mrf.mxu0  ;;  %3715 = vmatpush.bf16.msrb.mxu0 %v10621_v14  ;;  %v12271_v41 = vpop.permute.xlu2 %1067 }
 0x13f   : > { %v1339_v18 = vpop.permute.xlu0 %1338 }
 0x141   : > { %v2196_v50 = vpop.f32.mrf.mxu2  ;;  %9287 = vmatmul.msk.bf16.gmra.mxu0 %vm1436_vm15, %v1417_v1 }
 0x142   : > { %v2276_v28 = vadd.f32 %v2196_v50, %v1612_v11  ;;  %v1618_v35 = vpop.f32.mrf.mxu1  ;;  %v10858_v11 = vld [vmem:[#allocation2 + $0xb4] sm:$0xff] }
 0x143   : > { %v1099_v62 = vpop.permute.xlu1 %1098 }
 0x144   : > { %v2312_v20 = vadd.f32 %v12241_v9, %v2276_v28  ;;  %v1181_v31 = vsel %vm1159_vm14, %v1143_v63, %v1099_v62 }
 0x146   : > { %v2344_v39 = vmax.f32 %v2312_v20, 0.0  ;;  %v12254_v29 = vpop.f32.mrf.mxu0 }
 0x147   : > { %v2051_v57 = vpop.permute.xlu0 %2050 }
 0x148   : > { %v2495_v45 = vpack.c.bf16 %v2344_v39, %v2344_v39  ;;  %v2563_v39 = vld [vmem:[#allocation3 + $0x10] sm:$0xf] }
 0x149   : > { %v2198_v51 = vpop.f32.mrf.mxu2 }
 0x14a   : > { %2527 = vst.msk [vmem:[#allocation3 + $0x14] sm:$0xf] %vm2381_vm2, %v2495_v45  ;;  %v2277_v15 = vadd.f32 %v2198_v51, %v1614_v54  ;;  %v12257_v27 = vpop.f32.mrf.mxu1  ;;  %v2654_v45 = vshrl.u32 %v2563_v39, 16  ;;  %v2453_v51 = vld [vmem:[#allocation3 + $0x3c] sm:$0x1] }
 0x14b   : > { %v2016_v24 = vpop.permute.xlu1 %2015  ;;  %v2454_v32 = vsel %vm12212_vm9, 0, %v2453_v51  ;;  %v1622_v7 = vadd.f32 %v12257_v27, %v12236_v53  ;;  %v2567_v53 = vld [vmem:[#allocation3 + $0x20] sm:$0xf] }
 0x14c   : > { %v2313_v43 = vadd.f32 %v12241_v9, %v2277_v15  ;;  %v2093_v10 = vsel %vm1110_vm13, %v11702_v12, %v2016_v24  ;;  %v1383_v12 = vsel %vm1110_vm13, %v10858_v11, %v12207_v34  ;;  %v1146_v15 = vsel %vm1110_vm13, %v11732_v25, %v12224_v3  ;;  %2455 = vst [vmem:[#allocation3 + $0x3c] sm:$0x1] %v2454_v32 }
 0x14d   : > { %v2131_v4 = vsel %vm1159_vm14, %v2093_v10, %v2051_v57  ;;  %9307 = vmatmul.msk.bf16.gmra.mxu1 %vm1436_vm15, %v1181_v31  ;;  %v1419_v34 = vsel %vm1159_vm14, %v1383_v12, %v1339_v18  ;;  %v1619_v18 = vadd.f32 %v1618_v35, %v12221_v21  ;;  %v9336_v25 = vrot.slane %v2654_v45, 11 }
 0x14e   : > { %v2345_v60 = vmax.f32 %v2313_v43, 0.0  ;;  %9328 = vmatmul.msk.bf16.gmra.mxu2 %vm1436_vm15, %v2131_v4  ;;  %v12276_v50 = vpop.f32.mrf.mxu0  ;;  %v12297_v4 = vpop.permute.xlu2 %1305 }
 0x14f   : > { %v12278_v28 = vpop.permute.xlu0 %1340 }
 0x150   : > { %v2496_v16 = vpack.c.bf16 %v2345_v60, %v2345_v60 }
 0x151   : > { %v2201_v1 = vpop.f32.mrf.mxu2  ;;  %v2564_v62 = vld [vmem:[#allocation3 + $0x14] sm:$0xf]  ;;  %9288 = vmatmul.msk.bf16.gmra.mxu0 %vm1436_vm15, %v1419_v34  ;;  %v2408_v34 = vld [vmem:[#allocation3 + $0x40] sm:$0x8] }
 0x152   : > { %2528 = vst.msk [vmem:[#allocation3 + $0x18] sm:$0xf] %vm2381_vm2, %v2496_v16  ;;  %v2278_v20 = vadd.f32 %v2201_v1, %v1617_v40  ;;  %v12281_v49 = vpop.f32.mrf.mxu1  ;;  %v2659_v47 = vshrl.u32 %v2564_v62, 16  ;;  %v2662_v63 = vshll.u32 %v2564_v62, 16 }
 0x153   : > { %v1101_v8 = vpop.permute.xlu1 %1100 }
 0x154   : > { %v2314_v54 = vadd.f32 %v12241_v9, %v2278_v20  ;;  %v2661_v31 = vrot.slane %v2659_v47, 7  ;;  %v3815_v14 = vrot.slane %v2659_v47, 4  ;;  %v3816_v24 = vrot.slane %v2662_v63, 5 }
 0x155   : > { %v1183_v3 = vsel %vm1159_vm14, %v1146_v15, %v1101_v8  ;;  %v3825_v47 = vshll.u32 %v2566_v0, 16  ;;  %v359_v15 = vsel %vm11053_vm5, 0, %v358_v61  ;;  %vm3145_vm5 = vcmask 261120  }
 0x156   : > { %v2346_v57 = vmax.f32 %v2314_v54, 0.0  ;;  %v12295_v10 = vpop.f32.mrf.mxu0  ;;  %v2664_v21 = vor.u32 %v2662_v63, %v2661_v31  ;;  %v3817_v39 = vor.u32 %v3816_v24, %v3815_v14  ;;  %v2409_v14 = vsel %vm12177_vm4, 0, %v2408_v34  ;;  %360 = vst [vmem:[#allocation2 + $0x11c] sm:$0x1] %v359_v15 }
 0x157   : > { %v2053_v40 = vpop.permute.xlu0 %2052  ;;  %2410 = vst [vmem:[#allocation3 + $0x40] sm:$0x8] %v2409_v14  ;;  %v2676_v15 = vshrl.u32 %v2567_v53, 16 }
 0x158   : > { %v2497_v43 = vpack.c.bf16 %v2346_v57, %v2346_v57  ;;  %v2665_v32 = vsel %vm11095_vm8, %v9336_v25, %v2664_v21 }
 0x159   : > { %v2203_v60 = vpop.f32.mrf.mxu2  ;;  %v10600_v16 = vld [vmem:[#allocation3 + $0x14] sm:$0xff]  ;;  %v3029_v21 = vunpack.c.l.b16 %v2665_v32 }
 0x15a   : > { %v2565_v11 = vld [vmem:[#allocation3 + $0x18] sm:$0xf]  ;;  %2529 = vst.msk [vmem:[#allocation3 + $0x24] sm:$0xf] %vm2381_vm2, %v2497_v43  ;;  %v2279_v12 = vadd.f32 %v2203_v60, %v1619_v18  ;;  %v12301_v1 = vpop.f32.mrf.mxu1  ;;  %3324 = vrot.lane.b32.xlu2 %v10600_v16, %s10942_s25  ;;  %v3818_v43 = vrot.slane %v3817_v39, 4  ;;  %v3827_v60 = vrot.slane %v3825_v47, 5  ;;  %v12331_v47 = vpop.permute.xlu2 %1069 }
 0x15b   : > { %v2668_v35 = vshrl.u32 %v2565_v11, 16  ;;  %v2671_v62 = vshll.u32 %v2565_v11, 16  ;;  %v2018_v20 = vpop.permute.xlu1 %2017  ;;  %v10859_v16 = vld [vmem:[#allocation2 + $0xc4] sm:$0xff] }
 0x15c   : > { %v2315_v54 = vadd.f32 %v12241_v9, %v2279_v12  ;;  %v2096_v8 = vsel %vm1110_vm13, %v11778_v58, %v2018_v20  ;;  %v2666_v58 = vrot.slane %v2661_v31, 4  ;;  %v1386_v11 = vsel %vm1110_vm13, %v10859_v16, %v12246_v30 }
 0x15d   : > { %v2670_v45 = vrot.slane %v2668_v35, 7  ;;  %v3819_v51 = vrot.slane %v2671_v62, 5  ;;  %v2133_v57 = vsel %vm1159_vm14, %v2096_v8, %v2053_v40  ;;  %v3821_v63 = vrot.slane %v2668_v35, 4  ;;  %9308 = vmatmul.msk.bf16.gmra.mxu1 %vm1436_vm15, %v1183_v3 }
 0x15e   : > { %v2347_v24 = vmax.f32 %v2315_v54, 0.0  ;;  %9329 = vmatmul.msk.bf16.gmra.mxu2 %vm1436_vm15, %v2133_v57  ;;  %v12322_v12 = vpop.f32.mrf.mxu0 }
 0x15f   : > { %v2673_v18 = vor.u32 %v2671_v62, %v2670_v45  ;;  %v3822_v0 = vor.u32 %v3821_v63, %v3819_v51  ;;  %v12324_v25 = vpop.permute.xlu0 %1342  ;;  %v3820_v62 = vsel %vm11157_vm11, %v3818_v43, %v3819_v51  ;;  %v1421_v45 = vsel %vm1159_vm14, %v1386_v11, %v12278_v28  ;;  %v2456_v28 = vld [vmem:[#allocation3 + $0x4c] sm:$0x1] }
 0x160   : > { %v2498_v40 = vpack.c.bf16 %v2347_v24, %v2347_v24  ;;  %v4055_v57 = vunpack.c.l.b16 %v3820_v62  ;;  %v1149_v24 = vsel %vm1110_vm13, %v11823_v44, %v12271_v41  ;;  %v2457_v16 = vsel %vm12212_vm9, 0, %v2456_v28 }
 0x161   : > { %v2674_v3 = vsel %vm11095_vm8, %v2666_v58, %v2673_v18  ;;  %v2206_v31 = vpop.f32.mrf.mxu2  ;;  %v3823_v20 = vrot.slane %v3822_v0, 4  ;;  %v2568_v27 = vld [vmem:[#allocation3 + $0x24] sm:$0xf]  ;;  %9289 = vmatmul.msk.bf16.gmra.mxu0 %vm1436_vm15, %v1421_v45  ;;  %v2570_v18 = vld [vmem:[#allocation3 + $0x2c] sm:$0xf]  ;;  %v1624_v0 = vadd.f32 %v12281_v49, %v12254_v29 }
 0x162   : > { %v3030_v35 = vunpack.c.l.b16 %v2674_v3  ;;  %2530 = vst.msk [vmem:[#allocation3 + $0x28] sm:$0xf] %vm2381_vm2, %v2498_v40  ;;  %v2280_v39 = vadd.f32 %v2206_v31, %v1622_v7  ;;  %v12329_v30 = vpop.f32.mrf.mxu1  ;;  %v2681_v61 = vshrl.u32 %v2568_v27, 16  ;;  %v2684_v43 = vshll.u32 %v2568_v27, 16 }
 0x163   : > { %v1103_v34 = vpop.permute.xlu1 %1102  ;;  %v3828_v8 = vsel %vm11157_vm11, %v3823_v20, %v3827_v60  ;;  %v9337_v7 = vrot.slane %v2676_v15, 11  ;;  %2458 = vst [vmem:[#allocation3 + $0x4c] sm:$0x1] %v2457_v16  ;;  %v1932_v16 = vrot.slane %v976_v46, 4 }
 0x164   : > { %v12333_v54 = vpack.c.b16 %v3030_v35, %v3029_v21  ;;  %v2316_v51 = vadd.f32 %v12241_v9, %v2280_v39  ;;  %v4056_v63 = vunpack.c.l.b16 %v3828_v8  ;;  %v2683_v58 = vrot.slane %v2681_v61, 7 }
 0x165   : > { %v1185_v44 = vsel %vm1159_vm14, %v1149_v24, %v1103_v34  ;;  %v3839_v21 = vshll.u32 %v2570_v18, 16  ;;  %v3829_v27 = vrot.slane %v2681_v61, 4  ;;  %v3830_v39 = vrot.slane %v2684_v43, 5 }
 0x166   : > { %3078 = vrot.lane.b32.xlu1 %v12333_v54, %s10942_s25  ;;  %v2348_v14 = vmax.f32 %v2316_v51, 0.0  ;;  %v12346_v32 = vpack.c.b16 %v4056_v63, %v4055_v57  ;;  %v12352_v40 = vpop.f32.mrf.mxu0  ;;  %v2686_v49 = vor.u32 %v2684_v43, %v2683_v58  ;;  %v12364_v51 = vpop.permute.xlu2 %1307  ;;  %v10860_v63 = vld [vmem:[#allocation2 + $0xd4] sm:$0xff]  ;;  %v2688_v28 = vrot.slane %v2683_v58, 4 }
 0x167   : > { %v2055_v11 = vpop.permute.xlu0 %2054  ;;  %v1389_v15 = vsel %vm1110_vm13, %v10860_v63, %v12297_v4  ;;  %v3841_v24 = vrot.slane %v3839_v21, 5  ;;  %v3831_v4 = vor.u32 %v3830_v39, %v3829_v27  ;;  %v12387_v58 = vrot.slane %v988_v13, 5  ;;  %v593_v13 = vld [vmem:[#allocation2 + $0x11c] sm:$0xf] }
 0x168   : > { %v2499_v60 = vpack.c.bf16 %v2348_v14, %v2348_v14  ;;  %4104 = vrot.lane.b32.xlu2 %v12346_v32, %s10942_s25  ;;  %v1423_v39 = vsel %vm1159_vm14, %v1389_v15, %v12324_v25  ;;  %v1942_v25 = vshll.u32 %v593_v13, 16 }
 0x169   : > { %v2208_v41 = vpop.f32.mrf.mxu2  ;;  %v10601_v3 = vld [vmem:[#allocation3 + $0x24] sm:$0xff] }
 0x16a   : > { %v2569_v31 = vld [vmem:[#allocation3 + $0x28] sm:$0xf]  ;;  %2531 = vst.msk [vmem:[#allocation3 + $0x34] sm:$0xf] %vm2381_vm2, %v2499_v60  ;;  %v2281_v29 = vadd.f32 %v2208_v41, %v1624_v0  ;;  %v12358_v20 = vpop.f32.mrf.mxu1  ;;  %3361 = vrot.lane.b32.xlu0 %v10601_v3, %s10943_s21  ;;  %v1627_v0 = vadd.f32 %v12301_v1, %v12276_v50 }
 0x16b   : > { %v2690_v35 = vshrl.u32 %v2569_v31, 16  ;;  %v2693_v62 = vshll.u32 %v2569_v31, 16  ;;  %v2020_v53 = vpop.permute.xlu1 %2019 }
 0x16c   : > { %v2317_v34 = vadd.f32 %v12241_v9, %v2281_v29  ;;  %v2099_v8 = vsel %vm1110_vm13, %v11856_v2, %v2020_v53  ;;  %v2687_v2 = vsel %vm11095_vm8, %v9337_v7, %v2686_v49  ;;  %v1938_v49 = vrot.slane %v985_v37, 4  ;;  %v12410_v37 = vld [vmem:[#allocation3 + $0x3c] sm:$0xf] }
 0x16d   : > { %v2692_v45 = vrot.slane %v2690_v35, 7  ;;  %v12366_v57 = vrot.slane %v2693_v62, 5  ;;  %v2135_v14 = vsel %vm1159_vm14, %v2099_v8, %v2055_v11  ;;  %v3835_v61 = vrot.slane %v2690_v35, 4  ;;  %9309 = vmatmul.msk.bf16.gmra.mxu1 %vm1436_vm15, %v1185_v44  ;;  %v2571_v11 = vld [vmem:[#allocation3 + $0x30] sm:$0xf] }
 0x16e   : > { %3326 = vrot.lane.b32.xlu1 %v10601_v3, %s10942_s25  ;;  %v2349_v18 = vmax.f32 %v2317_v34, 0.0  ;;  %9330 = vmatmul.msk.bf16.gmra.mxu2 %vm1436_vm15, %v2135_v14  ;;  %v1933_v3 = vrot.slane %v979_v17, 5  ;;  %v12389_v7 = vpop.f32.mrf.mxu0  ;;  %v3031_v31 = vunpack.c.l.b16 %v2687_v2  ;;  %v2698_v27 = vshrl.u32 %v2571_v11, 16 }
 0x16f   : > { %v2695_v43 = vor.u32 %v2693_v62, %v2692_v45  ;;  %v3836_v60 = vor.u32 %v3835_v61, %v12366_v57  ;;  %v12391_v1 = vpop.permute.xlu0 %1344  ;;  %v3832_v8 = vrot.slane %v3831_v4, 4  ;;  %v1939_v63 = vor.u32 %v1938_v49, %v12387_v58  ;;  %v12416_v61 = vpop.permute.xlu2 %1071 }
 0x170   : > { %v2500_v41 = vpack.c.bf16 %v2349_v18, %v2349_v18  ;;  %v1934_v45 = vor.u32 %v1933_v3, %v1932_v16  ;;  %v9338_v2 = vrot.slane %v2698_v27, 11  ;;  %v1632_v4 = vadd.f32 %v12358_v20, %v12322_v12 }
 0x171   : > { %v2696_v44 = vsel %vm11095_vm8, %v2688_v28, %v2695_v43  ;;  %v2211_v50 = vpop.f32.mrf.mxu2  ;;  %v3837_v46 = vrot.slane %v3836_v60, 4  ;;  %v2572_v29 = vld [vmem:[#allocation3 + $0x34] sm:$0xf]  ;;  %9290 = vmatmul.msk.bf16.gmra.mxu0 %vm1436_vm15, %v1423_v39  ;;  %v3834_v14 = vsel %vm11157_vm11, %v3832_v8, %v12366_v57  ;;  %v1629_v43 = vadd.f32 %v12329_v30, %v12295_v10  ;;  %v2459_v39 = vld [vmem:[#allocation3 + $0x5c] sm:$0x1] }
 0x172   : > { %v3032_v21 = vunpack.c.l.b16 %v2696_v44  ;;  %2532 = vst.msk [vmem:[#allocation3 + $0x38] sm:$0xf] %vm2381_vm2, %v2500_v41  ;;  %v2282_v33 = vadd.f32 %v2211_v50, %v1627_v0  ;;  %v2703_v17 = vshrl.u32 %v2572_v29, 16  ;;  %v12396_v35 = vpop.f32.mrf.mxu1  ;;  %v2706_v28 = vshll.u32 %v2572_v29, 16 }
 0x173   : > { %v1105_v62 = vpop.permute.xlu1 %1104  ;;  %v3842_v59 = vsel %vm11157_vm11, %v3837_v46, %v3841_v24  ;;  %v3853_v60 = vshll.u32 %v12410_v37, 16  ;;  %v4057_v11 = vunpack.c.l.b16 %v3834_v14  ;;  %v12432_v3 = vrot.slane %v1939_v63, 4  ;;  %v10632_v46 = vld [vmem:[%s15439_s2 + $0x78] sm:$0xff] }
 0x174   : > { %v12398_v53 = vpack.c.b16 %v3032_v21, %v3031_v31  ;;  %v2318_v34 = vadd.f32 %v12241_v9, %v2282_v33  ;;  %v2705_v24 = vrot.slane %v2703_v17, 7  ;;  %v4058_v18 = vunpack.c.l.b16 %v3842_v59  ;;  %v10620_v21 = vld [vmem:[%s15439_s2 + $0x18] sm:$0xff]  ;;  %4336 = vmatpush.bf16.msrb.mxu1 %v10632_v46 }
 0x175   : > { %v12434_v50 = vrot.slane %v1942_v25, 5  ;;  %v3843_v13 = vrot.slane %v2703_v17, 4  ;;  %v3844_v27 = vrot.slane %v2706_v28, 5  ;;  %3716 = vmatpush.bf16.msrb.mxu0 %v10620_v21  ;;  %v2460_v25 = vsel %vm12212_vm9, 0, %v2459_v39 }
 0x176   : > { %2027 = vrot.lane.b32.xlu1 %v12167_v6, %s10939_s22  ;;  %3113 = vrot.lane.b32.xlu0 %v12398_v53, %s10943_s21  ;;  %v2350_v15 = vmax.f32 %v2318_v34, 0.0  ;;  %v1152_v6 = vsel %vm1110_vm13, %v11888_v26, %v12331_v47  ;;  %v12426_v57 = vpop.f32.mrf.mxu0  ;;  %v12430_v47 = vrot.slane %v1934_v45, 4  ;;  %v2708_v12 = vor.u32 %v2706_v28, %v2705_v24  ;;  %v2411_v34 = vld [vmem:[#allocation3 + $0x50] sm:$0x8]  ;;  %2461 = vst [vmem:[#allocation3 + $0x5c] sm:$0x1] %v2460_v25 }
 0x177   : > { %v2057_v41 = vpop.permute.xlu0 %2056  ;;  %v1187_v29 = vsel %vm1159_vm14, %v1152_v6, %v1105_v62  ;;  %v12448_v33 = vpack.c.b16 %v4058_v18, %v4057_v11  ;;  %v2710_v17 = vrot.slane %v2705_v24, 4  ;;  %v2412_v6 = vsel %vm12177_vm4, 0, %v2411_v34  ;;  %v10861_v18 = vld [vmem:[#allocation2 + $0xe4] sm:$0xff]  ;;  %s10797_s22 = sshll.u32 %s11012_s9, 4 }
 0x178   : > { %v2501_v0 = vpack.c.bf16 %v2350_v15, %v2350_v15  ;;  %v1392_v24 = vsel %vm1110_vm13, %v10861_v18, %v12364_v51  ;;  %2413 = vst [vmem:[#allocation3 + $0x50] sm:$0x8] %v2412_v6  ;;  %v1937_v21 = vsel %vm11157_vm11, %v12430_v47, %v12387_v58  ;;  %v1155_v25 = vsel %vm1110_vm13, %v11965_v38, %v12416_v61  ;;  %s9108_s12 = scalar_lea.hbm %s15445_s8, %s10797_s22  ;;  %s10895_s22 = scalar_lea.hbm %s15445_s8, 32 }
 0x179   : > { %v2213_v16 = vpop.f32.mrf.mxu2  ;;  %v12428_v44 = vld [vmem:[#allocation3 + $0x34] sm:$0xff]  ;;  %s9111_s17 = sshll.u32 %s9108_s12, 4  ;;  %s9112_s17 = int_to_ptr.hbm [resolvable:$true] %s9111_s17 }
 0x17a   : > { %v2573_v26 = vld [vmem:[#allocation3 + $0x38] sm:$0xf]  ;;  %2533 = vst.msk [vmem:[#allocation3 + $0x44] sm:$0xf] %vm2381_vm2, %v2501_v0  ;;  %v2283_v10 = vadd.f32 %v2213_v16, %v1629_v43  ;;  %v12437_v31 = vpop.f32.mrf.mxu1  ;;  %3363 = vrot.lane.b32.xlu2 %v12428_v44, %s10943_s21  ;;  %v12470_v16 = vpop.permute.xlu2 %1309  ;;  %s10889_s18 = sshra.s32 %s9112_s17, 4  ;;  %s10890_s18 = int_to_ptr.hbm [resolvable:$true] %s10889_s18 }
 0x17b   : > { %v2712_v30 = vshrl.u32 %v2573_v26, 16  ;;  %v2715_v20 = vshll.u32 %v2573_v26, 16  ;;  %v2022_v49 = vpop.permute.xlu1 %2021  ;;  %s10891_s19 = scalar_lea.hbm %s10890_s18, 16  ;;  %p10896_p0 = scmp.lt.s32.totalorder %s10890_s18, %s15445_s8 }
 0x17c   : > { %v2319_v8 = vadd.f32 %v12241_v9, %v2283_v10  ;;  %v2102_v59 = vsel %vm1110_vm13, %v11931_v36, %v2022_v49  ;;  %v2709_v36 = vsel %vm11095_vm8, %v9338_v2, %v2708_v12  ;;  %v3845_v2 = vor.u32 %v3844_v27, %v3843_v13  ;;  %p10892_p11 = scmp.ne.s32.totalorder %s10890_s18, %s10891_s19  ;;  %p10897_p1 = scmp.lt.s32.totalorder %s10895_s22, %s10891_s19 }
 0x17d   : > { %v2714_v37 = vrot.slane %v2712_v30, 7  ;;  %v3847_v45 = vrot.slane %v2715_v20, 5  ;;  %v2137_v62 = vsel %vm1159_vm14, %v2102_v59, %v2057_v41  ;;  %v3849_v63 = vrot.slane %v2712_v30, 4  ;;  %9310 = vmatmul.msk.bf16.gmra.mxu1 %vm1436_vm15, %v1187_v29 }
 0x17e   : > { %4106 = vrot.lane.b32.xlu1 %v12448_v33, %s10942_s25  ;;  %4139 = vrot.lane.b32.xlu0 %v12448_v33, %s10943_s21  ;;  %v2351_v15 = vmax.f32 %v2319_v8, 0.0  ;;  %v3855_v41 = vrot.slane %v3853_v60, 5  ;;  %v12472_v11 = vpop.f32.mrf.mxu0  ;;  %v3033_v12 = vunpack.c.l.b16 %v2709_v36  ;;  %v1945_v60 = vsel %vm11157_vm11, %v12432_v3, %v12434_v50  ;;  %v2575_v8 = vld [vmem:[#allocation3 + $0x40] sm:$0xf]  ;;  %p10893_p12 = pnand %p10892_p11, %p11029_p5  ;;  %p10898_p2 = por %p10897_p1, %p10896_p0 }
 0x17f   : > { %9331 = vmatmul.msk.bf16.gmra.mxu2 %vm1436_vm15, %v2137_v62  ;;  %v2717_v14 = vor.u32 %v2715_v20, %v2714_v37  ;;  %v3850_v28 = vor.u32 %v3849_v63, %v3847_v45  ;;  %v12474_v10 = vpop.permute.xlu0 %1346  ;;  %v1425_v29 = vsel %vm1159_vm14, %v1392_v24, %v12391_v1  ;;  %v3846_v27 = vrot.slane %v3845_v2, 4  ;;  %v2578_v37 = vld [vmem:[#allocation3 + $0x4c] sm:$0xf] }
 0x180   : > { %v2502_v43 = vpack.c.bf16 %v2351_v15, %v2351_v15  ;;  %v2029_v1 = vunpack.c.l.b16 %v1937_v21  ;;  %v2030_v47 = vunpack.c.l.b16 %v1945_v60  ;;  %v1634_v50 = vadd.f32 %v12396_v35, %v12352_v40  ;;  %p10894_p13 = pneg %p10893_p12 }
 0x181   : > { %v2718_v0 = vsel %vm11095_vm8, %v2710_v17, %v2717_v14  ;;  %v2216_v26 = vpop.f32.mrf.mxu2  ;;  %v3851_v20 = vrot.slane %v3850_v28, 4  ;;  %v12494_v58 = vld [vmem:[#allocation3 + $0x44] sm:$0xf]  ;;  %9291 = vmatmul.msk.bf16.gmra.mxu0 %vm1436_vm15, %v1425_v29  ;;  %v3848_v34 = vsel %vm11157_vm11, %v3846_v27, %v3847_v45  ;;  %v2720_v6 = vshrl.u32 %v2575_v8, 16 }
 0x182   : > { %v3034_v30 = vunpack.c.l.b16 %v2718_v0  ;;  %2534 = vst.msk [vmem:[#allocation3 + $0x48] sm:$0xf] %vm2381_vm2, %v2502_v43  ;;  %v2284_v51 = vadd.f32 %v2216_v26, %v1632_v4  ;;  %v12485_v46 = vpop.f32.mrf.mxu1  ;;  %v2725_v62 = vshrl.u32 %v12494_v58, 16  ;;  %v2728_v17 = vshll.u32 %v12494_v58, 16  ;;  %v12522_v26 = vpop.permute.xlu2 %1073  ;;  %p10899_p3 = pnand %p10898_p2, %p10894_p13 }
 0x183   : > { %v1107_v49 = vpop.permute.xlu1 %1106  ;;  %v3856_v39 = vsel %vm11157_vm11, %v3851_v20, %v3855_v41  ;;  %v4059_v40 = vunpack.c.l.b16 %v3848_v34  ;;  %v2031_v35 = vpack.c.b16 %v2030_v47, %v2029_v1  ;;  %v3867_v0 = vshll.u32 %v2578_v37, 16  ;;  %v2462_v20 = vld [vmem:[#allocation3 + $0x6c] sm:$0x1] }
 0x184   : > { %v12489_v13 = vpack.c.b16 %v3034_v30, %v3033_v12  ;;  %v2320_v4 = vadd.f32 %v12241_v9, %v2284_v51  ;;  %v4060_v59 = vunpack.c.l.b16 %v3856_v39  ;;  %v1189_v38 = vsel %vm1159_vm14, %v1155_v25, %v1107_v49  ;;  %v2414_v51 = vld [vmem:[#allocation3 + $0x60] sm:$0x8]  ;;  %v2386_v25 = vld [vmem:[#allocation3 + $0xc] sm:$0x1] }
 0x185   : > { %v3857_v12 = vrot.slane %v2725_v62, 4  ;;  %v3858_v30 = vrot.slane %v2728_v17, 5  ;;  %v2463_v39 = vsel %vm12212_vm9, 0, %v2462_v20  ;;  %v2415_v58 = vsel %vm12177_vm4, 0, %v2414_v51  ;;  %v2579_v51 = vld [vmem:[#allocation3 + $0x50] sm:$0xf] }
 0x186   : > { %3115 = vrot.lane.b32.xlu2 %v12489_v13, %s10943_s21  ;;  %3080 = vrot.lane.b32.xlu0 %v12398_v53, %s10942_s25  ;;  %v2352_v3 = vmax.f32 %v2320_v4, 0.0  ;;  %v12510_v15 = vpop.f32.mrf.mxu0  ;;  %v12520_v41 = vpack.c.b16 %v4060_v59, %v4059_v40  ;;  %2464 = vst [vmem:[#allocation3 + $0x6c] sm:$0x1] %v2463_v39  ;;  %v9339_v40 = vrot.slane %v2720_v6, 11 }
 0x187   : > { %v2059_v24 = vpop.permute.xlu0 %2058  ;;  %2416 = vst [vmem:[#allocation3 + $0x60] sm:$0x8] %v2415_v58  ;;  %v3859_v8 = vor.u32 %v3858_v30, %v3857_v12 }
 0x188   : > { %v2503_v63 = vpack.c.bf16 %v2352_v3, %v2352_v3  ;;  %v2727_v3 = vrot.slane %v2725_v62, 7 }
 0x189   : > { %v2218_v36 = vpop.f32.mrf.mxu2  ;;  %v12512_v14 = vld [vmem:[#allocation3 + $0x44] sm:$0xff] }
 0x18a   : > { %v2577_v45 = vld [vmem:[#allocation3 + $0x48] sm:$0xf]  ;;  %2535 = vst.msk [vmem:[#allocation3 + $0x54] sm:$0xf] %vm2381_vm2, %v2503_v63  ;;  %v2285_v18 = vadd.f32 %v2218_v36, %v1634_v50  ;;  %v12515_v2 = vpop.f32.mrf.mxu1  ;;  %3365 = vrot.lane.b32.xlu1 %v12512_v14, %s10943_s21  ;;  %v3869_v50 = vrot.slane %v3867_v0, 5  ;;  %v2730_v62 = vor.u32 %v2728_v17, %v2727_v3  ;;  %v3860_v0 = vrot.slane %v3859_v8, 4  ;;  %v2026_v12 = vpop.permute.xlu2 %2025 }
 0x18b   : > { %v2734_v28 = vshrl.u32 %v2577_v45, 16  ;;  %v2737_v43 = vshll.u32 %v2577_v45, 16  ;;  %v2024_v61 = vpop.permute.xlu1 %2023  ;;  %v2732_v45 = vrot.slane %v2727_v3, 4  ;;  %v2582_v17 = vld [vmem:[#allocation3 + $0x5c] sm:$0xf] }
 0x18c   : > { %v2321_v21 = vadd.f32 %v12241_v9, %v2285_v18  ;;  %v2105_v60 = vsel %vm1110_vm13, %v12001_v5, %v2024_v61  ;;  %v1637_v5 = vadd.f32 %v12437_v31, %v12389_v7  ;;  %v2387_v7 = vsel %vm12212_vm9, 0, %v2386_v25 }
 0x18d   : > { %v3861_v29 = vrot.slane %v2737_v43, 5  ;;  %v3863_v4 = vrot.slane %v2734_v28, 4  ;;  %v2139_v49 = vsel %vm1159_vm14, %v2105_v60, %v2059_v24  ;;  %v2736_v27 = vrot.slane %v2734_v28, 7  ;;  %9311 = vmatmul.msk.bf16.gmra.mxu1 %vm1436_vm15, %v1189_v38  ;;  %2388 = vst [vmem:[#allocation3 + $0xc] sm:$0x1] %v2387_v7 }
 0x18e   : > { %4141 = vrot.lane.b32.xlu2 %v12520_v41, %s10943_s21  ;;  %2062 = vrot.lane.b32.xlu0 %v2031_v35, %s10940_s23  ;;  %v2353_v1 = vmax.f32 %v2321_v21, 0.0  ;;  %v12539_v63 = vpop.f32.mrf.mxu0  ;;  %v1639_v60 = vadd.f32 %v12485_v46, %v12426_v57  ;;  %v3881_v58 = vshll.u32 %v2582_v17, 16 }
 0x18f   : > { %9332 = vmatmul.msk.bf16.gmra.mxu2 %vm1436_vm15, %v2139_v49  ;;  %v3864_v47 = vor.u32 %v3863_v4, %v3861_v29  ;;  %v2739_v37 = vor.u32 %v2737_v43, %v2736_v27  ;;  %v3862_v4 = vsel %vm11157_vm11, %v3860_v0, %v3861_v29  ;;  %v2731_v49 = vsel %vm11095_vm8, %v9339_v40, %v2730_v62 }
 0x190   : > { %v2504_v34 = vpack.c.bf16 %v2353_v1, %v2353_v1  ;;  %v4061_v29 = vunpack.c.l.b16 %v3862_v4  ;;  %v3883_v7 = vrot.slane %v3881_v58, 5 }
 0x191   : > { %v3865_v59 = vrot.slane %v3864_v47, 4  ;;  %v2221_v36 = vpop.f32.mrf.mxu2  ;;  %v2580_v35 = vld [vmem:[#allocation3 + $0x54] sm:$0xf]  ;;  %v2740_v61 = vsel %vm11095_vm8, %v2732_v45, %v2739_v37  ;;  %v2742_v47 = vshrl.u32 %v2579_v51, 16  ;;  %v2417_v51 = vld [vmem:[#allocation3 + $0x70] sm:$0x8] }
 0x192   : > { %2536 = vst.msk [vmem:[#allocation3 + $0x58] sm:$0xf] %vm2381_vm2, %v2504_v34  ;;  %v2286_v31 = vadd.f32 %v2221_v36, %v1637_v5  ;;  %v12544_v18 = vpop.f32.mrf.mxu1  ;;  %v2747_v24 = vshrl.u32 %v2580_v35, 16  ;;  %4108 = vrot.lane.b32.xlu1 %v12520_v41, %s10942_s25  ;;  %v2750_v43 = vshll.u32 %v2580_v35, 16  ;;  %v3036_v39 = vunpack.c.l.b16 %v2740_v61  ;;  %v2465_v61 = vld [vmem:[#allocation3 + $0x7c] sm:$0x1] }
 0x193   : > { %v1109_v28 = vpop.permute.xlu1 %1108  ;;  %v3870_v38 = vsel %vm11157_vm11, %v3865_v59, %v3869_v50  ;;  %v2108_v5 = vsel %vm1110_vm13, %v12067_v23, %v2026_v12  ;;  %v3035_v50 = vunpack.c.l.b16 %v2731_v49  ;;  %v1642_v12 = vadd.f32 %v12515_v2, %v12472_v11 }
 0x194   : > { %v2322_v6 = vadd.f32 %v12241_v9, %v2286_v31  ;;  %v3871_v30 = vrot.slane %v2747_v24, 4  ;;  %v3872_v20 = vrot.slane %v2750_v43, 5  ;;  %v4062_v27 = vunpack.c.l.b16 %v3870_v38 }
 0x195   : > { %v2749_v59 = vrot.slane %v2747_v24, 7  ;;  %v12580_v35 = vpack.c.b16 %v3036_v39, %v3035_v50  ;;  %v2418_v58 = vsel %vm12177_vm4, 0, %v2417_v51  ;;  %v10631_v50 = vld [vmem:[%s15439_s2 + $0x70] sm:$0xff] }
 0x196   : > { %3082 = vrot.lane.b32.xlu2 %v12489_v13, %s10942_s25  ;;  %3328 = vrot.lane.b32.xlu0 %v12428_v44, %s10942_s25  ;;  %v2354_v21 = vmax.f32 %v2322_v6, 0.0  ;;  %v1158_v44 = vsel %vm1110_vm13, %v12042_v42, %v12522_v26  ;;  %v12568_v3 = vpop.f32.mrf.mxu0  ;;  %v3873_v8 = vor.u32 %v3872_v20, %v3871_v30  ;;  %v12578_v40 = vpack.c.b16 %v4062_v27, %v4061_v29 }
 0x197   : > { %v1191_v23 = vsel %vm1159_vm14, %v1158_v44, %v1109_v28  ;;  %v9340_v6 = vrot.slane %v2742_v47, 11  ;;  %v2752_v0 = vor.u32 %v2750_v43, %v2749_v59  ;;  %v2754_v20 = vrot.slane %v2749_v59, 4  ;;  %2419 = vst [vmem:[#allocation3 + $0x70] sm:$0x8] %v2418_v58  ;;  %4337 = vmatpush.bf16.msrb.mxu1 %v10631_v50  ;;  %v2420_v50 = vld [vmem:[#allocation3 + $0x80] sm:$0x8] }
 0x198   : > { %v2505_v1 = vpack.c.bf16 %v2354_v21, %v2354_v21  ;;  %v3874_v28 = vrot.slane %v3873_v8, 4  ;;  %v2466_v43 = vsel %vm12212_vm9, 0, %v2465_v61 }
 0x199   : > { %v2223_v57 = vpop.f32.mrf.mxu2  ;;  %v12570_v46 = vld [vmem:[#allocation3 + $0x54] sm:$0xff]  ;;  %v2753_v11 = vsel %vm11095_vm8, %v9340_v6, %v2752_v0  ;;  %2467 = vst [vmem:[#allocation3 + $0x7c] sm:$0x1] %v2466_v43  ;;  %v2378_v6 = vld [vmem:[#allocation3] sm:$0x8] }
 0x19a   : > { %v2581_v34 = vld [vmem:[#allocation3 + $0x58] sm:$0xf]  ;;  %2537 = vst.msk [vmem:[#allocation3 + $0x64] sm:$0xf] %vm2381_vm2, %v2505_v1  ;;  %v2287_v37 = vadd.f32 %v2223_v57, %v1639_v60  ;;  %v12573_v42 = vpop.f32.mrf.mxu1  ;;  %3367 = vrot.lane.b32.xlu1 %v12570_v46, %s10943_s21  ;;  %v10619_v57 = vld [vmem:[%s15439_s2 + $0x10] sm:$0xff] }
 0x19b   : > { %v2756_v25 = vshrl.u32 %v2581_v34, 16  ;;  %v2759_v36 = vshll.u32 %v2581_v34, 16  ;;  %v2061_v26 = vpop.permute.xlu1 %2060  ;;  %3717 = vmatpush.bf16.msrb.mxu0 %v10619_v57 }
 0x19c   : > { %v2323_v31 = vadd.f32 %v12241_v9, %v2287_v37  ;;  %v2141_v62 = vsel %vm1159_vm14, %v2108_v5, %v2061_v26  ;;  %v3037_v37 = vunpack.c.l.b16 %v2753_v11 }
 0x19d   : > { %v3875_v45 = vrot.slane %v2759_v36, 5  ;;  %v3877_v24 = vrot.slane %v2756_v25, 4  ;;  %v2758_v38 = vrot.slane %v2756_v25, 7  ;;  %9312 = vmatmul.msk.bf16.gmra.mxu1 %vm1436_vm15, %v1191_v23  ;;  %v2586_v25 = vld [vmem:[#allocation3 + $0x6c] sm:$0xf] }
 0x19e   : > { %4143 = vrot.lane.b32.xlu2 %v12578_v40, %s10943_s21  ;;  %3117 = vrot.lane.b32.xlu0 %v12580_v35, %s10943_s21  ;;  %v2355_v17 = vmax.f32 %v2323_v31, 0.0  ;;  %v12592_v49 = vpop.f32.mrf.mxu0  ;;  %v3895_v0 = vshll.u32 %v2586_v25, 16 }
 0x19f   : > { %9333 = vmatmul.msk.bf16.gmra.mxu2 %vm1436_vm15, %v2141_v62  ;;  %v3878_v30 = vor.u32 %v3877_v24, %v3875_v45  ;;  %v2761_v21 = vor.u32 %v2759_v36, %v2758_v38  ;;  %v3876_v39 = vsel %vm11157_vm11, %v3874_v28, %v3875_v45  ;;  %v2583_v36 = vld [vmem:[#allocation3 + $0x60] sm:$0xf]  ;;  %v10862_v62 = vld [vmem:[#allocation2 + $0xf4] sm:$0xff]  ;;  %v1644_v28 = vadd.f32 %v12544_v18, %v12510_v15 }
 0x1a0   : > { %v2506_v60 = vpack.c.bf16 %v2355_v17, %v2355_v17  ;;  %v4063_v59 = vunpack.c.l.b16 %v3876_v39  ;;  %v1395_v45 = vsel %vm1110_vm13, %v10862_v62, %v12470_v16  ;;  %v2764_v38 = vshrl.u32 %v2583_v36, 16 }
 0x1a1   : > { %v3879_v4 = vrot.slane %v3878_v30, 4  ;;  %v2226_v27 = vpop.f32.mrf.mxu2  ;;  %v2584_v2 = vld [vmem:[#allocation3 + $0x64] sm:$0xf]  ;;  %v2762_v5 = vsel %vm11095_vm8, %v2754_v20, %v2761_v21  ;;  %v2379_v17 = vsel %vm12177_vm4, 0, %v2378_v6  ;;  %v1427_v21 = vsel %vm1159_vm14, %v1395_v45, %v12474_v10  ;;  %v10627_v10 = vld [vmem:[%s15439_s2 + $0x50] sm:$0xff] }
 0x1a2   : > { %2538 = vst.msk [vmem:[#allocation3 + $0x68] sm:$0xf] %vm2381_vm2, %v2506_v60  ;;  %v2288_v1 = vadd.f32 %v2226_v27, %v1642_v12  ;;  %v12607_v47 = vpop.f32.mrf.mxu1  ;;  %v2769_v29 = vshrl.u32 %v2584_v2, 16  ;;  %4110 = vrot.lane.b32.xlu1 %v12578_v40, %s10942_s25  ;;  %v2772_v34 = vshll.u32 %v2584_v2, 16  ;;  %v3038_v26 = vunpack.c.l.b16 %v2762_v5  ;;  %9292 = vmatmul.msk.bf16.gmra.mxu0 %vm1436_vm15, %v1427_v21 }
 0x1a3   : > { %v3884_v44 = vsel %vm11157_vm11, %v3879_v4, %v3883_v7  ;;  %2380 = vst [vmem:[#allocation3] sm:$0x8] %v2379_v17  ;;  %v3897_v11 = vrot.slane %v3895_v0, 5  ;;  %v9341_v2 = vrot.slane %v2764_v38, 11  ;;  %v12683_v17 = vld [vmem:[%s15444_s7] ss:$0 sm:$0xff] }
 0x1a4   : > { %v2324_v8 = vadd.f32 %v12241_v9, %v2288_v1  ;;  %v4064_v23 = vunpack.c.l.b16 %v3884_v44  ;;  %v3885_v7 = vrot.slane %v2769_v29, 4  ;;  %v3886_v31 = vrot.slane %v2772_v34, 5  ;;  %v2468_v1 = vld [vmem:[#allocation3 + $0x8c] sm:$0x1] }
 0x1a5   : > { %v2771_v61 = vrot.slane %v2769_v29, 7  ;;  %v12635_v51 = vpack.c.b16 %v3038_v26, %v3037_v37  ;;  %v2421_v37 = vsel %vm12177_vm4, 0, %v2420_v50  ;;  %v10626_v26 = vld [vmem:[%s15439_s2 + $0x48] sm:$0xff] }
 0x1a6   : > { %3084 = vrot.lane.b32.xlu2 %v12580_v35, %s10942_s25  ;;  %3330 = vrot.lane.b32.xlu0 %v12512_v14, %s10942_s25  ;;  %v2356_v24 = vmax.f32 %v2324_v8, 0.0  ;;  %v10628_v14 = vld [vmem:[%s15439_s2 + $0x58] sm:$0xff]  ;;  %v12633_v16 = vpack.c.b16 %v4064_v23, %v4063_v59  ;;  %v3887_v18 = vor.u32 %v3886_v31, %v3885_v7  ;;  %v12642_v39 = vpop.f32.mrf.mxu0  ;;  %2422 = vst [vmem:[#allocation3 + $0x80] sm:$0x8] %v2421_v37 }
 0x1a7   : > { %3557 = vmatpush.bf16.msra.mxu3 %v10628_v14  ;;  %v2774_v58 = vor.u32 %v2772_v34, %v2771_v61  ;;  %v2776_v59 = vrot.slane %v2771_v61, 4  ;;  %v2469_v34 = vsel %vm12212_vm9, 0, %v2468_v1  ;;  %v10625_v14 = vld [vmem:[%s15439_s2 + $0x40] sm:$0xff] }
 0x1a8   : > { %v2507_v12 = vpack.c.bf16 %v2356_v24, %v2356_v24  ;;  %v3888_v8 = vrot.slane %v3887_v18, 4  ;;  %2470 = vst [vmem:[#allocation3 + $0x8c] sm:$0x1] %v2469_v34  ;;  %v2587_v18 = vld [vmem:[#allocation3 + $0x70] sm:$0xf] }
 0x1a9   : > { %v2228_v30 = vpop.f32.mrf.mxu2  ;;  %v12631_v20 = vld [vmem:[#allocation3 + $0x64] sm:$0xff]  ;;  %v2775_v24 = vsel %vm11095_vm8, %v9341_v2, %v2774_v58  ;;  %v1649_v58 = vadd.f32 %v12607_v47, %v12568_v3  ;;  %v2786_v1 = vshrl.u32 %v2587_v18, 16 }
 0x1aa   : > { %v2585_v15 = vld [vmem:[#allocation3 + $0x68] sm:$0xf]  ;;  %2539 = vst.msk [vmem:[#allocation3 + $0x74] sm:$0xf] %vm2381_vm2, %v2507_v12  ;;  %v2289_v60 = vadd.f32 %v2228_v30, %v1644_v28  ;;  %v12640_v27 = vpop.f32.mrf.mxu1  ;;  %3369 = vrot.lane.b32.xlu1 %v12631_v20, %s10943_s21 }
 0x1ab   : > { %v2778_v4 = vshrl.u32 %v2585_v15, 16  ;;  %v2781_v43 = vshll.u32 %v2585_v15, 16  ;;  %3558 = vmatpush.bf16.msra.mxu3 %v10627_v10  ;;  %v3039_v15 = vunpack.c.l.b16 %v2775_v24  ;;  %v2590_v10 = vld [vmem:[#allocation3 + $0x7c] sm:$0xf] }
 0x1ac   : > { %v2325_v44 = vadd.f32 %v12241_v9, %v2289_v60  ;;  %v1647_v9 = vadd.f32 %v12573_v42, %v12539_v63 }
 0x1ad   : > { %v3889_v5 = vrot.slane %v2781_v43, 5  ;;  %v3891_v57 = vrot.slane %v2778_v4, 4  ;;  %v2780_v29 = vrot.slane %v2778_v4, 7 }
 0x1ae   : > { %4145 = vrot.lane.b32.xlu2 %v12633_v16, %s10943_s21  ;;  %3119 = vrot.lane.b32.xlu0 %v12635_v51, %s10943_s21  ;;  %v2357_v25 = vmax.f32 %v2325_v44, 0.0  ;;  %v12686_v21 = vpop.f32.mrf.mxu0 }
 0x1af   : > { %v3892_v36 = vor.u32 %v3891_v57, %v3889_v5  ;;  %v2783_v23 = vor.u32 %v2781_v43, %v2780_v29  ;;  %v3890_v45 = vsel %vm11157_vm11, %v3888_v8, %v3889_v5  ;;  %3559 = vmatpush.bf16.msra.mxu3 %v10626_v26  ;;  %v10624_v5 = vld [vmem:[%s15439_s2 + $0x38] sm:$0xff] }
 0x1b0   : > { %v2508_v7 = vpack.c.bf16 %v2357_v25, %v2357_v25  ;;  %v4065_v30 = vunpack.c.l.b16 %v3890_v45  ;;  %v3909_v25 = vshll.u32 %v2590_v10, 16 }
 0x1b1   : > { %v3893_v31 = vrot.slane %v3892_v36, 4  ;;  %v2231_v62 = vpop.f32.mrf.mxu2  ;;  %v2784_v63 = vsel %vm11095_vm8, %v2776_v59, %v2783_v23  ;;  %v2588_v42 = vld [vmem:[#allocation3 + $0x74] sm:$0xf]  ;;  %v1652_v36 = vadd.f32 %v12640_v27, %v12592_v49  ;;  %v9342_v23 = vrot.slane %v2786_v1, 11 }
 0x1b2   : > { %2540 = vst.msk [vmem:[#allocation3 + $0x78] sm:$0xf] %vm2381_vm2, %v2508_v7  ;;  %v2290_v28 = vadd.f32 %v2231_v62, %v1647_v9  ;;  %v12673_v0 = vpop.f32.mrf.mxu1  ;;  %v2791_v38 = vshrl.u32 %v2588_v42, 16  ;;  %v2794_v61 = vshll.u32 %v2588_v42, 16  ;;  %4112 = vrot.lane.b32.xlu1 %v12633_v16, %s10942_s25  ;;  %v3040_v4 = vunpack.c.l.b16 %v2784_v63  ;;  %v10623_v7 = vld [vmem:[%s15439_s2 + $0x30] sm:$0xff] }
 0x1b3   : > { %v3898_v6 = vsel %vm11157_vm11, %v3893_v31, %v3897_v11  ;;  %3560 = vmatpush.bf16.msra.mxu3 %v10625_v14  ;;  %v2471_v31 = vld [vmem:[#allocation3 + $0x9c] sm:$0x1]  ;;  %v2423_v62 = vld [vmem:[#allocation3 + $0x90] sm:$0x8]  ;;  %v3911_v14 = vrot.slane %v3909_v25, 5 }
 0x1b4   : > { %v2326_v12 = vadd.f32 %v12683_v17, %v2290_v28  ;;  %v4066_v60 = vunpack.c.l.b16 %v3898_v6  ;;  %v3899_v43 = vrot.slane %v2791_v38, 4  ;;  %v3900_v11 = vrot.slane %v2794_v61, 5 }
 0x1b5   : > { %v2793_v44 = vrot.slane %v2791_v38, 7  ;;  %v12701_v8 = vpack.c.b16 %v3040_v4, %v3039_v15  ;;  %v2472_v28 = vsel %vm12212_vm9, 0, %v2471_v31  ;;  %v2424_v6 = vsel %vm12177_vm4, 0, %v2423_v62  ;;  %v12750_v31 = vld [vmem:[#allocation3 + $0x8] sm:$0xf] }
 0x1b6   : > { %3086 = vrot.lane.b32.xlu2 %v12635_v51, %s10942_s25  ;;  %3332 = vrot.lane.b32.xlu0 %v12570_v46, %s10942_s25  ;;  %v2358_v2 = vmax.f32 %v2326_v12, 0.0  ;;  %v12699_v46 = vpack.c.b16 %v4066_v60, %v4065_v30  ;;  %v3901_v34 = vor.u32 %v3900_v11, %v3899_v43  ;;  %v12722_v30 = vpop.f32.mrf.mxu0  ;;  %2473 = vst [vmem:[#allocation3 + $0x9c] sm:$0x1] %v2472_v28 }
 0x1b7   : > { %3561 = vmatpush.bf16.msra.mxu3 %v10624_v5  ;;  %v2796_v26 = vor.u32 %v2794_v61, %v2793_v44  ;;  %v2798_v27 = vrot.slane %v2793_v44, 4  ;;  %2425 = vst [vmem:[#allocation3 + $0x90] sm:$0x8] %v2424_v6 }
 0x1b8   : > { %v2509_v57 = vpack.c.bf16 %v2358_v2, %v2358_v2  ;;  %v3902_v49 = vrot.slane %v3901_v34, 4 }
 0x1b9   : > { %v2233_v29 = vpop.f32.mrf.mxu2  ;;  %v12697_v50 = vld [vmem:[#allocation3 + $0x74] sm:$0xff]  ;;  %v2797_v43 = vsel %vm11095_vm8, %v9342_v23, %v2796_v26 }
 0x1ba   : > { %v2589_v59 = vld [vmem:[#allocation3 + $0x78] sm:$0xf]  ;;  %2541 = vst.msk [vmem:[#allocation3 + $0x84] sm:$0xf] %vm2381_vm2, %v2509_v57  ;;  %v2291_v3 = vadd.f32 %v2233_v29, %v1649_v58  ;;  %v12704_v9 = vpop.f32.mrf.mxu1  ;;  %3371 = vrot.lane.b32.xlu1 %v12697_v50, %s10943_s21  ;;  %v10618_v58 = vld [vmem:[%s15439_s2 + $0x8] sm:$0xff]  ;;  %v3041_v34 = vunpack.c.l.b16 %v2797_v43 }
 0x1bb   : > { %v2800_v47 = vshrl.u32 %v2589_v59, 16  ;;  %v2803_v37 = vshll.u32 %v2589_v59, 16  ;;  %3562 = vmatpush.bf16.msra.mxu3 %v10623_v7  ;;  %3718 = vmatpush.bf16.msrb.mxu0 %v10618_v58  ;;  %v10617_v7 = vld [vmem:[%s15439_s2] sm:$0xff] }
 0x1bc   : > { %v2327_v45 = vadd.f32 %v12683_v17, %v2291_v3  ;;  %v2594_v3 = vld [vmem:[#allocation3 + $0x8c] sm:$0xf] }
 0x1bd   : > { %v3903_v24 = vrot.slane %v2803_v37, 5  ;;  %v3905_v63 = vrot.slane %v2800_v47, 4  ;;  %v2802_v42 = vrot.slane %v2800_v47, 7  ;;  %v2591_v47 = vld [vmem:[#allocation3 + $0x80] sm:$0xf] }
 0x1be   : > { %4147 = vrot.lane.b32.xlu2 %v12699_v46, %s10943_s21  ;;  %3121 = vrot.lane.b32.xlu0 %v12701_v8, %s10943_s21  ;;  %v2359_v38 = vmax.f32 %v2327_v45, 0.0  ;;  %v1654_v45 = vadd.f32 %v12673_v0, %v12642_v39  ;;  %v12758_v6 = vpop.f32.mrf.mxu0 }
 0x1bf   : > { %v3906_v61 = vor.u32 %v3905_v63, %v3903_v24  ;;  %v2805_v12 = vor.u32 %v2803_v37, %v2802_v42  ;;  %v3904_v4 = vsel %vm11157_vm11, %v3902_v49, %v3903_v24  ;;  %v12741_v37 = vld [vmem:[#allocation3 + $0x4] sm:$0xf]  ;;  %v12754_v24 = vpop.permute.xlu2 %3324  ;;  %v3923_v63 = vshll.u32 %v2594_v3, 16  ;;  %3719 = vmatpush.bf16.msrb.mxu0 %v10617_v7 }
 0x1c0   : > { %v2510_v15 = vpack.c.bf16 %v2359_v38, %v2359_v38  ;;  %v4067_v59 = vunpack.c.l.b16 %v3904_v4  ;;  %v2808_v42 = vshrl.u32 %v2591_v47, 16  ;;  %v2646_v38 = vshrl.u32 %v12750_v31, 16 }
 0x1c1   : > { %v3907_v18 = vrot.slane %v3906_v61, 4  ;;  %v2236_v60 = vpop.f32.mrf.mxu2  ;;  %v2806_v11 = vsel %vm11095_vm8, %v2798_v27, %v2805_v12  ;;  %v2592_v2 = vld [vmem:[#allocation3 + $0x84] sm:$0xf]  ;;  %v2640_v27 = vshll.u32 %v12741_v37, 16  ;;  %v3925_v58 = vrot.slane %v3923_v63, 5 }
 0x1c2   : > { %2542 = vst.msk [vmem:[#allocation3 + $0x88] sm:$0xf] %vm2381_vm2, %v2510_v15  ;;  %v2292_v10 = vadd.f32 %v2236_v60, %v1652_v36  ;;  %v12736_v44 = vpop.f32.mrf.mxu1  ;;  %v2813_v5 = vshrl.u32 %v2592_v2, 16  ;;  %v2816_v57 = vshll.u32 %v2592_v2, 16  ;;  %4114 = vrot.lane.b32.xlu1 %v12699_v46, %s10942_s25  ;;  %v3042_v36 = vunpack.c.l.b16 %v2806_v11 }
 0x1c3   : > { %v3912_v1 = vsel %vm11157_vm11, %v3907_v18, %v3911_v14  ;;  %v10630_v18 = vld [vmem:[%s15439_s2 + $0x68] sm:$0xff]  ;;  %v2649_v60 = vshll.u32 %v12750_v31, 16 }
 0x1c4   : > { %v2328_v29 = vadd.f32 %v12683_v17, %v2292_v10  ;;  %v4068_v25 = vunpack.c.l.b16 %v3912_v1  ;;  %v3913_v23 = vrot.slane %v2813_v5, 4  ;;  %v3914_v26 = vrot.slane %v2816_v57, 5  ;;  %4338 = vmatpush.bf16.msrb.mxu1 %v10630_v18 }
 0x1c5   : > { %v2815_v49 = vrot.slane %v2813_v5, 7  ;;  %v12765_v39 = vpack.c.b16 %v3042_v36, %v3041_v34  ;;  %v9343_v10 = vrot.slane %v2808_v42, 11  ;;  %v2474_v5 = vld [vmem:[#allocation3 + $0xac] sm:$0x1]  ;;  %v2559_v34 = vld [vmem:[#allocation3] sm:$0xf] }
 0x1c6   : > { %3088 = vrot.lane.b32.xlu2 %v12701_v8, %s10942_s25  ;;  %3334 = vrot.lane.b32.xlu0 %v12631_v20, %s10942_s25  ;;  %v2360_v62 = vmax.f32 %v2328_v29, 0.0  ;;  %v2637_v20 = vshrl.u32 %v12741_v37, 16  ;;  %v12763_v12 = vpack.c.b16 %v4068_v25, %v4067_v59  ;;  %v3915_v15 = vor.u32 %v3914_v26, %v3913_v23  ;;  %v2426_v29 = vld [vmem:[#allocation3 + $0xa0] sm:$0x8] }
 0x1c7   : > { %15479 = vst [vmem:[#allocation15_spill] sm:$0xff] %v12765_v39  ;;  %v2818_v1 = vor.u32 %v2816_v57, %v2815_v49  ;;  %v2820_v23 = vrot.slane %v2815_v49, 4  ;;  %v10629_v57 = vld [vmem:[%s15439_s2 + $0x60] sm:$0xff]  ;;  %v2475_v26 = vsel %vm12212_vm9, 0, %v2474_v5  ;;  %v2427_v7 = vsel %vm12177_vm4, 0, %v2426_v29 }
 0x1c8   : > { %v2511_v28 = vpack.c.bf16 %v2360_v62, %v2360_v62  ;;  %v3916_v36 = vrot.slane %v3915_v15, 4  ;;  %2476 = vst [vmem:[#allocation3 + $0xac] sm:$0x1] %v2475_v26  ;;  %v12794_v49 = vrot.slane %v2640_v27, 5  ;;  %v12804_v15 = vpop.permute.xlu2 %4104  ;;  %4339 = vmatpush.bf16.msrb.mxu1 %v10629_v57  ;;  %v2632_v18 = vshrl.u32 %v2559_v34, 16 }
 0x1c9   : > { %v2238_v61 = vpop.f32.mrf.mxu2  ;;  %v12761_v14 = vld [vmem:[#allocation3 + $0x84] sm:$0xff]  ;;  %2428 = vst [vmem:[#allocation3 + $0xa0] sm:$0x8] %v2427_v7  ;;  %v2819_v29 = vsel %vm11095_vm8, %v9343_v10, %v2818_v1 }
 0x1ca   : > { %v2593_v0 = vld [vmem:[#allocation3 + $0x88] sm:$0xf]  ;;  %2543 = vst.msk [vmem:[#allocation3 + $0x94] sm:$0xf] %vm2381_vm2, %v2511_v28  ;;  %v2293_v4 = vadd.f32 %v2238_v61, %v1654_v45  ;;  %v12772_v2 = vpop.f32.mrf.mxu1  ;;  %3373 = vrot.lane.b32.xlu1 %v12761_v14, %s10943_s21  ;;  %v1657_v45 = vadd.f32 %v12704_v9, %v12686_v21  ;;  %v12790_v28 = vrot.slane %v2637_v20, 4  ;;  %v12798_v61 = vrot.slane %v2649_v60, 5 }
 0x1cb   : > { %v2822_v43 = vshrl.u32 %v2593_v0, 16  ;;  %v2825_v11 = vshll.u32 %v2593_v0, 16  ;;  %v12802_v0 = vrot.slane %v2646_v38, 4  ;;  %v12806_v21 = vld [vmem:[#allocation3 + $0xc] sm:$0xf] }
 0x1cc   : > { %v2329_v59 = vadd.f32 %v12683_v17, %v2293_v4  ;;  %v2639_v4 = vrot.slane %v2637_v20, 7  ;;  %v12819_v20 = vpop.f32.mrf.mxu0 }
 0x1cd   : > { %v3917_v3 = vrot.slane %v2825_v11, 5  ;;  %v3919_v47 = vrot.slane %v2822_v43, 4  ;;  %v2824_v25 = vrot.slane %v2822_v43, 7 }
 0x1ce   : > { %4149 = vrot.lane.b32.xlu2 %v12763_v12, %s10943_s21  ;;  %3123 = vrot.lane.b32.xlu0 %v12765_v39, %s10943_s21  ;;  %v2361_v62 = vmax.f32 %v2329_v59, 0.0  ;;  %v2644_v1 = vrot.slane %v2639_v4, 4 }
 0x1cf   : > { %v3920_v63 = vor.u32 %v3919_v47, %v3917_v3  ;;  %v2827_v42 = vor.u32 %v2825_v11, %v2824_v25  ;;  %v3918_v5 = vsel %vm11157_vm11, %v3916_v36, %v3917_v3  ;;  %v2648_v36 = vrot.slane %v2646_v38, 7 }
 0x1d0   : > { %v2512_v9 = vpack.c.bf16 %v2361_v62, %v2361_v62  ;;  %v12835_v62 = vrot.slane %v2632_v18, 11  ;;  %v4069_v38 = vunpack.c.l.b16 %v3918_v5  ;;  %v1659_v18 = vadd.f32 %v12736_v44, %v12722_v30 }
 0x1d1   : > { %v3921_v43 = vrot.slane %v3920_v63, 4  ;;  %v2241_v11 = vpop.f32.mrf.mxu2  ;;  %v2828_v59 = vsel %vm11095_vm8, %v2820_v23, %v2827_v42  ;;  %v12814_v47 = vld [vmem:[#allocation3 + $0x94] sm:$0xf]  ;;  %v2598_v63 = vld [vmem:[#allocation3 + $0x9c] sm:$0xf]  ;;  %v2651_v26 = vor.u32 %v2649_v60, %v2648_v36 }
 0x1d2   : > { %2544 = vst.msk [vmem:[#allocation3 + $0x98] sm:$0xf] %vm2381_vm2, %v2512_v9  ;;  %v2294_v25 = vadd.f32 %v2241_v11, %v1657_v45  ;;  %v2835_v57 = vshrl.u32 %v12814_v47, 16  ;;  %v2838_v3 = vshll.u32 %v12814_v47, 16  ;;  %4116 = vrot.lane.b32.xlu1 %v12763_v12, %s10942_s25  ;;  %v12830_v23 = vpop.f32.mrf.mxu1  ;;  %v12839_v45 = vor.u32 %v2640_v27, %v2639_v4  ;;  %v2595_v42 = vld [vmem:[#allocation3 + $0x90] sm:$0xf] }
 0x1d3   : > { %v3926_v34 = vsel %vm11157_vm11, %v3921_v43, %v3925_v58  ;;  %v10599_v58 = vld [vmem:[#allocation3 + $0x4] sm:$0xff]  ;;  %v3043_v43 = vunpack.c.l.b16 %v2819_v29  ;;  %v3044_v11 = vunpack.c.l.b16 %v2828_v59  ;;  %v3937_v55 = vshll.u32 %v2598_v63, 16 }
 0x1d4   : > { %v2330_v7 = vadd.f32 %v12683_v17, %v2294_v25  ;;  %v4070_v9 = vunpack.c.l.b16 %v3926_v34  ;;  %v3927_v25 = vrot.slane %v2835_v57, 4  ;;  %v3928_v37 = vrot.slane %v2838_v3, 5  ;;  %v12847_v27 = vpop.permute.xlu2 %3363 }
 0x1d5   : > { %v3395_v5 = vsel %vm3145_vm5, %v10599_v58, %v12754_v24  ;;  %v2643_v30 = vsel %vm11095_vm8, %v12835_v62, %v12839_v45  ;;  %v12863_v31 = vpack.c.b16 %v3044_v11, %v3043_v43  ;;  %v2837_v34 = vrot.slane %v2835_v57, 7 }
 0x1d6   : > { %3090 = vrot.lane.b32.xlu2 %v12765_v39, %s10942_s25  ;;  %3336 = vrot.lane.b32.xlu0 %v12697_v50, %s10942_s25  ;;  %v2362_v47 = vmax.f32 %v2330_v7, 0.0  ;;  %v2830_v50 = vshrl.u32 %v2595_v42, 16  ;;  %v12861_v4 = vpack.c.b16 %v4070_v9, %v4069_v38  ;;  %v3929_v7 = vor.u32 %v3928_v37, %v3927_v25  ;;  %v2477_v38 = vld [vmem:[#allocation3 + $0xbc] sm:$0x1]  ;;  %v2429_v9 = vld [vmem:[#allocation3 + $0xb0] sm:$0x8] }
 0x1d7   : > { %v2652_v62 = vsel %vm11095_vm8, %v2644_v1, %v2651_v26  ;;  %v1662_v45 = vadd.f32 %v12772_v2, %v12758_v6  ;;  %v3939_v63 = vrot.slane %v3937_v55, 5  ;;  %v2840_v26 = vor.u32 %v2838_v3, %v2837_v34 }
 0x1d8   : > { %v12851_v10 = vpop.permute.xlu1 %3078  ;;  %v2513_v29 = vpack.c.bf16 %v2362_v47, %v2362_v47  ;;  %v9344_v42 = vrot.slane %v2830_v50, 11  ;;  %v2842_v6 = vrot.slane %v2837_v34, 4  ;;  %v2478_v2 = vsel %vm12212_vm9, 0, %v2477_v38 }
 0x1d9   : > { %v2243_v44 = vpop.f32.mrf.mxu2  ;;  %v12859_v59 = vld [vmem:[#allocation3 + $0x94] sm:$0xff]  ;;  %v2430_v25 = vsel %vm12177_vm4, 0, %v2429_v9  ;;  %2479 = vst [vmem:[#allocation3 + $0xbc] sm:$0x1] %v2478_v2  ;;  %v15481_v3 = vor.u32 %v12802_v0, %v12798_v61 }
 0x1da   : > { %v2597_v60 = vld [vmem:[#allocation3 + $0x98] sm:$0xf]  ;;  %2545 = vst.msk [vmem:[#allocation3 + $0xa4] sm:$0xf] %vm2381_vm2, %v2513_v29  ;;  %v2295_v24 = vadd.f32 %v2243_v44, %v1659_v18  ;;  %3375 = vrot.lane.b32.xlu1 %v12859_v59, %s10943_s21  ;;  %v12873_v18 = vpop.f32.mrf.mxu0  ;;  %v12879_v55 = vpop.f32.mrf.mxu1  ;;  %v3930_v29 = vrot.slane %v3929_v7, 4  ;;  %v3028_v7 = vunpack.c.l.b16 %v2652_v62 }
 0x1db   : > { %v2844_v36 = vshrl.u32 %v2597_v60, 16  ;;  %v2847_v58 = vshll.u32 %v2597_v60, 16  ;;  %v15480_v60 = vor.u32 %v12794_v49, %v12790_v28  ;;  %v3809_v34 = vrot.slane %v15481_v3, 4  ;;  %2431 = vst [vmem:[#allocation3 + $0xb0] sm:$0x8] %v2430_v25 }
 0x1dc   : > { %v2331_v57 = vadd.f32 %v12683_v17, %v2295_v24  ;;  %v3362_v1 = vpop.permute.xlu0 %3361  ;;  %v2841_v49 = vsel %vm11095_vm8, %v9344_v42, %v2840_v26 }
 0x1dd   : > { %v3931_v43 = vrot.slane %v2847_v58, 5  ;;  %v3933_v11 = vrot.slane %v2844_v36, 4  ;;  %v2846_v47 = vrot.slane %v2844_v36, 7  ;;  %v3442_v50 = vsel %vm3194_vm10, %v3395_v5, %v3362_v1 }
 0x1de   : > { %4151 = vrot.lane.b32.xlu2 %v12861_v4, %s10943_s21  ;;  %3125 = vrot.lane.b32.xlu0 %v12863_v31, %s10943_s21  ;;  %v2363_v37 = vmax.f32 %v2331_v57, 0.0  ;;  %v3804_v24 = vrot.slane %v15480_v60, 4  ;;  %v15482_v36 = vshll.u32 %v12806_v21, 16  ;;  %v3027_v5 = vunpack.c.l.b16 %v2643_v30 }
 0x1df   : > { %v3934_v44 = vor.u32 %v3933_v11, %v3931_v43  ;;  %9461 = vmatmul.msk.bf16.vlgmr.msra.gmra.mxu3 %vm3522_vm12, %v3442_v50  ;;  %v2849_v9 = vor.u32 %v2847_v58, %v2846_v47  ;;  %v3932_v58 = vsel %vm11157_vm11, %v3930_v29, %v3931_v43 }
 0x1e0   : > { %v3813_v38 = vrot.slane %v15482_v36, 5  ;;  %v12894_v39 = vpop.permute.xlu2 %3115  ;;  %v2514_v57 = vpack.c.bf16 %v2363_v37, %v2363_v37  ;;  %v3327_v1 = vpop.permute.xlu1 %3326  ;;  %v3806_v42 = vsel %vm11157_vm11, %v3804_v24, %v12798_v61  ;;  %v3059_v26 = vpack.c.b16 %v3028_v7, %v3027_v5  ;;  %v2599_v37 = vld [vmem:[#allocation3 + $0xa0] sm:$0xf] }
 0x1e1   : > { %v3935_v11 = vrot.slane %v3934_v44, 4  ;;  %v2246_v28 = vpop.f32.mrf.mxu2  ;;  %v2850_v0 = vsel %vm11095_vm8, %v2842_v6, %v2849_v9  ;;  %v12901_v21 = vld [vmem:[#allocation3 + $0xa4] sm:$0xf]  ;;  %v3045_v6 = vunpack.c.l.b16 %v2841_v49  ;;  %v4071_v61 = vunpack.c.l.b16 %v3932_v58 }
 0x1e2   : > { %2546 = vst.msk [vmem:[#allocation3 + $0xa8] sm:$0xf] %vm2381_vm2, %v2514_v57  ;;  %v2296_v2 = vadd.f32 %v2246_v28, %v1662_v45  ;;  %v2857_v62 = vshrl.u32 %v12901_v21, 16  ;;  %v3814_v47 = vsel %vm11157_vm11, %v3809_v34, %v3813_v38  ;;  %4118 = vrot.lane.b32.xlu1 %v12861_v4, %s10942_s25  ;;  %v2860_v45 = vshll.u32 %v12901_v21, 16  ;;  %v12924_v36 = vpop.f32.mrf.mxu0  ;;  %v12928_v9 = vpop.f32.mrf.mxu1  ;;  %v10864_v57 = vld [vmem:[#allocation3 + $0x14] sm:$0xff] }
 0x1e3   : > { %v3940_v30 = vsel %vm11157_vm11, %v3935_v11, %v3939_v63  ;;  %v3046_v25 = vunpack.c.l.b16 %v2850_v0  ;;  %v2602_v63 = vld [vmem:[#allocation3 + $0xac] sm:$0xf]  ;;  %v4053_v60 = vunpack.c.l.b16 %v3806_v42  ;;  %v4054_v24 = vunpack.c.l.b16 %v3814_v47 }
 0x1e4   : > { %v2332_v43 = vadd.f32 %v12683_v17, %v2296_v2  ;;  %v4072_v50 = vunpack.c.l.b16 %v3940_v30  ;;  %v3941_v29 = vrot.slane %v2857_v62, 4  ;;  %v3942_v44 = vrot.slane %v2860_v45, 5 }
 0x1e5   : > { %v1664_v34 = vadd.f32 %v12830_v23, %v12819_v20  ;;  %v3951_v5 = vshll.u32 %v2602_v63, 16  ;;  %v2852_v7 = vshrl.u32 %v2599_v37, 16  ;;  %v3398_v11 = vsel %vm3145_vm5, %v10864_v57, %v3327_v1  ;;  %v2480_v37 = vld [vmem:[#allocation3 + $0xcc] sm:$0x1] }
 0x1e6   : > { %3092 = vrot.lane.b32.xlu2 %v12863_v31, %s10942_s25  ;;  %3338 = vrot.lane.b32.xlu0 %v12761_v14, %s10942_s25  ;;  %v2364_v3 = vmax.f32 %v2332_v43, 0.0  ;;  %v3148_v14 = vsel %vm3145_vm5, %v3059_v26, %v12851_v10  ;;  %v12933_v0 = vpack.c.b16 %v3046_v25, %v3045_v6  ;;  %v12938_v2 = vpack.c.b16 %v4072_v50, %v4071_v61  ;;  %v2432_v61 = vld [vmem:[#allocation3 + $0xc0] sm:$0x8] }
 0x1e7   : > { %v3943_v30 = vor.u32 %v3942_v44, %v3941_v29  ;;  %v2859_v42 = vrot.slane %v2857_v62, 7  ;;  %v4085_v47 = vpack.c.b16 %v4054_v24, %v4053_v60  ;;  %v1667_v6 = vadd.f32 %v12879_v55, %v12873_v18 }
 0x1e8   : > { %v12926_v38 = vpop.permute.xlu2 %4141  ;;  %v2515_v28 = vpack.c.bf16 %v2364_v3, %v2364_v3  ;;  %v3114_v49 = vpop.permute.xlu0 %3113  ;;  %v3444_v25 = vsel %vm3194_vm10, %v3398_v11, %v12847_v27  ;;  %v3953_v62 = vrot.slane %v3951_v5, 5  ;;  %v9345_v63 = vrot.slane %v2852_v7, 11 }
 0x1e9   : > { %v3196_v20 = vsel %vm3194_vm10, %v3148_v14, %v3114_v49  ;;  %v2248_v23 = vpop.f32.mrf.mxu2  ;;  %v12936_v21 = vld [vmem:[#allocation3 + $0xa4] sm:$0xff]  ;;  %v12942_v43 = vpop.permute.xlu1 %2027  ;;  %v3944_v24 = vrot.slane %v3943_v30, 4  ;;  %v2862_v18 = vor.u32 %v2860_v45, %v2859_v42  ;;  %v2481_v27 = vsel %vm12212_vm9, 0, %v2480_v37 }
 0x1ea   : > { %v2601_v58 = vld [vmem:[#allocation3 + $0xa8] sm:$0xf]  ;;  %2547 = vst.msk [vmem:[#allocation3 + $0xb4] sm:$0xf] %vm2381_vm2, %v2515_v28  ;;  %v2297_v10 = vadd.f32 %v2248_v23, %v1664_v34  ;;  %9501 = vmatmul.msk.bf16.vlgmr.msrb.gmra.mxu0 %vm3522_vm12, %v3196_v20  ;;  %3377 = vrot.lane.b32.xlu1 %v12936_v21, %s10943_s21  ;;  %v2433_v55 = vsel %vm12177_vm4, 0, %v2432_v61  ;;  %v2864_v5 = vrot.slane %v2859_v42, 4  ;;  %v4173_v57 = vsel %vm3145_vm5, %v4085_v47, %v12804_v15  ;;  %v12964_v49 = vpop.f32.mrf.mxu0  ;;  %v12971_v42 = vpop.f32.mrf.mxu1 }
 0x1eb   : > { %v2866_v1 = vshrl.u32 %v2601_v58, 16  ;;  %v2869_v26 = vshll.u32 %v2601_v58, 16  ;;  %2482 = vst [vmem:[#allocation3 + $0xcc] sm:$0x1] %v2481_v27  ;;  %v2863_v30 = vsel %vm11095_vm8, %v9345_v63, %v2862_v18  ;;  %v1669_v27 = vadd.f32 %v12928_v9, %v12924_v36 }
 0x1ec   : > { %v2333_v50 = vadd.f32 %v12683_v17, %v2297_v10  ;;  %2434 = vst [vmem:[#allocation3 + $0xc0] sm:$0x8] %v2433_v55  ;;  %v3047_v61 = vunpack.c.l.b16 %v2863_v30 }
 0x1ed   : > { %v3945_v29 = vrot.slane %v2869_v26, 5  ;;  %v3947_v44 = vrot.slane %v2866_v1, 4  ;;  %v2868_v60 = vrot.slane %v2866_v1, 7 }
 0x1ee   : > { %4153 = vrot.lane.b32.xlu2 %v12938_v2, %s10943_s21  ;;  %3127 = vrot.lane.b32.xlu0 %v12933_v0, %s10943_s21  ;;  %v2365_v3 = vmax.f32 %v2333_v50, 0.0  ;;  %v2606_v50 = vld [vmem:[#allocation3 + $0xbc] sm:$0xf] }
 0x1ef   : > { %v3948_v34 = vor.u32 %v3947_v44, %v3945_v29  ;;  %v2871_v7 = vor.u32 %v2869_v26, %v2868_v60  ;;  %9462 = vmatmul.msk.bf16.gmra.mxu3 %vm3522_vm12, %v3444_v25  ;;  %v3946_v58 = vsel %vm11157_vm11, %v3944_v24, %v3945_v29  ;;  %v2603_v29 = vld [vmem:[#allocation3 + $0xb0] sm:$0xf] }
 0x1f0   : > { %v12959_v14 = vpop.permute.xlu2 %3082  ;;  %v2516_v45 = vpack.c.bf16 %v2365_v3, %v2365_v3  ;;  %v4140_v11 = vpop.permute.xlu0 %4139  ;;  %v4073_v37 = vunpack.c.l.b16 %v3946_v58  ;;  %v3965_v3 = vshll.u32 %v2606_v50, 16 }
 0x1f1   : > { %v3949_v28 = vrot.slane %v3948_v34, 4  ;;  %v4220_v20 = vsel %vm3194_vm10, %v4173_v57, %v4140_v11  ;;  %v2251_v23 = vpop.f32.mrf.mxu2  ;;  %v2604_v10 = vld [vmem:[#allocation3 + $0xb4] sm:$0xf]  ;;  %v2872_v1 = vsel %vm11095_vm8, %v2864_v5, %v2871_v7  ;;  %v2874_v34 = vshrl.u32 %v2603_v29, 16 }
 0x1f2   : > { %2548 = vst.msk [vmem:[#allocation3 + $0xb8] sm:$0xf] %vm2381_vm2, %v2516_v45  ;;  %v2298_v15 = vadd.f32 %v2251_v23, %v1667_v6  ;;  %9553 = vmatmul.msk.bf16.vlgmr.msrb.gmra.mxu1 %vm3522_vm12, %v4220_v20  ;;  %v2879_v26 = vshrl.u32 %v2604_v10, 16  ;;  %4120 = vrot.lane.b32.xlu1 %v12938_v2, %s10942_s25  ;;  %v2882_v25 = vshll.u32 %v2604_v10, 16  ;;  %v4107_v6 = vpop.permute.xlu1 %4106  ;;  %v3048_v44 = vunpack.c.l.b16 %v2872_v1 }
 0x1f3   : > { %v3954_v47 = vsel %vm11157_vm11, %v3949_v28, %v3953_v62  ;;  %v2111_v7 = vsel %vm1110_vm13, %v12124_v22, %v12942_v43  ;;  %v13004_v43 = vpop.f32.mrf.mxu0  ;;  %v9346_v1 = vrot.slane %v2874_v34, 11  ;;  %vm5170_vm13 = vcmask 1043459  }
 0x1f4   : > { %v2334_v63 = vadd.f32 %v12683_v17, %v2298_v15  ;;  %v4074_v62 = vunpack.c.l.b16 %v3954_v47  ;;  %v3955_v60 = vrot.slane %v2879_v26, 4  ;;  %v3956_v24 = vrot.slane %v2882_v25, 5  ;;  %v1673_v15 = vpop.f32.mrf.mxu1 }
 0x1f5   : > { %v2881_v5 = vrot.slane %v2879_v26, 7  ;;  %v12999_v36 = vpack.c.b16 %v3048_v44, %v3047_v61  ;;  %v3967_v47 = vrot.slane %v3965_v3, 5 }
 0x1f6   : > { %3094 = vrot.lane.b32.xlu2 %v12933_v0, %s10942_s25  ;;  %3340 = vrot.lane.b32.xlu0 %v12859_v59, %s10942_s25  ;;  %v2366_v18 = vmax.f32 %v2334_v63, 0.0  ;;  %v12997_v20 = vpack.c.b16 %v4074_v62, %v4073_v37  ;;  %v3957_v23 = vor.u32 %v3956_v24, %v3955_v60  ;;  %v2483_v63 = vld [vmem:[#allocation3 + $0xdc] sm:$0x1]  ;;  %v2435_v37 = vld [vmem:[#allocation3 + $0xd0] sm:$0x8]  ;;  %v1672_v24 = vadd.f32 %v12971_v42, %v12964_v49 }
 0x1f7   : > { %v2884_v26 = vor.u32 %v2882_v25, %v2881_v5  ;;  %v2886_v62 = vrot.slane %v2881_v5, 4  ;;  %v2484_v25 = vsel %vm12212_vm9, 0, %v2483_v63  ;;  %v2436_v44 = vsel %vm12177_vm4, 0, %v2435_v37  ;;  %v2607_v63 = vld [vmem:[#allocation3 + $0xc0] sm:$0xf] }
 0x1f8   : > { %v12988_v55 = vpop.permute.xlu2 %4143  ;;  %v2517_v57 = vpack.c.bf16 %v2366_v18, %v2366_v18  ;;  %v3081_v45 = vpop.permute.xlu0 %3080  ;;  %2485 = vst [vmem:[#allocation3 + $0xdc] sm:$0x1] %v2484_v25 }
 0x1f9   : > { %v3151_v59 = vsel %vm3145_vm5, %v12333_v54, %v3081_v45  ;;  %v2253_v11 = vpop.f32.mrf.mxu2  ;;  %v12995_v28 = vld [vmem:[#allocation3 + $0xb4] sm:$0xff]  ;;  %v4176_v54 = vsel %vm3145_vm5, %v12346_v32, %v4107_v6  ;;  %v3958_v6 = vrot.slane %v3957_v23, 4  ;;  %2437 = vst [vmem:[#allocation3 + $0xd0] sm:$0x8] %v2436_v44  ;;  %v2885_v49 = vsel %vm11095_vm8, %v9346_v1, %v2884_v26  ;;  %v2610_v26 = vld [vmem:[#allocation3 + $0xcc] sm:$0xf] }
 0x1fa   : > { %v2605_v9 = vld [vmem:[#allocation3 + $0xb8] sm:$0xf]  ;;  %2549 = vst.msk [vmem:[#allocation3 + $0xc4] sm:$0xf] %vm2381_vm2, %v2517_v57  ;;  %v2299_v58 = vadd.f32 %v2253_v11, %v1669_v27  ;;  %v3198_v22 = vsel %vm3194_vm10, %v3151_v59, %v12894_v39  ;;  %3379 = vrot.lane.b32.xlu1 %v12995_v28, %s10943_s21  ;;  %v4222_v5 = vsel %vm3194_vm10, %v4176_v54, %v12926_v38  ;;  %v3049_v54 = vunpack.c.l.b16 %v2885_v49 }
 0x1fb   : > { %v2888_v30 = vshrl.u32 %v2605_v9, 16  ;;  %v2891_v10 = vshll.u32 %v2605_v9, 16  ;;  %9502 = vmatmul.msk.bf16.gmra.mxu0 %vm3522_vm12, %v3198_v22  ;;  %v1547_v1 = vpop.f32.mrf.mxu0  ;;  %v3979_v44 = vshll.u32 %v2610_v26, 16 }
 0x1fc   : > { %v2335_v39 = vadd.f32 %v12683_v17, %v2299_v58  ;;  %v13016_v32 = vpop.permute.xlu1 %3365 }
 0x1fd   : > { %v3959_v61 = vrot.slane %v2891_v10, 5  ;;  %v3961_v50 = vrot.slane %v2888_v30, 4  ;;  %v2890_v29 = vrot.slane %v2888_v30, 7 }
 0x1fe   : > { %4155 = vrot.lane.b32.xlu2 %v12997_v20, %s10943_s21  ;;  %3129 = vrot.lane.b32.xlu0 %v12999_v36, %s10943_s21  ;;  %v2367_v60 = vmax.f32 %v2335_v39, 0.0 }
 0x1ff   : > { %v3962_v18 = vor.u32 %v3961_v50, %v3959_v61  ;;  %v2893_v27 = vor.u32 %v2891_v10, %v2890_v29  ;;  %v3960_v9 = vsel %vm11157_vm11, %v3958_v6, %v3959_v61  ;;  %v1676_v61 = vpop.f32.mrf.mxu1 }
 0x200   : > { %v13024_v3 = vpop.permute.xlu2 %3084  ;;  %v2518_v34 = vpack.c.bf16 %v2367_v60, %v2367_v60  ;;  %v2063_v57 = vpop.permute.xlu0 %2062  ;;  %v4075_v10 = vunpack.c.l.b16 %v3960_v9  ;;  %v2896_v60 = vshrl.u32 %v2607_v63, 16 }
 0x201   : > { %v3963_v45 = vrot.slane %v3962_v18, 4  ;;  %v2143_v59 = vsel %vm1159_vm14, %v2111_v7, %v2063_v57  ;;  %v2894_v42 = vsel %vm11095_vm8, %v2886_v62, %v2893_v27  ;;  %v2608_v23 = vld [vmem:[#allocation3 + $0xc4] sm:$0xf]  ;;  %v1674_v62 = vadd.f32 %v1673_v15, %v13004_v43  ;;  %vm13580_vm14 = vmand %vm5170_vm13, %vm15459_vm1 }
 0x202   : > { %v2256_v11 = vpop.f32.mrf.mxu2  ;;  %2550 = vst.msk [vmem:[#allocation3 + $0xc8] sm:$0xf] %vm2381_vm2, %v2518_v34  ;;  %9334 = vmatmul.msk.bf16.gmra.mxu2 %vm1436_vm15, %v2143_v59  ;;  %9554 = vmatmul.msk.bf16.gmra.mxu1 %vm3522_vm12, %v4222_v5  ;;  %v2901_v7 = vshrl.u32 %v2608_v23, 16  ;;  %v2904_v22 = vshll.u32 %v2608_v23, 16  ;;  %v3050_v39 = vunpack.c.l.b16 %v2894_v42  ;;  %v10865_v34 = vld [vmem:[#allocation3 + $0x24] sm:$0xff]  ;;  %vm5164_vm15 = vcmask 1041409  }
 0x203   : > { %v2300_v58 = vadd.f32 %v2256_v11, %v1672_v24  ;;  %v3968_v38 = vsel %vm11157_vm11, %v3963_v45, %v3967_v47  ;;  %4122 = vrot.lane.b32.xlu1 %v12997_v20, %s10942_s25  ;;  %vm5182_vm1 = vcmask 1047559  }
 0x204   : > { %v4109_v37 = vpop.permute.xlu1 %4108  ;;  %v4076_v47 = vunpack.c.l.b16 %v3968_v38  ;;  %v3969_v50 = vrot.slane %v2901_v7, 4  ;;  %v3970_v29 = vrot.slane %v2904_v22, 5  ;;  %v2903_v24 = vrot.slane %v2901_v7, 7 }
 0x205   : > { %v2336_v30 = vadd.f32 %v12683_v17, %v2300_v58  ;;  %v13055_v59 = vpack.c.b16 %v3050_v39, %v3049_v54  ;;  %v4179_v23 = vsel %vm3145_vm5, %v12448_v33, %v4109_v37  ;;  %v3981_v58 = vrot.slane %v3979_v44, 5 }
 0x206   : > { %3096 = vrot.lane.b32.xlu2 %v12999_v36, %s10942_s25  ;;  %3342 = vrot.lane.b32.xlu0 %v12936_v21, %s10942_s25  ;;  %v13053_v45 = vpack.c.b16 %v4076_v47, %v4075_v10  ;;  %v3971_v9 = vor.u32 %v3970_v29, %v3969_v50  ;;  %v9347_v38 = vrot.slane %v2896_v60, 11  ;;  %v2906_v7 = vor.u32 %v2904_v22, %v2903_v24  ;;  %v2438_v10 = vld [vmem:[#allocation3 + $0xe0] sm:$0x8] }
 0x207   : > { %v2368_v6 = vmax.f32 %v2336_v30, 0.0  ;;  %v2486_v30 = vld [vmem:[#allocation3 + $0xec] sm:$0x1]  ;;  %v2908_v47 = vrot.slane %v2903_v24, 4  ;;  %v2439_v39 = vsel %vm12177_vm4, 0, %v2438_v10  ;;  %v1677_v29 = vadd.f32 %v1676_v61, %v1547_v1 }
 0x208   : > { %v13048_v25 = vpop.permute.xlu2 %4145  ;;  %v3329_v27 = vpop.permute.xlu0 %3328  ;;  %v3972_v37 = vrot.slane %v3971_v9, 4  ;;  %v2487_v22 = vsel %vm12212_vm9, 0, %v2486_v30  ;;  %2440 = vst [vmem:[#allocation3 + $0xe0] sm:$0x8] %v2439_v39  ;;  %v3154_v24 = vsel %vm3145_vm5, %v12398_v53, %v12959_v14  ;;  %v2907_v9 = vsel %vm11095_vm8, %v9347_v38, %v2906_v7  ;;  %v2614_v7 = vld [vmem:[#allocation3 + $0xdc] sm:$0xf] }
 0x209   : > { %v2519_v18 = vpack.c.bf16 %v2368_v6, %v2368_v6  ;;  %v3401_v57 = vsel %vm3145_vm5, %v10865_v34, %v3329_v27  ;;  %v13051_v5 = vld [vmem:[#allocation3 + $0xc4] sm:$0xff]  ;;  %v1549_v6 = vpop.f32.mrf.mxu0  ;;  %2488 = vst [vmem:[#allocation3 + $0xec] sm:$0x1] %v2487_v22  ;;  %v3051_v38 = vunpack.c.l.b16 %v2907_v9  ;;  %v2611_v30 = vld [vmem:[#allocation3 + $0xd0] sm:$0xf] }
 0x20a   : > { %v2258_v21 = vpop.f32.mrf.mxu2  ;;  %v2609_v11 = vld [vmem:[#allocation3 + $0xc8] sm:$0xf]  ;;  %v3446_v15 = vsel %vm3194_vm10, %v3401_v57, %v13016_v32  ;;  %v4224_v57 = vsel %vm3194_vm10, %v4179_v23, %v12988_v55  ;;  %v2918_v22 = vshrl.u32 %v2611_v30, 16 }
 0x20b   : > { %2551 = vst.msk [vmem:[#allocation3 + $0xd4] sm:$0xf] %vm2381_vm2, %v2519_v18  ;;  %v2301_v43 = vadd.f32 %v2258_v21, %v1674_v62  ;;  %v2910_v49 = vshrl.u32 %v2609_v11, 16  ;;  %v2913_v42 = vshll.u32 %v2609_v11, 16  ;;  %9463 = vmatmul.msk.bf16.gmra.mxu3 %vm3522_vm12, %v3446_v15  ;;  %3381 = vrot.lane.b32.xlu1 %v13051_v5, %s10943_s21  ;;  %v1678_v18 = vpop.f32.mrf.mxu1 }
 0x20c   : > { %v13070_v33 = vpop.permute.xlu1 %3367 }
 0x20d   : > { %v2337_v54 = vadd.f32 %v12683_v17, %v2301_v43  ;;  %v3973_v26 = vrot.slane %v2913_v42, 5  ;;  %v3975_v63 = vrot.slane %v2910_v49, 4  ;;  %v2912_v32 = vrot.slane %v2910_v49, 7 }
 0x20e   : > { %4157 = vrot.lane.b32.xlu2 %v13053_v45, %s10943_s21  ;;  %3131 = vrot.lane.b32.xlu0 %v13055_v59, %s10943_s21 }
 0x20f   : > { %v2369_v50 = vmax.f32 %v2337_v54, 0.0  ;;  %v3976_v62 = vor.u32 %v3975_v63, %v3973_v26  ;;  %v2915_v44 = vor.u32 %v2913_v42, %v2912_v32  ;;  %v3974_v11 = vsel %vm11157_vm11, %v3972_v37, %v3973_v26 }
 0x210   : > { %v13076_v60 = vpop.permute.xlu2 %3086  ;;  %v3118_v34 = vpop.permute.xlu0 %3117  ;;  %v4077_v23 = vunpack.c.l.b16 %v3974_v11  ;;  %v1679_v37 = vadd.f32 %v1678_v18, %v1549_v6 }
 0x211   : > { %v2520_v27 = vpack.c.bf16 %v2369_v50, %v2369_v50  ;;  %v3977_v21 = vrot.slane %v3976_v62, 4  ;;  %v3200_v1 = vsel %vm3194_vm10, %v3154_v24, %v3118_v34  ;;  %v2916_v43 = vsel %vm11095_vm8, %v2908_v47, %v2915_v44  ;;  %v1552_v62 = vpop.f32.mrf.mxu0  ;;  %v10866_v44 = vld [vmem:[#allocation3 + $0x34] sm:$0xff] }
 0x212   : > { %v2261_v61 = vpop.f32.mrf.mxu2  ;;  %v2612_v15 = vld [vmem:[#allocation3 + $0xd4] sm:$0xf]  ;;  %9503 = vmatmul.msk.bf16.gmra.mxu0 %vm3522_vm12, %v3200_v1  ;;  %9555 = vmatmul.msk.bf16.gmra.mxu1 %vm3522_vm12, %v4224_v57 }
 0x213   : > { %2552 = vst.msk [vmem:[#allocation3 + $0xd8] sm:$0xf] %vm2381_vm2, %v2520_v27  ;;  %v2302_v53 = vadd.f32 %v2261_v61, %v1677_v29  ;;  %v3982_v14 = vsel %vm11157_vm11, %v3977_v21, %v3981_v58  ;;  %v2923_v55 = vshrl.u32 %v2612_v15, 16  ;;  %v2926_v49 = vshll.u32 %v2612_v15, 16  ;;  %4124 = vrot.lane.b32.xlu1 %v13053_v45, %s10942_s25  ;;  %v1681_v1 = vpop.f32.mrf.mxu1 }
 0x214   : > { %v4111_v10 = vpop.permute.xlu1 %4110  ;;  %v4078_v54 = vunpack.c.l.b16 %v3982_v14  ;;  %v3052_v58 = vunpack.c.l.b16 %v2916_v43  ;;  %v9348_v14 = vrot.slane %v2918_v22, 11 }
 0x215   : > { %v2338_v42 = vadd.f32 %v12683_v17, %v2302_v53  ;;  %v3983_v26 = vrot.slane %v2923_v55, 4  ;;  %v3984_v63 = vrot.slane %v2926_v49, 5  ;;  %v3993_v17 = vshll.u32 %v2614_v7, 16 }
 0x216   : > { %3098 = vrot.lane.b32.xlu2 %v13055_v59, %s10942_s25  ;;  %3344 = vrot.lane.b32.xlu0 %v12995_v28, %s10942_s25  ;;  %v2925_v39 = vrot.slane %v2923_v55, 7  ;;  %v13107_v57 = vpack.c.b16 %v4078_v54, %v4077_v23  ;;  %v13109_v21 = vpack.c.b16 %v3052_v58, %v3051_v38  ;;  %v4182_v15 = vsel %vm3145_vm5, %v12520_v41, %v4111_v10  ;;  %v2441_v23 = vld [vmem:[#allocation3 + $0xf0] sm:$0x8]  ;;  %v13122_v38 = vld [vmem:[%s15444_s7] ss:$0 sm:$0xff] }
 0x217   : > { %v2370_v32 = vmax.f32 %v2338_v42, 0.0  ;;  %v3985_v18 = vor.u32 %v3984_v63, %v3983_v26  ;;  %v3995_v53 = vrot.slane %v3993_v17, 5  ;;  %v2489_v42 = vld [vmem:[#allocation3 + $0xfc] sm:$0x1]  ;;  %v2442_v26 = vsel %vm12177_vm4, 0, %v2441_v23 }
 0x218   : > { %v13102_v47 = vpop.permute.xlu2 %4147  ;;  %v3331_v29 = vpop.permute.xlu0 %3330  ;;  %v2928_v55 = vor.u32 %v2926_v49, %v2925_v39  ;;  %v2930_v54 = vrot.slane %v2925_v39, 4  ;;  %v2490_v58 = vsel %vm12212_vm9, 0, %v2489_v42  ;;  %2443 = vst [vmem:[#allocation3 + $0xf0] sm:$0x8] %v2442_v26  ;;  %v2618_v42 = vld [vmem:[#allocation3 + $0xec] sm:$0xf] }
 0x219   : > { %v2521_v50 = vpack.c.bf16 %v2370_v32, %v2370_v32  ;;  %v3404_v24 = vsel %vm3145_vm5, %v10866_v44, %v3331_v29  ;;  %v3986_v49 = vrot.slane %v3985_v18, 4  ;;  %v1682_v32 = vadd.f32 %v1681_v1, %v1552_v62  ;;  %2491 = vst [vmem:[#allocation3 + $0xfc] sm:$0x1] %v2490_v58 }
 0x21a   : > { %v2263_v27 = vpop.f32.mrf.mxu2  ;;  %v13105_v34 = vld [vmem:[#allocation3 + $0xd4] sm:$0xff]  ;;  %v3448_v11 = vsel %vm3194_vm10, %v3404_v24, %v13070_v33  ;;  %v4226_v44 = vsel %vm3194_vm10, %v4182_v15, %v13048_v25  ;;  %v2929_v1 = vsel %vm11095_vm8, %v9348_v14, %v2928_v55  ;;  %v4007_v26 = vshll.u32 %v2618_v42, 16 }
 0x21b   : > { %v2613_v6 = vld [vmem:[#allocation3 + $0xd8] sm:$0xf]  ;;  %2553 = vst.msk [vmem:[#allocation3 + $0xe4] sm:$0xf] %vm2381_vm2, %v2521_v50  ;;  %v2303_v61 = vadd.f32 %v2263_v27, %v1679_v37  ;;  %9464 = vmatmul.msk.bf16.gmra.mxu3 %vm3522_vm12, %v3448_v11  ;;  %3383 = vrot.lane.b32.xlu1 %v13105_v34, %s10943_s21  ;;  %v3157_v50 = vsel %vm3145_vm5, %v12489_v13, %v13024_v3  ;;  %v3053_v14 = vunpack.c.l.b16 %v2929_v1 }
 0x21c   : > { %v2932_v9 = vshrl.u32 %v2613_v6, 16  ;;  %v2935_v43 = vshll.u32 %v2613_v6, 16  ;;  %v13129_v10 = vpop.permute.xlu1 %3369 }
 0x21d   : > { %v2339_v33 = vadd.f32 %v13122_v38, %v2303_v61 }
 0x21e   : > { %v3987_v7 = vrot.slane %v2935_v43, 5  ;;  %v3989_v30 = vrot.slane %v2932_v9, 4  ;;  %v2934_v41 = vrot.slane %v2932_v9, 7  ;;  %4159 = vrot.lane.b32.xlu2 %v13107_v57, %s10943_s21  ;;  %3133 = vrot.lane.b32.xlu0 %v13109_v21, %s10943_s21  ;;  %v1554_v9 = vpop.f32.mrf.mxu0 }
 0x21f   : > { %v2371_v63 = vmax.f32 %v2339_v33, 0.0 }
 0x220   : > { %v3990_v37 = vor.u32 %v3989_v30, %v3987_v7  ;;  %v2937_v17 = vor.u32 %v2935_v43, %v2934_v41  ;;  %v13135_v22 = vpop.permute.xlu2 %3088  ;;  %v3120_v39 = vpop.permute.xlu0 %3119  ;;  %v3988_v62 = vsel %vm11157_vm11, %v3986_v49, %v3987_v7  ;;  %v2615_v41 = vld [vmem:[#allocation3 + $0xe0] sm:$0xf] }
 0x221   : > { %v2522_v29 = vpack.c.bf16 %v2371_v63, %v2371_v63  ;;  %v3202_v27 = vsel %vm3194_vm10, %v3157_v50, %v3120_v39  ;;  %v1683_v43 = vpop.f32.mrf.mxu1  ;;  %v10868_v50 = vld [vmem:[#allocation3 + $0x44] sm:$0xff] }
 0x222   : > { %v3991_v24 = vrot.slane %v3990_v37, 4  ;;  %v2266_v6 = vpop.f32.mrf.mxu2  ;;  %v2938_v18 = vsel %vm11095_vm8, %v2930_v54, %v2937_v17  ;;  %v2616_v61 = vld [vmem:[#allocation3 + $0xe4] sm:$0xf]  ;;  %9504 = vmatmul.msk.bf16.gmra.mxu0 %vm3522_vm12, %v3202_v27  ;;  %9556 = vmatmul.msk.bf16.gmra.mxu1 %vm3522_vm12, %v4226_v44  ;;  %v1684_v54 = vadd.f32 %v1683_v43, %v1554_v9  ;;  %v2940_v17 = vshrl.u32 %v2615_v41, 16 }
 0x223   : > { %2554 = vst.msk [vmem:[#allocation3 + $0xe8] sm:$0xf] %vm2381_vm2, %v2522_v29  ;;  %v2304_v13 = vadd.f32 %v2266_v6, %v1682_v32  ;;  %v2945_v25 = vshrl.u32 %v2616_v61, 16  ;;  %v2948_v11 = vshll.u32 %v2616_v61, 16  ;;  %4126 = vrot.lane.b32.xlu1 %v13107_v57, %s10942_s25  ;;  %v3054_v55 = vunpack.c.l.b16 %v2938_v18 }
 0x224   : > { %v3996_v3 = vsel %vm11157_vm11, %v3991_v24, %v3995_v53  ;;  %v4113_v23 = vpop.permute.xlu1 %4112  ;;  %v4079_v53 = vunpack.c.l.b16 %v3988_v62  ;;  %v9349_v42 = vrot.slane %v2940_v17, 11 }
 0x225   : > { %v2340_v15 = vadd.f32 %v13122_v38, %v2304_v13  ;;  %v4080_v33 = vunpack.c.l.b16 %v3996_v3  ;;  %v3997_v7 = vrot.slane %v2945_v25, 4  ;;  %v3998_v30 = vrot.slane %v2948_v11, 5 }
 0x226   : > { %3100 = vrot.lane.b32.xlu2 %v13109_v21, %s10942_s25  ;;  %3346 = vrot.lane.b32.xlu0 %v13051_v5, %s10942_s25  ;;  %v13163_v37 = vpack.c.b16 %v3054_v55, %v3053_v14  ;;  %v2947_v62 = vrot.slane %v2945_v25, 7  ;;  %v4009_v3 = vrot.slane %v4007_v26, 5  ;;  %v4185_v25 = vsel %vm3145_vm5, %v12578_v40, %v4113_v23 }
 0x227   : > { %v2372_v49 = vmax.f32 %v2340_v15, 0.0  ;;  %v13168_v24 = vpack.c.b16 %v4080_v33, %v4079_v53  ;;  %v3999_v6 = vor.u32 %v3998_v30, %v3997_v7  ;;  %v3160_v40 = vsel %vm3145_vm5, %v12580_v35, %v13076_v60 }
 0x228   : > { %v13161_v58 = vpop.permute.xlu2 %4149  ;;  %v3333_v32 = vpop.permute.xlu0 %3332  ;;  %v2950_v53 = vor.u32 %v2948_v11, %v2947_v62  ;;  %v2952_v30 = vrot.slane %v2947_v62, 4 }
 0x229   : > { %v2523_v63 = vpack.c.bf16 %v2372_v49, %v2372_v49  ;;  %v3407_v29 = vsel %vm3145_vm5, %v10868_v50, %v3333_v32  ;;  %v4000_v55 = vrot.slane %v3999_v6, 4  ;;  %v4228_v32 = vsel %vm3194_vm10, %v4185_v25, %v13102_v47  ;;  %v10869_v25 = vld [vmem:[#allocation3 + $0x54] sm:$0xff] }
 0x22a   : > { %v2268_v39 = vpop.f32.mrf.mxu2  ;;  %v13166_v44 = vld [vmem:[#allocation3 + $0xe4] sm:$0xff]  ;;  %v3450_v18 = vsel %vm3194_vm10, %v3407_v29, %v13129_v10  ;;  %v2951_v17 = vsel %vm11095_vm8, %v9349_v42, %v2950_v53 }
 0x22b   : > { %v2617_v27 = vld [vmem:[#allocation3 + $0xe8] sm:$0xf]  ;;  %2555 = vst.msk [vmem:[#allocation3 + $0xf4] sm:$0xf] %vm2381_vm2, %v2523_v63  ;;  %v2305_v1 = vadd.f32 %v2268_v39, %v1684_v54  ;;  %9465 = vmatmul.msk.bf16.gmra.mxu3 %vm3522_vm12, %v3450_v18  ;;  %3385 = vrot.lane.b32.xlu1 %v13166_v44, %s10943_s21  ;;  %v3055_v62 = vunpack.c.l.b16 %v2951_v17  ;;  %v2622_v18 = vld [vmem:[#allocation3 + $0xfc] sm:$0xf] }
 0x22c   : > { %v2954_v61 = vshrl.u32 %v2617_v27, 16  ;;  %v2957_v13 = vshll.u32 %v2617_v27, 16  ;;  %v3372_v10 = vpop.permute.xlu1 %3371 }
 0x22d   : > { %v2341_v9 = vadd.f32 %v13122_v38, %v2305_v1 }
 0x22e   : > { %v4001_v43 = vrot.slane %v2957_v13, 5  ;;  %v4003_v15 = vrot.slane %v2954_v61, 4  ;;  %v2956_v14 = vrot.slane %v2954_v61, 7  ;;  %4161 = vrot.lane.b32.xlu2 %v13168_v24, %s10943_s21  ;;  %3135 = vrot.lane.b32.xlu0 %v13163_v37, %s10943_s21  ;;  %v2619_v61 = vld [vmem:[#allocation3 + $0xf0] sm:$0xf] }
 0x22f   : > { %v2373_v33 = vmax.f32 %v2341_v9, 0.0 }
 0x230   : > { %v4004_v7 = vor.u32 %v4003_v15, %v4001_v43  ;;  %v2959_v41 = vor.u32 %v2957_v13, %v2956_v14  ;;  %v13183_v49 = vpop.permute.xlu2 %3090  ;;  %v3122_v54 = vpop.permute.xlu0 %3121  ;;  %v4002_v11 = vsel %vm11157_vm11, %v4000_v55, %v4001_v43  ;;  %v4021_v15 = vshll.u32 %v2622_v18, 16 }
 0x231   : > { %v2524_v23 = vpack.c.bf16 %v2373_v33, %v2373_v33  ;;  %v3204_v63 = vsel %vm3194_vm10, %v3160_v40, %v3122_v54  ;;  %v4081_v27 = vunpack.c.l.b16 %v4002_v11  ;;  %v2962_v14 = vshrl.u32 %v2619_v61, 16 }
 0x232   : > { %v4005_v26 = vrot.slane %v4004_v7, 4  ;;  %v2620_v50 = vld [vmem:[#allocation3 + $0xf4] sm:$0xf]  ;;  %9505 = vmatmul.msk.bf16.gmra.mxu0 %vm3522_vm12, %v3204_v63  ;;  %9557 = vmatmul.msk.bf16.gmra.mxu1 %vm3522_vm12, %v4228_v32  ;;  %v2960_v60 = vsel %vm11095_vm8, %v2952_v30, %v2959_v41  ;;  %v4023_v17 = vrot.slane %v4021_v15, 5 }
 0x233   : > { %2556 = vst.msk [vmem:[#allocation3 + $0xf8] sm:$0xf] %vm2381_vm2, %v2524_v23  ;;  %v2967_v47 = vshrl.u32 %v2620_v50, 16  ;;  %v2970_v29 = vshll.u32 %v2620_v50, 16  ;;  %4128 = vrot.lane.b32.xlu1 %v13168_v24, %s10942_s25  ;;  %v3056_v1 = vunpack.c.l.b16 %v2960_v60  ;;  %v9350_v50 = vrot.slane %v2962_v14, 11 }
 0x234   : > { %v4010_v35 = vsel %vm11157_vm11, %v4005_v26, %v4009_v3  ;;  %v4115_v39 = vpop.permute.xlu1 %4114 }
 0x235   : > { %v4082_v6 = vunpack.c.l.b16 %v4010_v35  ;;  %v4011_v13 = vrot.slane %v2967_v47, 4  ;;  %v4012_v3 = vrot.slane %v2970_v29, 5  ;;  %v13215_v33 = vpack.c.b16 %v3056_v1, %v3055_v62 }
 0x236   : > { %3102 = vrot.lane.b32.xlu2 %v13163_v37, %s10942_s25  ;;  %3348 = vrot.lane.b32.xlu0 %v13105_v34, %s10942_s25  ;;  %v2969_v30 = vrot.slane %v2967_v47, 7  ;;  %v4188_v11 = vsel %vm3145_vm5, %v12633_v16, %v4115_v39  ;;  %v3163_v1 = vsel %vm3145_vm5, %v12635_v51, %v13135_v22 }
 0x237   : > { %v13213_v53 = vpack.c.b16 %v4082_v6, %v4081_v27  ;;  %v4013_v54 = vor.u32 %v4012_v3, %v4011_v13  ;;  %v4230_v61 = vsel %vm3194_vm10, %v4188_v11, %v13161_v58 }
 0x238   : > { %v13208_v9 = vpop.permute.xlu2 %4151  ;;  %v3335_v43 = vpop.permute.xlu0 %3334  ;;  %v2972_v35 = vor.u32 %v2970_v29, %v2969_v30  ;;  %v2974_v27 = vrot.slane %v2969_v30, 4 }
 0x239   : > { %v3410_v55 = vsel %vm3145_vm5, %v10869_v25, %v3335_v43  ;;  %v4014_v60 = vrot.slane %v4013_v54, 4 }
 0x23a   : > { %v13211_v42 = vld [vmem:[#allocation3 + $0xf4] sm:$0xff]  ;;  %v3452_v41 = vsel %vm3194_vm10, %v3410_v55, %v3372_v10  ;;  %v2973_v13 = vsel %vm11095_vm8, %v9350_v50, %v2972_v35  ;;  %v13270_v50 = vpop.f32.mrf.mxu0 }
 0x23b   : > { %v2621_v7 = vld [vmem:[#allocation3 + $0xf8] sm:$0xf]  ;;  %9466 = vmatmul.msk.bf16.gmra.mxu3 %vm3522_vm12, %v3452_v41  ;;  %3387 = vrot.lane.b32.xlu1 %v13211_v42, %s10943_s21  ;;  %v3057_v15 = vunpack.c.l.b16 %v2973_v13 }
 0x23c   : > { %v2976_v40 = vshrl.u32 %v2621_v7, 16  ;;  %v2979_v23 = vshll.u32 %v2621_v7, 16  ;;  %v3374_v10 = vpop.permute.xlu1 %3373  ;;  %v10870_v7 = vld [vmem:[#allocation3 + $0x64] sm:$0xff] }
 0x23e   : > { %v4015_v26 = vrot.slane %v2979_v23, 5  ;;  %v4017_v63 = vrot.slane %v2976_v40, 4  ;;  %v2978_v32 = vrot.slane %v2976_v40, 7  ;;  %4163 = vrot.lane.b32.xlu2 %v13213_v53, %s10943_s21  ;;  %3137 = vrot.lane.b32.xlu0 %v13215_v33, %s10943_s21 }
 0x240   : > { %v4018_v47 = vor.u32 %v4017_v63, %v4015_v26  ;;  %v2981_v6 = vor.u32 %v2979_v23, %v2978_v32  ;;  %v3093_v62 = vpop.permute.xlu2 %3092  ;;  %v3124_v16 = vpop.permute.xlu0 %3123  ;;  %v4016_v29 = vsel %vm11157_vm11, %v4014_v60, %v4015_v26  ;;  %v3166_v63 = vsel %vm3145_vm5, %v12701_v8, %v13183_v49  ;;  %v10871_v49 = vld [vmem:[#allocation3 + $0x74] sm:$0xff] }
 0x241   : > { %v3206_v18 = vsel %vm3194_vm10, %v3163_v1, %v3124_v16  ;;  %v4083_v3 = vunpack.c.l.b16 %v4016_v29  ;;  %v15483_v16 = vld [vmem:[#allocation15_spill] sm:$0xff] }
 0x242   : > { %v4019_v39 = vrot.slane %v4018_v47, 4  ;;  %9506 = vmatmul.msk.bf16.gmra.mxu0 %vm3522_vm12, %v3206_v18  ;;  %9558 = vmatmul.msk.bf16.gmra.mxu1 %vm3522_vm12, %v4230_v61  ;;  %v2982_v22 = vsel %vm11095_vm8, %v2974_v27, %v2981_v6  ;;  %v13279_v47 = vpop.f32.mrf.mxu1  ;;  %v13283_v1 = vpop.f32.mrf.mxu0 }
 0x243   : > { %4130 = vrot.lane.b32.xlu1 %v13213_v53, %s10942_s25  ;;  %v3058_v14 = vunpack.c.l.b16 %v2982_v22 }
 0x244   : > { %v4024_v51 = vsel %vm11157_vm11, %v4019_v39, %v4023_v17  ;;  %v4117_v58 = vpop.permute.xlu1 %4116  ;;  %v3169_v39 = vsel %vm3145_vm5, %v15483_v16, %v3093_v62  ;;  %v2492_v16 = vld [vmem:[#allocation3 + $0x10c] sm:$0x1] }
 0x245   : > { %v4084_v43 = vunpack.c.l.b16 %v4024_v51  ;;  %v13252_v40 = vpack.c.b16 %v3058_v14, %v3057_v15  ;;  %v4191_v26 = vsel %vm3145_vm5, %v12699_v46, %v4117_v58  ;;  %v10872_v15 = vld [vmem:[#allocation3 + $0x84] sm:$0xff] }
 0x246   : > { %3104 = vrot.lane.b32.xlu2 %v13215_v33, %s10942_s25  ;;  %3350 = vrot.lane.b32.xlu0 %v13166_v44, %s10942_s25 }
 0x247   : > { %v13250_v41 = vpack.c.b16 %v4084_v43, %v4083_v3 }
 0x248   : > { %v4154_v25 = vpop.permute.xlu2 %4153  ;;  %v3337_v55 = vpop.permute.xlu0 %3336 }
 0x249   : > { %v3413_v30 = vsel %vm3145_vm5, %v10870_v7, %v3337_v55 }
 0x24a   : > { %v3454_v23 = vsel %vm3194_vm10, %v3413_v30, %v3374_v10  ;;  %v4232_v10 = vsel %vm3194_vm10, %v4191_v26, %v13208_v9  ;;  %v13291_v58 = vpop.f32.mrf.mxu1 }
 0x24b   : > { %9467 = vmatmul.msk.bf16.gmra.mxu3 %vm3522_vm12, %v3454_v23 }
 0x24c   : > { %v3376_v54 = vpop.permute.xlu1 %3375 }
 0x24e   : > { %4165 = vrot.lane.b32.xlu2 %v13250_v41, %s10943_s21  ;;  %3139 = vrot.lane.b32.xlu0 %v13252_v40, %s10943_s21 }
 0x250   : > { %v3126_v32 = vpop.permute.xlu0 %3125  ;;  %v3095_v17 = vpop.permute.xlu2 %3094 }
 0x251   : > { %v3208_v11 = vsel %vm3194_vm10, %v3166_v63, %v3126_v32  ;;  %v3172_v26 = vsel %vm3145_vm5, %v12863_v31, %v3095_v17 }
 0x252   : > { %9507 = vmatmul.msk.bf16.gmra.mxu0 %vm3522_vm12, %v3208_v11  ;;  %9559 = vmatmul.msk.bf16.gmra.mxu1 %vm3522_vm12, %v4232_v10 }
 0x254   : > { %v4119_v46 = vpop.permute.xlu1 %4118 }
 0x255   : > { %v4194_v6 = vsel %vm3145_vm5, %v12763_v12, %v4119_v46 }
 0x256   : > { %3106 = vrot.lane.b32.xlu2 %v13252_v40, %s10942_s25  ;;  %3352 = vrot.lane.b32.xlu0 %v13211_v42, %s10942_s25  ;;  %v4234_v13 = vsel %vm3194_vm10, %v4194_v6, %v4154_v25 }
 0x258   : > { %v3339_v8 = vpop.permute.xlu0 %3338  ;;  %v4156_v60 = vpop.permute.xlu2 %4155 }
 0x259   : > { %v3416_v35 = vsel %vm3145_vm5, %v10871_v49, %v3339_v8 }
 0x25a   : > { %v3456_v9 = vsel %vm3194_vm10, %v3416_v35, %v3376_v54  ;;  %v2444_v54 = vld [vmem:[#allocation3 + $0x100] sm:$0x8] }
 0x25b   : > { %9468 = vmatmul.msk.bf16.gmra.mxu3 %vm3522_vm12, %v3456_v9  ;;  %v2445_v10 = vsel %vm12177_vm4, 0, %v2444_v54 }
 0x25c   : > { %v3378_v27 = vpop.permute.xlu1 %3377  ;;  %2446 = vst [vmem:[#allocation3 + $0x100] sm:$0x8] %v2445_v10 }
 0x260   : > { %v3128_v18 = vpop.permute.xlu0 %3127  ;;  %v3097_v22 = vpop.permute.xlu2 %3096 }
 0x261   : > { %v3210_v61 = vsel %vm3194_vm10, %v3169_v39, %v3128_v18  ;;  %v10873_v18 = vld [vmem:[#allocation3 + $0x94] sm:$0xff] }
 0x262   : > { %9508 = vmatmul.msk.bf16.gmra.mxu0 %vm3522_vm12, %v3210_v61  ;;  %9560 = vmatmul.msk.bf16.gmra.mxu1 %vm3522_vm12, %v4234_v13  ;;  %v3564_v29 = vpop.f32.mrf.mxu3 }
 0x264   : > { %v4121_v51 = vpop.permute.xlu1 %4120 }
 0x265   : > { %v4197_v55 = vsel %vm3145_vm5, %v12861_v4, %v4121_v51 }
 0x266   : > { %v4236_v8 = vsel %vm3194_vm10, %v4197_v55, %v4156_v60  ;;  %v2493_v60 = vsel %vm12212_vm9, 0, %v2492_v16  ;;  %v1687_v55 = vadd.f32 %v13279_v47, %v13270_v50 }
 0x267   : > { %v3721_v12 = vpop.f32.mrf.mxu0  ;;  %2494 = vst [vmem:[#allocation3 + $0x10c] sm:$0x1] %v2493_v60 }
 0x268   : > { %v3722_v3 = vadd.f32 %v3721_v12, %v3564_v29  ;;  %v3341_v43 = vpop.permute.xlu0 %3340  ;;  %v4158_v63 = vpop.permute.xlu2 %4157 }
 0x269   : > { %v3419_v62 = vsel %vm3145_vm5, %v10872_v15, %v3341_v43  ;;  %v3175_v43 = vsel %vm3145_vm5, %v12933_v0, %v3097_v22  ;;  %v2390_v22 = vld [vmem:[#allocation3 + $0x110] sm:$0x8] }
 0x26a   : > { %v3458_v14 = vsel %vm3194_vm10, %v3419_v62, %v3378_v27  ;;  %v3566_v7 = vpop.f32.mrf.mxu3  ;;  %v2391_v10 = vsel %vm12177_vm4, 0, %v2390_v22 }
 0x26b   : > { %9469 = vmatmul.msk.bf16.gmra.mxu3 %vm3522_vm12, %v3458_v14  ;;  %2392 = vst [vmem:[#allocation3 + $0x110] sm:$0x8] %v2391_v10 }
 0x26c   : > { %v3380_v25 = vpop.permute.xlu1 %3379 }
 0x26e   : > { %v2626_v10 = vld [vmem:[#allocation3 + $0x10c] sm:$0xf] }
 0x26f   : > { %v3723_v30 = vpop.f32.mrf.mxu0  ;;  %v4341_v23 = vpop.f32.mrf.mxu1 }
 0x270   : > { %v13300_v32 = vadd.f32 %v4341_v23, %v3722_v3  ;;  %v3130_v11 = vpop.permute.xlu0 %3129  ;;  %v3724_v49 = vadd.f32 %v3723_v30, %v3566_v7  ;;  %v3099_v39 = vpop.permute.xlu2 %3098 }
 0x271   : > { %v3212_v46 = vsel %vm3194_vm10, %v3172_v26, %v3130_v11 }
 0x272   : > { %9509 = vmatmul.msk.bf16.gmra.mxu0 %vm3522_vm12, %v3212_v46  ;;  %9561 = vmatmul.msk.bf16.gmra.mxu1 %vm3522_vm12, %v4236_v8  ;;  %v3569_v31 = vpop.f32.mrf.mxu3 }
 0x275   : > { %v4123_v4 = vpop.permute.xlu1 %4122 }
 0x276   : > { %v4200_v51 = vsel %vm3145_vm5, %v12938_v2, %v4123_v4  ;;  %v10874_v4 = vld [vmem:[#allocation3 + $0xa4] sm:$0xff] }
 0x277   : > { %v4343_v35 = vpop.f32.mrf.mxu1  ;;  %v4238_v62 = vsel %vm3194_vm10, %v4200_v51, %v4158_v63 }
 0x278   : > { %v13308_v17 = vadd.f32 %v4343_v35, %v3724_v49  ;;  %v3726_v9 = vpop.f32.mrf.mxu0  ;;  %v3343_v6 = vpop.permute.xlu0 %3342  ;;  %v1689_v49 = vadd.f32 %v13291_v58, %v13283_v1  ;;  %v3178_v1 = vsel %vm3145_vm5, %v12999_v36, %v3099_v39  ;;  %v2623_v36 = vld [vmem:[#allocation3 + $0x100] sm:$0xf] }
 0x279   : > { %v3727_v27 = vadd.f32 %v3726_v9, %v3569_v31  ;;  %v3422_v61 = vsel %vm3145_vm5, %v10873_v18, %v3343_v6  ;;  %v4160_v2 = vpop.permute.xlu2 %4159 }
 0x27a   : > { %v3460_v13 = vsel %vm3194_vm10, %v3422_v61, %v3380_v25  ;;  %v3571_v7 = vpop.f32.mrf.mxu3 }
 0x27b   : > { %9470 = vmatmul.msk.bf16.gmra.mxu3 %vm3522_vm12, %v3460_v13 }
 0x27d   : > { %v3382_v29 = vpop.permute.xlu1 %3381 }
 0x27f   : > { %v4346_v12 = vpop.f32.mrf.mxu1 }
 0x280   : > { %v13317_v3 = vadd.f32 %v4346_v12, %v3727_v27  ;;  %v3132_v15 = vpop.permute.xlu0 %3131  ;;  %v3728_v25 = vpop.f32.mrf.mxu0 }
 0x281   : > { %v3214_v14 = vsel %vm3194_vm10, %v3175_v43, %v3132_v15  ;;  %v3729_v54 = vadd.f32 %v3728_v25, %v3571_v7  ;;  %v3101_v27 = vpop.permute.xlu2 %3100 }
 0x282   : > { %9562 = vmatmul.msk.bf16.gmra.mxu1 %vm3522_vm12, %v4238_v62  ;;  %9510 = vmatmul.msk.bf16.gmra.mxu0 %vm3522_vm12, %v3214_v14 }
 0x285   : > { %v2271_v30 = vpop.f32.mrf.mxu2  ;;  %v4125_v23 = vpop.permute.xlu1 %4124 }
 0x286   : > { %v2306_v26 = vadd.f32 %v2271_v30, %v1687_v55  ;;  %v4203_v6 = vsel %vm3145_vm5, %v12997_v20, %v4125_v23  ;;  %v2984_v23 = vshrl.u32 %v2623_v36, 16 }
 0x287   : > { %v4348_v0 = vpop.f32.mrf.mxu1  ;;  %v4240_v51 = vsel %vm3194_vm10, %v4203_v6, %v4160_v2  ;;  %v13368_v6 = vld [vmem:[#allocation3 + $0x118] sm:$0xf] }
 0x288   : > { %v2342_v63 = vadd.f32 %v13122_v38, %v2306_v26  ;;  %v13328_v11 = vadd.f32 %v4348_v0, %v3729_v54  ;;  %v3345_v46 = vpop.permute.xlu0 %3344 }
 0x289   : > { %v3425_v50 = vsel %vm3145_vm5, %v10874_v4, %v3345_v46  ;;  %v4162_v7 = vpop.permute.xlu2 %4161  ;;  %v13360_v46 = vld [vmem:[#allocation3 + $0x114] sm:$0xf] }
 0x28a   : > { %v2374_v8 = vmax.f32 %v2342_v63, 0.0  ;;  %v3462_v47 = vsel %vm3194_vm10, %v3425_v50, %v3382_v29 }
 0x28b   : > { %9471 = vmatmul.msk.bf16.gmra.mxu3 %vm3522_vm12, %v3462_v47  ;;  %v9351_v47 = vrot.slane %v2984_v23, 11 }
 0x28c   : > { %v2525_v35 = vpack.c.bf16 %v2374_v8, %v2374_v8 }
 0x28d   : > { %v2273_v31 = vpop.f32.mrf.mxu2  ;;  %v3384_v9 = vpop.permute.xlu1 %3383 }
 0x28e   : > { %2557 = vst.msk [vmem:[#allocation3 + $0x104] sm:$0xf] %vm2381_vm2, %v2525_v35  ;;  %v2307_v16 = vadd.f32 %v2273_v31, %v1689_v49  ;;  %v3574_v18 = vpop.f32.mrf.mxu3 }
 0x28f   : > { %v3731_v61 = vpop.f32.mrf.mxu0  ;;  %v4351_v60 = vpop.f32.mrf.mxu1 }
 0x290   : > { %v2343_v13 = vadd.f32 %v13122_v38, %v2307_v16  ;;  %v3732_v29 = vadd.f32 %v3731_v61, %v3574_v18  ;;  %v3134_v58 = vpop.permute.xlu0 %3133  ;;  %v2395_v16 = vld [vmem:[#allocation3 + $0x11c] sm:$0x1] }
 0x291   : > { %v3216_v15 = vsel %vm3194_vm10, %v3178_v1, %v3134_v58  ;;  %v2396_v1 = vsel %vm12212_vm9, 0, %v2395_v16 }
 0x292   : > { %v2375_v12 = vmax.f32 %v2343_v13, 0.0  ;;  %v13344_v43 = vadd.f32 %v4351_v60, %v3732_v29  ;;  %9563 = vmatmul.msk.bf16.gmra.mxu1 %vm3522_vm12, %v4240_v51  ;;  %9511 = vmatmul.msk.bf16.gmra.mxu0 %vm3522_vm12, %v3216_v15  ;;  %v4035_v13 = vshll.u32 %v2626_v10, 16  ;;  %v3011_v29 = vshrl.u32 %v13360_v46, 16  ;;  %v2627_v15 = vld [vmem:[#allocation3 + $0x110] sm:$0xf] }
 0x293   : > { %2397 = vst [vmem:[#allocation3 + $0x11c] sm:$0x1] %v2396_v1  ;;  %v3014_v10 = vshll.u32 %v13360_v46, 16 }
 0x294   : > { %v2526_v20 = vpack.c.bf16 %v2375_v12, %v2375_v12 }
 0x295   : > { %v4127_v62 = vpop.permute.xlu1 %4126  ;;  %v2624_v14 = vld [vmem:[#allocation3 + $0x104] sm:$0xf] }
 0x296   : > { %2558 = vst.msk [vmem:[#allocation3 + $0x108] sm:$0xf] %vm2381_vm2, %v2526_v20  ;;  %v13350_v38 = vpop.f32.mrf.mxu3  ;;  %v2989_v39 = vshrl.u32 %v2624_v14, 16  ;;  %v2992_v2 = vshll.u32 %v2624_v14, 16  ;;  %v4206_v49 = vsel %vm3145_vm5, %v13053_v45, %v4127_v62  ;;  %v3181_v20 = vsel %vm3145_vm5, %v13055_v59, %v3101_v27 }
 0x297   : > { %v13352_v25 = vpop.f32.mrf.mxu0  ;;  %v13354_v55 = vpop.f32.mrf.mxu1  ;;  %v4242_v14 = vsel %vm3194_vm10, %v4206_v49, %v4162_v7  ;;  %v4037_v7 = vrot.slane %v4035_v13, 5 }
 0x298   : > { %v3347_v30 = vpop.permute.xlu0 %3346  ;;  %v2991_v26 = vrot.slane %v2989_v39, 7  ;;  %v4025_v22 = vrot.slane %v2989_v39, 4  ;;  %v4026_v63 = vrot.slane %v2992_v2, 5  ;;  %v3020_v39 = vshrl.u32 %v13368_v6, 16 }
 0x299   : > { %v3428_v54 = vsel %vm3145_vm5, %v12995_v28, %v3347_v30 }
 0x29a   : > { %v3464_v0 = vsel %vm3194_vm10, %v3428_v54, %v3384_v9  ;;  %v2994_v35 = vor.u32 %v2992_v2, %v2991_v26  ;;  %v4027_v60 = vor.u32 %v4026_v63, %v4025_v22  ;;  %v2996_v36 = vrot.slane %v2991_v26, 4  ;;  %v3103_v2 = vpop.permute.xlu2 %3102 }
 0x29b   : > { %9472 = vmatmul.msk.bf16.gmra.mxu3 %vm3522_vm12, %v3464_v0  ;;  %v3006_v26 = vshrl.u32 %v2627_v15, 16  ;;  %v3013_v63 = vrot.slane %v3011_v29, 7  ;;  %v3022_v16 = vrot.slane %v3020_v39, 7  ;;  %v2630_v15 = vld [vmem:[#allocation3 + $0x11c] sm:$0xf] }
 0x29c   : > { %v2995_v54 = vsel %vm11095_vm8, %v9351_v47, %v2994_v35  ;;  %v4028_v59 = vrot.slane %v4027_v60, 4 }
 0x29d   : > { %v13362_v8 = vpop.permute.xlu1 %3385  ;;  %v13364_v4 = vld [vmem:[#allocation3 + $0x104] sm:$0xff]  ;;  %v3075_v49 = vunpack.c.l.b16 %v2995_v54 }
 0x29e   : > { %v2625_v50 = vld [vmem:[#allocation3 + $0x108] sm:$0xf]  ;;  %v3579_v28 = vpop.f32.mrf.mxu3  ;;  %3389 = vrot.lane.b32.xlu1 %v13364_v4, %s10943_s21 }
 0x29f   : > { %v2998_v31 = vshrl.u32 %v2625_v50, 16  ;;  %v3001_v9 = vshll.u32 %v2625_v50, 16  ;;  %v3736_v18 = vpop.f32.mrf.mxu0  ;;  %v4356_v61 = vpop.f32.mrf.mxu1  ;;  %v3023_v50 = vshll.u32 %v13368_v6, 16 }
 0x2a0   : > { %v3737_v45 = vadd.f32 %v3736_v18, %v3579_v28  ;;  %v3136_v62 = vpop.permute.xlu0 %3135  ;;  %v4039_v18 = vrot.slane %v3011_v29, 4  ;;  %v3016_v29 = vor.u32 %v3014_v10, %v3013_v63 }
 0x2a1   : > { %v3000_v58 = vrot.slane %v2998_v31, 7  ;;  %v4029_v51 = vrot.slane %v3001_v9, 5  ;;  %v4031_v12 = vrot.slane %v2998_v31, 4  ;;  %v3218_v23 = vsel %vm3194_vm10, %v3181_v20, %v3136_v62 }
 0x2a2   : > { %v13379_v30 = vadd.f32 %v4356_v61, %v3737_v45  ;;  %9564 = vmatmul.msk.bf16.gmra.mxu1 %vm3522_vm12, %v4242_v14  ;;  %9512 = vmatmul.msk.bf16.gmra.mxu0 %vm3522_vm12, %v3218_v23  ;;  %v4040_v61 = vrot.slane %v3014_v10, 5  ;;  %v4043_v60 = vrot.slane %v3023_v50, 5  ;;  %v4045_v45 = vrot.slane %v3020_v39, 4 }
 0x2a3   : > { %v3003_v0 = vor.u32 %v3001_v9, %v3000_v58  ;;  %v4032_v27 = vor.u32 %v4031_v12, %v4029_v51  ;;  %v4030_v47 = vsel %vm11157_vm11, %v4028_v59, %v4029_v51  ;;  %v9352_v12 = vrot.slane %v3006_v26, 11 }
 0x2a4   : > { %v4101_v58 = vunpack.c.l.b16 %v4030_v47  ;;  %v4041_v62 = vor.u32 %v4040_v61, %v4039_v18  ;;  %v4046_v14 = vor.u32 %v4045_v45, %v4043_v60  ;;  %v3025_v59 = vor.u32 %v3023_v50, %v3022_v16 }
 0x2a5   : > { %v3004_v22 = vsel %vm11095_vm8, %v2996_v36, %v3003_v0  ;;  %v4033_v35 = vrot.slane %v4032_v27, 4  ;;  %v4129_v9 = vpop.permute.xlu1 %4128  ;;  %v4049_v36 = vshll.u32 %v2630_v15, 16  ;;  %v3018_v0 = vrot.slane %v3013_v63, 4  ;;  %v10616_v27 = vld [vmem:[#allocation3 + $0x114] sm:$0xff] }
 0x2a6   : > { %v3076_v28 = vunpack.c.l.b16 %v3004_v22  ;;  %v13392_v31 = vpop.f32.mrf.mxu3  ;;  %4132 = vrot.lane.b32.xlu1 %v13250_v41, %s10942_s25  ;;  %v3017_v26 = vsel %vm11095_vm8, %v9352_v12, %v3016_v29  ;;  %v4042_v22 = vrot.slane %v4041_v62, 4  ;;  %v4047_v10 = vrot.slane %v4046_v14, 4 }
 0x2a7   : > { %v13394_v13 = vpop.f32.mrf.mxu0  ;;  %v13396_v1 = vpop.f32.mrf.mxu1  ;;  %v4038_v6 = vsel %vm11157_vm11, %v4033_v35, %v4037_v7  ;;  %v3026_v50 = vsel %vm11095_vm8, %v3018_v0, %v3025_v59  ;;  %v3184_v47 = vsel %vm3145_vm5, %v13109_v21, %v3103_v2  ;;  %v3110_v16 = vunpack.c.l.b16 %v3017_v26 }
 0x2a8   : > { %v3077_v46 = vpack.c.b16 %v3076_v28, %v3075_v49  ;;  %v4102_v51 = vunpack.c.l.b16 %v4038_v6  ;;  %v3349_v20 = vpop.permute.xlu0 %3348  ;;  %v4164_v7 = vpop.permute.xlu2 %4163  ;;  %v4051_v49 = vrot.slane %v4049_v36, 5  ;;  %v4044_v6 = vsel %vm11157_vm11, %v4042_v22, %v4043_v60 }
 0x2a9   : > { %v3431_v23 = vsel %vm3145_vm5, %v13051_v5, %v3349_v20  ;;  %v4209_v5 = vsel %vm3145_vm5, %v13107_v57, %v4129_v9  ;;  %v3111_v9 = vunpack.c.l.b16 %v3026_v50 }
 0x2aa   : > { %3141 = vrot.lane.b32.xlu0 %v3077_v46, %s10943_s21  ;;  %v4103_v54 = vpack.c.b16 %v4102_v51, %v4101_v58  ;;  %v3466_v39 = vsel %vm3194_vm10, %v3431_v23, %v13362_v8  ;;  %v4244_v57 = vsel %vm3194_vm10, %v4209_v5, %v4164_v7  ;;  %v4052_v45 = vsel %vm11157_vm11, %v4047_v10, %v4051_v49  ;;  %v10845_v23 = vld [vmem:[%s15444_s7] ss:$0 sm:$0xff] }
 0x2ab   : > { %9473 = vmatmul.msk.bf16.gmra.mxu3 %vm3522_vm12, %v3466_v39  ;;  %v4137_v2 = vunpack.c.l.b16 %v4052_v45  ;;  %v3112_v51 = vpack.c.b16 %v3111_v9, %v3110_v16 }
 0x2ac   : > { %4167 = vrot.lane.b32.xlu2 %v4103_v54, %s10943_s21 }
 0x2ad   : > { %v3388_v18 = vpop.permute.xlu1 %3387 }
 0x2ae   : > { %v3584_v63 = vpop.f32.mrf.mxu3  ;;  %3391 = vrot.lane.b32.xlu1 %v10616_v27, %s10943_s21 }
 0x2af   : > { %v3741_v8 = vpop.f32.mrf.mxu0  ;;  %v4361_v28 = vpop.f32.mrf.mxu1 }
 0x2b0   : > { %v3742_v35 = vadd.f32 %v3741_v8, %v3584_v63  ;;  %v3138_v61 = vpop.permute.xlu0 %3137  ;;  %v3105_v12 = vpop.permute.xlu2 %3104 }
 0x2b1   : > { %v3220_v21 = vsel %vm3194_vm10, %v3184_v47, %v3138_v61 }
 0x2b2   : > { %3354 = vrot.lane.b32.xlu0 %v13364_v4, %s10942_s25  ;;  %v13425_v58 = vadd.f32 %v4361_v28, %v3742_v35  ;;  %9565 = vmatmul.msk.bf16.gmra.mxu1 %vm3522_vm12, %v4244_v57  ;;  %v4136_v4 = vunpack.c.l.b16 %v4044_v6 }
 0x2b3   : > { %9513 = vmatmul.msk.bf16.gmra.mxu0 %vm3522_vm12, %v3220_v21 }
 0x2b4   : > { %3108 = vrot.lane.b32.xlu2 %v3077_v46, %s10942_s25  ;;  %v4138_v29 = vpack.c.b16 %v4137_v2, %v4136_v4 }
 0x2b5   : > { %v4131_v46 = vpop.permute.xlu1 %4130 }
 0x2b6   : > { %v13431_v15 = vpop.f32.mrf.mxu3  ;;  %4134 = vrot.lane.b32.xlu1 %v4103_v54, %s10942_s25  ;;  %v4212_v54 = vsel %vm3145_vm5, %v13168_v24, %v4131_v46 }
 0x2b7   : > { %v13433_v60 = vpop.f32.mrf.mxu0  ;;  %v13435_v20 = vpop.f32.mrf.mxu1 }
 0x2b8   : > { %v3351_v62 = vpop.permute.xlu0 %3350  ;;  %v4166_v27 = vpop.permute.xlu2 %4165 }
 0x2b9   : > { %v3434_v14 = vsel %vm3145_vm5, %v13105_v34, %v3351_v62  ;;  %v3187_v34 = vsel %vm3145_vm5, %v13163_v37, %v3105_v12  ;;  %v4246_v22 = vsel %vm3194_vm10, %v4212_v54, %v4166_v27 }
 0x2ba   : > { %3143 = vrot.lane.b32.xlu0 %v3112_v51, %s10943_s21  ;;  %v3468_v36 = vsel %vm3194_vm10, %v3434_v14, %v3388_v18 }
 0x2bb   : > { %9474 = vmatmul.msk.bf16.gmra.mxu3 %vm3522_vm12, %v3468_v36 }
 0x2bc   : > { %4169 = vrot.lane.b32.xlu2 %v4138_v29, %s10943_s21 }
 0x2be   : > { %v3589_v0 = vpop.f32.mrf.mxu3 }
 0x2bf   : > { %v3746_v59 = vpop.f32.mrf.mxu0  ;;  %v4366_v39 = vpop.f32.mrf.mxu1 }
 0x2c0   : > { %v3747_v7 = vadd.f32 %v3746_v59, %v3589_v0  ;;  %v3140_v26 = vpop.permute.xlu0 %3139 }
 0x2c1   : > { %v3222_v49 = vsel %vm3194_vm10, %v3187_v34, %v3140_v26 }
 0x2c2   : > { %4456 = vrot.lane.b32.xlu0 %v10845_v23, %s10944_s13  ;;  %v13452_v10 = vadd.f32 %v4366_v39, %v3747_v7  ;;  %9566 = vmatmul.msk.bf16.gmra.mxu1 %vm3522_vm12, %v4246_v22  ;;  %v10646_v7 = vld [vmem:[%s15440_s3 + $0x58] sm:$0xff] }
 0x2c3   : > { %9514 = vmatmul.msk.bf16.gmra.mxu0 %vm3522_vm12, %v3222_v49  ;;  %5657 = vmatpush.bf16.msrb.mxu2 %v10646_v7  ;;  %v3107_v49 = vpop.permute.xlu2 %3106 }
 0x2c6   : > { %v13457_v24 = vpop.f32.mrf.mxu3 }
 0x2c7   : > { %v13459_v5 = vpop.f32.mrf.mxu0  ;;  %v13461_v63 = vpop.f32.mrf.mxu1 }
 0x2ce   : > { %v3594_v37 = vpop.f32.mrf.mxu3 }
 0x2cf   : > { %v3751_v50 = vpop.f32.mrf.mxu0  ;;  %v4371_v8 = vpop.f32.mrf.mxu1 }
 0x2d0   : > { %v3752_v28 = vadd.f32 %v3751_v50, %v3594_v37  ;;  %v3353_v37 = vpop.permute.xlu0 %3352 }
 0x2d2   : > { %v13463_v47 = vadd.f32 %v4371_v8, %v3752_v28 }
 0x2d6   : > { %v13465_v35 = vpop.f32.mrf.mxu3 }
 0x2d7   : > { %v13467_v16 = vpop.f32.mrf.mxu0  ;;  %v13469_v18 = vpop.f32.mrf.mxu1 }
 0x2de   : > { %v3599_v61 = vpop.f32.mrf.mxu3 }
 0x2df   : > { %v3756_v57 = vpop.f32.mrf.mxu0  ;;  %v4376_v9 = vpop.f32.mrf.mxu1 }
 0x2e0   : > { %v3757_v6 = vadd.f32 %v3756_v57, %v3599_v61  ;;  %v3437_v61 = vsel %vm3145_vm5, %v13166_v44, %v3353_v37  ;;  %v3190_v44 = vsel %vm3145_vm5, %v13215_v33, %v3107_v49 }
 0x2e2   : > { %v13471_v45 = vadd.f32 %v4376_v9, %v3757_v6 }
 0x2e6   : > { %v13473_v21 = vpop.f32.mrf.mxu3 }
 0x2e7   : > { %v13475_v4 = vpop.f32.mrf.mxu0  ;;  %v13477_v2 = vpop.f32.mrf.mxu1 }
 0x2ee   : > { %v3604_v51 = vpop.f32.mrf.mxu3 }
 0x2ef   : > { %v3761_v12 = vpop.f32.mrf.mxu0  ;;  %v4381_v29 = vpop.f32.mrf.mxu1 }
 0x2f0   : > { %v3762_v62 = vadd.f32 %v3761_v12, %v3604_v51 }
 0x2f2   : > { %v13479_v14 = vadd.f32 %v4381_v29, %v3762_v62 }
 0x2f6   : > { %v13481_v46 = vpop.f32.mrf.mxu3 }
 0x2f7   : > { %v13483_v36 = vpop.f32.mrf.mxu0  ;;  %v13485_v23 = vpop.f32.mrf.mxu1 }
 0x2fe   : > { %v3609_v54 = vpop.f32.mrf.mxu3 }
 0x2ff   : > { %v4386_v0 = vpop.f32.mrf.mxu1  ;;  %v3766_v59 = vpop.f32.mrf.mxu0 }
 0x300   : > { %v3767_v39 = vadd.f32 %v3766_v59, %v3609_v54 }
 0x302   : > { %v13487_v27 = vadd.f32 %v4386_v0, %v3767_v39 }
 0x306   : > { %v13492_v34 = vpop.f32.mrf.mxu3  ;;  %v4168_v12 = vpop.permute.xlu2 %4167 }
 0x307   : > { %v13494_v26 = vpop.f32.mrf.mxu1  ;;  %v13496_v22 = vpop.f32.mrf.mxu0 }
 0x30e   : > { %v3614_v50 = vpop.f32.mrf.mxu3 }
 0x30f   : > { %v4391_v8 = vpop.f32.mrf.mxu1  ;;  %v3771_v28 = vpop.f32.mrf.mxu0 }
 0x310   : > { %v3772_v57 = vadd.f32 %v3771_v28, %v3614_v50  ;;  %v3390_v9 = vpop.permute.xlu1 %3389 }
 0x311   : > { %v3470_v6 = vsel %vm3194_vm10, %v3437_v61, %v3390_v9 }
 0x312   : > { %v13501_v51 = vadd.f32 %v4391_v8, %v3772_v57  ;;  %9475 = vmatmul.msk.bf16.gmra.mxu3 %vm3522_vm12, %v3470_v6  ;;  %v3109_v57 = vpop.permute.xlu2 %3108 }
 0x316   : > { %v3616_v29 = vpop.f32.mrf.mxu3 }
 0x317   : > { %v4393_v62 = vpop.f32.mrf.mxu1  ;;  %v3773_v54 = vpop.f32.mrf.mxu0 }
 0x318   : > { %v3774_v0 = vadd.f32 %v3773_v54, %v3616_v29  ;;  %v4133_v59 = vpop.permute.xlu1 %4132 }
 0x319   : > { %v4215_v39 = vsel %vm3145_vm5, %v13213_v53, %v4133_v59 }
 0x31a   : > { %v13508_v7 = vadd.f32 %v4393_v62, %v3774_v0  ;;  %v4248_v50 = vsel %vm3194_vm10, %v4215_v39, %v4168_v12  ;;  %v4170_v59 = vpop.permute.xlu2 %4169 }
 0x31b   : > { %9567 = vmatmul.msk.bf16.gmra.mxu1 %vm3522_vm12, %v4248_v50  ;;  %v3193_v50 = vsel %vm3145_vm5, %v13252_v40, %v3109_v57  ;;  %v3744_v40 = vadd.f32 %v13433_v60, %v13431_v15  ;;  %v3749_v57 = vadd.f32 %v13459_v5, %v13457_v24  ;;  %v13552_v5 = vadd.f32 %v13483_v36, %v13481_v46 }
 0x31c   : > { %v3142_v37 = vpop.permute.xlu0 %3141 }
 0x31d   : > { %v3224_v8 = vsel %vm3194_vm10, %v3190_v44, %v3142_v37  ;;  %v4432_v15 = vadd.f32 %v13461_v63, %v3749_v57 }
 0x31e   : > { %9515 = vmatmul.msk.bf16.gmra.mxu0 %vm3522_vm12, %v3224_v8  ;;  %v3619_v28 = vpop.f32.mrf.mxu3 }
 0x31f   : > { %v4396_v61 = vpop.f32.mrf.mxu1  ;;  %v3776_v9 = vpop.f32.mrf.mxu0 }
 0x320   : > { %v3777_v6 = vadd.f32 %v3776_v9, %v3619_v28  ;;  %v3392_v53 = vpop.permute.xlu1 %3391  ;;  %v3734_v9 = vadd.f32 %v13352_v25, %v13350_v38 }
 0x322   : > { %v13514_v29 = vadd.f32 %v4396_v61, %v3777_v6  ;;  %v3754_v6 = vadd.f32 %v13467_v16, %v13465_v35  ;;  %v4426_v25 = vadd.f32 %v13354_v55, %v3734_v9  ;;  %v7993_v9 = vld [vmem:[#allocation7] sm:$0x8] }
 0x324   : > { %15484 = vst [vmem:[#allocation15_spill] sm:$0xff] %v13514_v29  ;;  %v3355_v33 = vpop.permute.xlu0 %3354  ;;  %v4434_v60 = vadd.f32 %v13469_v18, %v3754_v6 }
 0x325   : > { %v3440_v49 = vsel %vm3145_vm5, %v13211_v42, %v3355_v33 }
 0x326   : > { %v3472_v12 = vsel %vm3194_vm10, %v3440_v49, %v3392_v53  ;;  %v3621_v62 = vpop.f32.mrf.mxu3  ;;  %v3759_v53 = vadd.f32 %v13475_v4, %v13473_v21 }
 0x327   : > { %9476 = vmatmul.msk.bf16.gmra.mxu3 %vm3522_vm12, %v3472_v12  ;;  %v4398_v54 = vpop.f32.mrf.mxu1  ;;  %v3778_v0 = vpop.f32.mrf.mxu0 }
 0x328   : > { %v3779_v39 = vadd.f32 %v3778_v0, %v3621_v62  ;;  %v4135_v44 = vpop.permute.xlu1 %4134  ;;  %v4436_v24 = vadd.f32 %v13477_v2, %v3759_v53 }
 0x329   : > { %v4218_v37 = vsel %vm3145_vm5, %v13250_v41, %v4135_v44  ;;  %v3739_v41 = vadd.f32 %v13394_v13, %v13392_v31  ;;  %v4430_v13 = vadd.f32 %v13435_v20, %v3744_v40 }
 0x32a   : > { %v13524_v8 = vadd.f32 %v4398_v54, %v3779_v39  ;;  %v4250_v42 = vsel %vm3194_vm10, %v4218_v37, %v4170_v59 }
 0x32b   : > { %9568 = vmatmul.msk.bf16.gmra.mxu1 %vm3522_vm12, %v4250_v42  ;;  %v13544_v31 = vadd.f32 %v13396_v1, %v3739_v41  ;;  %v8002_v41 = vld [vmem:[#allocation7 + $0x3c] sm:$0x8] }
 0x32c   : > { %15485 = vst [vmem:[#allocation16_spill] sm:$0xff] %v13524_v8  ;;  %v3144_v28 = vpop.permute.xlu0 %3143  ;;  %v8003_v53 = vsel %vm13580_vm14, 0, %v8002_v41 }
 0x32d   : > { %v3226_v61 = vsel %vm3194_vm10, %v3193_v50, %v3144_v28  ;;  %8004 = vst [vmem:[#allocation7 + $0x3c] sm:$0x8] %v8003_v53 }
 0x32e   : > { %9516 = vmatmul.msk.bf16.gmra.mxu0 %vm3522_vm12, %v3226_v61  ;;  %v3624_v33 = vpop.f32.mrf.mxu3 }
 0x32f   : > { %v4401_v49 = vpop.f32.mrf.mxu1 }
 0x330   : > { %v3781_v38 = vpop.f32.mrf.mxu0 }
 0x331   : > { %v3782_v12 = vadd.f32 %v3781_v38, %v3624_v33  ;;  %v8009_v33 = vld [vmem:[#allocation7 + $0xc] sm:$0x8] }
 0x333   : > { %v4445_v35 = vadd.f32 %v4401_v49, %v3782_v12  ;;  %v8012_v49 = vld [vmem:[#allocation7 + $0x18] sm:$0x8] }
 0x334   : > { %v13554_v16 = vpop.permute.xlu0 %4456 }
 0x335   : > { %v4467_v55 = vadd.f32 %v13554_v16, %v13425_v58  ;;  %v4468_v1 = vadd.f32 %v13554_v16, %v4430_v13  ;;  %v4469_v20 = vadd.f32 %v13554_v16, %v13452_v10  ;;  %v4470_v63 = vadd.f32 %v13554_v16, %v4432_v15  ;;  %v8015_v15 = vld [vmem:[#allocation7 + $0x24] sm:$0x8] }
 0x336   : > { %v13563_v18 = vadd.f32 %v13554_v16, %v4445_v35  ;;  %v4471_v21 = vadd.f32 %v13554_v16, %v13463_v47  ;;  %v4472_v4 = vadd.f32 %v13554_v16, %v4434_v60  ;;  %v4473_v2 = vadd.f32 %v13554_v16, %v13471_v45  ;;  %v3626_v54 = vpop.f32.mrf.mxu3  ;;  %v8018_v35 = vld [vmem:[#allocation7 + $0x30] sm:$0x8] }
 0x337   : > { %v4474_v58 = vadd.f32 %v13554_v16, %v4436_v24  ;;  %v4499_v46 = vmax.f32 %v4467_v55, 0.0  ;;  %v4500_v36 = vmax.f32 %v4468_v1, 0.0  ;;  %v4501_v62 = vmax.f32 %v4469_v20, 0.0  ;;  %v4403_v10 = vpop.f32.mrf.mxu1 }
 0x338   : > { %v4502_v59 = vmax.f32 %v4470_v63, 0.0  ;;  %v4503_v39 = vmax.f32 %v4471_v21, 0.0  ;;  %v4504_v44 = vmax.f32 %v4472_v4, 0.0  ;;  %v3783_v37 = vpop.f32.mrf.mxu0  ;;  %v4505_v50 = vmax.f32 %v4473_v2, 0.0 }
 0x339   : > { %v4506_v47 = vmax.f32 %v4474_v58, 0.0  ;;  %v13572_v42 = vmax.f32 %v4499_v46, %v4501_v62  ;;  %v13576_v45 = vadd.f32 %v13554_v16, %v13300_v32  ;;  %v3784_v28 = vadd.f32 %v3783_v37, %v3626_v54 }
 0x33a   : > { %v13584_v40 = vmax.f32 %v4500_v36, %v4502_v59  ;;  %v13588_v57 = vadd.f32 %v13554_v16, %v13308_v17  ;;  %v13592_v6 = vadd.f32 %v13554_v16, %v13317_v3  ;;  %v7994_v32 = vsel %vm13580_vm14, 0, %v7993_v9 }
 0x33b   : > { %v13598_v38 = vmax.f32 %v4503_v39, %v4505_v50  ;;  %v13600_v12 = vmax.f32 %v4504_v44, %v4506_v47  ;;  %v4446_v13 = vadd.f32 %v4403_v10, %v3784_v28  ;;  %7995 = vst [vmem:[#allocation7] sm:$0x8] %v7994_v32  ;;  %v8010_v17 = vsel %vm13580_vm14, 0, %v8009_v33 }
 0x33c   : > { %v8013_v3 = vsel %vm13580_vm14, 0, %v8012_v49  ;;  %v13608_v60 = vadd.f32 %v13554_v16, %v13328_v11  ;;  %v8016_v24 = vsel %vm13580_vm14, 0, %v8015_v15  ;;  %v4567_v55 = vrot.slane %v13572_v42, 2  ;;  %8011 = vst [vmem:[#allocation7 + $0xc] sm:$0x8] %v8010_v17 }
 0x33d   : > { %v13615_v1 = vadd.f32 %v13554_v16, %v13344_v43  ;;  %v13618_v20 = vadd.f32 %v13554_v16, %v4426_v25  ;;  %v13621_v63 = vadd.f32 %v13554_v16, %v4446_v13  ;;  %v8019_v11 = vsel %vm13580_vm14, 0, %v8018_v35  ;;  %8014 = vst [vmem:[#allocation7 + $0x18] sm:$0x8] %v8013_v3 }
 0x33e   : > { %v4568_v21 = vrot.slane %v13572_v42, 4  ;;  %v4569_v4 = vrot.slane %v13572_v42, 6  ;;  %v4570_v2 = vrot.slane %v13584_v40, 2  ;;  %v4571_v43 = vrot.slane %v13584_v40, 4  ;;  %v3629_v36 = vpop.f32.mrf.mxu3  ;;  %8017 = vst [vmem:[#allocation7 + $0x24] sm:$0x8] %v8016_v24 }
 0x33f   : > { %v4572_v58 = vrot.slane %v13584_v40, 6  ;;  %v4573_v25 = vrot.slane %v13598_v38, 2  ;;  %v4574_v62 = vrot.slane %v13598_v38, 4  ;;  %v4575_v54 = vrot.slane %v13598_v38, 6  ;;  %8020 = vst [vmem:[#allocation7 + $0x30] sm:$0x8] %v8019_v11  ;;  %v4406_v28 = vpop.f32.mrf.mxu1 }
 0x340   : > { %v4576_v10 = vrot.slane %v13600_v12, 2  ;;  %v3786_v59 = vpop.f32.mrf.mxu0  ;;  %v4577_v39 = vrot.slane %v13600_v12, 4  ;;  %v4578_v44 = vrot.slane %v13600_v12, 6  ;;  %v9585_v37 = vrot.slane %v13572_v42, 9 }
 0x341   : > { %v9586_v50 = vrot.slane %v4567_v55, 9  ;;  %v3787_v47 = vadd.f32 %v3786_v59, %v3629_v36  ;;  %v9587_v61 = vrot.slane %v4568_v21, 9  ;;  %v9588_v9 = vrot.slane %v4569_v4, 9  ;;  %v10645_v59 = vld [vmem:[%s15440_s3 + $0x50] sm:$0xff] }
 0x342   : > { %v9589_v41 = vrot.slane %v13584_v40, 9  ;;  %v9590_v32 = vrot.slane %v4570_v2, 9  ;;  %v9591_v53 = vrot.slane %v4571_v43, 9  ;;  %v9592_v33 = vrot.slane %v4572_v58, 9  ;;  %5658 = vmatpush.bf16.msrb.mxu2 %v10645_v59 }
 0x343   : > { %v9593_v49 = vrot.slane %v13598_v38, 9  ;;  %v4447_v13 = vadd.f32 %v4406_v28, %v3787_v47  ;;  %v9594_v17 = vrot.slane %v4573_v25, 9  ;;  %v9595_v3 = vrot.slane %v4574_v62, 9 }
 0x344   : > { %v9596_v15 = vrot.slane %v4575_v54, 9  ;;  %v9597_v24 = vrot.slane %v13600_v12, 9  ;;  %v9598_v35 = vrot.slane %v4576_v10, 9  ;;  %v9599_v11 = vrot.slane %v4577_v39, 9 }
 0x345   : > { %v9600_v46 = vrot.slane %v4578_v44, 9  ;;  %v4485_v36 = vadd.f32 %v13554_v16, %v4447_v13  ;;  %v13646_v0 = vmax.f32 %v13572_v42, %v9585_v37  ;;  %v13648_v48 = vmax.f32 %v4567_v55, %v9586_v50 }
 0x346   : > { %v13650_v47 = vmax.f32 %v4568_v21, %v9587_v61  ;;  %v13652_v28 = vmax.f32 %v4569_v4, %v9588_v9  ;;  %v13655_v56 = vmax.f32 %v13584_v40, %v9589_v41  ;;  %v13657_v19 = vmax.f32 %v4570_v2, %v9590_v32  ;;  %v3631_v8 = vpop.f32.mrf.mxu3 }
 0x347   : > { %v13659_v52 = vmax.f32 %v4571_v43, %v9591_v53  ;;  %v4517_v13 = vmax.f32 %v4485_v36, 0.0  ;;  %v13661_v29 = vmax.f32 %v4572_v58, %v9592_v33  ;;  %v13664_v42 = vmax.f32 %v13598_v38, %v9593_v49 }
 0x348   : > { %v13666_v55 = vmax.f32 %v4573_v25, %v9594_v17  ;;  %v3788_v21 = vpop.f32.mrf.mxu0  ;;  %v13668_v4 = vmax.f32 %v4574_v62, %v9595_v3  ;;  %v13670_v37 = vmax.f32 %v4575_v54, %v9596_v15  ;;  %v13673_v40 = vmax.f32 %v13600_v12, %v9597_v24 }
 0x349   : > { %v13675_v2 = vmax.f32 %v4576_v10, %v9598_v35  ;;  %v15488_v43 = vmax.f32 %v13563_v18, 0.0  ;;  %v3789_v58 = vadd.f32 %v3788_v21, %v3631_v8  ;;  %v13679_v61 = vmax.f32 %v4577_v39, %v9599_v11  ;;  %v4408_v39 = vpop.f32.mrf.mxu1 }
 0x34a   : > { %v13681_v38 = vmax.f32 %v4578_v44, %v9600_v46  ;;  %v4987_v25 = vpack.c.bf16 %v13646_v0, %v13646_v0  ;;  %v4988_v62 = vpack.c.bf16 %v13648_v48, %v13648_v48  ;;  %v4989_v12 = vpack.c.bf16 %v13650_v47, %v13650_v47 }
 0x34b   : > { %v4535_v50 = vmax.f32 %v15488_v43, %v4517_v13  ;;  %v4990_v54 = vpack.c.bf16 %v13652_v28, %v13652_v28  ;;  %v4448_v41 = vadd.f32 %v4408_v39, %v3789_v58  ;;  %v4991_v46 = vpack.c.bf16 %v13655_v56, %v13655_v56 }
 0x34c   : > { %v4992_v0 = vpack.c.bf16 %v13657_v19, %v13657_v19  ;;  %v4993_v48 = vpack.c.bf16 %v13659_v52, %v13659_v52  ;;  %v4994_v17 = vpack.c.bf16 %v13661_v29, %v13661_v29  ;;  %v4995_v3 = vpack.c.bf16 %v13664_v42, %v13664_v42 }
 0x34d   : > { %v4591_v10 = vrot.slane %v4535_v50, 2  ;;  %v4592_v18 = vrot.slane %v4535_v50, 4  ;;  %v4593_v9 = vrot.slane %v4535_v50, 6  ;;  %v9617_v8 = vrot.slane %v4535_v50, 9 }
 0x34e   : > { %v4486_v49 = vadd.f32 %v13554_v16, %v4448_v41  ;;  %v4996_v56 = vpack.c.bf16 %v13666_v55, %v13666_v55  ;;  %v4997_v11 = vpack.c.bf16 %v13668_v4, %v13668_v4  ;;  %v4998_v36 = vpack.c.bf16 %v13670_v37, %v13670_v37 }
 0x34f   : > { %v9618_v44 = vrot.slane %v4591_v10, 9  ;;  %v9619_v32 = vrot.slane %v4592_v18, 9  ;;  %v9620_v53 = vrot.slane %v4593_v9, 9  ;;  %v4891_v33 = vmax.f32 %v4535_v50, %v9617_v8 }
 0x350   : > { %v4518_v35 = vmax.f32 %v4486_v49, 0.0  ;;  %v4999_v29 = vpack.c.bf16 %v13673_v40, %v13673_v40  ;;  %v15489_v42 = vmax.f32 %v13621_v63, 0.0  ;;  %v5000_v21 = vpack.c.bf16 %v13675_v2, %v13675_v2 }
 0x351   : > { %v4892_v19 = vmax.f32 %v4591_v10, %v9618_v44  ;;  %v4893_v15 = vmax.f32 %v4592_v18, %v9619_v32  ;;  %v4894_v24 = vmax.f32 %v4593_v9, %v9620_v53  ;;  %v5019_v52 = vpack.c.bf16 %v4891_v33, %v4891_v33 }
 0x352   : > { %v4536_v55 = vmax.f32 %v15489_v42, %v4518_v35  ;;  %v5001_v43 = vpack.c.bf16 %v13679_v61, %v13679_v61  ;;  %v5002_v4 = vpack.c.bf16 %v13681_v38, %v13681_v38  ;;  %v5115_v40 = vunpack.c.l.b16 %v4987_v25 }
 0x353   : > { %v5020_v59 = vpack.c.bf16 %v4892_v19, %v4892_v19  ;;  %v5021_v47 = vpack.c.bf16 %v4893_v15, %v4893_v15  ;;  %v5022_v28 = vpack.c.bf16 %v4894_v24, %v4894_v24  ;;  %v5147_v13 = vunpack.c.l.b16 %v5019_v52 }
 0x354   : > { %v4594_v10 = vrot.slane %v4536_v55, 2  ;;  %v4595_v18 = vrot.slane %v4536_v55, 4  ;;  %v4596_v9 = vrot.slane %v4536_v55, 6  ;;  %v9621_v8 = vrot.slane %v4536_v55, 9 }
 0x355   : > { %v5148_v37 = vunpack.c.l.b16 %v5020_v59  ;;  %v5149_v50 = vunpack.c.l.b16 %v5021_v47  ;;  %v5150_v58 = vunpack.c.l.b16 %v5022_v28  ;;  %v5116_v44 = vunpack.c.l.b16 %v4988_v62 }
 0x356   : > { %v9622_v32 = vrot.slane %v4594_v10, 9  ;;  %v9623_v2 = vrot.slane %v4595_v18, 9  ;;  %v9624_v53 = vrot.slane %v4596_v9, 9  ;;  %v4895_v33 = vmax.f32 %v4536_v55, %v9621_v8 }
 0x357   : > { %v5254_v39 = vrot.slane %v5148_v37, 7  ;;  %v5256_v63 = vrot.slane %v5149_v50, 6  ;;  %v5258_v41 = vrot.slane %v5150_v58, 5  ;;  %vm5176_vm14 = vcmask 1045509  }
 0x358   : > { %v5117_v38 = vunpack.c.l.b16 %v4989_v12  ;;  %v5118_v49 = vunpack.c.l.b16 %v4990_v54  ;;  %v5119_v19 = vunpack.c.l.b16 %v4991_v46  ;;  %v4896_v15 = vmax.f32 %v4594_v10, %v9622_v32 }
 0x359   : > { %v5255_v61 = vsel %vm5164_vm15, %v5254_v39, %v5147_v13  ;;  %v4897_v24 = vmax.f32 %v4595_v18, %v9623_v2  ;;  %v4898_v52 = vmax.f32 %v4596_v9, %v9624_v53  ;;  %v5023_v62 = vpack.c.bf16 %v4895_v33, %v4895_v33 }
 0x35a   : > { %v5257_v25 = vsel %vm5167_vm0, %v5256_v63, %v5255_v61  ;;  %v5120_v59 = vunpack.c.l.b16 %v4992_v0  ;;  %v5121_v47 = vunpack.c.l.b16 %v4993_v48  ;;  %v5024_v28 = vpack.c.bf16 %v4896_v15, %v4896_v15 }
 0x35b   : > { %v5259_v35 = vsel %vm5170_vm13, %v5258_v41, %v5257_v25  ;;  %v5025_v42 = vpack.c.bf16 %v4897_v24, %v4897_v24  ;;  %v5026_v55 = vpack.c.bf16 %v4898_v52, %v4898_v52  ;;  %v5122_v13 = vunpack.c.l.b16 %v4994_v17 }
 0x35c   : > { %v5151_v37 = vunpack.c.l.b16 %v5023_v62  ;;  %v5123_v12 = vunpack.c.l.b16 %v4995_v3  ;;  %v5124_v54 = vunpack.c.l.b16 %v4996_v56  ;;  %v5125_v46 = vunpack.c.l.b16 %v4997_v11 }
 0x35d   : > { %v5152_v50 = vunpack.c.l.b16 %v5024_v28  ;;  %v5153_v58 = vunpack.c.l.b16 %v5025_v42  ;;  %v5154_v10 = vunpack.c.l.b16 %v5026_v55  ;;  %v5126_v18 = vunpack.c.l.b16 %v4998_v36 }
 0x35e   : > { %v5260_v9 = vrot.slane %v5151_v37, 4  ;;  %v5127_v8 = vunpack.c.l.b16 %v4999_v29  ;;  %v5128_v39 = vunpack.c.l.b16 %v5000_v21  ;;  %v5129_v63 = vunpack.c.l.b16 %v5001_v43 }
 0x35f   : > { %v5262_v41 = vrot.slane %v5152_v50, 3  ;;  %v5264_v32 = vrot.slane %v5153_v58, 2  ;;  %v5266_v0 = vrot.slane %v5154_v10, 1  ;;  %v5130_v48 = vunpack.c.l.b16 %v5002_v4 }
 0x360   : > { %v5261_v2 = vsel %vm5173_vm6, %v5260_v9, %v5259_v35  ;;  %v5198_v53 = vrot.slane %v5116_v44, 7  ;;  %v5200_v17 = vrot.slane %v5117_v38, 6  ;;  %v5202_v33 = vrot.slane %v5118_v49, 5 }
 0x361   : > { %v5263_v3 = vsel %vm5176_vm14, %v5262_v41, %v5261_v2  ;;  %v5204_v56 = vrot.slane %v5119_v19, 4  ;;  %v5206_v11 = vrot.slane %v5120_v59, 3  ;;  %v5208_v61 = vrot.slane %v5121_v47, 2 }
 0x362   : > { %v5265_v36 = vsel %vm5179_vm7, %v5264_v32, %v5263_v3  ;;  %v5199_v29 = vsel %vm5164_vm15, %v5198_v53, %v5115_v40  ;;  %v5210_v21 = vrot.slane %v5122_v13, 1  ;;  %v5212_v43 = vrot.slane %v5124_v54, 7 }
 0x363   : > { %v5267_v25 = vsel %vm5182_vm1, %v5266_v0, %v5265_v36  ;;  %v5201_v4 = vsel %vm5167_vm0, %v5200_v17, %v5199_v29  ;;  %v5214_v15 = vrot.slane %v5125_v46, 6  ;;  %v5216_v24 = vrot.slane %v5126_v18, 5 }
 0x364   : > { %v5288_v44 = vpack.c.b16 %v5267_v25, %v5267_v25  ;;  %v5203_v38 = vsel %vm5170_vm13, %v5202_v33, %v5201_v4  ;;  %v5213_v49 = vsel %vm5164_vm15, %v5212_v43, %v5123_v12  ;;  %v5218_v19 = vrot.slane %v5127_v8, 4 }
 0x365   : > { %v5205_v52 = vsel %vm5173_vm6, %v5204_v56, %v5203_v38  ;;  %v5215_v35 = vsel %vm5167_vm0, %v5214_v15, %v5213_v49  ;;  %v5220_v62 = vrot.slane %v5128_v39, 3  ;;  %v5222_v40 = vrot.slane %v5129_v63, 2 }
 0x366   : > { %5304 = vst.msk [vmem:[#allocation4 + $0x58] sm:$0xf] %vm2381_vm2, %v5288_v44  ;;  %v5207_v59 = vsel %vm5176_vm14, %v5206_v11, %v5205_v52  ;;  %v5217_v47 = vsel %vm5170_vm13, %v5216_v24, %v5215_v35  ;;  %v5224_v28 = vrot.slane %v5130_v48, 1  ;;  %v4465_v42 = vadd.f32 %v13554_v16, %v13379_v30 }
 0x367   : > { %v5209_v55 = vsel %vm5179_vm7, %v5208_v61, %v5207_v59  ;;  %v5219_v13 = vsel %vm5173_vm6, %v5218_v19, %v5217_v47  ;;  %v4466_v37 = vadd.f32 %v13554_v16, %v13544_v31  ;;  %v4491_v12 = vmax.f32 %v13576_v45, 0.0 }
 0x368   : > { %v5211_v54 = vsel %vm5182_vm1, %v5210_v21, %v5209_v55  ;;  %v5221_v46 = vsel %vm5176_vm14, %v5220_v62, %v5219_v13  ;;  %v4492_v50 = vmax.f32 %v13588_v57, 0.0  ;;  %v4493_v58 = vmax.f32 %v13592_v6, 0.0 }
 0x369   : > { %v5223_v10 = vsel %vm5179_vm7, %v5222_v40, %v5221_v46  ;;  %v5284_v30 = vpack.c.b16 %v5211_v54, %v5211_v54  ;;  %v4494_v18 = vmax.f32 %v13608_v60, 0.0  ;;  %v4495_v9 = vmax.f32 %v13615_v1, 0.0 }
 0x36a   : > { %v5225_v8 = vsel %vm5182_vm1, %v5224_v28, %v5223_v10  ;;  %v4496_v31 = vmax.f32 %v13618_v20, 0.0  ;;  %v4497_v45 = vmax.f32 %v4465_v42, 0.0  ;;  %v4498_v39 = vmax.f32 %v4466_v37, 0.0 }
 0x36b   : > { %v3769_v63 = vadd.f32 %v13496_v22, %v13492_v34  ;;  %v5285_v41 = vpack.c.b16 %v5225_v8, %v5225_v8  ;;  %5300 = vst.msk [vmem:[#allocation4 + $0x28] sm:$0xf] %vm2381_vm2, %v5284_v30  ;;  %v4523_v57 = vmax.f32 %v4491_v12, %v4493_v58  ;;  %v4524_v6 = vmax.f32 %v4492_v50, %v4494_v18 }
 0x36c   : > { %v4525_v32 = vmax.f32 %v4495_v9, %v4497_v45  ;;  %v4438_v60 = vadd.f32 %v13485_v23, %v13552_v5  ;;  %v4526_v1 = vmax.f32 %v4496_v31, %v4498_v39  ;;  %v13761_v34 = vadd.f32 %v13554_v16, %v13479_v14 }
 0x36d   : > { %5301 = vst.msk [vmem:[#allocation4 + $0x34] sm:$0xf] %vm2381_vm2, %v5285_v41  ;;  %v13757_v0 = vadd.f32 %v13494_v26, %v3769_v63  ;;  %v4555_v20 = vrot.slane %v4523_v57, 2  ;;  %v4556_v48 = vrot.slane %v4523_v57, 4  ;;  %v4557_v22 = vrot.slane %v4523_v57, 6 }
 0x36e   : > { %v4558_v2 = vrot.slane %v4524_v6, 2  ;;  %v4559_v53 = vrot.slane %v4524_v6, 4  ;;  %v13764_v17 = vadd.f32 %v13554_v16, %v4438_v60  ;;  %v4560_v33 = vrot.slane %v4524_v6, 6 }
 0x36f   : > { %v4561_v3 = vrot.slane %v4525_v32, 2  ;;  %v4562_v56 = vrot.slane %v4525_v32, 4  ;;  %v13768_v23 = vadd.f32 %v13554_v16, %v13487_v27  ;;  %v4563_v5 = vrot.slane %v4525_v32, 6 }
 0x370   : > { %v4564_v11 = vrot.slane %v4526_v1, 2  ;;  %v4565_v61 = vrot.slane %v4526_v1, 4  ;;  %v4566_v14 = vrot.slane %v4526_v1, 6  ;;  %v9569_v29 = vrot.slane %v4523_v57, 9 }
 0x371   : > { %v9570_v21 = vrot.slane %v4555_v20, 9  ;;  %v9571_v43 = vrot.slane %v4556_v48, 9  ;;  %v9572_v4 = vrot.slane %v4557_v22, 9  ;;  %v9573_v15 = vrot.slane %v4524_v6, 9 }
 0x372   : > { %v13770_v26 = vld [vmem:[#allocation4 + $0x28] sm:$0xf]  ;;  %v9574_v24 = vrot.slane %v4558_v2, 9  ;;  %v9575_v44 = vrot.slane %v4559_v53, 9  ;;  %v9576_v38 = vrot.slane %v4560_v33, 9  ;;  %v9578_v49 = vrot.slane %v4561_v3, 9 }
 0x373   : > { %v5544_v36 = vunpack.c.l.b16 %v13770_v26  ;;  %v9579_v19 = vrot.slane %v4562_v56, 9  ;;  %v9577_v52 = vrot.slane %v4525_v32, 9  ;;  %v9580_v35 = vrot.slane %v4563_v5, 9 }
 0x374   : > { %v13773_v25 = vld [vmem:[#allocation4 + $0x34] sm:$0xf]  ;;  %v9581_v62 = vrot.slane %v4526_v1, 9  ;;  %v9582_v40 = vrot.slane %v4564_v11, 9  ;;  %v9583_v47 = vrot.slane %v4565_v61, 9  ;;  %v4844_v28 = vmax.f32 %v4555_v20, %v9570_v21 }
 0x375   : > { %v5545_v27 = vunpack.c.l.b16 %v13773_v25  ;;  %v4845_v42 = vmax.f32 %v4556_v48, %v9571_v43  ;;  %v9584_v55 = vrot.slane %v4566_v14, 9  ;;  %v4846_v13 = vmax.f32 %v4557_v22, %v9572_v4 }
 0x376   : > { %v4847_v37 = vmax.f32 %v4524_v6, %v9573_v15  ;;  %v4848_v12 = vmax.f32 %v4558_v2, %v9574_v24  ;;  %v4843_v54 = vmax.f32 %v4523_v57, %v9569_v29  ;;  %v4849_v46 = vmax.f32 %v4559_v53, %v9575_v44  ;;  %v10640_v6 = vld [vmem:[%s15440_s3 + $0x28] sm:$0xff] }
 0x377   : > { %v5556_v59 = vpack.c.b16 %v5545_v27, %v5544_v36  ;;  %v4852_v50 = vmax.f32 %v4561_v3, %v9578_v49  ;;  %v4853_v58 = vmax.f32 %v4562_v56, %v9579_v19  ;;  %v4850_v10 = vmax.f32 %v4560_v33, %v9576_v38  ;;  %5730 = vmatpush.bf16.msrb.mxu3 %v10640_v6 }
 0x378   : > { %v4851_v30 = vmax.f32 %v4525_v32, %v9577_v52  ;;  %v4854_v18 = vmax.f32 %v4563_v5, %v9580_v35  ;;  %v4855_v9 = vmax.f32 %v4526_v1, %v9581_v62  ;;  %v4856_v8 = vmax.f32 %v4564_v11, %v9582_v40 }
 0x379   : > { %5561 = vrot.lane.b32.xlu0 %v5556_v59, %s10942_s25  ;;  %v4857_v31 = vmax.f32 %v4565_v61, %v9583_v47  ;;  %v4972_v45 = vpack.c.bf16 %v4844_v28, %v4844_v28  ;;  %v4973_v39 = vpack.c.bf16 %v4845_v42, %v4845_v42  ;;  %v4858_v63 = vmax.f32 %v4566_v14, %v9584_v55 }
 0x37a   : > { %v4974_v41 = vpack.c.bf16 %v4846_v13, %v4846_v13  ;;  %v4975_v60 = vpack.c.bf16 %v4847_v37, %v4847_v37  ;;  %v4976_v20 = vpack.c.bf16 %v4848_v12, %v4848_v12  ;;  %v4971_v57 = vpack.c.bf16 %v4843_v54, %v4843_v54 }
 0x37b   : > { %v4977_v48 = vpack.c.bf16 %v4849_v46, %v4849_v46  ;;  %v4980_v22 = vpack.c.bf16 %v4852_v50, %v4852_v50  ;;  %v4981_v2 = vpack.c.bf16 %v4853_v58, %v4853_v58  ;;  %v4978_v53 = vpack.c.bf16 %v4850_v10, %v4850_v10 }
 0x37c   : > { %v4979_v32 = vpack.c.bf16 %v4851_v30, %v4851_v30  ;;  %v4982_v33 = vpack.c.bf16 %v4854_v18, %v4854_v18  ;;  %v4983_v1 = vpack.c.bf16 %v4855_v9, %v4855_v9  ;;  %v4984_v3 = vpack.c.bf16 %v4856_v8, %v4856_v8 }
 0x37d   : > { %v4985_v56 = vpack.c.bf16 %v4857_v31, %v4857_v31  ;;  %v5100_v5 = vunpack.c.l.b16 %v4972_v45  ;;  %v5101_v11 = vunpack.c.l.b16 %v4973_v39  ;;  %v4986_v61 = vpack.c.bf16 %v4858_v63, %v4858_v63 }
 0x37e   : > { %v5102_v14 = vunpack.c.l.b16 %v4974_v41  ;;  %v5103_v29 = vunpack.c.l.b16 %v4975_v60  ;;  %v5104_v21 = vunpack.c.l.b16 %v4976_v20  ;;  %v5099_v43 = vunpack.c.l.b16 %v4971_v57 }
 0x37f   : > { %v5105_v4 = vunpack.c.l.b16 %v4977_v48  ;;  %v5108_v15 = vunpack.c.l.b16 %v4980_v22  ;;  %v5109_v24 = vunpack.c.l.b16 %v4981_v2  ;;  %v5106_v44 = vunpack.c.l.b16 %v4978_v53 }
 0x380   : > { %v5107_v38 = vunpack.c.l.b16 %v4979_v32  ;;  %v5110_v49 = vunpack.c.l.b16 %v4982_v33  ;;  %v5111_v19 = vunpack.c.l.b16 %v4983_v1  ;;  %v5112_v52 = vunpack.c.l.b16 %v4984_v3 }
 0x381   : > { %v5113_v35 = vunpack.c.l.b16 %v4985_v56  ;;  %v5163_v62 = vrot.slane %v5100_v5, 7  ;;  %v5166_v40 = vrot.slane %v5101_v11, 6  ;;  %v5114_v59 = vunpack.c.l.b16 %v4986_v61 }
 0x382   : > { %v5169_v47 = vrot.slane %v5102_v14, 5  ;;  %v5172_v28 = vrot.slane %v5103_v29, 4  ;;  %v5175_v42 = vrot.slane %v5104_v21, 3  ;;  %v5178_v13 = vrot.slane %v5105_v4, 2 }
 0x383   : > { %v5165_v55 = vsel %vm5164_vm15, %v5163_v62, %v5099_v43  ;;  %v5184_v37 = vrot.slane %v5108_v15, 7  ;;  %v5186_v12 = vrot.slane %v5109_v24, 6  ;;  %v5181_v46 = vrot.slane %v5106_v44, 1 }
 0x384   : > { %v5168_v54 = vsel %vm5167_vm0, %v5166_v40, %v5165_v55  ;;  %v5188_v50 = vrot.slane %v5110_v49, 5  ;;  %v5190_v58 = vrot.slane %v5111_v19, 4  ;;  %v5192_v18 = vrot.slane %v5112_v52, 3 }
 0x385   : > { %v5171_v10 = vsel %vm5170_vm13, %v5169_v47, %v5168_v54  ;;  %v5185_v30 = vsel %vm5164_vm15, %v5184_v37, %v5107_v38  ;;  %v4478_v9 = vadd.f32 %v13554_v16, %v13757_v0  ;;  %v4507_v45 = vmax.f32 %v13761_v34, 0.0 }
 0x386   : > { %v5174_v8 = vsel %vm5173_vm6, %v5172_v28, %v5171_v10  ;;  %v5187_v31 = vsel %vm5167_vm0, %v5186_v12, %v5185_v30  ;;  %v4508_v39 = vmax.f32 %v13764_v17, 0.0  ;;  %v4509_v60 = vmax.f32 %v13768_v23, 0.0 }
 0x387   : > { %v5177_v63 = vsel %vm5176_vm14, %v5175_v42, %v5174_v8  ;;  %v5189_v41 = vsel %vm5170_vm13, %v5188_v50, %v5187_v31  ;;  %v4510_v20 = vmax.f32 %v4478_v9, 0.0  ;;  %v5194_v0 = vrot.slane %v5113_v35, 2 }
 0x388   : > { %v5180_v6 = vsel %vm5179_vm7, %v5178_v13, %v5177_v63  ;;  %v5191_v57 = vsel %vm5173_vm6, %v5190_v58, %v5189_v41  ;;  %v5196_v48 = vrot.slane %v5114_v59, 1  ;;  %v4531_v34 = vmax.f32 %v4507_v45, %v4509_v60 }
 0x389   : > { %v5183_v22 = vsel %vm5182_vm1, %v5181_v46, %v5180_v6  ;;  %v5193_v2 = vsel %vm5176_vm14, %v5192_v18, %v5191_v57  ;;  %v4532_v53 = vmax.f32 %v4508_v39, %v4510_v20  ;;  %v5381_v10 = vshrl.u32 %v13770_v26, 16 }
 0x38a   : > { %v5195_v17 = vsel %vm5179_vm7, %v5194_v0, %v5193_v2  ;;  %v5282_v32 = vpack.c.b16 %v5183_v22, %v5183_v22  ;;  %v4579_v1 = vrot.slane %v4531_v34, 2  ;;  %v4580_v23 = vrot.slane %v4531_v34, 4  ;;  %v15491_v2 = vld [vmem:[#allocation16_spill] sm:$0xff] }
 0x38b   : > { %v5197_v33 = vsel %vm5182_vm1, %v5196_v48, %v5195_v17  ;;  %v4581_v3 = vrot.slane %v4531_v34, 6  ;;  %v4582_v5 = vrot.slane %v4532_v53, 2  ;;  %v4583_v11 = vrot.slane %v4532_v53, 4  ;;  %v15490_v48 = vld [vmem:[#allocation15_spill] sm:$0xff] }
 0x38c   : > { %v5283_v56 = vpack.c.b16 %v5197_v33, %v5197_v33  ;;  %5298 = vst.msk [vmem:[#allocation4 + $0x10] sm:$0xf] %vm2381_vm2, %v5282_v32  ;;  %v4584_v61 = vrot.slane %v4532_v53, 6  ;;  %v9601_v14 = vrot.slane %v4531_v34, 9  ;;  %v9602_v29 = vrot.slane %v4579_v1, 9 }
 0x38d   : > { %v9603_v21 = vrot.slane %v4580_v23, 9  ;;  %v9604_v43 = vrot.slane %v4581_v3, 9  ;;  %v9605_v4 = vrot.slane %v4532_v53, 9  ;;  %v9606_v15 = vrot.slane %v4582_v5, 9  ;;  %v4923_v32 = vld [vmem:[#allocation4 + $0xc] sm:$0x8] }
 0x38e   : > { %5299 = vst.msk [vmem:[#allocation4 + $0x1c] sm:$0xf] %vm2381_vm2, %v5283_v56  ;;  %v9607_v24 = vrot.slane %v4583_v11, 9  ;;  %v9608_v44 = vrot.slane %v4584_v61, 9  ;;  %v4875_v38 = vmax.f32 %v4531_v34, %v9601_v14  ;;  %v4876_v49 = vmax.f32 %v4579_v1, %v9602_v29  ;;  %v4926_v1 = vld [vmem:[#allocation4 + $0x18] sm:$0x8] }
 0x38f   : > { %v4877_v19 = vmax.f32 %v4580_v23, %v9603_v21  ;;  %v4878_v52 = vmax.f32 %v4581_v3, %v9604_v43  ;;  %v4879_v35 = vmax.f32 %v4532_v53, %v9605_v4  ;;  %v4880_v62 = vmax.f32 %v4582_v5, %v9606_v15  ;;  %v4950_v23 = vld [vmem:[#allocation4 + $0x20] sm:$0x1]  ;;  %v4938_v3 = vld [vmem:[#allocation4 + $0x48] sm:$0x8]  ;;  %v4956_v4 = vld [vmem:[#allocation4 + $0x38] sm:$0x1] }
 0x390   : > { %v4881_v40 = vmax.f32 %v4583_v11, %v9607_v24  ;;  %v4882_v59 = vmax.f32 %v4584_v61, %v9608_v44  ;;  %v5003_v47 = vpack.c.bf16 %v4875_v38, %v4875_v38  ;;  %v5004_v28 = vpack.c.bf16 %v4876_v49, %v4876_v49 }
 0x391   : > { %v5005_v42 = vpack.c.bf16 %v4877_v19, %v4877_v19  ;;  %v5006_v55 = vpack.c.bf16 %v4878_v52, %v4878_v52  ;;  %v5007_v13 = vpack.c.bf16 %v4879_v35, %v4879_v35  ;;  %v5008_v37 = vpack.c.bf16 %v4880_v62, %v4880_v62 }
 0x392   : > { %v5009_v12 = vpack.c.bf16 %v4881_v40, %v4881_v40  ;;  %v5010_v54 = vpack.c.bf16 %v4882_v59, %v4882_v59  ;;  %v5132_v50 = vunpack.c.l.b16 %v5004_v28  ;;  %v5131_v31 = vunpack.c.l.b16 %v5003_v47 }
 0x393   : > { %v13805_v46 = vld [vmem:[#allocation4 + $0x10] sm:$0xf]  ;;  %v5133_v58 = vunpack.c.l.b16 %v5005_v42  ;;  %v5134_v18 = vunpack.c.l.b16 %v5006_v55  ;;  %v5135_v9 = vunpack.c.l.b16 %v5007_v13  ;;  %v4479_v39 = vadd.f32 %v13554_v16, %v13501_v51 }
 0x394   : > { %v5542_v30 = vunpack.c.l.b16 %v13805_v46  ;;  %v5226_v45 = vrot.slane %v5132_v50, 7  ;;  %v4480_v63 = vadd.f32 %v13554_v16, %v13508_v7  ;;  %v5136_v60 = vunpack.c.l.b16 %v5008_v37 }
 0x395   : > { %v13809_v8 = vld [vmem:[#allocation4 + $0x1c] sm:$0xf]  ;;  %v5137_v20 = vunpack.c.l.b16 %v5009_v12  ;;  %v5138_v6 = vunpack.c.l.b16 %v5010_v54  ;;  %v5228_v0 = vrot.slane %v5133_v58, 6  ;;  %v4481_v22 = vadd.f32 %v13554_v16, %v15490_v48 }
 0x396   : > { %v5543_v41 = vunpack.c.l.b16 %v13809_v8  ;;  %v5227_v57 = vsel %vm5164_vm15, %v5226_v45, %v5131_v31  ;;  %v4482_v34 = vadd.f32 %v13554_v16, %v15491_v2  ;;  %v5230_v53 = vrot.slane %v5134_v18, 5 }
 0x397   : > { %v5232_v17 = vrot.slane %v5135_v9, 4  ;;  %v5229_v33 = vsel %vm5167_vm0, %v5228_v0, %v5227_v57  ;;  %v5234_v5 = vrot.slane %v5136_v60, 3  ;;  %v5236_v11 = vrot.slane %v5137_v20, 2 }
 0x398   : > { %v5555_v51 = vpack.c.b16 %v5543_v41, %v5542_v30  ;;  %v13825_v7 = vpack.c.b16 %v5544_v36, %v5543_v41  ;;  %v5231_v56 = vsel %vm5170_vm13, %v5230_v53, %v5229_v33  ;;  %v5238_v61 = vrot.slane %v5138_v6, 1  ;;  %v4953_v36 = vld [vmem:[#allocation4 + $0x2c] sm:$0x1]  ;;  %v10644_v6 = vld [vmem:[%s15440_s3 + $0x48] sm:$0xff] }
 0x399   : > { %v5233_v14 = vsel %vm5173_vm6, %v5232_v17, %v5231_v56  ;;  %v4511_v29 = vmax.f32 %v4479_v39, 0.0  ;;  %v4512_v21 = vmax.f32 %v4480_v63, 0.0  ;;  %v4513_v43 = vmax.f32 %v4481_v22, 0.0  ;;  %5659 = vmatpush.bf16.msrb.mxu2 %v10644_v6 }
 0x39a   : > { %5559 = vrot.lane.b32.xlu1 %v5555_v51, %s10942_s25  ;;  %5570 = vrot.lane.b32.xlu2 %v13825_v7, %s10943_s21  ;;  %v5235_v15 = vsel %vm5176_vm14, %v5234_v5, %v5233_v14  ;;  %v4514_v24 = vmax.f32 %v4482_v34, 0.0  ;;  %v4924_v38 = vsel %vm12177_vm4, 0, %v4923_v32  ;;  %v4927_v49 = vsel %vm12177_vm4, 0, %v4926_v1 }
 0x39b   : > { %v5237_v19 = vsel %vm5179_vm7, %v5236_v11, %v5235_v15  ;;  %v4533_v52 = vmax.f32 %v4511_v29, %v4513_v43  ;;  %4925 = vst [vmem:[#allocation4 + $0xc] sm:$0x8] %v4924_v38  ;;  %v4951_v62 = vsel %vm12212_vm9, 0, %v4950_v23  ;;  %v4954_v40 = vsel %vm12212_vm9, 0, %v4953_v36 }
 0x39c   : > { %v5239_v59 = vsel %vm5182_vm1, %v5238_v61, %v5237_v19  ;;  %v4534_v47 = vmax.f32 %v4512_v21, %v4514_v24  ;;  %4928 = vst [vmem:[#allocation4 + $0x18] sm:$0x8] %v4927_v49  ;;  %v4957_v28 = vsel %vm12212_vm9, 0, %v4956_v4  ;;  %v4939_v42 = vsel %vm12177_vm4, 0, %v4938_v3 }
 0x39d   : > { %v5286_v55 = vpack.c.b16 %v5239_v59, %v5239_v59  ;;  %v4585_v13 = vrot.slane %v4533_v52, 2  ;;  %v4586_v37 = vrot.slane %v4533_v52, 4  ;;  %v4587_v12 = vrot.slane %v4533_v52, 6  ;;  %4952 = vst [vmem:[#allocation4 + $0x20] sm:$0x1] %v4951_v62 }
 0x39e   : > { %v4588_v54 = vrot.slane %v4534_v47, 2  ;;  %v4589_v50 = vrot.slane %v4534_v47, 4  ;;  %v4590_v58 = vrot.slane %v4534_v47, 6  ;;  %v9609_v18 = vrot.slane %v4533_v52, 9  ;;  %4955 = vst [vmem:[#allocation4 + $0x2c] sm:$0x1] %v4954_v40 }
 0x39f   : > { %5302 = vst.msk [vmem:[#allocation4 + $0x40] sm:$0xf] %vm2381_vm2, %v5286_v55  ;;  %v9610_v9 = vrot.slane %v4585_v13, 9  ;;  %v9611_v31 = vrot.slane %v4586_v37, 9  ;;  %v9612_v45 = vrot.slane %v4587_v12, 9  ;;  %v9613_v39 = vrot.slane %v4534_v47, 9 }
 0x3a0   : > { %v9614_v63 = vrot.slane %v4588_v54, 9  ;;  %v9615_v41 = vrot.slane %v4589_v50, 9  ;;  %v9616_v60 = vrot.slane %v4590_v58, 9  ;;  %v4883_v20 = vmax.f32 %v4533_v52, %v9609_v18  ;;  %4958 = vst [vmem:[#allocation4 + $0x38] sm:$0x1] %v4957_v28 }
 0x3a1   : > { %v4884_v57 = vmax.f32 %v4585_v13, %v9610_v9  ;;  %v4885_v0 = vmax.f32 %v4586_v37, %v9611_v31  ;;  %v4886_v48 = vmax.f32 %v4587_v12, %v9612_v45  ;;  %v4887_v22 = vmax.f32 %v4534_v47, %v9613_v39  ;;  %4940 = vst [vmem:[#allocation4 + $0x48] sm:$0x8] %v4939_v42 }
 0x3a2   : > { %v5384_v2 = vshll.u32 %v13770_v26, 16  ;;  %v4888_v34 = vmax.f32 %v4588_v54, %v9614_v63  ;;  %v4889_v51 = vmax.f32 %v4589_v50, %v9615_v41  ;;  %v4890_v53 = vmax.f32 %v4590_v58, %v9616_v60 }
 0x3a3   : > { %v5012_v17 = vpack.c.bf16 %v4884_v57, %v4884_v57  ;;  %v5013_v32 = vpack.c.bf16 %v4885_v0, %v4885_v0  ;;  %v5014_v33 = vpack.c.bf16 %v4886_v48, %v4886_v48  ;;  %v5015_v1 = vpack.c.bf16 %v4887_v22, %v4887_v22  ;;  %v5309_v22 = vld [vmem:[#allocation4 + $0xc] sm:$0xf] }
 0x3a4   : > { %v5394_v23 = vshrl.u32 %v13773_v25, 16  ;;  %v5011_v3 = vpack.c.bf16 %v4883_v20, %v4883_v20  ;;  %v5016_v56 = vpack.c.bf16 %v4888_v34, %v4888_v34  ;;  %v5397_v5 = vshll.u32 %v13773_v25, 16  ;;  %v13889_v20 = vld [vmem:[#allocation4 + $0x58] sm:$0xf] }
 0x3a5   : > { %v5017_v11 = vpack.c.bf16 %v4889_v51, %v4889_v51  ;;  %v5140_v61 = vunpack.c.l.b16 %v5012_v17  ;;  %v5141_v36 = vunpack.c.l.b16 %v5013_v32  ;;  %v13857_v14 = vrot.slane %v5381_v10, 7  ;;  %v5317_v45 = vld [vmem:[#allocation4 + $0x2c] sm:$0xf] }
 0x3a6   : > { %v5784_v29 = vrot.slane %v5381_v10, 4  ;;  %v13861_v21 = vld [vmem:[#allocation4 + $0x40] sm:$0xf]  ;;  %v5018_v43 = vpack.c.bf16 %v4890_v53, %v4890_v53  ;;  %v5142_v4 = vunpack.c.l.b16 %v5014_v33  ;;  %v5785_v15 = vrot.slane %v5384_v2, 5  ;;  %v5312_v53 = vld [vmem:[#allocation4 + $0x18] sm:$0xf] }
 0x3a7   : > { %v5546_v24 = vunpack.c.l.b16 %v13861_v21  ;;  %v5143_v38 = vunpack.c.l.b16 %v5015_v1  ;;  %v5240_v49 = vrot.slane %v5140_v61, 7  ;;  %v5355_v19 = vshrl.u32 %v13805_v46, 16  ;;  %v5320_v33 = vld [vmem:[#allocation4 + $0x38] sm:$0xf] }
 0x3a8   : > { %v5139_v52 = vunpack.c.l.b16 %v5011_v3  ;;  %v5144_v62 = vunpack.c.l.b16 %v5016_v56  ;;  %v5242_v40 = vrot.slane %v5141_v36, 6  ;;  %v13867_v59 = vrot.slane %v5394_v23, 7 }
 0x3a9   : > { %v5368_v10 = vshrl.u32 %v13809_v8, 16  ;;  %v13874_v47 = vpack.c.b16 %v5546_v24, %v5545_v27  ;;  %v5145_v28 = vunpack.c.l.b16 %v5017_v11  ;;  %v5371_v42 = vshll.u32 %v13809_v8, 16  ;;  %v4941_v11 = vld [vmem:[#allocation4 + $0x54] sm:$0x8] }
 0x3aa   : > { %v5146_v55 = vunpack.c.l.b16 %v5018_v43  ;;  %v5241_v13 = vsel %vm5164_vm15, %v5240_v49, %v5139_v52  ;;  %v5244_v37 = vrot.slane %v5142_v4, 5  ;;  %v5793_v12 = vrot.slane %v5394_v23, 4  ;;  %v5314_v4 = vld [vmem:[#allocation4 + $0x20] sm:$0xf]  ;;  %v4947_v52 = vld [vmem:[#allocation4 + $0x14] sm:$0x1] }
 0x3ab   : > { %v5794_v54 = vrot.slane %v5397_v5, 5  ;;  %5572 = vrot.lane.b32.xlu1 %v13874_v47, %s10943_s21  ;;  %v5243_v50 = vsel %vm5167_vm0, %v5242_v40, %v5241_v13  ;;  %v5246_v58 = vrot.slane %v5143_v38, 4  ;;  %v5357_v18 = vrot.slane %v5355_v19, 7 }
 0x3ac   : > { %v5358_v27 = vshll.u32 %v13805_v46, 16  ;;  %v5245_v9 = vsel %vm5170_vm13, %v5244_v37, %v5243_v50  ;;  %v5248_v31 = vrot.slane %v5144_v62, 3  ;;  %v13885_v39 = vrot.slane %v5355_v19, 4  ;;  %v4919_v46 = vld [vmem:[#allocation4 + $0x74] sm:$0x1] }
 0x3ad   : > { %v5407_v63 = vshrl.u32 %v13861_v21, 16  ;;  %v5247_v41 = vsel %vm5173_vm6, %v5246_v58, %v5245_v9  ;;  %v5250_v60 = vrot.slane %v5145_v28, 2  ;;  %v5775_v6 = vrot.slane %v5368_v10, 4  ;;  %v10660_v37 = vld [vmem:[%s15441_s4 + $0x38] sm:$0xff] }
 0x3ae   : > { %v5776_v57 = vrot.slane %v5371_v42, 5  ;;  %v5249_v0 = vsel %vm5176_vm14, %v5248_v31, %v5247_v41  ;;  %v5252_v48 = vrot.slane %v5146_v55, 1  ;;  %v5410_v34 = vshll.u32 %v13861_v21, 16  ;;  %v4929_v55 = vld [vmem:[#allocation4 + $0x24] sm:$0x8] }
 0x3af   : > { %v5251_v51 = vsel %vm5179_vm7, %v5250_v60, %v5249_v0  ;;  %v5786_v17 = vor.u32 %v5785_v15, %v5784_v29  ;;  %v5789_v32 = vshll.u32 %v5317_v45, 16  ;;  %v13896_v1 = vrot.slane %v5358_v27, 5  ;;  %v13917_v41 = vld [vmem:[#allocation4 + $0x4] sm:$0xf]  ;;  %v4907_v60 = vld [vmem:[#allocation4] sm:$0x8] }
 0x3b0   : > { %v5370_v23 = vrot.slane %v5368_v10, 7  ;;  %v5253_v3 = vsel %vm5182_vm1, %v5252_v48, %v5251_v51  ;;  %v5433_v56 = vshrl.u32 %v13889_v20, 16  ;;  %v13902_v61 = vrot.slane %v5407_v63, 4  ;;  %v4935_v51 = vld [vmem:[#allocation4 + $0x3c] sm:$0x8] }
 0x3b1   : > { %v5287_v36 = vpack.c.b16 %v5253_v3, %v5253_v3  ;;  %v5350_v43 = vshrl.u32 %v5309_v22, 16  ;;  %v5787_v38 = vrot.slane %v5786_v17, 4  ;;  %v5363_v49 = vshrl.u32 %v5312_v53, 16  ;;  %v4932_v22 = vld [vmem:[#allocation4 + $0x30] sm:$0x8] }
 0x3b2   : > { %v5791_v29 = vrot.slane %v5789_v32, 5  ;;  %v5795_v15 = vor.u32 %v5794_v54, %v5793_v12  ;;  %v5798_v19 = vshll.u32 %v5320_v33, 16  ;;  %v13906_v62 = vrot.slane %v5410_v34, 5  ;;  %v4959_v32 = vld [vmem:[#allocation4 + $0x44] sm:$0x1] }
 0x3b3   : > { %5303 = vst.msk [vmem:[#allocation4 + $0x4c] sm:$0xf] %vm2381_vm2, %v5287_v36  ;;  %v5436_v40 = vshll.u32 %v13889_v20, 16  ;;  %v5777_v10 = vor.u32 %v5776_v57, %v5775_v6  ;;  %v4942_v28 = vsel %vm12177_vm4, 0, %v4941_v11  ;;  %v5780_v13 = vshll.u32 %v5314_v4, 16 }
 0x3b4   : > { %v5792_v50 = vsel %vm11157_vm11, %v5787_v38, %v5791_v29  ;;  %v5796_v12 = vrot.slane %v5795_v15, 4  ;;  %v5800_v54 = vrot.slane %v5798_v19, 5  ;;  %4943 = vst [vmem:[#allocation4 + $0x54] sm:$0x8] %v4942_v28  ;;  %v5548_v58 = vunpack.c.l.b16 %v13889_v20  ;;  %v4962_v33 = vld [vmem:[#allocation4 + $0x50] sm:$0x1] }
 0x3b5   : > { %v9634_v9 = vrot.slane %v5350_v43, 11  ;;  %v5360_v31 = vor.u32 %v5358_v27, %v5357_v18  ;;  %v13915_v45 = vunpack.c.l.b16 %v5792_v50  ;;  %v13921_v6 = vrot.slane %v5433_v56, 4  ;;  %v4911_v15 = vld [vmem:[#allocation4 + $0x8] sm:$0x1] }
 0x3b6   : > { %v9635_v57 = vrot.slane %v5363_v49, 11  ;;  %v5373_v0 = vor.u32 %v5371_v42, %v5370_v23  ;;  %v5801_v48 = vsel %vm11157_vm11, %v5796_v12, %v5800_v54  ;;  %v13929_v18 = vrot.slane %v5436_v40, 5  ;;  %v10639_v42 = vld [vmem:[%s15440_s3 + $0x20] sm:$0xff] }
 0x3b7   : > { %v13931_v27 = vrot.slane %v5777_v10, 4  ;;  %v13933_v53 = vunpack.c.l.b16 %v5801_v48  ;;  %v4948_v17 = vsel %vm12212_vm9, 0, %v4947_v52  ;;  %v5782_v8 = vrot.slane %v5780_v13, 5  ;;  %5731 = vmatpush.bf16.msrb.mxu3 %v10639_v42 }
 0x3b8   : > { %4949 = vst [vmem:[#allocation4 + $0x14] sm:$0x1] %v4948_v17  ;;  %v5768_v23 = vor.u32 %v13896_v1, %v13885_v39  ;;  %v4930_v3 = vsel %vm12177_vm4, 0, %v4929_v55  ;;  %v13947_v11 = vor.u32 %v5384_v2, %v13857_v14  ;;  %v5361_v43 = vsel %vm11095_vm8, %v9634_v9, %v5360_v31  ;;  %v4965_v1 = vld [vmem:[#allocation4 + $0x5c] sm:$0x1] }
 0x3b9   : > { %v5861_v4 = vpack.c.b16 %v13933_v53, %v13915_v45  ;;  %4931 = vst [vmem:[#allocation4 + $0x24] sm:$0x8] %v4930_v3  ;;  %v4908_v38 = vsel %vm12177_vm4, 0, %v4907_v60  ;;  %v4933_v39 = vsel %vm12177_vm4, 0, %v4932_v22  ;;  %v5374_v26 = vsel %vm11095_vm8, %v9635_v57, %v5373_v0 }
 0x3ba   : > { %v13957_v49 = vld [vmem:[#allocation4 + $0x4c] sm:$0xf]  ;;  %v5342_v2 = vshrl.u32 %v13917_v41, 16  ;;  %4909 = vst [vmem:[#allocation4] sm:$0x8] %v4908_v38  ;;  %v4936_v14 = vsel %vm12177_vm4, 0, %v4935_v51  ;;  %v13967_v29 = vor.u32 %v5397_v5, %v13867_v59  ;;  %v13973_v55 = vunpack.c.l.b16 %v5361_v43 }
 0x3bb   : > { %v5420_v19 = vshrl.u32 %v13957_v49, 16  ;;  %v5423_v52 = vshll.u32 %v13957_v49, 16  ;;  %v5547_v10 = vunpack.c.l.b16 %v13957_v49  ;;  %v5345_v28 = vshll.u32 %v13917_v41, 16  ;;  %4934 = vst [vmem:[#allocation4 + $0x30] sm:$0x8] %v4933_v39 }
 0x3bc   : > { %4937 = vst [vmem:[#allocation4 + $0x3c] sm:$0x8] %v4936_v14  ;;  %v4960_v13 = vsel %vm12212_vm9, 0, %v4959_v32  ;;  %v4963_v25 = vsel %vm12212_vm9, 0, %v4962_v33  ;;  %v4966_v5 = vsel %vm12212_vm9, 0, %v4965_v1  ;;  %v5468_v54 = vunpack.c.l.b16 %v5374_v26  ;;  %v10643_v32 = vld [vmem:[%s15440_s3 + $0x40] sm:$0xff] }
 0x3bd   : > { %v5557_v59 = vpack.c.b16 %v5547_v10, %v5546_v24  ;;  %v5811_v50 = vrot.slane %v5420_v19, 4  ;;  %v5812_v12 = vrot.slane %v5423_v52, 5  ;;  %4961 = vst [vmem:[#allocation4 + $0x44] sm:$0x1] %v4960_v13  ;;  %v13989_v9 = vpack.c.b16 %v5548_v58, %v5547_v10  ;;  %5660 = vmatpush.bf16.msrb.mxu2 %v10643_v32 }
 0x3be   : > { %v5344_v31 = vrot.slane %v5342_v2, 7  ;;  %v5757_v60 = vrot.slane %v5342_v2, 4  ;;  %4964 = vst [vmem:[#allocation4 + $0x50] sm:$0x1] %v4963_v25  ;;  %v5822_v57 = vor.u32 %v13929_v18, %v13921_v6  ;;  %v5783_v24 = vsel %vm11157_vm11, %v13931_v27, %v5782_v8  ;;  %v3634_v6 = vpop.f32.mrf.mxu3  ;;  %v3791_v18 = vpop.f32.mrf.mxu0 }
 0x3bf   : > { %5563 = vrot.lane.b32.xlu2 %v5557_v59, %s10942_s25  ;;  %v5758_v0 = vrot.slane %v5345_v28, 5  ;;  %v5311_v48 = vld [vmem:[#allocation4 + $0x14] sm:$0xf]  ;;  %4967 = vst [vmem:[#allocation4 + $0x5c] sm:$0x1] %v4966_v5  ;;  %v5813_v22 = vor.u32 %v5812_v12, %v5811_v50  ;;  %v4912_v51 = vsel %vm12212_vm9, 0, %v4911_v15  ;;  %5574 = vrot.lane.b32.xlu0 %v13989_v9, %s10943_s21  ;;  %v5804_v33 = vor.u32 %v13906_v62, %v13902_v61  ;;  %v14008_v8 = vpop.f32.mrf.mxu1 }
 0x3c0   : > { %v5409_v17 = vrot.slane %v5407_v63, 7  ;;  %v5315_v27 = vld [vmem:[#allocation4 + $0x24] sm:$0xf]  ;;  %v5771_v42 = vshll.u32 %v5311_v48, 16  ;;  %4913 = vst [vmem:[#allocation4 + $0x8] sm:$0x1] %v4912_v51  ;;  %v5479_v63 = vpack.c.b16 %v5468_v54, %v13973_v55  ;;  %v14011_v38 = vunpack.c.l.b16 %v5783_v24 }
 0x3c1   : > { %v5376_v3 = vshrl.u32 %v5315_v27, 16  ;;  %v5306_v43 = vld [vmem:[#allocation4] sm:$0xf]  ;;  %v5347_v1 = vor.u32 %v5345_v28, %v5344_v31  ;;  %v5769_v2 = vrot.slane %v5768_v23, 4  ;;  %v5759_v13 = vor.u32 %v5758_v0, %v5757_v60 }
 0x3c2   : > { %v5337_v39 = vshrl.u32 %v5306_v43, 16  ;;  %v5318_v26 = vld [vmem:[#allocation4 + $0x30] sm:$0xf]  ;;  %v5412_v25 = vor.u32 %v5410_v34, %v5409_v17  ;;  %v5805_v59 = vrot.slane %v5804_v33, 4  ;;  %v5773_v50 = vrot.slane %v5771_v42, 5 }
 0x3c3   : > { %v9636_v14 = vrot.slane %v5376_v3, 11  ;;  %v5321_v15 = vld [vmem:[#allocation4 + $0x3c] sm:$0xf]  ;;  %v5389_v10 = vshrl.u32 %v5318_v26, 16  ;;  %v5823_v28 = vrot.slane %v5822_v57, 4  ;;  %v5814_v17 = vrot.slane %v5813_v22, 4 }
 0x3c4   : > { %v9633_v61 = vrot.slane %v5337_v39, 11  ;;  %v5402_v62 = vshrl.u32 %v5321_v15, 16  ;;  %v5323_v5 = vld [vmem:[#allocation4 + $0x44] sm:$0xf]  ;;  %v5760_v32 = vrot.slane %v5759_v13, 4  ;;  %v3792_v13 = vadd.f32 %v3791_v18, %v3634_v6 }
 0x3c5   : > { %v5387_v12 = vsel %vm11095_vm8, %v9636_v14, %v13947_v11  ;;  %v9637_v24 = vrot.slane %v5389_v10, 11  ;;  %v5807_v0 = vshll.u32 %v5323_v5, 16  ;;  %v5326_v48 = vld [vmem:[#allocation4 + $0x50] sm:$0xf]  ;;  %v5327_v10 = vld [vmem:[#allocation4 + $0x54] sm:$0xf] }
 0x3c6   : > { %v14018_v31 = vunpack.c.l.b16 %v5387_v12  ;;  %v5348_v23 = vsel %vm11095_vm8, %v9633_v61, %v5347_v1  ;;  %v9638_v60 = vrot.slane %v5402_v62, 11  ;;  %v5329_v34 = vld [vmem:[#allocation4 + $0x5c] sm:$0xf]  ;;  %v3636_v11 = vpop.f32.mrf.mxu3  ;;  %v3793_v57 = vpop.f32.mrf.mxu0  ;;  %v5816_v1 = vshll.u32 %v5326_v48, 16 }
 0x3c7   : > { %v14022_v51 = vunpack.c.l.b16 %v5348_v23  ;;  %v5400_v21 = vsel %vm11095_vm8, %v9637_v24, %v13967_v29  ;;  %5483 = vrot.lane.b32.xlu0 %v5479_v63, %s10942_s25  ;;  %v5809_v3 = vrot.slane %v5807_v0, 5  ;;  %v5308_v43 = vld [vmem:[#allocation4 + $0x8] sm:$0xf]  ;;  %v4413_v39 = vpop.f32.mrf.mxu1  ;;  %v5774_v29 = vsel %vm11157_vm11, %v5769_v2, %v5773_v50 }
 0x3c8   : > { %v14029_v27 = vpack.c.b16 %v14018_v31, %v5468_v54  ;;  %v5413_v33 = vsel %vm11095_vm8, %v9638_v60, %v5412_v25  ;;  %v14033_v42 = vunpack.c.l.b16 %v5400_v21  ;;  %v5825_v14 = vshll.u32 %v5329_v34, 16 }
 0x3c9   : > { %v5474_v22 = vpack.c.b16 %v13973_v55, %v14022_v51  ;;  %v14039_v63 = vunpack.c.l.b16 %v5413_v33  ;;  %v5810_v26 = vsel %vm11157_vm11, %v5805_v59, %v5809_v3  ;;  %v5762_v15 = vshll.u32 %v5308_v43, 16  ;;  %v5324_v59 = vld [vmem:[#allocation4 + $0x48] sm:$0xf]  ;;  %v10846_v55 = vld [vmem:[%s15444_s7] ss:$0 sm:$0xff] }
 0x3ca   : > { %v5480_v54 = vpack.c.b16 %v14033_v42, %v14018_v31  ;;  %v14049_v2 = vunpack.c.l.b16 %v5810_v26  ;;  %v5818_v62 = vrot.slane %v5816_v1, 5  ;;  %v5827_v25 = vrot.slane %v5825_v14, 5 }
 0x3cb   : > { %v14047_v61 = vpack.c.b16 %v14039_v63, %v14033_v42  ;;  %v5764_v5 = vrot.slane %v5762_v15, 5  ;;  %v5435_v50 = vrot.slane %v5433_v56, 7  ;;  %v14055_v12 = vpack.c.b16 %v13915_v45, %v14011_v38 }
 0x3cc   : > { %v14057_v24 = vunpack.c.l.b16 %v5774_v29  ;;  %v14061_v6 = vpack.c.b16 %v14049_v2, %v13933_v53  ;;  %v5428_v18 = vshrl.u32 %v5327_v10, 16  ;;  %v5819_v23 = vsel %vm11157_vm11, %v5814_v17, %v5818_v62 }
 0x3cd   : > { %v5828_v60 = vsel %vm11157_vm11, %v5823_v28, %v5827_v25  ;;  %v5765_v56 = vsel %vm11157_vm11, %v5760_v32, %v5764_v5  ;;  %v4449_v0 = vadd.f32 %v14008_v8, %v3792_v13  ;;  %v14070_v48 = vunpack.c.l.b16 %v5819_v23  ;;  %v10638_v5 = vld [vmem:[%s15440_s3 + $0x18] sm:$0xff] }
 0x3ce   : > { %v14072_v21 = vunpack.c.l.b16 %v5828_v60  ;;  %v14074_v34 = vunpack.c.l.b16 %v5765_v56  ;;  %v5422_v33 = vrot.slane %v5420_v19, 7  ;;  %v5415_v17 = vshrl.u32 %v5324_v59, 16  ;;  %v3639_v3 = vpop.f32.mrf.mxu3  ;;  %v3796_v28 = vpop.f32.mrf.mxu0  ;;  %5732 = vmatpush.bf16.msrb.mxu3 %v10638_v5 }
 0x3cf   : > { %5874 = vrot.lane.b32.xlu0 %v14055_v12, %s10943_s21  ;;  %v3797_v43 = vadd.f32 %v3796_v28, %v3639_v3  ;;  %v4416_v29 = vpop.f32.mrf.mxu1  ;;  %v5862_v32 = vpack.c.b16 %v14070_v48, %v14049_v2  ;;  %v9640_v26 = vrot.slane %v5428_v18, 11  ;;  %v5438_v19 = vor.u32 %v5436_v40, %v5435_v50 }
 0x3d0   : > { %v14082_v8 = vpack.c.b16 %v14072_v21, %v14070_v48  ;;  %v4487_v14 = vadd.f32 %v13554_v16, %v4449_v0  ;;  %v3794_v10 = vadd.f32 %v3793_v57, %v3636_v11  ;;  %v9639_v13 = vrot.slane %v5415_v17, 11 }
 0x3d1   : > { %v4451_v15 = vadd.f32 %v4416_v29, %v3797_v43  ;;  %v5425_v62 = vor.u32 %v5423_v52, %v5422_v33  ;;  %v5439_v59 = vsel %vm11095_vm8, %v9640_v26, %v5438_v19 }
 0x3d2   : > { %v4519_v18 = vmax.f32 %v4487_v14, 0.0  ;;  %v4450_v40 = vadd.f32 %v4413_v39, %v3794_v10  ;;  %v14105_v60 = vunpack.c.l.b16 %v5439_v59 }
 0x3d3   : > { %v4489_v25 = vadd.f32 %v13554_v16, %v4451_v15  ;;  %v5426_v11 = vsel %vm11095_vm8, %v9639_v13, %v5425_v62 }
 0x3d4   : > { %v14107_v28 = vunpack.c.l.b16 %v5426_v11  ;;  %v4488_v45 = vadd.f32 %v13554_v16, %v4450_v40 }
 0x3d5   : > { %v4521_v23 = vmax.f32 %v4489_v25, 0.0 }
 0x3d6   : > { %v3641_v49 = vpop.f32.mrf.mxu3  ;;  %v3798_v52 = vpop.f32.mrf.mxu0  ;;  %v14112_v26 = vpack.c.b16 %v14105_v60, %v14107_v28  ;;  %v4520_v13 = vmax.f32 %v4488_v45, 0.0  ;;  %v5481_v35 = vpack.c.b16 %v14107_v28, %v14039_v63 }
 0x3d7   : > { %5866 = vrot.lane.b32.xlu0 %v5861_v4, %s10942_s25  ;;  %v4537_v57 = vmax.f32 %v4519_v18, %v4521_v23  ;;  %v3799_v50 = vadd.f32 %v3798_v52, %v3641_v49  ;;  %v4418_v3 = vpop.f32.mrf.mxu1 }
 0x3d9   : > { %v4597_v56 = vrot.slane %v4537_v57, 2  ;;  %v4598_v0 = vrot.slane %v4537_v57, 4  ;;  %v4599_v33 = vrot.slane %v4537_v57, 6  ;;  %v9625_v17 = vrot.slane %v4537_v57, 9 }
 0x3da   : > { %v4452_v53 = vadd.f32 %v4418_v3, %v3799_v50 }
 0x3db   : > { %v9626_v4 = vrot.slane %v4597_v56, 9  ;;  %v9627_v39 = vrot.slane %v4598_v0, 9  ;;  %v9628_v43 = vrot.slane %v4599_v33, 9  ;;  %v4899_v29 = vmax.f32 %v4537_v57, %v9625_v17 }
 0x3dc   : > { %v4490_v19 = vadd.f32 %v13554_v16, %v4452_v53 }
 0x3dd   : > { %v4900_v14 = vmax.f32 %v4597_v56, %v9626_v4  ;;  %v4901_v15 = vmax.f32 %v4598_v0, %v9627_v39  ;;  %v4902_v10 = vmax.f32 %v4599_v33, %v9628_v43  ;;  %v5027_v25 = vpack.c.bf16 %v4899_v29, %v4899_v29 }
 0x3de   : > { %v4522_v62 = vmax.f32 %v4490_v19, 0.0 }
 0x3df   : > { %5497 = vrot.lane.b32.xlu0 %v14112_v26, %s10943_s21  ;;  %v5028_v5 = vpack.c.bf16 %v4900_v14, %v4900_v14  ;;  %v5029_v59 = vpack.c.bf16 %v4901_v15, %v4901_v15  ;;  %v5030_v23 = vpack.c.bf16 %v4902_v10, %v4902_v10  ;;  %v5155_v16 = vunpack.c.l.b16 %v5027_v25 }
 0x3e0   : > { %v4538_v18 = vmax.f32 %v4520_v13, %v4522_v62 }
 0x3e1   : > { %v5156_v40 = vunpack.c.l.b16 %v5028_v5  ;;  %v5157_v49 = vunpack.c.l.b16 %v5029_v59  ;;  %v5158_v53 = vunpack.c.l.b16 %v5030_v23 }
 0x3e2   : > { %v4600_v52 = vrot.slane %v4538_v18, 2  ;;  %v4601_v11 = vrot.slane %v4538_v18, 4  ;;  %v4602_v57 = vrot.slane %v4538_v18, 6  ;;  %v9629_v50 = vrot.slane %v4538_v18, 9 }
 0x3e3   : > { %v5268_v56 = vrot.slane %v5156_v40, 7  ;;  %v5270_v45 = vrot.slane %v5157_v49, 6  ;;  %v5272_v25 = vrot.slane %v5158_v53, 5 }
 0x3e4   : > { %v9630_v0 = vrot.slane %v4600_v52, 9  ;;  %v9631_v33 = vrot.slane %v4601_v11, 9  ;;  %v9632_v17 = vrot.slane %v4602_v57, 9  ;;  %v4903_v3 = vmax.f32 %v4538_v18, %v9629_v50 }
 0x3e5   : > { %v5269_v4 = vsel %vm5164_vm15, %v5268_v56, %v5155_v16 }
 0x3e6   : > { %v4904_v39 = vmax.f32 %v4600_v52, %v9630_v0  ;;  %v4905_v43 = vmax.f32 %v4601_v11, %v9631_v33  ;;  %v4906_v29 = vmax.f32 %v4602_v57, %v9632_v17  ;;  %v5031_v19 = vpack.c.bf16 %v4903_v3, %v4903_v3  ;;  %v10642_v0 = vld [vmem:[%s15440_s3 + $0x38] sm:$0xff]  ;;  %v10641_v33 = vld [vmem:[%s15440_s3 + $0x30] sm:$0xff] }
 0x3e7   : > { %v5271_v13 = vsel %vm5167_vm0, %v5270_v45, %v5269_v4  ;;  %5661 = vmatpush.bf16.msrb.mxu2 %v10642_v0  ;;  %v14131_v17 = vld [vmem:[#allocation4 + $0x70] sm:$0xf]  ;;  %v10637_v3 = vld [vmem:[%s15440_s3 + $0x10] sm:$0xff] }
 0x3e8   : > { %v5032_v14 = vpack.c.bf16 %v4904_v39, %v4904_v39  ;;  %v5033_v15 = vpack.c.bf16 %v4905_v43, %v4905_v43  ;;  %v5034_v10 = vpack.c.bf16 %v4906_v29, %v4906_v29  ;;  %v5159_v62 = vunpack.c.l.b16 %v5031_v19  ;;  %5733 = vmatpush.bf16.msrb.mxu3 %v10637_v3 }
 0x3e9   : > { %v5273_v18 = vsel %vm5170_vm13, %v5272_v25, %v5271_v13  ;;  %v5568_v45 = vunpack.c.l.b16 %v14131_v17  ;;  %v5541_v43 = vunpack.c.l.b16 %v13917_v41  ;;  %v4944_v41 = vld [vmem:[#allocation4 + $0x60] sm:$0x8] }
 0x3ea   : > { %v5160_v5 = vunpack.c.l.b16 %v5032_v14  ;;  %v5161_v59 = vunpack.c.l.b16 %v5033_v15  ;;  %v5162_v40 = vunpack.c.l.b16 %v5034_v10  ;;  %v5274_v1 = vrot.slane %v5159_v62, 4 }
 0x3eb   : > { %5662 = vmatpush.bf16.msrb.mxu2 %v10641_v33  ;;  %v5549_v29 = vpack.c.b16 %v5542_v30, %v5541_v43  ;;  %v5860_v14 = vpack.c.b16 %v14011_v38, %v14057_v24  ;;  %v4968_v30 = vld [vmem:[#allocation4 + $0x68] sm:$0x1]  ;;  %v4945_v13 = vsel %vm12177_vm4, 0, %v4944_v41  ;;  %v4920_v62 = vsel %vm12212_vm9, 0, %v4919_v46  ;;  %v4915_v33 = vld [vmem:[#allocation4 + $0x6c] sm:$0x8] }
 0x3ec   : > { %v5276_v23 = vrot.slane %v5160_v5, 3  ;;  %v5278_v49 = vrot.slane %v5161_v59, 2  ;;  %v5275_v52 = vsel %vm5173_vm6, %v5274_v1, %v5273_v18  ;;  %v5280_v57 = vrot.slane %v5162_v40, 1  ;;  %4946 = vst [vmem:[#allocation4 + $0x60] sm:$0x8] %v4945_v13 }
 0x3ed   : > { %v4969_v25 = vsel %vm12212_vm9, 0, %v4968_v30  ;;  %v5459_v5 = vshrl.u32 %v14131_v17, 16  ;;  %v5462_v59 = vshll.u32 %v14131_v17, 16  ;;  %4921 = vst [vmem:[#allocation4 + $0x74] sm:$0x1] %v4920_v62  ;;  %v4916_v28 = vsel %vm12177_vm4, 0, %v4915_v33 }
 0x3ee   : > { %v5277_v11 = vsel %vm5176_vm14, %v5276_v23, %v5275_v52  ;;  %4970 = vst [vmem:[#allocation4 + $0x68] sm:$0x1] %v4969_v25  ;;  %v5562_v23 = vpop.permute.xlu0 %5561  ;;  %vm6018_vm4 = vcmask 519171   ;;  %vm15500_vm9 = vsmask.f32 7950 }
 0x3ef   : > { %v5279_v50 = vsel %vm5179_vm7, %v5278_v49, %v5277_v11  ;;  %v5838_v40 = vrot.slane %v5459_v5, 4  ;;  %v5839_v18 = vrot.slane %v5462_v59, 5  ;;  %v5583_v11 = vsel %vm3145_vm5, %v13825_v7, %v5562_v23  ;;  %4917 = vst [vmem:[#allocation4 + $0x6c] sm:$0x8] %v4916_v28 }
 0x3f0   : > { %v5281_v16 = vsel %vm5182_vm1, %v5280_v57, %v5279_v50  ;;  %vm6023_vm1 = vcmask 519168   ;;  %vm6025_vm7 = vcmask 516096  }
 0x3f1   : > { %v5289_v56 = vpack.c.b16 %v5281_v16, %v5281_v16  ;;  %v5840_v0 = vor.u32 %v5839_v18, %v5838_v40  ;;  %v10648_v40 = vld [vmem:[%s15440_s3 + $0x68] sm:$0xff] }
 0x3f3   : > { %5305 = vst.msk [vmem:[#allocation4 + $0x64] sm:$0xf] %vm2381_vm2, %v5289_v56  ;;  %v5330_v49 = vld [vmem:[#allocation4 + $0x60] sm:$0xf]  ;;  %vm14313_vm2 = vmand %vm6025_vm7, %vm347_vm3  ;;  %vm7287_vm7 = vsmask.f32 2312 }
 0x3f4   : > { %v5571_v15 = vpop.permute.xlu2 %5570  ;;  %v5441_v50 = vshrl.u32 %v5330_v49, 16  ;;  %v5335_v56 = vld [vmem:[#allocation4 + $0x74] sm:$0xf] }
 0x3f5   : > { %v5332_v17 = vld [vmem:[#allocation4 + $0x68] sm:$0xf]  ;;  %v5843_v63 = vshll.u32 %v5335_v56, 16  ;;  %v15496_v56 = vpack.c.b16 %v14057_v24, %v14074_v34 }
 0x3f6   : > { %v9641_v3 = vrot.slane %v5441_v50, 11 }
 0x3f7   : > { %v5845_v43 = vrot.slane %v5843_v63, 5 }
 0x3fa   : > { %v5331_v1 = vld [vmem:[#allocation4 + $0x64] sm:$0xf] }
 0x3fb   : > { %v5554_v53 = vunpack.c.l.b16 %v5331_v1  ;;  %v5449_v38 = vshll.u32 %v5331_v1, 16 }
 0x3fd   : > { %v5558_v4 = vpack.c.b16 %v5554_v53, %v5548_v58  ;;  %v5569_v39 = vpack.c.b16 %v5568_v45, %v5554_v53  ;;  %v5446_v58 = vshrl.u32 %v5331_v1, 16  ;;  %v5830_v42 = vrot.slane %v5449_v38, 5 }
 0x3fe   : > { %v5834_v53 = vshll.u32 %v5332_v17, 16 }
 0x3ff   : > { %5565 = vrot.lane.b32.xlu1 %v5558_v4, %s10942_s25  ;;  %5576 = vrot.lane.b32.xlu2 %v5569_v39, %s10943_s21  ;;  %v5829_v31 = vrot.slane %v5446_v58, 4  ;;  %v5841_v39 = vrot.slane %v5840_v0, 4 }
 0x400   : > { %v5836_v4 = vrot.slane %v5834_v53, 5 }
 0x401   : > { %v5831_v52 = vor.u32 %v5830_v42, %v5829_v31  ;;  %v10650_v42 = vld [vmem:[%s15440_s3 + $0x78] sm:$0xff] }
 0x403   : > { %v5832_v45 = vrot.slane %v5831_v52, 4  ;;  %v10647_v52 = vld [vmem:[%s15440_s3 + $0x60] sm:$0xff] }
 0x407   : > { %5493 = vrot.lane.b32.xlu1 %v14029_v27, %s10943_s21  ;;  %5864 = vrot.lane.b32.xlu2 %v5860_v14, %s10942_s25  ;;  %v5837_v14 = vsel %vm11157_vm11, %v5832_v45, %v5836_v4 }
 0x40c   : > { %v5560_v19 = vpop.permute.xlu1 %5559 }
 0x40d   : > { %v5580_v10 = vsel %vm3145_vm5, %v5549_v29, %v5560_v19  ;;  %v5461_v19 = vrot.slane %v5459_v5, 7  ;;  %v10636_v5 = vld [vmem:[%s15440_s3 + $0x8] sm:$0xff] }
 0x40e   : > { %v5591_v20 = vsel %vm3194_vm10, %v5580_v10, %v5571_v15  ;;  %v5846_v15 = vsel %vm11157_vm11, %v5841_v39, %v5845_v43  ;;  %v5333_v10 = vld [vmem:[#allocation4 + $0x6c] sm:$0xf]  ;;  %5734 = vmatpush.bf16.msrb.mxu3 %v10636_v5 }
 0x40f   : > { %9679 = vmatmul.msk.bf16.vlgmr.msrb.gmra.mxu2 %vm3522_vm12, %v5591_v20  ;;  %5485 = vrot.lane.b32.xlu1 %v5480_v54, %s10942_s25  ;;  %v5448_v54 = vrot.slane %v5446_v58, 7  ;;  %v5454_v20 = vshrl.u32 %v5333_v10, 16  ;;  %v5859_v58 = vunpack.c.l.b16 %v5837_v14  ;;  %v5872_v41 = vunpack.c.l.b16 %v5846_v15 }
 0x410   : > { %5495 = vrot.lane.b32.xlu2 %v14047_v61, %s10943_s21  ;;  %v5464_v48 = vor.u32 %v5462_v59, %v5461_v19  ;;  %v10652_v59 = vld [vmem:[%s15440_s3 + $0x88] sm:$0xff] }
 0x411   : > { %v5451_v16 = vor.u32 %v5449_v38, %v5448_v54  ;;  %v9642_v2 = vrot.slane %v5454_v20, 11  ;;  %v5863_v13 = vpack.c.b16 %v5859_v58, %v14072_v21  ;;  %5961 = vmatpush.bf16.msra.mxu2 %v10652_v59  ;;  %v10651_v21 = vld [vmem:[%s15440_s3 + $0x80] sm:$0xff]  ;;  %v10649_v54 = vld [vmem:[%s15440_s3 + $0x70] sm:$0xff] }
 0x413   : > { %v5452_v7 = vsel %vm11095_vm8, %v9641_v3, %v5451_v16 }
 0x414   : > { %v5478_v29 = vunpack.c.l.b16 %v5452_v7 }
 0x415   : > { %5962 = vmatpush.bf16.msra.mxu2 %v10651_v21 }
 0x416   : > { %v5482_v44 = vpack.c.b16 %v5478_v29, %v14105_v60  ;;  %v5873_v60 = vpack.c.b16 %v5872_v41, %v5859_v58 }
 0x417   : > { %5876 = vrot.lane.b32.xlu1 %v14061_v6, %s10943_s21 }
 0x418   : > { %5487 = vrot.lane.b32.xlu2 %v5481_v35, %s10942_s25  ;;  %5489 = vrot.lane.b32.xlu0 %v5482_v44, %s10942_s25 }
 0x419   : > { %v5564_v38 = vpop.permute.xlu2 %5563  ;;  %5963 = vmatpush.bf16.msra.mxu2 %v10650_v42 }
 0x41a   : > { %v5586_v62 = vsel %vm3145_vm5, %v13874_v47, %v5564_v38  ;;  %v10635_v47 = vld [vmem:[%s15440_s3] sm:$0xff]  ;;  %v10688_v38 = vld [vmem:[%s15441_s4 + $0x118] sm:$0xff] }
 0x41b   : > { %5735 = vmatpush.bf16.msrb.mxu3 %v10635_v47  ;;  %6958 = vmatpush.bf16.msra.mxu0 %v10688_v38 }
 0x41d   : > { %v5573_v57 = vpop.permute.xlu1 %5572  ;;  %5964 = vmatpush.bf16.msra.mxu2 %v10649_v54 }
 0x41e   : > { %v5593_v1 = vsel %vm3194_vm10, %v5583_v11, %v5573_v57 }
 0x41f   : > { %9680 = vmatmul.msk.bf16.gmra.mxu2 %vm3522_vm12, %v5593_v1  ;;  %5868 = vrot.lane.b32.xlu1 %v5862_v32, %s10942_s25  ;;  %v5465_v32 = vsel %vm11095_vm8, %v9642_v2, %v5464_v48 }
 0x420   : > { %5878 = vrot.lane.b32.xlu2 %v14082_v8, %s10943_s21  ;;  %v5491_v46 = vunpack.c.l.b16 %v5465_v32  ;;  %5880 = vrot.lane.b32.xlu0 %v5873_v60, %s10943_s21 }
 0x421   : > { %5965 = vmatpush.bf16.msra.mxu2 %v10648_v40 }
 0x422   : > { %v5492_v30 = vpack.c.b16 %v5491_v46, %v5478_v29 }
 0x425   : > { %5966 = vmatpush.bf16.msra.mxu2 %v10647_v52  ;;  %v10687_v52 = vld [vmem:[%s15441_s4 + $0x110] sm:$0xff] }
 0x426   : > { %6959 = vmatpush.bf16.msra.mxu0 %v10687_v52  ;;  %v6075_v52 = vld [vmem:[#allocation5 + $0x44] sm:$0x1] }
 0x427   : > { %5499 = vrot.lane.b32.xlu1 %v5492_v30, %s10943_s21  ;;  %v10676_v30 = vld [vmem:[%s15441_s4 + $0xb8] sm:$0xff] }
 0x428   : > { %5870 = vrot.lane.b32.xlu2 %v5863_v13, %s10942_s25 }
 0x429   : > { %6522 = vmatpush.bf16.msrb.mxu2 %v10676_v30 }
 0x42f   : > { %5999 = vrot.lane.b32.xlu1 %v10846_v55, %s10943_s21  ;;  %v6069_v55 = vld [vmem:[#allocation5 + $0x2c] sm:$0x1] }
 0x431   : > { %v5575_v25 = vpop.permute.xlu0 %5574 }
 0x432   : > { %v5595_v31 = vsel %vm3194_vm10, %v5586_v62, %v5575_v25 }
 0x433   : > { %9681 = vmatmul.msk.bf16.gmra.mxu2 %vm3522_vm12, %v5595_v31  ;;  %v10675_v31 = vld [vmem:[%s15441_s4 + $0xb0] sm:$0xff] }
 0x434   : > { %6523 = vmatpush.bf16.msrb.mxu2 %v10675_v31 }
 0x439   : > { %v5484_v11 = vpop.permute.xlu0 %5483 }
 0x43a   : > { %v5503_v57 = vsel %vm3145_vm5, %v5474_v22, %v5484_v11 }
 0x441   : > { %v5875_v33 = vpop.permute.xlu0 %5874 }
 0x449   : > { %v5867_v34 = vpop.permute.xlu0 %5866 }
 0x44a   : > { %v5887_v28 = vsel %vm3145_vm5, %v14055_v12, %v5867_v34  ;;  %v6070_v34 = vsel %vm14313_vm2, 0, %v6069_v55 }
 0x44b   : > { %6071 = vst [vmem:[#allocation5 + $0x2c] sm:$0x1] %v6070_v34 }
 0x451   : > { %v5498_v45 = vpop.permute.xlu0 %5497 }
 0x459   : > { %v5577_v23 = vpop.permute.xlu2 %5576 }
 0x471   : > { %v5566_v18 = vpop.permute.xlu1 %5565 }
 0x472   : > { %v5589_v35 = vsel %vm3145_vm5, %v13989_v9, %v5566_v18  ;;  %v5865_v9 = vpop.permute.xlu2 %5864  ;;  %v10674_v18 = vld [vmem:[%s15441_s4 + $0xa8] sm:$0xff] }
 0x473   : > { %v5597_v49 = vsel %vm3194_vm10, %v5589_v35, %v5577_v23  ;;  %v5884_v0 = vsel %vm3145_vm5, %v15496_v56, %v5865_v9  ;;  %6524 = vmatpush.bf16.msrb.mxu2 %v10674_v18 }
 0x474   : > { %9682 = vmatmul.msk.bf16.gmra.mxu2 %vm3522_vm12, %v5597_v49  ;;  %v5895_v1 = vsel %vm3194_vm10, %v5884_v0, %v5875_v33  ;;  %v10673_v49 = vld [vmem:[%s15441_s4 + $0xa0] sm:$0xff] }
 0x477   : > { %6525 = vmatpush.bf16.msrb.mxu2 %v10673_v49 }
 0x479   : > { %v5494_v50 = vpop.permute.xlu1 %5493 }
 0x47a   : > { %v5514_v16 = vsel %vm3194_vm10, %v5503_v57, %v5494_v50  ;;  %v5496_v22 = vpop.permute.xlu2 %5495  ;;  %v10686_v57 = vld [vmem:[%s15441_s4 + $0x108] sm:$0xff] }
 0x47b   : > { %9707 = vmatmul.msk.bf16.vlgmr.msrb.gmra.mxu3 %vm3522_vm12, %v5514_v16  ;;  %6960 = vmatpush.bf16.msra.mxu0 %v10686_v57 }
 0x481   : > { %v5486_v17 = vpop.permute.xlu1 %5485 }
 0x482   : > { %v5506_v51 = vsel %vm3145_vm5, %v14029_v27, %v5486_v17  ;;  %v5488_v53 = vpop.permute.xlu2 %5487  ;;  %v6066_v17 = vld [vmem:[#allocation5 + $0x20] sm:$0x1] }
 0x483   : > { %v5516_v24 = vsel %vm3194_vm10, %v5506_v51, %v5496_v22  ;;  %v5509_v27 = vsel %vm3145_vm5, %v14047_v61, %v5488_v53  ;;  %v10665_v22 = vld [vmem:[%s15441_s4 + $0x60] sm:$0xff] }
 0x484   : > { %9747 = vmatmul.msk.bf16.vlgmr.msra.gmra.mxu2 %vm3522_vm12, %v5895_v1  ;;  %v5518_v7 = vsel %vm3194_vm10, %v5509_v27, %v5498_v45  ;;  %v10685_v1 = vld [vmem:[%s15441_s4 + $0x100] sm:$0xff] }
 0x485   : > { %6961 = vmatpush.bf16.msra.mxu0 %v10685_v1  ;;  %v6076_v1 = vsel %vm14313_vm2, 0, %v6075_v52  ;;  %v6063_v52 = vld [vmem:[#allocation5 + $0x14] sm:$0x1] }
 0x486   : > { %6077 = vst [vmem:[#allocation5 + $0x44] sm:$0x1] %v6076_v1 }
 0x489   : > { %v5877_v63 = vpop.permute.xlu1 %5876 }
 0x48a   : > { %v5897_v3 = vsel %vm3194_vm10, %v5887_v28, %v5877_v63  ;;  %v5879_v43 = vpop.permute.xlu2 %5878  ;;  %v5490_v29 = vpop.permute.xlu0 %5489 }
 0x48b   : > { %9708 = vmatmul.msk.bf16.gmra.mxu3 %vm3522_vm12, %v5516_v24  ;;  %v5512_v19 = vsel %vm3145_vm5, %v14112_v26, %v5490_v29  ;;  %v15497_v26 = vmov 0   ;;  %v6067_v24 = vsel %vm14313_vm2, 0, %v6066_v17 }
 0x48c   : > { %6024 = vst.msk [vmem:[#allocation5 + $0x4] sm:$0xf] %vm6023_vm1, %v15497_v26 }
 0x48d   : > { %6034 = vst.msk [vmem:[#allocation5 + $0x70] sm:$0xf] %vm6023_vm1, %v15497_v26 }
 0x48e   : > { %6068 = vst [vmem:[#allocation5 + $0x20] sm:$0x1] %v6067_v24 }
 0x491   : > { %v5869_v4 = vpop.permute.xlu1 %5868 }
 0x492   : > { %v5890_v39 = vsel %vm3145_vm5, %v14061_v6, %v5869_v4  ;;  %v5871_v14 = vpop.permute.xlu2 %5870  ;;  %v5881_v10 = vpop.permute.xlu0 %5880 }
 0x493   : > { %v5899_v12 = vsel %vm3194_vm10, %v5890_v39, %v5879_v43  ;;  %v5893_v15 = vsel %vm3145_vm5, %v14082_v8, %v5871_v14  ;;  %v5664_v20 = vpop.f32.mrf.mxu2  ;;  %vm14335_vm5 = vmand %vm6018_vm4, %vm15500_vm9  ;;  %vm7290_vm9 = vsmask.f32 6424 }
 0x494   : > { %9748 = vmatmul.msk.bf16.gmra.mxu2 %vm3522_vm12, %v5897_v3  ;;  %v5901_v6 = vsel %vm3194_vm10, %v5893_v15, %v5881_v10 }
 0x499   : > { %v5500_v44 = vpop.permute.xlu1 %5499 }
 0x49a   : > { %v5520_v61 = vsel %vm3194_vm10, %v5512_v19, %v5500_v44  ;;  %v6039_v44 = vld [vmem:[#allocation5 + $0xc] sm:$0x8]  ;;  %v6042_v19 = vld [vmem:[#allocation5 + $0x18] sm:$0x8] }
 0x49b   : > { %9709 = vmatmul.msk.bf16.gmra.mxu3 %vm3522_vm12, %v5518_v7  ;;  %v5666_v58 = vpop.f32.mrf.mxu2 }
 0x4a1   : > { %v14287_v5 = vpop.permute.xlu1 %5999 }
 0x4a3   : > { %v5669_v41 = vpop.f32.mrf.mxu2 }
 0x4a4   : > { %9749 = vmatmul.msk.bf16.gmra.mxu2 %vm3522_vm12, %v5899_v12 }
 0x4ab   : > { %9710 = vmatmul.msk.bf16.gmra.mxu3 %vm3522_vm12, %v5520_v61  ;;  %v5671_v2 = vpop.f32.mrf.mxu2 }
 0x4b4   : > { %9750 = vmatmul.msk.bf16.gmra.mxu2 %vm3522_vm12, %v5901_v6  ;;  %vm7136_vm12 = vcmask 518146  }
 0x4b6   : > { %v14269_v48 = vpop.f32.mrf.mxu2 }
 0x4be   : > { %v14275_v32 = vpop.f32.mrf.mxu2 }
 0x4f7   : > { %v14277_v8 = vpop.f32.mrf.mxu2 }
 0x4fe   : > { %v5737_v60 = vpop.f32.mrf.mxu3 }
 0x4ff   : > { %v14279_v46 = vpop.f32.mrf.mxu2  ;;  %v5738_v13 = vadd.f32 %v5737_v60, %v5664_v20  ;;  %v6114_v60 = vld [vmem:[#allocation5 + $0x2c] sm:$0xf] }
 0x506   : > { %v5739_v62 = vpop.f32.mrf.mxu3 }
 0x507   : > { %v5968_v25 = vpop.f32.mrf.mxu2  ;;  %v5740_v42 = vadd.f32 %v5739_v62, %v5666_v58  ;;  %v6111_v58 = vld [vmem:[#allocation5 + $0x20] sm:$0xf] }
 0x508   : > { %v5988_v59 = vadd.f32 %v5968_v25, %v5738_v13  ;;  %v6709_v30 = vshll.u32 %v6111_v58, 16 }
 0x50a   : > { %v6002_v47 = vadd.f32 %v14287_v5, %v5988_v59 }
 0x50c   : > { %v6010_v21 = vmax.f32 %v6002_v47, 0.0 }
 0x50e   : > { %v6087_v54 = vpack.c.bf16 %v6010_v21, %v6010_v21  ;;  %v5742_v40 = vpop.f32.mrf.mxu3 }
 0x50f   : > { %v5970_v23 = vpop.f32.mrf.mxu2  ;;  %v5743_v16 = vadd.f32 %v5742_v40, %v5669_v41  ;;  %v6040_v41 = vsel %vm14335_vm5, 0, %v6039_v44 }
 0x510   : > { %6095 = vst.msk [vmem:[#allocation5 + $0x10] sm:$0xf] %vm6023_vm1, %v6087_v54  ;;  %v5989_v35 = vadd.f32 %v5970_v23, %v5740_v42  ;;  %v6718_v42 = vshll.u32 %v6114_v60, 16  ;;  %v6072_v23 = vld [vmem:[#allocation5 + $0x38] sm:$0x1] }
 0x511   : > { %6041 = vst [vmem:[#allocation5 + $0xc] sm:$0x8] %v6040_v41  ;;  %v6073_v49 = vsel %vm14313_vm2, 0, %v6072_v23 }
 0x512   : > { %v6003_v11 = vadd.f32 %v14287_v5, %v5989_v35  ;;  %v6711_v35 = vrot.slane %v6709_v30, 5  ;;  %6074 = vst [vmem:[#allocation5 + $0x38] sm:$0x1] %v6073_v49 }
 0x514   : > { %v6011_v50 = vmax.f32 %v6003_v11, 0.0  ;;  %v6045_v11 = vld [vmem:[#allocation5 + $0x24] sm:$0x8] }
 0x515   : > { %v6046_v17 = vsel %vm14335_vm5, 0, %v6045_v11 }
 0x516   : > { %v6088_v9 = vpack.c.bf16 %v6011_v50, %v6011_v50  ;;  %v5744_v56 = vpop.f32.mrf.mxu3  ;;  %6047 = vst [vmem:[#allocation5 + $0x24] sm:$0x8] %v6046_v17  ;;  %v6064_v17 = vsel %vm14313_vm2, 0, %v6063_v52 }
 0x517   : > { %v5973_v0 = vpop.f32.mrf.mxu2  ;;  %v14321_v28 = vld [vmem:[#allocation5 + $0x10] sm:$0xf]  ;;  %v5745_v3 = vadd.f32 %v5744_v56, %v5671_v2  ;;  %v6043_v2 = vsel %vm14335_vm5, 0, %v6042_v19  ;;  %6065 = vst [vmem:[#allocation5 + $0x14] sm:$0x1] %v6064_v17 }
 0x518   : > { %6096 = vst.msk [vmem:[#allocation5 + $0x1c] sm:$0xf] %vm6023_vm1, %v6088_v9  ;;  %v5990_v33 = vadd.f32 %v5973_v0, %v5743_v16  ;;  %v6339_v4 = vunpack.c.l.b16 %v14321_v28  ;;  %v6152_v15 = vshrl.u32 %v14321_v28, 16  ;;  %v6048_v56 = vld [vmem:[#allocation5 + $0x30] sm:$0x8] }
 0x519   : > { %6044 = vst [vmem:[#allocation5 + $0x18] sm:$0x8] %v6043_v2  ;;  %v6049_v55 = vsel %vm14335_vm5, 0, %v6048_v56  ;;  %v10671_v17 = vld [vmem:[%s15441_s4 + $0x90] sm:$0xff] }
 0x51a   : > { %v6004_v51 = vadd.f32 %v14287_v5, %v5990_v33  ;;  %v6154_v31 = vrot.slane %v6152_v15, 7  ;;  %v6106_v33 = vld [vmem:[#allocation5 + $0xc] sm:$0xf]  ;;  %6050 = vst [vmem:[#allocation5 + $0x30] sm:$0x8] %v6049_v55 }
 0x51c   : > { %v6012_v63 = vmax.f32 %v6004_v51, 0.0 }
 0x51d   : > { %v6112_v1 = vld [vmem:[#allocation5 + $0x24] sm:$0xf] }
 0x51e   : > { %v6089_v53 = vpack.c.bf16 %v6012_v63, %v6012_v63  ;;  %v5747_v27 = vpop.f32.mrf.mxu3  ;;  %v6147_v63 = vshrl.u32 %v6106_v33, 16 }
 0x51f   : > { %v5975_v45 = vpop.f32.mrf.mxu2  ;;  %v14323_v7 = vld [vmem:[#allocation5 + $0x1c] sm:$0xf]  ;;  %v5748_v38 = vadd.f32 %v5747_v27, %v14269_v48 }
 0x520   : > { %6097 = vst.msk [vmem:[#allocation5 + $0x28] sm:$0xf] %vm6023_vm1, %v6089_v53  ;;  %v5991_v39 = vadd.f32 %v5975_v45, %v5745_v3  ;;  %v6165_v43 = vshrl.u32 %v14323_v7, 16  ;;  %v6168_v12 = vshll.u32 %v14323_v7, 16  ;;  %v6340_v29 = vunpack.c.l.b16 %v14323_v7  ;;  %v6109_v34 = vld [vmem:[#allocation5 + $0x18] sm:$0xf] }
 0x521   : > { %v6155_v3 = vshll.u32 %v14321_v28, 16  ;;  %v6720_v53 = vrot.slane %v6718_v42, 5  ;;  %v6160_v27 = vshrl.u32 %v6109_v34, 16 }
 0x522   : > { %v6005_v61 = vadd.f32 %v14287_v5, %v5991_v39  ;;  %v6352_v14 = vpack.c.b16 %v6340_v29, %v6339_v4  ;;  %v6704_v6 = vrot.slane %v6165_v43, 4  ;;  %v6705_v20 = vrot.slane %v6168_v12, 5 }
 0x523   : > { %v6167_v25 = vrot.slane %v6165_v43, 7 }
 0x524   : > { %v6013_v26 = vmax.f32 %v6005_v61, 0.0  ;;  %6356 = vrot.lane.b32.xlu2 %v6352_v14, %s10943_s21  ;;  %v6706_v59 = vor.u32 %v6705_v20, %v6704_v6  ;;  %v9752_v14 = vrot.slane %v6147_v63, 11  ;;  %v6157_v6 = vor.u32 %v6155_v3, %v6154_v31  ;;  %v6117_v31 = vld [vmem:[#allocation5 + $0x38] sm:$0xf] }
 0x525   : > { %v9753_v20 = vrot.slane %v6160_v27, 11  ;;  %v14424_v63 = vrot.slane %v6155_v3, 5 }
 0x526   : > { %v6090_v13 = vpack.c.bf16 %v6013_v26, %v6013_v26  ;;  %v5749_v47 = vpop.f32.mrf.mxu3  ;;  %v6707_v0 = vrot.slane %v6706_v59, 4 }
 0x527   : > { %v14347_v62 = vld [vmem:[#allocation5 + $0x28] sm:$0xf]  ;;  %v5978_v21 = vpop.f32.mrf.mxu2  ;;  %v5750_v39 = vadd.f32 %v5749_v47, %v14275_v32  ;;  %v6120_v47 = vld [vmem:[#allocation5 + $0x44] sm:$0xf] }
 0x528   : > { %6098 = vst.msk [vmem:[#allocation5 + $0x34] sm:$0xf] %vm6023_vm1, %v6090_v13  ;;  %v6178_v54 = vshrl.u32 %v14347_v62, 16  ;;  %v6181_v40 = vshll.u32 %v14347_v62, 16  ;;  %v6341_v18 = vunpack.c.l.b16 %v14347_v62  ;;  %v5992_v48 = vadd.f32 %v5978_v21, %v5748_v38 }
 0x529   : > { %v6712_v61 = vsel %vm11157_vm11, %v6707_v0, %v6711_v35  ;;  %v14395_v21 = vrot.slane %v6152_v15, 4 }
 0x52a   : > { %v14357_v57 = vpack.c.b16 %v6341_v18, %v6340_v29  ;;  %v6713_v50 = vrot.slane %v6178_v54, 4  ;;  %v6714_v16 = vrot.slane %v6181_v40, 5  ;;  %v6006_v9 = vadd.f32 %v14287_v5, %v5992_v48 }
 0x52b   : > { %v6170_v29 = vor.u32 %v6168_v12, %v6167_v25  ;;  %v14389_v25 = vunpack.c.l.b16 %v6712_v61  ;;  %v6180_v49 = vrot.slane %v6178_v54, 7  ;;  %v10672_v54 = vld [vmem:[%s15441_s4 + $0x98] sm:$0xff]  ;;  %v6057_v61 = vld [vmem:[#allocation5 + $0x54] sm:$0x8]  ;;  %v6697_v52 = vor.u32 %v14424_v63, %v14395_v21  ;;  %v6054_v21 = vld [vmem:[#allocation5 + $0x48] sm:$0x8] }
 0x52c   : > { %v6715_v51 = vor.u32 %v6714_v16, %v6713_v50  ;;  %v6014_v24 = vmax.f32 %v6006_v9, 0.0  ;;  %9833 = vmatmul.msk.bf16.vlgmr.msrb.gmra.mxu2 %vm3194_vm10, %v14357_v57  ;;  %v6727_v50 = vshll.u32 %v6117_v31, 16  ;;  %v6736_v16 = vshll.u32 %v6120_v47, 16  ;;  %v6115_v9 = vld [vmem:[#allocation5 + $0x30] sm:$0xf]  ;;  %6489 = vmatpush.bf16.msra.mxu3 %v10672_v54 }
 0x52d   : > { %v6171_v30 = vsel %vm11095_vm8, %v9753_v20, %v6170_v29  ;;  %v6186_v27 = vshrl.u32 %v6115_v9, 16  ;;  %v6108_v9 = vld [vmem:[#allocation5 + $0x14] sm:$0xf] }
 0x52e   : > { %v6716_v45 = vrot.slane %v6715_v51, 4  ;;  %v6091_v43 = vpack.c.bf16 %v6014_v24, %v6014_v24  ;;  %v5752_v12 = vpop.f32.mrf.mxu3  ;;  %v14405_v35 = vunpack.c.l.b16 %v6171_v30  ;;  %v6729_v20 = vrot.slane %v6727_v50, 5 }
 0x52f   : > { %v5980_v44 = vpop.f32.mrf.mxu2  ;;  %v14376_v19 = vld [vmem:[#allocation5 + $0x34] sm:$0xf]  ;;  %v5753_v48 = vadd.f32 %v5752_v12, %v14277_v8  ;;  %v9755_v62 = vrot.slane %v6186_v27, 11 }
 0x530   : > { %6099 = vst.msk [vmem:[#allocation5 + $0x40] sm:$0xf] %vm6023_vm1, %v6091_v43  ;;  %v5993_v58 = vadd.f32 %v5980_v44, %v5750_v39  ;;  %v6191_v41 = vshrl.u32 %v14376_v19, 16  ;;  %v6194_v32 = vshll.u32 %v14376_v19, 16  ;;  %v6342_v7 = vunpack.c.l.b16 %v14376_v19  ;;  %v6081_v19 = vld [vmem:[#allocation5 + $0x5c] sm:$0x1]  ;;  %6490 = vmatpush.bf16.msra.mxu3 %v10671_v17 }
 0x531   : > { %v6721_v2 = vsel %vm11157_vm11, %v6716_v45, %v6720_v53  ;;  %v6078_v45 = vld [vmem:[#allocation5 + $0x50] sm:$0x1]  ;;  %v6173_v44 = vshrl.u32 %v6112_v1, 16  ;;  %v6700_v1 = vshll.u32 %v6108_v9, 16 }
 0x532   : > { %v6007_v26 = vadd.f32 %v14287_v5, %v5993_v58  ;;  %v6353_v60 = vpack.c.b16 %v6342_v7, %v6341_v18  ;;  %v6722_v38 = vrot.slane %v6191_v41, 4  ;;  %v6723_v13 = vrot.slane %v6194_v32, 5  ;;  %v10663_v27 = vld [vmem:[%s15441_s4 + $0x50] sm:$0xff] }
 0x533   : > { %v14391_v59 = vunpack.c.l.b16 %v6721_v2  ;;  %v6158_v18 = vsel %vm11095_vm8, %v9752_v14, %v6157_v6  ;;  %v6193_v11 = vrot.slane %v6191_v41, 7  ;;  %v14437_v58 = vor.u32 %v6181_v40, %v6180_v49  ;;  %v6060_v41 = vld [vmem:[#allocation5 + $0x60] sm:$0x8] }
 0x534   : > { %v6015_v42 = vmax.f32 %v6007_v26, 0.0  ;;  %6358 = vrot.lane.b32.xlu0 %v6353_v60, %s10943_s21  ;;  %v14413_v0 = vunpack.c.l.b16 %v6158_v18  ;;  %v6724_v33 = vor.u32 %v6723_v13, %v6722_v38  ;;  %v6079_v26 = vsel %vm14313_vm2, 0, %v6078_v45  ;;  %v10664_v60 = vld [vmem:[%s15441_s4 + $0x58] sm:$0xff] }
 0x535   : > { %v14403_v23 = vpack.c.b16 %v14391_v59, %v14389_v25  ;;  %v6196_v2 = vor.u32 %v6194_v32, %v6193_v11  ;;  %6080 = vst [vmem:[#allocation5 + $0x50] sm:$0x1] %v6079_v26  ;;  %v6082_v40 = vsel %vm14313_vm2, 0, %v6081_v19  ;;  %v6058_v38 = vsel %vm14335_vm5, 0, %v6057_v61  ;;  %6661 = vmatpush.bf16.msra.mxu2 %v10664_v60  ;;  %v6084_v19 = vld [vmem:[#allocation5 + $0x68] sm:$0x1] }
 0x536   : > { %v6092_v15 = vpack.c.bf16 %v6015_v42, %v6015_v42  ;;  %v6276_v53 = vpack.c.b16 %v14405_v35, %v14413_v0  ;;  %v5754_v14 = vpop.f32.mrf.mxu3  ;;  %v6725_v6 = vrot.slane %v6724_v33, 4  ;;  %v9754_v32 = vrot.slane %v6173_v44, 11  ;;  %6083 = vst [vmem:[#allocation5 + $0x5c] sm:$0x1] %v6082_v40 }
 0x537   : > { %9961 = vmatmul.msk.bf16.vlgmr.msra.gmra.mxu0 %vm3194_vm10, %v14403_v23  ;;  %v5983_v56 = vpop.f32.mrf.mxu2  ;;  %v14411_v8 = vld [vmem:[#allocation5 + $0x40] sm:$0xf]  ;;  %v5755_v13 = vadd.f32 %v5754_v14, %v14279_v46  ;;  %v6061_v47 = vsel %vm14335_vm5, 0, %v6060_v41  ;;  %6059 = vst [vmem:[#allocation5 + $0x54] sm:$0x8] %v6058_v38  ;;  %v6197_v33 = vsel %vm11095_vm8, %v9755_v62, %v6196_v2  ;;  %v6698_v44 = vrot.slane %v6697_v52, 4 }
 0x538   : > { %6100 = vst.msk [vmem:[#allocation5 + $0x4c] sm:$0xf] %vm6023_vm1, %v6092_v15  ;;  %v5994_v55 = vadd.f32 %v5983_v56, %v5753_v48  ;;  %v6204_v51 = vshrl.u32 %v14411_v8, 16  ;;  %v6207_v24 = vshll.u32 %v14411_v8, 16  ;;  %v6343_v34 = vunpack.c.l.b16 %v14411_v8  ;;  %v6051_v15 = vld [vmem:[#allocation5 + $0x3c] sm:$0x8] }
 0x539   : > { %v6730_v48 = vsel %vm11157_vm11, %v6725_v6, %v6729_v20  ;;  %6062 = vst [vmem:[#allocation5 + $0x60] sm:$0x8] %v6061_v47  ;;  %v14487_v14 = vld [vmem:[#allocation5 + $0x70] sm:$0xf]  ;;  %v6055_v6 = vsel %vm14335_vm5, 0, %v6054_v21  ;;  %6662 = vmatpush.bf16.msra.mxu2 %v10663_v27  ;;  %v10662_v20 = vld [vmem:[%s15441_s4 + $0x48] sm:$0xff] }
 0x53a   : > { %v6008_v39 = vadd.f32 %v14287_v5, %v5994_v55  ;;  %v14429_v43 = vpack.c.b16 %v6343_v34, %v6342_v7  ;;  %v6731_v29 = vrot.slane %v6204_v51, 4  ;;  %v6732_v3 = vrot.slane %v6207_v24, 5  ;;  %6056 = vst [vmem:[#allocation5 + $0x48] sm:$0x8] %v6055_v6 }
 0x53b   : > { %v6738_v7 = vrot.slane %v6736_v16, 5  ;;  %v6702_v41 = vrot.slane %v6700_v1, 5  ;;  %v6206_v26 = vrot.slane %v6204_v51, 7  ;;  %v6085_v62 = vsel %vm14313_vm2, 0, %v6084_v19  ;;  %v10670_v51 = vld [vmem:[%s15441_s4 + $0x88] sm:$0xff] }
 0x53c   : > { %v6016_v12 = vmax.f32 %v6008_v39, 0.0  ;;  %9834 = vmatmul.msk.bf16.gmra.mxu2 %vm3194_vm10, %v14429_v43  ;;  %6280 = vrot.lane.b32.xlu0 %v6276_v53, %s10943_s21  ;;  %v6733_v30 = vor.u32 %v6732_v3, %v6731_v29  ;;  %v6184_v53 = vsel %vm11095_vm8, %v9754_v32, %v14437_v58  ;;  %v14480_v39 = vunpack.c.l.b16 %v6730_v48  ;;  %v6123_v61 = vld [vmem:[#allocation5 + $0x50] sm:$0xf]  ;;  %6086 = vst [vmem:[#allocation5 + $0x68] sm:$0x1] %v6085_v62 }
 0x53d   : > { %v6052_v3 = vsel %vm14335_vm5, 0, %v6051_v15  ;;  %v6745_v2 = vshll.u32 %v6123_v61, 16  ;;  %v14506_v40 = vunpack.c.l.b16 %v6184_v53  ;;  %6663 = vmatpush.bf16.msra.mxu2 %v10662_v20  ;;  %v6703_v15 = vsel %vm11157_vm11, %v6698_v44, %v6702_v41  ;;  %6491 = vmatpush.bf16.msra.mxu3 %v10670_v51 }
 0x53e   : > { %v6093_v31 = vpack.c.bf16 %v6016_v12, %v6016_v12  ;;  %v6734_v49 = vrot.slane %v6733_v30, 4  ;;  %v6126_v12 = vld [vmem:[#allocation5 + $0x5c] sm:$0xf]  ;;  %6053 = vst [vmem:[#allocation5 + $0x3c] sm:$0x8] %v6052_v3  ;;  %v6259_v9 = vshll.u32 %v14487_v14, 16  ;;  %v6209_v41 = vor.u32 %v6207_v24, %v6206_v26 }
 0x53f   : > { %v5985_v42 = vpop.f32.mrf.mxu2  ;;  %v14454_v18 = vld [vmem:[#allocation5 + $0x4c] sm:$0xf]  ;;  %v6124_v30 = vld [vmem:[#allocation5 + $0x54] sm:$0xf]  ;;  %v6754_v32 = vshll.u32 %v6126_v12, 16 }
 0x540   : > { %6101 = vst.msk [vmem:[#allocation5 + $0x58] sm:$0xf] %vm6023_vm1, %v6093_v31  ;;  %v5995_v46 = vadd.f32 %v5985_v42, %v5755_v13  ;;  %v6217_v11 = vshrl.u32 %v14454_v18, 16  ;;  %v6220_v50 = vshll.u32 %v14454_v18, 16  ;;  %v6344_v16 = vunpack.c.l.b16 %v14454_v18 }
 0x541   : > { %v6739_v56 = vsel %vm11157_vm11, %v6734_v49, %v6738_v7  ;;  %v6747_v31 = vrot.slane %v6745_v2, 5  ;;  %v6127_v49 = vld [vmem:[#allocation5 + $0x60] sm:$0xf]  ;;  %v6756_v44 = vrot.slane %v6754_v32, 5  ;;  %v14546_v3 = vrot.slane %v6259_v9, 5 }
 0x542   : > { %v6009_v54 = vadd.f32 %v14287_v5, %v5995_v46  ;;  %v6354_v55 = vpack.c.b16 %v6344_v16, %v6343_v34  ;;  %v6740_v63 = vrot.slane %v6217_v11, 4  ;;  %v6741_v45 = vrot.slane %v6220_v50, 5  ;;  %v6121_v6 = vld [vmem:[#allocation5 + $0x48] sm:$0xf] }
 0x543   : > { %v14482_v29 = vunpack.c.l.b16 %v6739_v56  ;;  %v14485_v34 = vunpack.c.l.b16 %v6197_v33  ;;  %v6256_v46 = vshrl.u32 %v14487_v14, 16  ;;  %v10661_v56 = vld [vmem:[%s15441_s4 + $0x40] sm:$0xff]  ;;  %v6219_v33 = vrot.slane %v6217_v11, 7  ;;  %v6129_v51 = vld [vmem:[#allocation5 + $0x68] sm:$0xf] }
 0x544   : > { %v6017_v5 = vmax.f32 %v6009_v54, 0.0  ;;  %6360 = vrot.lane.b32.xlu1 %v6354_v55, %s10943_s21  ;;  %v6742_v7 = vor.u32 %v6741_v45, %v6740_v63  ;;  %v6035_v54 = vld [vmem:[#allocation5 + $0x74] sm:$0x1]  ;;  %v6225_v63 = vshrl.u32 %v6124_v30, 16  ;;  %v6238_v53 = vshrl.u32 %v6127_v49, 16  ;;  %6664 = vmatpush.bf16.msra.mxu2 %v10661_v56  ;;  %v10668_v30 = vld [vmem:[%s15441_s4 + $0x78] sm:$0xff] }
 0x545   : > { %v14498_v58 = vpack.c.b16 %v14482_v29, %v14480_v39  ;;  %v6277_v52 = vpack.c.b16 %v14485_v34, %v14506_v40  ;;  %v6036_v27 = vsel %vm14313_vm2, 0, %v6035_v54  ;;  %v14533_v45 = vunpack.c.l.b16 %v6703_v15  ;;  %v6118_v19 = vld [vmem:[#allocation5 + $0x3c] sm:$0xf] }
 0x546   : > { %v6094_v60 = vpack.c.bf16 %v6017_v5, %v6017_v5  ;;  %v6743_v13 = vrot.slane %v6742_v7, 4  ;;  %6037 = vst [vmem:[#allocation5 + $0x74] sm:$0x1] %v6036_v27  ;;  %v10669_v5 = vld [vmem:[%s15441_s4 + $0x80] sm:$0xff]  ;;  %v14542_v61 = vrot.slane %v6256_v46, 4  ;;  %v6199_v20 = vshrl.u32 %v6118_v19, 16 }
 0x547   : > { %9962 = vmatmul.msk.bf16.gmra.mxu0 %vm3194_vm10, %v14498_v58  ;;  %v14508_v38 = vld [vmem:[#allocation5 + $0x58] sm:$0xf]  ;;  %v6789_v12 = vpack.c.b16 %v14389_v25, %v14533_v45  ;;  %v6212_v2 = vshrl.u32 %v6121_v6, 16  ;;  %6492 = vmatpush.bf16.msra.mxu3 %v10669_v5  ;;  %v9759_v24 = vrot.slane %v6238_v53, 11  ;;  %v6763_v49 = vshll.u32 %v6129_v51, 16 }
 0x548   : > { %6102 = vst.msk [vmem:[#allocation5 + $0x64] sm:$0xf] %vm6023_vm1, %v6094_v60  ;;  %v6230_v47 = vshrl.u32 %v14508_v38, 16  ;;  %v6233_v42 = vshll.u32 %v14508_v38, 16  ;;  %v6345_v48 = vunpack.c.l.b16 %v14508_v38  ;;  %v6748_v11 = vsel %vm11157_vm11, %v6743_v13, %v6747_v31 }
 0x549   : > { %v6222_v60 = vor.u32 %v6220_v50, %v6219_v33  ;;  %v14557_v38 = vunpack.c.l.b16 %v6748_v11  ;;  %v9758_v13 = vrot.slane %v6225_v63, 11  ;;  %v9756_v50 = vrot.slane %v6199_v20, 11  ;;  %v6027_v20 = vld [vmem:[#allocation5 + $0x8] sm:$0x1] }
 0x54a   : > { %v14526_v1 = vpack.c.b16 %v6345_v48, %v6344_v16  ;;  %v6749_v21 = vrot.slane %v6230_v47, 4  ;;  %v6750_v17 = vrot.slane %v6233_v42, 5  ;;  %v6232_v55 = vrot.slane %v6230_v47, 7 }
 0x54b   : > { %v9757_v47 = vrot.slane %v6212_v2, 11  ;;  %6493 = vmatpush.bf16.msra.mxu3 %v10668_v30  ;;  %v6365_v54 = vunpack.c.l.b16 %v14487_v14  ;;  %v6765_v11 = vrot.slane %v6763_v49, 5  ;;  %v6769_v19 = vor.u32 %v14546_v3, %v14542_v61  ;;  %v10655_v14 = vld [vmem:[%s15441_s4 + $0x10] sm:$0xff] }
 0x54c   : > { %6282 = vrot.lane.b32.xlu1 %v6277_v52, %s10943_s21  ;;  %9835 = vmatmul.msk.bf16.gmra.mxu2 %vm3194_vm10, %v14526_v1  ;;  %v6751_v16 = vor.u32 %v6750_v17, %v6749_v21  ;;  %v6235_v8 = vor.u32 %v6233_v42, %v6232_v55  ;;  %v10667_v42 = vld [vmem:[%s15441_s4 + $0x70] sm:$0xff]  ;;  %v14564_v21 = vld [vmem:[#allocation5 + $0x4] sm:$0xf]  ;;  %vm7230_vm1 = vcmask 517120  }
 0x54d   : > { %v6223_v55 = vsel %vm11095_vm8, %v9757_v47, %v6222_v60  ;;  %v6132_v63 = vld [vmem:[#allocation5 + $0x74] sm:$0xf]  ;;  %v6139_v5 = vshrl.u32 %v14564_v21, 16  ;;  %v6142_v6 = vshll.u32 %v14564_v21, 16  ;;  %v6770_v47 = vrot.slane %v6769_v19, 4 }
 0x54e   : > { %v6752_v7 = vrot.slane %v6751_v16, 4  ;;  %v6020_v16 = vld [vmem:[#allocation5] sm:$0x8]  ;;  %v6772_v60 = vshll.u32 %v6132_v63, 16 }
 0x54f   : > { %v6128_v62 = vld [vmem:[#allocation5 + $0x64] sm:$0xf]  ;;  %6494 = vmatpush.bf16.msra.mxu3 %v10667_v42  ;;  %v6021_v30 = vsel %vm14335_vm5, 0, %v6020_v16 }
 0x550   : > { %v6243_v26 = vshrl.u32 %v6128_v62, 16  ;;  %v6246_v31 = vshll.u32 %v6128_v62, 16  ;;  %v6351_v32 = vunpack.c.l.b16 %v6128_v62  ;;  %v6757_v25 = vsel %vm11157_vm11, %v6752_v7, %v6756_v44  ;;  %6022 = vst [vmem:[#allocation5] sm:$0x8] %v6021_v30 }
 0x551   : > { %v6783_v18 = vunpack.c.l.b16 %v6757_v25  ;;  %v6210_v44 = vsel %vm11095_vm8, %v9756_v50, %v6209_v41  ;;  %v14584_v7 = vunpack.c.l.b16 %v6223_v55  ;;  %v10666_v41 = vld [vmem:[%s15441_s4 + $0x68] sm:$0xff]  ;;  %v6687_v25 = vrot.slane %v6142_v6, 5 }
 0x552   : > { %v6245_v52 = vrot.slane %v6243_v26, 7  ;;  %v6355_v15 = vpack.c.b16 %v6351_v32, %v6345_v48  ;;  %v6758_v56 = vrot.slane %v6243_v26, 4  ;;  %v6759_v33 = vrot.slane %v6246_v31, 5 }
 0x553   : > { %v14567_v17 = vpack.c.b16 %v6783_v18, %v14557_v38  ;;  %v6236_v48 = vsel %vm11095_vm8, %v9758_v13, %v6235_v8  ;;  %v6268_v62 = vunpack.c.l.b16 %v6210_v44  ;;  %v6028_v8 = vsel %vm14313_vm2, 0, %v6027_v20  ;;  %6495 = vmatpush.bf16.msra.mxu3 %v10666_v41  ;;  %v6031_v20 = vld [vmem:[#allocation5 + $0x6c] sm:$0x8]  ;;  %vm7288_vm2 = vmor %vm347_vm3, %vm7287_vm7 }
 0x554   : > { %6362 = vrot.lane.b32.xlu2 %v6355_v15, %s10943_s21  ;;  %6793 = vrot.lane.b32.xlu1 %v6789_v12, %s10943_s21  ;;  %v6248_v53 = vor.u32 %v6246_v31, %v6245_v52  ;;  %v6760_v27 = vor.u32 %v6759_v33, %v6758_v56  ;;  %v14591_v61 = vunpack.c.l.b16 %v6236_v48  ;;  %v6686_v31 = vrot.slane %v6139_v5, 4  ;;  %6029 = vst [vmem:[#allocation5 + $0x8] sm:$0x1] %v6028_v8  ;;  %v10657_v8 = vld [vmem:[%s15441_s4 + $0x20] sm:$0xff] }
 0x555   : > { %v6366_v51 = vpack.c.b16 %v6365_v54, %v6351_v32  ;;  %v6278_v50 = vpack.c.b16 %v14584_v7, %v6268_v62  ;;  %v6774_v49 = vrot.slane %v6772_v60, 5  ;;  %v6141_v15 = vrot.slane %v6139_v5, 7 }
 0x556   : > { %v6249_v12 = vsel %vm11095_vm8, %v9759_v24, %v6248_v53  ;;  %v6761_v2 = vrot.slane %v6760_v27, 4  ;;  %v6688_v32 = vor.u32 %v6687_v25, %v6686_v31  ;;  %v6791_v55 = vpack.c.b16 %v14557_v38, %v14482_v29 }
 0x557   : > { %9963 = vmatmul.msk.bf16.gmra.mxu0 %vm3194_vm10, %v14567_v17  ;;  %v14593_v3 = vunpack.c.l.b16 %v6249_v12  ;;  %v6775_v56 = vsel %vm11157_vm11, %v6770_v47, %v6774_v49  ;;  %6496 = vmatpush.bf16.msra.mxu3 %v10665_v22  ;;  %v6103_v33 = vld [vmem:[#allocation5] sm:$0xf]  ;;  %v6144_v54 = vor.u32 %v6142_v6, %v6141_v15  ;;  %v6790_v27 = vpack.c.b16 %v14480_v39, %v14391_v59  ;;  %v10680_v15 = vld [vmem:[%s15441_s4 + $0xd8] sm:$0xff] }
 0x558   : > { %v6766_v13 = vsel %vm11157_vm11, %v6761_v2, %v6765_v11  ;;  %v6134_v42 = vshrl.u32 %v6103_v33, 16  ;;  %v6801_v63 = vunpack.c.l.b16 %v6775_v56  ;;  %v6689_v48 = vrot.slane %v6688_v32, 4  ;;  %v10681_v49 = vld [vmem:[%s15441_s4 + $0xe0] sm:$0xff]  ;;  %v10678_v33 = vld [vmem:[%s15441_s4 + $0xc8] sm:$0xff] }
 0x559   : > { %v6279_v24 = vpack.c.b16 %v14593_v3, %v14591_v61  ;;  %v6788_v26 = vunpack.c.l.b16 %v6766_v13  ;;  %v14634_v6 = vpack.c.b16 %v14506_v40, %v14405_v35  ;;  %v6032_v12 = vsel %vm14335_vm5, 0, %v6031_v20  ;;  %v10659_v35 = vld [vmem:[%s15441_s4 + $0x30] sm:$0xff] }
 0x55a   : > { %v9751_v11 = vrot.slane %v6134_v42, 11  ;;  %6033 = vst [vmem:[#allocation5 + $0x6c] sm:$0x8] %v6032_v12  ;;  %v14645_v2 = vpack.c.b16 %v6268_v62, %v14485_v34  ;;  %v10658_v34 = vld [vmem:[%s15441_s4 + $0x28] sm:$0xff]  ;;  %v6258_v62 = vrot.slane %v6256_v46, 7  ;;  %v10656_v46 = vld [vmem:[%s15441_s4 + $0x18] sm:$0xff] }
 0x55b   : > { %6286 = vrot.lane.b32.xlu0 %v6279_v24, %s10943_s21  ;;  %v6792_v52 = vpack.c.b16 %v6788_v26, %v6783_v18  ;;  %v6105_v18 = vld [vmem:[#allocation5 + $0x8] sm:$0xf]  ;;  %v6802_v19 = vpack.c.b16 %v6801_v63, %v6788_v26  ;;  %6628 = vmatpush.bf16.msrb.mxu3 %v10660_v37  ;;  %v10677_v42 = vld [vmem:[%s15441_s4 + $0xc0] sm:$0xff]  ;;  %vm7726_vm7 = vsmask.f32 7448 }
 0x55c   : > { %9836 = vmatmul.msk.bf16.gmra.mxu2 %vm3194_vm10, %v6366_v51  ;;  %6284 = vrot.lane.b32.xlu2 %v6278_v50, %s10943_s21  ;;  %v6691_v53 = vshll.u32 %v6105_v18, 16  ;;  %v6145_v44 = vsel %vm11095_vm8, %v9751_v11, %v6144_v54  ;;  %v10654_v26 = vld [vmem:[%s15441_s4 + $0x8] sm:$0xff]  ;;  %v10683_v51 = vld [vmem:[%s15441_s4 + $0xf0] sm:$0xff] }
 0x55d   : > { %6799 = vrot.lane.b32.xlu1 %v6792_v52, %s10943_s21  ;;  %v14621_v5 = vunpack.c.l.b16 %v6145_v44 }
 0x55e   : > { %v6693_v16 = vrot.slane %v6691_v53, 5 }
 0x55f   : > { %v6271_v59 = vpack.c.b16 %v14413_v0, %v14621_v5  ;;  %v6338_v0 = vunpack.c.l.b16 %v14564_v21  ;;  %6629 = vmatpush.bf16.msrb.mxu3 %v10659_v35  ;;  %v6274_v21 = vpack.c.b16 %v14591_v61, %v14584_v7 }
 0x560   : > { %v6694_v29 = vsel %vm11157_vm11, %v6689_v48, %v6693_v16  ;;  %vm7111_vm11 = vsmask.f32 2304 }
 0x561   : > { %v14625_v38 = vunpack.c.l.b16 %v6694_v29  ;;  %v6346_v40 = vpack.c.b16 %v6339_v4, %v6338_v0  ;;  %v6130_v30 = vld [vmem:[#allocation5 + $0x6c] sm:$0xf]  ;;  %v6261_v4 = vor.u32 %v6259_v9, %v6258_v62  ;;  %vm14751_vm14 = vmand %vm7136_vm12, %vm7111_vm11  ;;  %vm7722_vm12 = vsmask.f32 3336 }
 0x562   : > { %v6251_v13 = vshrl.u32 %v6130_v30, 16 }
 0x563   : > { %6797 = vrot.lane.b32.xlu0 %v6791_v55, %s10943_s21  ;;  %v6784_v39 = vpack.c.b16 %v14533_v45, %v14625_v38  ;;  %6630 = vmatpush.bf16.msrb.mxu3 %v10658_v34 }
 0x564   : > { %6795 = vrot.lane.b32.xlu2 %v6790_v27, %s10943_s21  ;;  %v9760_v28 = vrot.slane %v6251_v13, 11 }
 0x566   : > { %v6262_v24 = vsel %vm11095_vm8, %v9760_v28, %v6261_v4  ;;  %vm7110_vm8 = vcmask 518144  }
 0x567   : > { %9964 = vmatmul.msk.bf16.gmra.mxu0 %vm3194_vm10, %v6802_v19  ;;  %6631 = vmatpush.bf16.msrb.mxu3 %v10657_v8  ;;  %v6288_v7 = vunpack.c.l.b16 %v6262_v24  ;;  %vm7112_vm6 = vmand %vm7110_vm8, %vm7111_vm11  ;;  %vm7721_vm8 = vsmask.f32 1280 }
 0x569   : > { %v6289_v61 = vpack.c.b16 %v6288_v7, %v14593_v3  ;;  %v10653_v3 = vld [vmem:[%s15441_s4] sm:$0xff] }
 0x56b   : > { %6632 = vmatpush.bf16.msrb.mxu3 %v10656_v46 }
 0x56c   : > { %9885 = vmatmul.msk.bf16.vlgmr.msra.gmra.mxu2 %vm3194_vm10, %v14634_v6 }
 0x56f   : > { %6633 = vmatpush.bf16.msrb.mxu3 %v10655_v14 }
 0x573   : > { %6634 = vmatpush.bf16.msrb.mxu3 %v10654_v26 }
 0x577   : > { %6635 = vmatpush.bf16.msrb.mxu3 %v10653_v3 }
 0x57c   : > { %9886 = vmatmul.msk.bf16.gmra.mxu2 %vm3194_vm10, %v14645_v2 }
 0x57e   : > { %v6357_v60 = vpop.permute.xlu2 %6356 }
 0x57f   : > { %v6369_v41 = vsel %vm3194_vm10, %v6346_v40, %v6357_v60 }
 0x580   : > { %6497 = vmatmul.bf16.vlgmr.msra.gmra.mxu3 %v6369_v41 }
 0x58c   : > { %9887 = vmatmul.msk.bf16.gmra.mxu2 %vm3194_vm10, %v6274_v21 }
 0x59c   : > { %9888 = vmatmul.msk.bf16.gmra.mxu2 %vm3194_vm10, %v6289_v61 }
 0x5a6   : > { %v6359_v9 = vpop.permute.xlu0 %6358 }
 0x5a7   : > { %v6373_v36 = vsel %vm3194_vm10, %v14357_v57, %v6359_v9  ;;  %v10684_v57 = vld [vmem:[%s15441_s4 + $0xf8] sm:$0xff] }
 0x5a8   : > { %6502 = vmatmul.bf16.gmra.mxu3 %v6373_v36 }
 0x5a9   : > { %6925 = vmatpush.bf16.msra.mxu3 %v10684_v57 }
 0x5ad   : > { %6926 = vmatpush.bf16.msra.mxu3 %v10683_v51  ;;  %v7120_v51 = vld [vmem:[#allocation6 + $0x40] sm:$0x7] }
 0x5ae   : > { %v6363_v50 = vpop.permute.xlu2 %6362  ;;  %v6281_v52 = vpop.permute.xlu0 %6280 }
 0x5af   : > { %v6381_v47 = vsel %vm3194_vm10, %v14526_v1, %v6363_v50  ;;  %v6292_v22 = vsel %vm3194_vm10, %v6271_v59, %v6281_v52  ;;  %v10679_v1 = vld [vmem:[%s15441_s4 + $0xd0] sm:$0xff]  ;;  %v6527_v55 = vpop.f32.mrf.mxu2  ;;  %v7138_v50 = vld [vmem:[#allocation6 + $0x10] sm:$0x4] }
 0x5b0   : > { %v7139_v52 = vsel %vm14751_vm14, 0, %v7138_v50 }
 0x5b1   : > { %7140 = vst [vmem:[#allocation6 + $0x10] sm:$0x4] %v7139_v52 }
 0x5b6   : > { %v6361_v31 = vpop.permute.xlu1 %6360  ;;  %v6285_v54 = vpop.permute.xlu2 %6284 }
 0x5b7   : > { %v6377_v25 = vsel %vm3194_vm10, %v14429_v43, %v6361_v31  ;;  %v10682_v43 = vld [vmem:[%s15441_s4 + $0xe8] sm:$0xff]  ;;  %v6300_v18 = vsel %vm3194_vm10, %v14645_v2, %v6285_v54 }
 0x5b8   : > { %6507 = vmatmul.bf16.gmra.mxu3 %v6377_v25  ;;  %v7113_v25 = vld [vmem:[#allocation6 + $0x4] sm:$0x7] }
 0x5b9   : > { %6927 = vmatpush.bf16.msra.mxu3 %v10682_v43  ;;  %v7121_v43 = vsel %vm7112_vm6, 0, %v7120_v51 }
 0x5ba   : > { %7122 = vst [vmem:[#allocation6 + $0x40] sm:$0x7] %v7121_v43 }
 0x5bd   : > { %6928 = vmatpush.bf16.msra.mxu3 %v10681_v49 }
 0x5be   : > { %v6283_v32 = vpop.permute.xlu1 %6282  ;;  %v6796_v19 = vpop.permute.xlu2 %6795 }
 0x5bf   : > { %v6296_v56 = vsel %vm3194_vm10, %v14634_v6, %v6283_v32  ;;  %v6809_v5 = vsel %vm3194_vm10, %v14403_v23, %v6796_v19 }
 0x5c1   : > { %6929 = vmatpush.bf16.msra.mxu3 %v10680_v15 }
 0x5c5   : > { %6930 = vmatpush.bf16.msra.mxu3 %v10679_v1 }
 0x5c6   : > { %v6794_v11 = vpop.permute.xlu1 %6793 }
 0x5c7   : > { %v6805_v16 = vsel %vm3194_vm10, %v6784_v39, %v6794_v11  ;;  %v6529_v39 = vpop.f32.mrf.mxu2 }
 0x5c8   : > { %6512 = vmatmul.bf16.gmra.mxu3 %v6381_v47  ;;  %v7114_v47 = vsel %vm7112_vm6, 0, %v7113_v25  ;;  %vm7724_vm6 = vsmask.f32 5392 }
 0x5c9   : > { %6931 = vmatpush.bf16.msra.mxu3 %v10678_v33  ;;  %7115 = vst [vmem:[#allocation6 + $0x4] sm:$0x7] %v7114_v47 }
 0x5cd   : > { %6932 = vmatpush.bf16.msra.mxu3 %v10677_v42  ;;  %v6287_v48 = vpop.permute.xlu0 %6286 }
 0x5ce   : > { %v6304_v27 = vsel %vm3194_vm10, %v6274_v21, %v6287_v48 }
 0x5cf   : > { %v6800_v0 = vpop.permute.xlu1 %6799  ;;  %v6532_v40 = vpop.f32.mrf.mxu2 }
 0x5d0   : > { %v6817_v45 = vsel %vm3194_vm10, %v14567_v17, %v6800_v0  ;;  %v10708_v17 = vld [vmem:[%s15442_s5 + $0x98] sm:$0xff] }
 0x5d1   : > { %7547 = vmatpush.bf16.msra.mxu1 %v10708_v17 }
 0x5d5   : > { %v6798_v6 = vpop.permute.xlu0 %6797 }
 0x5d6   : > { %v6813_v37 = vsel %vm3194_vm10, %v14498_v58, %v6798_v6 }
 0x5d7   : > { %v6534_v41 = vpop.f32.mrf.mxu2 }
 0x5d8   : > { %6636 = vmatmul.bf16.vlgmr.msrb.gmra.mxu3 %v6292_v22  ;;  %v6963_v22 = vpop.f32.mrf.mxu0 }
 0x5df   : > { %v6537_v21 = vpop.f32.mrf.mxu2 }
 0x5e0   : > { %v6965_v54 = vpop.f32.mrf.mxu0 }
 0x5e7   : > { %v6539_v8 = vpop.f32.mrf.mxu2 }
 0x5e8   : > { %6641 = vmatmul.bf16.gmra.mxu3 %v6296_v56 }
 0x5ef   : > { %v6542_v9 = vpop.f32.mrf.mxu2 }
 0x5f7   : > { %v14745_v31 = vpop.f32.mrf.mxu2 }
 0x5f8   : > { %6646 = vmatmul.bf16.gmra.mxu3 %v6300_v18 }
 0x5ff   : > { %v6666_v15 = vpop.f32.mrf.mxu2 }
 0x603   : > { %v6498_v63 = vpop.f32.mrf.mxu3 }
 0x604   : > { %v6528_v53 = vadd.f32 %v6527_v55, %v6498_v63  ;;  %v14760_v55 = vld [vmem:[%s15444_s7 + $0x1] ss:$0 sm:$0xff] }
 0x607   : > { %v6668_v63 = vpop.f32.mrf.mxu2 }
 0x608   : > { %6651 = vmatmul.bf16.gmra.mxu3 %v6304_v27 }
 0x60b   : > { %v6500_v44 = vpop.f32.mrf.mxu3 }
 0x60c   : > { %v6530_v32 = vadd.f32 %v6529_v39, %v6500_v44 }
 0x60f   : > { %v6671_v6 = vpop.f32.mrf.mxu2 }
 0x617   : > { %v6673_v25 = vpop.f32.mrf.mxu2 }
 0x618   : > { %6933 = vmatmul.bf16.vlgmr.msra.gmra.mxu3 %v6805_v16 }
 0x628   : > { %6938 = vmatmul.bf16.gmra.mxu3 %v6809_v5 }
 0x62b   : > { %v6503_v29 = vpop.f32.mrf.mxu3 }
 0x62c   : > { %v6533_v30 = vadd.f32 %v6532_v40, %v6503_v29  ;;  %v7141_v40 = vld [vmem:[#allocation6 + $0x1c] sm:$0x4] }
 0x633   : > { %v6505_v59 = vpop.f32.mrf.mxu3 }
 0x634   : > { %v6535_v62 = vadd.f32 %v6534_v41, %v6505_v59  ;;  %v6968_v59 = vpop.f32.mrf.mxu0 }
 0x638   : > { %6943 = vmatmul.bf16.gmra.mxu3 %v6813_v37 }
 0x63b   : > { %v6508_v20 = vpop.f32.mrf.mxu3 }
 0x63c   : > { %v6538_v4 = vadd.f32 %v6537_v21, %v6508_v20 }
 0x643   : > { %v6510_v12 = vpop.f32.mrf.mxu3 }
 0x644   : > { %v6540_v46 = vadd.f32 %v6539_v8, %v6510_v12  ;;  %v14766_v8 = vld [vmem:[#allocation6 + $0x4] sm:$0xf] }
 0x645   : > { %7250 = vst.sshfl [vmem:[#allocation1 + $0x10] sm:$0xff pattern:$0x75643120] %v14766_v8 }
 0x648   : > { %6948 = vmatmul.bf16.gmra.mxu3 %v6817_v45 }
 0x64b   : > { %v6513_v38 = vpop.f32.mrf.mxu3 }
 0x64c   : > { %v6543_v36 = vadd.f32 %v6542_v9, %v6513_v38 }
 0x653   : > { %v14730_v2 = vpop.f32.mrf.mxu3 }
 0x65b   : > { %v6637_v23 = vpop.f32.mrf.mxu3 }
 0x65c   : > { %v6638_v35 = vadd.f32 %v6637_v23, %v6528_v53 }
 0x65e   : > { %v6667_v33 = vadd.f32 %v6666_v15, %v6638_v35 }
 0x663   : > { %v6639_v60 = vpop.f32.mrf.mxu3 }
 0x664   : > { %v6640_v42 = vadd.f32 %v6639_v60, %v6530_v32  ;;  %v7142_v60 = vsel %vm14751_vm14, 0, %v7141_v40 }
 0x665   : > { %7143 = vst [vmem:[#allocation6 + $0x1c] sm:$0x4] %v7142_v60 }
 0x666   : > { %v6669_v53 = vadd.f32 %v6668_v63, %v6640_v42 }
 0x66b   : > { %v6642_v34 = vpop.f32.mrf.mxu3 }
 0x66c   : > { %v14732_v58 = vadd.f32 %v6642_v34, %v6533_v30 }
 0x673   : > { %v6644_v13 = vpop.f32.mrf.mxu3 }
 0x674   : > { %v14734_v28 = vadd.f32 %v6644_v13, %v6535_v62 }
 0x676   : > { %v6674_v52 = vadd.f32 %v6673_v25, %v14734_v28 }
 0x67b   : > { %v6647_v24 = vpop.f32.mrf.mxu3 }
 0x67c   : > { %v14739_v7 = vadd.f32 %v6647_v24, %v6538_v4  ;;  %v6672_v24 = vadd.f32 %v6671_v6, %v14732_v58  ;;  %v10707_v6 = vld [vmem:[%s15442_s5 + $0x90] sm:$0xff] }
 0x67d   : > { %7548 = vmatpush.bf16.msra.mxu1 %v10707_v6 }
 0x683   : > { %v6649_v61 = vpop.f32.mrf.mxu3 }
 0x684   : > { %v14741_v14 = vadd.f32 %v6649_v61, %v6540_v46 }
 0x68b   : > { %v6652_v26 = vpop.f32.mrf.mxu3 }
 0x68c   : > { %v14743_v3 = vadd.f32 %v6652_v26, %v6543_v36  ;;  %v6970_v36 = vpop.f32.mrf.mxu0 }
 0x693   : > { %v14747_v57 = vpop.f32.mrf.mxu3 }
 0x69b   : > { %v6934_v1 = vpop.f32.mrf.mxu3 }
 0x69c   : > { %v6964_v56 = vadd.f32 %v6963_v22, %v6934_v1 }
 0x69e   : > { %v6983_v18 = vadd.f32 %v6964_v56, %v6667_v33 }
 0x6a0   : > { %v6995_v11 = vadd.f32 %v14760_v55, %v6983_v18 }
 0x6a2   : > { %v7003_v44 = vmax.f32 %v6995_v11, 0.0 }
 0x6a3   : > { %v6936_v48 = vpop.f32.mrf.mxu3 }
 0x6a4   : > { %v6966_v27 = vadd.f32 %v6965_v54, %v6936_v48 }
 0x6a6   : > { %v6984_v16 = vadd.f32 %v6966_v27, %v6669_v53 }
 0x6a8   : > { %v6996_v19 = vadd.f32 %v14760_v55, %v6984_v16  ;;  %v6973_v16 = vpop.f32.mrf.mxu0 }
 0x6aa   : > { %v7004_v5 = vmax.f32 %v6996_v19, 0.0  ;;  %v6676_v19 = vpop.f32.mrf.mxu2 }
 0x6ab   : > { %v6939_v35 = vpop.f32.mrf.mxu3 }
 0x6ac   : > { %v7011_v29 = vmax.f32 %v7003_v44, %v7004_v5  ;;  %v6969_v21 = vadd.f32 %v6968_v59, %v6939_v35 }
 0x6ae   : > { %v7019_v37 = vrot.slane %v7011_v29, 2  ;;  %v7020_v20 = vrot.slane %v7011_v29, 4  ;;  %v7021_v12 = vrot.slane %v7011_v29, 6  ;;  %v9965_v0 = vrot.slane %v7011_v29, 9 }
 0x6af   : > { %v6985_v26 = vadd.f32 %v6969_v21, %v6672_v24  ;;  %v6677_v24 = vadd.f32 %v6676_v19, %v14739_v7 }
 0x6b0   : > { %v9966_v45 = vrot.slane %v7019_v37, 9  ;;  %v9967_v38 = vrot.slane %v7020_v20, 9  ;;  %v9968_v39 = vrot.slane %v7021_v12, 9  ;;  %v7091_v23 = vmax.f32 %v7011_v29, %v9965_v0 }
 0x6b1   : > { %v6997_v32 = vadd.f32 %v14760_v55, %v6985_v26 }
 0x6b2   : > { %v7092_v41 = vmax.f32 %v7019_v37, %v9966_v45  ;;  %v7093_v30 = vmax.f32 %v7020_v20, %v9967_v38  ;;  %v7094_v34 = vmax.f32 %v7021_v12, %v9968_v39  ;;  %v7150_v62 = vpack.c.bf16 %v7091_v23, %v7091_v23 }
 0x6b3   : > { %v6941_v43 = vpop.f32.mrf.mxu3  ;;  %v7005_v18 = vmax.f32 %v6997_v32, 0.0 }
 0x6b4   : > { %v7151_v13 = vpack.c.bf16 %v7092_v41, %v7092_v41  ;;  %v7152_v17 = vpack.c.bf16 %v7093_v30, %v7093_v30  ;;  %v7153_v4 = vpack.c.bf16 %v7094_v34, %v7094_v34  ;;  %v7182_v51 = vunpack.c.l.b16 %v7150_v62 }
 0x6b5   : > { %v6971_v22 = vadd.f32 %v6970_v36, %v6941_v43 }
 0x6b6   : > { %v7183_v46 = vunpack.c.l.b16 %v7151_v13  ;;  %v7184_v61 = vunpack.c.l.b16 %v7152_v17  ;;  %v7185_v9 = vunpack.c.l.b16 %v7153_v4  ;;  %v7144_v13 = vld [vmem:[#allocation6 + $0x28] sm:$0x4]  ;;  %v6975_v17 = vpop.f32.mrf.mxu0  ;;  %v6678_v4 = vpop.f32.mrf.mxu2 }
 0x6b7   : > { %v6986_v56 = vadd.f32 %v6971_v22, %v6674_v52 }
 0x6b8   : > { %v7198_v50 = vrot.slane %v7183_v46, 7  ;;  %v7200_v47 = vrot.slane %v7184_v61, 6  ;;  %v7202_v1 = vrot.slane %v7185_v9, 5  ;;  %v6679_v61 = vadd.f32 %v6678_v4, %v14741_v14 }
 0x6b9   : > { %v6998_v54 = vadd.f32 %v14760_v55, %v6986_v56 }
 0x6ba   : > { %v7199_v15 = vsel %vm5164_vm15, %v7198_v50, %v7182_v51  ;;  %v7145_v50 = vsel %vm14751_vm14, 0, %v7144_v13  ;;  %v7127_v13 = vld [vmem:[#allocation6 + $0x18] sm:$0x8] }
 0x6bb   : > { %v7201_v58 = vsel %vm5167_vm0, %v7200_v47, %v7199_v15  ;;  %v7006_v63 = vmax.f32 %v6998_v54, 0.0  ;;  %v6944_v37 = vpop.f32.mrf.mxu3  ;;  %7146 = vst [vmem:[#allocation6 + $0x28] sm:$0x4] %v7145_v50 }
 0x6bc   : > { %v7203_v33 = vsel %vm5170_vm13, %v7202_v1, %v7201_v58  ;;  %v6974_v46 = vadd.f32 %v6973_v16, %v6944_v37  ;;  %v14793_v58 = vld [vmem:[#allocation1 + $0x10] ss:$2 sm:$0xff] }
 0x6bd   : > { %v7222_v42 = vpack.c.b16 %v7203_v33, %v7203_v33  ;;  %v7012_v28 = vmax.f32 %v7005_v18, %v7006_v63 }
 0x6be   : > { %v6987_v51 = vadd.f32 %v6974_v46, %v6677_v24  ;;  %v6681_v6 = vpop.f32.mrf.mxu2  ;;  %v7128_v46 = vsel %vm14335_vm5, 0, %v7127_v13 }
 0x6bf   : > { %7231 = vst.msk [vmem:[#allocation6 + $0x10] sm:$0x3] %vm7230_vm1, %v7222_v42  ;;  %v7022_v48 = vrot.slane %v7012_v28, 2  ;;  %v7023_v53 = vrot.slane %v7012_v28, 4  ;;  %v7024_v27 = vrot.slane %v7012_v28, 6  ;;  %v9969_v11 = vrot.slane %v7012_v28, 9 }
 0x6c0   : > { %v6999_v7 = vadd.f32 %v14760_v55, %v6987_v51  ;;  %7129 = vst [vmem:[#allocation6 + $0x18] sm:$0x8] %v7128_v46 }
 0x6c1   : > { %v9970_v44 = vrot.slane %v7022_v48, 9  ;;  %v9971_v5 = vrot.slane %v7023_v53, 9  ;;  %v9972_v29 = vrot.slane %v7024_v27, 9  ;;  %v7095_v59 = vmax.f32 %v7012_v28, %v9969_v11 }
 0x6c2   : > { %v7007_v14 = vmax.f32 %v6999_v7, 0.0 }
 0x6c3   : > { %v7096_v12 = vmax.f32 %v7022_v48, %v9970_v44  ;;  %v7097_v0 = vmax.f32 %v7023_v53, %v9971_v5  ;;  %v7098_v45 = vmax.f32 %v7024_v27, %v9972_v29  ;;  %v7154_v38 = vpack.c.bf16 %v7095_v59, %v7095_v59  ;;  %v6946_v62 = vpop.f32.mrf.mxu3  ;;  %v6978_v29 = vpop.f32.mrf.mxu0 }
 0x6c4   : > { %v6976_v26 = vadd.f32 %v6975_v17, %v6946_v62  ;;  %v6545_v17 = vadd.f32 %v14745_v31, %v14730_v2  ;;  %v7147_v31 = vld [vmem:[#allocation6 + $0x34] sm:$0x4] }
 0x6c5   : > { %v7155_v39 = vpack.c.bf16 %v7096_v12, %v7096_v12  ;;  %v7156_v23 = vpack.c.bf16 %v7097_v0, %v7097_v0  ;;  %v7157_v35 = vpack.c.bf16 %v7098_v45, %v7098_v45  ;;  %v7186_v30 = vunpack.c.l.b16 %v7154_v38 }
 0x6c6   : > { %v14780_v20 = vld [vmem:[#allocation6 + $0x10] sm:$0xf]  ;;  %v6988_v43 = vadd.f32 %v6976_v26, %v6679_v61  ;;  %v7130_v61 = vld [vmem:[#allocation6 + $0x24] sm:$0x8]  ;;  %v6655_v51 = vadd.f32 %v14747_v57, %v6545_v17  ;;  %v7148_v50 = vsel %vm14751_vm14, 0, %v7147_v31  ;;  %vm7723_vm14 = vmor %vm7721_vm8, %vm7722_vm12 }
 0x6c7   : > { %7258 = vst.sshfl [vmem:[#allocation1 + $0x30] sm:$0xff pattern:$0x75643120] %v14780_v20  ;;  %v7187_v40 = vunpack.c.l.b16 %v7155_v39  ;;  %v7188_v60 = vunpack.c.l.b16 %v7156_v23  ;;  %v7189_v41 = vunpack.c.l.b16 %v7157_v35  ;;  %v7107_v23 = vld [vmem:[#allocation6] sm:$0x8] }
 0x6c8   : > { %v7000_v22 = vadd.f32 %v14760_v55, %v6988_v43  ;;  %v7133_v26 = vld [vmem:[#allocation6 + $0x30] sm:$0x8]  ;;  %7149 = vst [vmem:[#allocation6 + $0x34] sm:$0x4] %v7148_v50 }
 0x6c9   : > { %v7204_v34 = vrot.slane %v7187_v40, 7  ;;  %v7206_v21 = vrot.slane %v7188_v60, 6  ;;  %v7208_v36 = vrot.slane %v7189_v41, 5  ;;  %v7108_v60 = vsel %vm14335_vm5, 0, %v7107_v23  ;;  %v7117_v41 = vld [vmem:[#allocation6 + $0x3c] sm:$0x8] }
 0x6ca   : > { %v7008_v15 = vmax.f32 %v7000_v22, 0.0  ;;  %7109 = vst [vmem:[#allocation6] sm:$0x8] %v7108_v60  ;;  %v7134_v2 = vsel %vm14335_vm5, 0, %v7133_v26 }
 0x6cb   : > { %v7205_v9 = vsel %vm5164_vm15, %v7204_v34, %v7186_v30  ;;  %v6949_v39 = vpop.f32.mrf.mxu3  ;;  %v7124_v30 = vld [vmem:[#allocation6 + $0xc] sm:$0x8]  ;;  %7135 = vst [vmem:[#allocation6 + $0x30] sm:$0x8] %v7134_v2  ;;  %v7296_v2 = vshrl.u32 %v14793_v58, 16 }
 0x6cc   : > { %v7207_v25 = vsel %vm5167_vm0, %v7206_v21, %v7205_v9  ;;  %v7013_v1 = vmax.f32 %v7007_v14, %v7008_v15  ;;  %v7118_v21 = vsel %vm14335_vm5, 0, %v7117_v41  ;;  %v7125_v62 = vsel %vm14335_vm5, 0, %v7124_v30 }
 0x6cd   : > { %v7209_v47 = vsel %vm5170_vm13, %v7208_v36, %v7207_v25  ;;  %v6979_v24 = vadd.f32 %v6978_v29, %v6949_v39  ;;  %7119 = vst [vmem:[#allocation6 + $0x3c] sm:$0x8] %v7118_v21  ;;  %v7131_v36 = vsel %vm14335_vm5, 0, %v7130_v61  ;;  %v6682_v25 = vadd.f32 %v6681_v6, %v14743_v3 }
 0x6ce   : > { %v7223_v52 = vpack.c.b16 %v7209_v47, %v7209_v47  ;;  %v7025_v32 = vrot.slane %v7013_v1, 2  ;;  %v7026_v56 = vrot.slane %v7013_v1, 4  ;;  %v7027_v33 = vrot.slane %v7013_v1, 6  ;;  %7126 = vst [vmem:[#allocation6 + $0xc] sm:$0x8] %v7125_v62  ;;  %v6980_v47 = vpop.f32.mrf.mxu0 }
 0x6cf   : > { %v9973_v42 = vrot.slane %v7013_v1, 9  ;;  %v6989_v43 = vadd.f32 %v6979_v24, %v6682_v25  ;;  %7132 = vst [vmem:[#allocation6 + $0x24] sm:$0x8] %v7131_v36  ;;  %v14823_v49 = vld [vmem:[#allocation1 + $0x30] ss:$2 sm:$0xff]  ;;  %vm7692_vm5 = vcmask 1043458  }
 0x6d0   : > { %7232 = vst.msk [vmem:[#allocation6 + $0x1c] sm:$0x3] %vm7230_vm1, %v7223_v52  ;;  %v9974_v18 = vrot.slane %v7025_v32, 9  ;;  %v9975_v63 = vrot.slane %v7026_v56, 9  ;;  %v9976_v28 = vrot.slane %v7027_v33, 9  ;;  %v6683_v52 = vpop.f32.mrf.mxu2  ;;  %v7307_v46 = vshrl.u32 %v14823_v49, 16 }
 0x6d1   : > { %v7099_v48 = vmax.f32 %v7013_v1, %v9973_v42  ;;  %v6684_v22 = vadd.f32 %v6683_v52, %v6655_v51  ;;  %v7235_v57 = vld [vmem:[#allocation6] sm:$0xf]  ;;  %v7001_v10 = vadd.f32 %v14760_v55, %v6989_v43  ;;  %v7239_v42 = vld [vmem:[#allocation6 + $0x18] sm:$0xf] }
 0x6d2   : > { %v7100_v53 = vmax.f32 %v7025_v32, %v9974_v18  ;;  %v7101_v27 = vmax.f32 %v7026_v56, %v9975_v63  ;;  %v7102_v11 = vmax.f32 %v7027_v33, %v9976_v28  ;;  %7248 = vst.sshfl [vmem:[#allocation1] sm:$0xff pattern:$0x75643120] %v7235_v57  ;;  %v7309_v25 = vrot.slane %v7307_v46, 7  ;;  %v10709_v46 = vld [vmem:[%s15442_s5 + $0xa0] sm:$0xff]  ;;  %v10780_v57 = vld [vmem:[%s15443_s6 + $0x1b8] sm:$0xff] }
 0x6d3   : > { %v7158_v16 = vpack.c.bf16 %v7099_v48, %v7099_v48  ;;  %v6951_v7 = vpop.f32.mrf.mxu3  ;;  %v7009_v56 = vmax.f32 %v7001_v10, 0.0  ;;  %v14829_v48 = vld [vmem:[#allocation6 + $0x40] sm:$0xf]  ;;  %v7298_v10 = vrot.slane %v7296_v2, 7 }
 0x6d4   : > { %v7159_v19 = vpack.c.bf16 %v7100_v53, %v7100_v53  ;;  %v7160_v44 = vpack.c.bf16 %v7101_v27, %v7101_v27  ;;  %v7161_v5 = vpack.c.bf16 %v7102_v11, %v7102_v11  ;;  %v6981_v3 = vadd.f32 %v6980_v47, %v6951_v7  ;;  %v7245_v39 = vld [vmem:[#allocation6 + $0x3c] sm:$0xf] }
 0x6d5   : > { %v7190_v0 = vunpack.c.l.b16 %v7158_v16  ;;  %v7237_v15 = vld [vmem:[#allocation6 + $0xc] sm:$0xf]  ;;  %v7310_v47 = vshll.u32 %v14823_v49, 16 }
 0x6d6   : > { %v7191_v59 = vunpack.c.l.b16 %v7159_v19  ;;  %v7192_v37 = vunpack.c.l.b16 %v7160_v44  ;;  %v7193_v12 = vunpack.c.l.b16 %v7161_v5  ;;  %v6990_v14 = vadd.f32 %v6981_v3, %v6684_v22  ;;  %7256 = vst.sshfl [vmem:[#allocation1 + $0x20] sm:$0xff pattern:$0x75643120] %v7237_v15  ;;  %v7241_v63 = vld [vmem:[#allocation6 + $0x24] sm:$0xf] }
 0x6d7   : > { %v14795_v54 = vld [vmem:[#allocation6 + $0x1c] sm:$0xf]  ;;  %v7312_v22 = vor.u32 %v7310_v47, %v7309_v25 }
 0x6d8   : > { %7266 = vst.sshfl [vmem:[#allocation1 + $0x10] sm:$0xff pattern:$0x75643120] %v14795_v54  ;;  %v7210_v45 = vrot.slane %v7191_v59, 7  ;;  %v7212_v38 = vrot.slane %v7192_v37, 6  ;;  %v7214_v40 = vrot.slane %v7193_v12, 5  ;;  %v7002_v32 = vadd.f32 %v14760_v55, %v6990_v14 }
 0x6d9   : > { %v14827_v28 = vld [vmem:[#allocation1 + $0x1] ss:$2 sm:$0xff]  ;;  %v7299_v14 = vshll.u32 %v14793_v58, 16 }
 0x6da   : > { %v7211_v35 = vsel %vm5164_vm15, %v7210_v45, %v7190_v0  ;;  %v7010_v33 = vmax.f32 %v7002_v32, 0.0  ;;  %7264 = vst.sshfl [vmem:[#allocation1] sm:$0xff pattern:$0x75643120] %v7239_v42  ;;  %v7243_v37 = vld [vmem:[#allocation6 + $0x30] sm:$0xf] }
 0x6db   : > { %v7213_v34 = vsel %vm5167_vm0, %v7212_v38, %v7211_v35  ;;  %v7292_v52 = vshrl.u32 %v14827_v28, 16  ;;  %v7301_v28 = vor.u32 %v7299_v14, %v7298_v10 }
 0x6dc   : > { %v7215_v4 = vsel %vm5170_vm13, %v7214_v40, %v7213_v34  ;;  %v7014_v18 = vmax.f32 %v7009_v56, %v7010_v33 }
 0x6dd   : > { %v7224_v9 = vpack.c.b16 %v7215_v4, %v7215_v4  ;;  %v7260_v27 = vld [vmem:[#allocation1 + $0x21] ss:$2 sm:$0xff] }
 0x6de   : > { %v7028_v53 = vrot.slane %v7014_v18, 2  ;;  %v7029_v11 = vrot.slane %v7014_v18, 4  ;;  %v7030_v16 = vrot.slane %v7014_v18, 6  ;;  %v9977_v19 = vrot.slane %v7014_v18, 9 }
 0x6df   : > { %7233 = vst.msk [vmem:[#allocation6 + $0x28] sm:$0x3] %vm7230_vm1, %v7224_v9  ;;  %v7303_v26 = vshrl.u32 %v7260_v27, 16  ;;  %v7268_v51 = vld [vmem:[#allocation1 + $0x10] ss:$2 sm:$0xff] }
 0x6e0   : > { %7270 = vst.sshfl [vmem:[#allocation1 + $0x20] sm:$0xff pattern:$0x75643120] %v7241_v63  ;;  %v9978_v55 = vrot.slane %v7028_v53, 9  ;;  %v9979_v5 = vrot.slane %v7029_v11, 9  ;;  %v9980_v29 = vrot.slane %v7030_v16, 9  ;;  %v7103_v59 = vmax.f32 %v7014_v18, %v9977_v19 }
 0x6e1   : > { %v7267_v23 = vld [vmem:[#allocation1 + $0x1] ss:$2 sm:$0xff]  ;;  %v9982_v7 = vrot.slane %v7303_v26, 9  ;;  %v7318_v3 = vshrl.u32 %v7268_v51, 16  ;;  %v9981_v63 = vrot.slane %v7292_v52, 9  ;;  %v7321_v27 = vshll.u32 %v7268_v51, 16 }
 0x6e2   : > { %v7104_v6 = vmax.f32 %v7028_v53, %v9978_v55  ;;  %v7105_v12 = vmax.f32 %v7029_v11, %v9979_v5  ;;  %v7106_v0 = vmax.f32 %v7030_v16, %v9980_v29  ;;  %v7162_v45 = vpack.c.bf16 %v7103_v59, %v7103_v59  ;;  %7276 = vst.sshfl [vmem:[#allocation1] sm:$0xff pattern:$0x75643120] %v7243_v37 }
 0x6e3   : > { %v7314_v42 = vshrl.u32 %v7267_v23, 16  ;;  %v7320_v18 = vrot.slane %v7318_v3, 7  ;;  %v7684_v26 = vrot.slane %v14780_v20, 2  ;;  %v7685_v51 = vrot.slane %v14795_v54, 2 }
 0x6e4   : > { %v7163_v38 = vpack.c.bf16 %v7104_v6, %v7104_v6  ;;  %v7164_v35 = vpack.c.bf16 %v7105_v12, %v7105_v12  ;;  %v7165_v40 = vpack.c.bf16 %v7106_v0, %v7106_v0  ;;  %v7194_v21 = vunpack.c.l.b16 %v7162_v45 }
 0x6e5   : > { %v9983_v58 = vrot.slane %v7314_v42, 9  ;;  %v7323_v11 = vor.u32 %v7321_v27, %v7320_v18 }
 0x6e6   : > { %v14821_v1 = vld [vmem:[#allocation6 + $0x28] sm:$0xf]  ;;  %v7195_v60 = vunpack.c.l.b16 %v7163_v38  ;;  %v7196_v30 = vunpack.c.l.b16 %v7164_v35  ;;  %v7197_v34 = vunpack.c.l.b16 %v7165_v40 }
 0x6e7   : > { %7272 = vst.sshfl [vmem:[#allocation1 + $0x30] sm:$0xff pattern:$0x75643120] %v14821_v1  ;;  %v7273_v41 = vld [vmem:[#allocation1 + $0x21] ss:$2 sm:$0xff] }
 0x6e8   : > { %7282 = vst.sshfl [vmem:[#allocation1 + $0x20] sm:$0xff pattern:$0x75643120] %v7245_v39  ;;  %v7216_v62 = vrot.slane %v7195_v60, 7  ;;  %v7218_v13 = vrot.slane %v7196_v30, 6  ;;  %v7220_v4 = vrot.slane %v7197_v34, 5 }
 0x6e9   : > { %v7325_v31 = vshrl.u32 %v7273_v41, 16  ;;  %v7279_v56 = vld [vmem:[#allocation1 + $0x1] ss:$2 sm:$0xff]  ;;  %v10712_v41 = vld [vmem:[%s15442_s5 + $0xb8] sm:$0xff] }
 0x6ea   : > { %v7217_v17 = vsel %vm5164_vm15, %v7216_v62, %v7194_v21  ;;  %vm15505_vm15 = vsmask.f32 4368  ;;  %v7336_v5 = vshrl.u32 %v7279_v56, 16  ;;  %v10706_v60 = vld [vmem:[%s15442_s5 + $0x88] sm:$0xff]  ;;  %v10705_v30 = vld [vmem:[%s15442_s5 + $0x80] sm:$0xff]  ;;  %7565 = vmatpush.bf16.msrb.mxu2 %v10712_v41  ;;  %v10711_v62 = vld [vmem:[%s15442_s5 + $0xb0] sm:$0xff] }
 0x6eb   : > { %v7219_v24 = vsel %vm5167_vm0, %v7218_v13, %v7217_v17  ;;  %vm7289_vm4 = vmor %vm7288_vm2, %vm15505_vm15  ;;  %v9984_v15 = vrot.slane %v7325_v31, 9  ;;  %7549 = vmatpush.bf16.msra.mxu1 %v10706_v60  ;;  %v10704_v17 = vld [vmem:[%s15442_s5 + $0x78] sm:$0xff]  ;;  %v7686_v31 = vrot.slane %v14821_v1, 2  ;;  %v10701_v60 = vld [vmem:[%s15442_s5 + $0x60] sm:$0xff]  ;;  %vm7996_vm15 = vcmask 1042432  }
 0x6ec   : > { %v7221_v61 = vsel %vm5170_vm13, %v7220_v4, %v7219_v24  ;;  %vm14842_vm3 = vmor %vm7289_vm4, %vm7290_vm9  ;;  %v9985_v37 = vrot.slane %v7336_v5, 9  ;;  %v10710_v24 = vld [vmem:[%s15442_s5 + $0xa8] sm:$0xff]  ;;  %vm7689_vm13 = vcmask 1041408  }
 0x6ed   : > { %v7225_v36 = vpack.c.b16 %v7221_v61, %v7221_v61  ;;  %v7313_v49 = vsel %vm14842_vm3, %v9982_v7, %v7312_v22  ;;  %v7302_v16 = vsel %vm14842_vm3, %v9981_v63, %v7301_v28  ;;  %v7702_v7 = vsel %vm7689_vm13, %v14795_v54, %v7685_v51  ;;  %vm14968_vm4 = vmand %vm7996_vm15, %vm7111_vm11 }
 0x6ee   : > { %v7274_v44 = vld [vmem:[#allocation1 + $0x30] ss:$2 sm:$0xff]  ;;  %7566 = vmatpush.bf16.msrb.mxu2 %v10711_v62  ;;  %v7707_v22 = vsel %vm7689_vm13, %v14821_v1, %v7686_v31  ;;  %v7754_v56 = vshrl.u32 %v7702_v7, 16  ;;  %vm15068_vm9 = vmand %vm5167_vm0, %vm7111_vm11 }
 0x6ef   : > { %7284 = vst.sshfl [vmem:[#allocation1 + $0x30] sm:$0xff pattern:$0x75643120] %v14829_v48  ;;  %v7329_v9 = vshrl.u32 %v7274_v44, 16  ;;  %v7332_v43 = vshll.u32 %v7274_v44, 16  ;;  %v7324_v44 = vsel %vm14842_vm3, %v9983_v58, %v7323_v11  ;;  %7550 = vmatpush.bf16.msra.mxu1 %v10705_v30  ;;  %v7767_v42 = vshrl.u32 %v7707_v22, 16 }
 0x6f0   : > { %7234 = vst.msk [vmem:[#allocation6 + $0x34] sm:$0x3] %vm7230_vm1, %v7225_v36  ;;  %v7285_v38 = vld [vmem:[#allocation1 + $0x21] ss:$2 sm:$0xff]  ;;  %v7683_v36 = vrot.slane %v14766_v8, 2  ;;  %v7770_v18 = vshll.u32 %v7707_v22, 16  ;;  %vm7725_vm1 = vmor %vm7723_vm14, %vm7724_vm6 }
 0x6f1   : > { %v7331_v50 = vrot.slane %v7329_v9, 7  ;;  %v7347_v40 = vshrl.u32 %v7285_v38, 16  ;;  %v10703_v9 = vld [vmem:[%s15442_s5 + $0x70] sm:$0xff]  ;;  %vm14943_vm2 = vmor %vm7725_vm1, %vm7726_vm7 }
 0x6f2   : > { %7567 = vmatpush.bf16.msrb.mxu2 %v10710_v24  ;;  %v7691_v2 = vsel %vm7689_vm13, %v14766_v8, %v7683_v36  ;;  %v7693_v47 = vsel %vm7692_vm5, %v14766_v8, %v7683_v36  ;;  %v7772_v5 = vrot.slane %v7770_v18, 7 }
 0x6f3   : > { %v7334_v32 = vor.u32 %v7332_v43, %v7331_v50  ;;  %v9986_v34 = vrot.slane %v7347_v40, 9  ;;  %7551 = vmatpush.bf16.msra.mxu1 %v10704_v17  ;;  %v7697_v50 = vsel %vm7689_vm13, %v14780_v20, %v7684_v26  ;;  %v7728_v43 = vshrl.u32 %v7691_v2, 16  ;;  %v10695_v40 = vld [vmem:[%s15442_s5 + $0x30] sm:$0xff] }
 0x6f4   : > { %v7731_v52 = vshll.u32 %v7691_v2, 16  ;;  %v7741_v3 = vshrl.u32 %v7697_v50, 16  ;;  %v7744_v10 = vshll.u32 %v7697_v50, 16  ;;  %v7695_v14 = vrot.slane %v7693_v47, 2 }
 0x6f5   : > { %v7335_v53 = vsel %vm14842_vm3, %v9984_v15, %v7334_v32  ;;  %v7730_v15 = vrot.slane %v7728_v43, 6 }
 0x6f6   : > { %v7286_v6 = vld [vmem:[#allocation1 + $0x30] ss:$2 sm:$0xff]  ;;  %7568 = vmatpush.bf16.msrb.mxu2 %v10709_v46  ;;  %v7733_v32 = vrot.slane %v7731_v52, 7  ;;  %v7743_v63 = vrot.slane %v7741_v3, 6  ;;  %v7746_v28 = vrot.slane %v7744_v10, 7  ;;  %v7737_v27 = vshll.u32 %v7695_v14, 16 }
 0x6f7   : > { %v14847_v33 = vld [vmem:[#allocation6 + $0x34] sm:$0xf]  ;;  %v7351_v0 = vshrl.u32 %v7286_v6, 16  ;;  %v7354_v35 = vshll.u32 %v7286_v6, 16  ;;  %7552 = vmatpush.bf16.msra.mxu1 %v10703_v9  ;;  %v7998_v14 = vld [vmem:[#allocation7 + $0x4] sm:$0x7] }
 0x6f8   : > { %7278 = vst.sshfl [vmem:[#allocation1 + $0x10] sm:$0xff pattern:$0x75643120] %v14847_v33  ;;  %v7734_v11 = vor.u32 %v7733_v32, %v7730_v15  ;;  %v7747_v6 = vor.u32 %v7746_v28, %v7743_v63  ;;  %v10694_v9 = vld [vmem:[%s15442_s5 + $0x28] sm:$0xff]  ;;  %v7999_v32 = vsel %vm14968_vm4, 0, %v7998_v14  ;;  %v10691_v28 = vld [vmem:[%s15442_s5 + $0x10] sm:$0xff] }
 0x6f9   : > { %7362 = vst [vmem:[#allocation1 + $0x1] ss:$4 sm:$0xff] %v7313_v49  ;;  %v7353_v23 = vrot.slane %v7351_v0, 7  ;;  %v8023_v10 = vld [vmem:[#allocation7 + $0x10] sm:$0x4] }
 0x6fa   : > { %7368 = vst [vmem:[#allocation1 + $0x3] ss:$4 sm:$0xff] %v7335_v53  ;;  %v7735_v0 = vrot.slane %v7734_v11, 2  ;;  %v7748_v30 = vrot.slane %v7747_v6, 2  ;;  %v8026_v14 = vld [vmem:[#allocation7 + $0x1c] sm:$0x4] }
 0x6fb   : > { %v7356_v21 = vor.u32 %v7354_v35, %v7353_v23  ;;  %8000 = vst [vmem:[#allocation7 + $0x4] sm:$0x7] %v7999_v32  ;;  %v8027_v32 = vsel %vm15068_vm9, 0, %v8026_v14 }
 0x6fc   : > { %8028 = vst [vmem:[#allocation7 + $0x1c] sm:$0x4] %v8027_v32 }
 0x6fd   : > { %v7357_v4 = vsel %vm14842_vm3, %v9986_v34, %v7356_v21 }
 0x6ff   : > { %v7280_v19 = vld [vmem:[#allocation1 + $0x10] ss:$2 sm:$0xff] }
 0x700   : > { %v7340_v55 = vshrl.u32 %v7280_v19, 16  ;;  %7359 = vst [vmem:[#allocation1] ss:$4 sm:$0xff] %v7302_v16  ;;  %v7343_v59 = vshll.u32 %v7280_v19, 16  ;;  %v7756_v16 = vrot.slane %v7754_v56, 6  ;;  %v10692_v56 = vld [vmem:[%s15442_s5 + $0x18] sm:$0xff] }
 0x701   : > { %7365 = vst [vmem:[#allocation1 + $0x2] ss:$4 sm:$0xff] %v7324_v44 }
 0x702   : > { %v7342_v29 = vrot.slane %v7340_v55, 7  ;;  %v7769_v55 = vrot.slane %v7767_v42, 6 }
 0x704   : > { %v7345_v12 = vor.u32 %v7343_v59, %v7342_v29  ;;  %v7687_v29 = vrot.slane %v14847_v33, 2  ;;  %v7773_v23 = vor.u32 %v7772_v5, %v7769_v55  ;;  %v10689_v55 = vld [vmem:[%s15442_s5] sm:$0xff] }
 0x706   : > { %v7346_v39 = vsel %vm14842_vm3, %v9985_v37, %v7345_v12  ;;  %v10696_v12 = vld [vmem:[%s15442_s5 + $0x38] sm:$0xff]  ;;  %v7712_v35 = vsel %vm7689_vm13, %v14847_v33, %v7687_v29  ;;  %v7774_v46 = vrot.slane %v7773_v23, 2 }
 0x707   : > { %7649 = vmatpush.bf16.msrb.mxu3 %v10696_v12  ;;  %v7780_v17 = vshrl.u32 %v7712_v35, 16  ;;  %v10700_v23 = vld [vmem:[%s15442_s5 + $0x58] sm:$0xff] }
 0x708   : > { %v14858_v45 = vld.sshfl [vmem:[#allocation1] sm:$0xff pattern:$0x73625140] }
 0x709   : > { %7370 = vst [vmem:[#allocation1] ss:$4 sm:$0xff] %v7313_v49  ;;  %v7757_v49 = vshll.u32 %v7702_v7, 16  ;;  %v7782_v47 = vrot.slane %v7780_v17, 6  ;;  %v10717_v17 = vld [vmem:[%s15442_s5 + $0xe0] sm:$0xff] }
 0x70a   : > { %7372 = vst [vmem:[#allocation1 + $0x1] ss:$4 sm:$0xff] %v7324_v44 }
 0x70b   : > { %7374 = vst [vmem:[#allocation1 + $0x2] ss:$4 sm:$0xff] %v7335_v53  ;;  %v7759_v19 = vrot.slane %v7757_v49, 7  ;;  %7650 = vmatpush.bf16.msrb.mxu3 %v10695_v40  ;;  %v10698_v40 = vld [vmem:[%s15442_s5 + $0x48] sm:$0xff] }
 0x70c   : > { %7377 = vst [vmem:[#allocation1 + $0x3] ss:$4 sm:$0xff] %v7346_v39 }
 0x70d   : > { %v7760_v38 = vor.u32 %v7759_v19, %v7756_v16 }
 0x70f   : > { %7651 = vmatpush.bf16.msrb.mxu3 %v10694_v9  ;;  %v10716_v9 = vld [vmem:[%s15442_s5 + $0xd8] sm:$0xff] }
 0x713   : > { %v7378_v13 = vld.sshfl [vmem:[#allocation1] sm:$0xff pattern:$0x73625140] }
 0x714   : > { %7382 = vst [vmem:[#allocation1] ss:$4 sm:$0xff] %v7324_v44  ;;  %7380 = vrot.lane.b32.xlu0 %v7378_v13, %s10943_s21  ;;  %v7708_v44 = vsel %vm7692_vm5, %v14821_v1, %v7686_v31  ;;  %v7761_v13 = vrot.slane %v7760_v38, 2  ;;  %v7713_v31 = vsel %vm7692_vm5, %v14847_v33, %v7687_v29  ;;  %v8051_v38 = vld [vmem:[#allocation7 + $0x30] sm:$0xf] }
 0x715   : > { %7384 = vst [vmem:[#allocation1 + $0x1] ss:$4 sm:$0xff] %v7335_v53  ;;  %v7703_v53 = vsel %vm7692_vm5, %v14795_v54, %v7685_v51  ;;  %v7710_v37 = vrot.slane %v7708_v44, 2  ;;  %v7715_v3 = vrot.slane %v7713_v31, 2  ;;  %v10721_v31 = vld [vmem:[%s15442_s5 + $0x100] sm:$0xff] }
 0x716   : > { %7386 = vst [vmem:[#allocation1 + $0x2] ss:$4 sm:$0xff] %v7346_v39  ;;  %v7705_v59 = vrot.slane %v7703_v53, 2 }
 0x717   : > { %7389 = vst [vmem:[#allocation1 + $0x3] ss:$4 sm:$0xff] %v7357_v4  ;;  %v7776_v21 = vshll.u32 %v7710_v37, 16  ;;  %v7783_v4 = vshll.u32 %v7712_v35, 16  ;;  %v7789_v18 = vshll.u32 %v7715_v3, 16  ;;  %v10699_v35 = vld [vmem:[%s15442_s5 + $0x50] sm:$0xff] }
 0x718   : > { %v7763_v41 = vshll.u32 %v7705_v59, 16  ;;  %v14995_v37 = vld [vmem:[#allocation7 + $0x4] sm:$0xf] }
 0x719   : > { %v7778_v2 = vrot.slane %v7776_v21, 7  ;;  %v7785_v43 = vrot.slane %v7783_v4, 7  ;;  %v7791_v16 = vrot.slane %v7789_v18, 7  ;;  %v10724_v4 = vld [vmem:[%s15442_s5 + $0x118] sm:$0xff] }
 0x71a   : > { %v7765_v36 = vrot.slane %v7763_v41, 7  ;;  %v10720_v41 = vld [vmem:[%s15442_s5 + $0xf8] sm:$0xff] }
 0x71b   : > { %v7779_v7 = vsel %vm14943_vm2, %v7774_v46, %v7778_v2  ;;  %v7786_v15 = vor.u32 %v7785_v43, %v7782_v47  ;;  %7941 = vmatpush.bf16.msra.mxu2 %v10720_v41  ;;  %v8005_v46 = vld [vmem:[#allocation7 + $0x40] sm:$0x7]  ;;  %v10714_v2 = vld [vmem:[%s15442_s5 + $0xc8] sm:$0xff] }
 0x71c   : > { %v7766_v52 = vsel %vm14943_vm2, %v7761_v13, %v7765_v36  ;;  %v10718_v13 = vld [vmem:[%s15442_s5 + $0xe8] sm:$0xff]  ;;  %v10723_v36 = vld [vmem:[%s15442_s5 + $0x110] sm:$0xff]  ;;  %v7971_v47 = vld [vmem:[%s15444_s7 + $0x1] sm:$0x3] }
 0x71d   : > { %v7787_v63 = vrot.slane %v7786_v15, 2  ;;  %v7974_v43 = vperm.slane %v7971_v47, 1  ;;  %v8024_v15 = vsel %vm15068_vm9, 0, %v8023_v10  ;;  %v10753_v10 = vld [vmem:[%s15443_s6 + $0xe0] sm:$0xff] }
 0x71e   : > { %v14886_v61 = vld.sshfl [vmem:[#allocation1] sm:$0xff pattern:$0x73625140]  ;;  %8025 = vst [vmem:[#allocation7 + $0x10] sm:$0x4] %v8024_v15 }
 0x71f   : > { %7418 = vst [vmem:[#allocation1] ss:$4 sm:$0xff] %v14766_v8  ;;  %v7698_v8 = vsel %vm7692_vm5, %v14780_v20, %v7684_v26  ;;  %v7688_v26 = vrot.slane %v14829_v48, 2  ;;  %v7792_v19 = vsel %vm14943_vm2, %v7787_v63, %v7791_v16  ;;  %7977 = vrot.lane.b32.xlu0 %v7974_v43, %s10943_s21 }
 0x720   : > { %7420 = vst [vmem:[#allocation1 + $0x1] ss:$4 sm:$0xff] %v14780_v20 }
 0x721   : > { %7422 = vst [vmem:[#allocation1 + $0x2] ss:$4 sm:$0xff] %v14795_v54  ;;  %v7717_v22 = vsel %vm7689_vm13, %v14829_v48, %v7688_v26 }
 0x722   : > { %7424 = vst [vmem:[#allocation1 + $0x3] ss:$4 sm:$0xff] %v14821_v1  ;;  %v7793_v49 = vshrl.u32 %v7717_v22, 16  ;;  %v7796_v42 = vshll.u32 %v7717_v22, 16 }
 0x724   : > { %v7798_v11 = vrot.slane %v7796_v42, 7 }
 0x729   : > { %v14897_v25 = vld.sshfl [vmem:[#allocation1] sm:$0xff pattern:$0x73625140] }
 0x72a   : > { %7432 = vst [vmem:[#allocation1 + $0x3] ss:$4 sm:$0xff] %v14847_v33 }
 0x72b   : > { %7426 = vst [vmem:[#allocation1] ss:$4 sm:$0xff] %v14780_v20  ;;  %v7700_v20 = vrot.slane %v7698_v8, 2  ;;  %v7718_v8 = vsel %vm7692_vm5, %v14829_v48, %v7688_v26  ;;  %v8006_v26 = vsel %vm14968_vm4, 0, %v8005_v46  ;;  %v10756_v46 = vld [vmem:[%s15443_s6 + $0xf8] sm:$0xff] }
 0x72c   : > { %7428 = vst [vmem:[#allocation1 + $0x1] ss:$4 sm:$0xff] %v14795_v54 }
 0x72d   : > { %7430 = vst [vmem:[#allocation1 + $0x2] ss:$4 sm:$0xff] %v14821_v1  ;;  %v7750_v39 = vshll.u32 %v7700_v20, 16 }
 0x72e   : > { %8007 = vst [vmem:[#allocation7 + $0x40] sm:$0x7] %v8006_v26 }
 0x72f   : > { %v7752_v24 = vrot.slane %v7750_v39, 7 }
 0x731   : > { %v7753_v50 = vsel %vm14943_vm2, %v7748_v30, %v7752_v24  ;;  %v10719_v30 = vld [vmem:[%s15442_s5 + $0xf0] sm:$0xff] }
 0x732   : > { %7942 = vmatpush.bf16.msra.mxu2 %v10719_v30 }
 0x734   : > { %v7433_v58 = vld.sshfl [vmem:[#allocation1] sm:$0xff pattern:$0x73625140] }
 0x735   : > { %7435 = vrot.lane.b32.xlu2 %v7433_v58, %s10943_s21  ;;  %7437 = vst [vmem:[#allocation1] ss:$4 sm:$0xff] %v14795_v54  ;;  %v10702_v54 = vld [vmem:[%s15442_s5 + $0x68] sm:$0xff]  ;;  %v7795_v58 = vrot.slane %v7793_v49, 6 }
 0x736   : > { %7439 = vst [vmem:[#allocation1 + $0x1] ss:$4 sm:$0xff] %v14821_v1  ;;  %v7739_v1 = vrot.slane %v7737_v27, 7  ;;  %7553 = vmatpush.bf16.msra.mxu1 %v10702_v54  ;;  %v7720_v27 = vrot.slane %v7718_v8, 2  ;;  %v8043_v54 = vld [vmem:[#allocation7] sm:$0xf]  ;;  %7943 = vmatpush.bf16.msra.mxu2 %v10718_v13 }
 0x737   : > { %7441 = vst [vmem:[#allocation1 + $0x2] ss:$4 sm:$0xff] %v14847_v33  ;;  %v10693_v33 = vld [vmem:[%s15442_s5 + $0x20] sm:$0xff]  ;;  %v7799_v44 = vor.u32 %v7798_v11, %v7795_v58 }
 0x738   : > { %7443 = vst [vmem:[#allocation1 + $0x3] ss:$4 sm:$0xff] %v14829_v48  ;;  %v7740_v62 = vsel %vm14943_vm2, %v7735_v0, %v7739_v1  ;;  %7652 = vmatpush.bf16.msrb.mxu3 %v10693_v33  ;;  %v10690_v48 = vld [vmem:[%s15442_s5 + $0x8] sm:$0xff]  ;;  %v7802_v20 = vshll.u32 %v7720_v27, 16  ;;  %v8047_v0 = vld [vmem:[#allocation7 + $0x18] sm:$0xf] }
 0x739   : > { %v7800_v5 = vrot.slane %v7799_v44, 2  ;;  %v8032_v44 = vld [vmem:[#allocation7 + $0x34] sm:$0x4] }
 0x73a   : > { %7554 = vmatpush.bf16.msra.mxu1 %v10701_v60  ;;  %v7804_v29 = vrot.slane %v7802_v20, 7  ;;  %v10697_v60 = vld [vmem:[%s15442_s5 + $0x40] sm:$0xff]  ;;  %7944 = vmatpush.bf16.msra.mxu2 %v10717_v17 }
 0x73b   : > { %v8049_v17 = vld [vmem:[#allocation7 + $0x24] sm:$0xf] }
 0x73c   : > { %7653 = vmatpush.bf16.msrb.mxu3 %v10692_v56  ;;  %v7805_v6 = vsel %vm14943_vm2, %v7800_v5, %v7804_v29  ;;  %v8033_v5 = vsel %vm15068_vm9, 0, %v8032_v44  ;;  %v8045_v29 = vld [vmem:[#allocation7 + $0xc] sm:$0xf] }
 0x73d   : > { %8034 = vst [vmem:[#allocation7 + $0x34] sm:$0x4] %v8033_v5 }
 0x73e   : > { %7667 = vmatpush.bf16.msrb.mxu1 %v10700_v23  ;;  %7945 = vmatpush.bf16.msra.mxu2 %v10716_v9  ;;  %8064 = vst.sshfl [vmem:[#allocation1 + $0x20] sm:$0xff pattern:$0x75643120] %v8045_v29  ;;  %v10726_v29 = vld [vmem:[%s15443_s6 + $0x8] sm:$0xff] }
 0x73f   : > { %v7444_v51 = vld.sshfl [vmem:[#allocation1] sm:$0xff pattern:$0x73625140] }
 0x740   : > { %10059 = vmatmul.msk.bf16.vlgmr.msrb.gmra.mxu2 %vm3194_vm10, %v7444_v51  ;;  %7807 = vst [vmem:[#allocation1] ss:$4 sm:$0xff] %v7740_v62  ;;  %7654 = vmatpush.bf16.msrb.mxu3 %v10691_v28  ;;  %v10722_v51 = vld [vmem:[%s15442_s5 + $0x108] sm:$0xff] }
 0x741   : > { %7810 = vst [vmem:[#allocation1 + $0x1] ss:$4 sm:$0xff] %v7753_v50 }
 0x742   : > { %7813 = vst [vmem:[#allocation1 + $0x2] ss:$4 sm:$0xff] %v7766_v52  ;;  %7668 = vmatpush.bf16.msrb.mxu1 %v10699_v35 }
 0x743   : > { %7816 = vst [vmem:[#allocation1 + $0x3] ss:$4 sm:$0xff] %v7779_v7 }
 0x744   : > { %7655 = vmatpush.bf16.msrb.mxu3 %v10690_v48  ;;  %v8029_v48 = vld [vmem:[#allocation7 + $0x28] sm:$0x4] }
 0x746   : > { %7669 = vmatpush.bf16.msrb.mxu1 %v10698_v40  ;;  %v10732_v40 = vld [vmem:[%s15443_s6 + $0x38] sm:$0xff] }
 0x748   : > { %7656 = vmatpush.bf16.msrb.mxu3 %v10689_v55  ;;  %v8030_v55 = vsel %vm15068_vm9, 0, %v8029_v48 }
 0x749   : > { %8031 = vst [vmem:[#allocation7 + $0x28] sm:$0x4] %v8030_v55 }
 0x74a   : > { %v14982_v53 = vld.sshfl [vmem:[#allocation1] sm:$0xff pattern:$0x73625140]  ;;  %7670 = vmatpush.bf16.msrb.mxu1 %v10697_v60 }
 0x74b   : > { %7818 = vst [vmem:[#allocation1] ss:$4 sm:$0xff] %v7753_v50  ;;  %v10713_v50 = vld [vmem:[%s15442_s5 + $0xc0] sm:$0xff] }
 0x74c   : > { %7820 = vst [vmem:[#allocation1 + $0x1] ss:$4 sm:$0xff] %v7766_v52  ;;  %8462 = vmatpush.bf16.msra.mxu3 %v10756_v46  ;;  %v10771_v46 = vld [vmem:[%s15443_s6 + $0x170] sm:$0xff] }
 0x74d   : > { %7822 = vst [vmem:[#allocation1 + $0x2] ss:$4 sm:$0xff] %v7779_v7 }
 0x74e   : > { %7825 = vst [vmem:[#allocation1 + $0x3] ss:$4 sm:$0xff] %v7792_v19 }
 0x755   : > { %v7826_v59 = vld.sshfl [vmem:[#allocation1] sm:$0xff pattern:$0x73625140] }
 0x756   : > { %7828 = vrot.lane.b32.xlu1 %v7826_v59, %s10943_s21  ;;  %7830 = vst [vmem:[#allocation1] ss:$4 sm:$0xff] %v7766_v52  ;;  %v7973_v52 = vperm.slane %v7971_v47, 0  ;;  %v8053_v47 = vld [vmem:[#allocation7 + $0x3c] sm:$0xf] }
 0x757   : > { %7832 = vst [vmem:[#allocation1 + $0x1] ss:$4 sm:$0xff] %v7779_v7 }
 0x758   : > { %7834 = vst [vmem:[#allocation1 + $0x2] ss:$4 sm:$0xff] %v7792_v19  ;;  %7975 = vrot.lane.b32.xlu2 %v7973_v52, %s10943_s21  ;;  %v10729_v52 = vld [vmem:[%s15443_s6 + $0x20] sm:$0xff] }
 0x759   : > { %7837 = vst [vmem:[#allocation1 + $0x3] ss:$4 sm:$0xff] %v7805_v6 }
 0x75a   : > { %8058 = vst.sshfl [vmem:[#allocation1 + $0x10] sm:$0xff pattern:$0x75643120] %v14995_v37 }
 0x760   : > { %v7838_v12 = vld.sshfl [vmem:[#allocation1] sm:$0xff pattern:$0x73625140] }
 0x761   : > { %8056 = vst.sshfl [vmem:[#allocation1] sm:$0xff pattern:$0x75643120] %v8043_v54 }
 0x768   : > { %v14998_v1 = vld [vmem:[#allocation1 + $0x1] ss:$2 sm:$0xff] }
 0x769   : > { %8072 = vst.sshfl [vmem:[#allocation1] sm:$0xff pattern:$0x75643120] %v8047_v0 }
 0x770   : > { %v15000_v39 = vld [vmem:[#allocation1 + $0x1] ss:$2 sm:$0xff] }
 0x771   : > { %8084 = vst.sshfl [vmem:[#allocation1] sm:$0xff pattern:$0x75643120] %v8051_v38 }
 0x786   : > { %v7381_v21 = vpop.permute.xlu0 %7380 }
 0x787   : > { %v7392_v62 = vsel %vm3194_vm10, %v14858_v45, %v7381_v21 }
 0x788   : > { %7657 = vmatmul.bf16.vlgmr.msrb.gmra.mxu3 %v7392_v62 }
 0x78f   : > { %v7436_v24 = vpop.permute.xlu2 %7435 }
 0x790   : > { %v7446_v45 = vsel %vm3194_vm10, %v14897_v25, %v7436_v24  ;;  %v10715_v25 = vld [vmem:[%s15442_s5 + $0xd0] sm:$0xff] }
 0x791   : > { %7555 = vmatmul.bf16.vlgmr.msra.gmra.mxu1 %v7446_v45  ;;  %7946 = vmatpush.bf16.msra.mxu2 %v10715_v25  ;;  %v7978_v27 = vpop.permute.xlu0 %7977  ;;  %v10731_v24 = vld [vmem:[%s15443_s6 + $0x30] sm:$0xff] }
 0x792   : > { %7959 = vmatpush.bf16.msra.mxu1 %v10724_v4  ;;  %v8068_v4 = vld [vmem:[#allocation1 + $0x21] ss:$2 sm:$0xff] }
 0x793   : > { %8078 = vst.sshfl [vmem:[#allocation1 + $0x20] sm:$0xff pattern:$0x75643120] %v8049_v17 }
 0x795   : > { %7947 = vmatpush.bf16.msra.mxu2 %v10714_v2 }
 0x796   : > { %7960 = vmatpush.bf16.msra.mxu1 %v10723_v36  ;;  %v10730_v36 = vld [vmem:[%s15443_s6 + $0x28] sm:$0xff] }
 0x799   : > { %7948 = vmatpush.bf16.msra.mxu2 %v10713_v50 }
 0x79a   : > { %7961 = vmatpush.bf16.msra.mxu1 %v10722_v51  ;;  %v8062_v51 = vld [vmem:[#allocation1 + $0x10] ss:$2 sm:$0xff] }
 0x79b   : > { %v8099_v15 = vshrl.u32 %v8062_v51, 16  ;;  %v8102_v55 = vshll.u32 %v8062_v51, 16  ;;  %v10760_v51 = vld [vmem:[%s15443_s6 + $0x118] sm:$0xff] }
 0x79d   : > { %8648 = vmatpush.bf16.msrb.mxu2 %v10732_v40 }
 0x79e   : > { %7962 = vmatpush.bf16.msra.mxu1 %v10721_v31  ;;  %v10755_v31 = vld [vmem:[%s15443_s6 + $0xf0] sm:$0xff] }
 0x79f   : > { %8463 = vmatpush.bf16.msra.mxu3 %v10755_v31  ;;  %v10770_v31 = vld [vmem:[%s15443_s6 + $0x168] sm:$0xff] }
 0x7a1   : > { %10108 = vmatmul.msk.bf16.vlgmr.msrb.gmra.mxu1 %vm3194_vm10, %v14886_v61  ;;  %8649 = vmatpush.bf16.msrb.mxu2 %v10731_v24  ;;  %v10750_v24 = vld [vmem:[%s15443_s6 + $0xc8] sm:$0xff] }
 0x7a5   : > { %8650 = vmatpush.bf16.msrb.mxu2 %v10730_v36 }
 0x7a9   : > { %8651 = vmatpush.bf16.msrb.mxu2 %v10729_v52  ;;  %v10759_v52 = vld [vmem:[%s15443_s6 + $0x110] sm:$0xff] }
 0x7b1   : > { %10181 = vmatmul.msk.bf16.vlgmr.msra.gmra.mxu1 %vm3194_vm10, %v7838_v12 }
 0x7b2   : > { %v7976_v58 = vpop.permute.xlu2 %7975 }
 0x7b3   : > { %v7979_v20 = vsel %vm3194_vm10, %v7976_v58, %v7978_v27  ;;  %v8101_v58 = vrot.slane %v8099_v15, 7 }
 0x7c3   : > { %v7570_v49 = vpop.f32.mrf.mxu2 }
 0x7c8   : > { %v7829_v7 = vpop.permute.xlu1 %7828 }
 0x7c9   : > { %v7840_v33 = vsel %vm3194_vm10, %v14982_v53, %v7829_v7  ;;  %v8081_v7 = vld [vmem:[#allocation1 + $0x21] ss:$2 sm:$0xff] }
 0x7ca   : > { %7949 = vmatmul.bf16.vlgmr.msra.gmra.mxu2 %v7840_v33  ;;  %8090 = vst.sshfl [vmem:[#allocation1 + $0x20] sm:$0xff pattern:$0x75643120] %v8053_v47  ;;  %v10754_v33 = vld [vmem:[%s15443_s6 + $0xe8] sm:$0xff] }
 0x7cb   : > { %v7572_v18 = vpop.f32.mrf.mxu2  ;;  %8464 = vmatpush.bf16.msra.mxu3 %v10754_v33  ;;  %v10739_v33 = vld [vmem:[%s15443_s6 + $0x70] sm:$0xff] }
 0x7cf   : > { %8465 = vmatpush.bf16.msra.mxu3 %v10753_v10 }
 0x7d1   : > { %v8093_v10 = vld [vmem:[#allocation1 + $0x21] ss:$2 sm:$0xff] }
 0x80b   : > { %v7658_v8 = vpop.f32.mrf.mxu3 }
 0x80e   : > { %v7556_v22 = vpop.f32.mrf.mxu1 }
 0x80f   : > { %v7571_v63 = vadd.f32 %v7570_v49, %v7556_v22  ;;  %v8106_v22 = vshrl.u32 %v8068_v4, 16  ;;  %v8095_v49 = vshrl.u32 %v14998_v1, 16 }
 0x811   : > { %v7659_v53 = vadd.f32 %v7658_v8, %v7571_v63  ;;  %v10764_v8 = vld [vmem:[%s15443_s6 + $0x138] sm:$0xff] }
 0x812   : > { %8476 = vmatpush.bf16.msrb.mxu0 %v10764_v8  ;;  %v10738_v8 = vld [vmem:[%s15443_s6 + $0x68] sm:$0xff] }
 0x813   : > { %v7660_v6 = vpop.f32.mrf.mxu3 }
 0x816   : > { %v7558_v3 = vpop.f32.mrf.mxu1 }
 0x817   : > { %v7573_v54 = vadd.f32 %v7572_v18, %v7558_v3  ;;  %v10728_v3 = vld [vmem:[%s15443_s6 + $0x18] sm:$0xff] }
 0x818   : > { %8652 = vmatpush.bf16.msrb.mxu2 %v10728_v3 }
 0x819   : > { %v7661_v0 = vadd.f32 %v7660_v6, %v7573_v54 }
 0x81e   : > { %v7672_v56 = vpop.f32.mrf.mxu1 }
 0x81f   : > { %v7673_v16 = vadd.f32 %v7672_v56, %v7659_v53  ;;  %v8117_v53 = vshrl.u32 %v15000_v39, 16  ;;  %v10182_v39 = vrot.slane %v8095_v49, 9  ;;  %v10758_v49 = vld [vmem:[%s15443_s6 + $0x108] sm:$0xff] }
 0x821   : > { %v10184_v6 = vrot.slane %v8117_v53, 9  ;;  %v8150_v53 = vshrl.u32 %v8093_v10, 16 }
 0x826   : > { %v7674_v42 = vpop.f32.mrf.mxu1 }
 0x827   : > { %v7675_v60 = vadd.f32 %v7674_v42, %v7661_v0  ;;  %v10183_v42 = vrot.slane %v8106_v22, 9  ;;  %v8104_v0 = vor.u32 %v8102_v55, %v8101_v58  ;;  %v10736_v55 = vld [vmem:[%s15443_s6 + $0x58] sm:$0xff] }
 0x82e   : > { %v7964_v28 = vpop.f32.mrf.mxu1 }
 0x836   : > { %v7966_v23 = vpop.f32.mrf.mxu1 }
 0x84d   : > { %v7950_v11 = vpop.f32.mrf.mxu2 }
 0x84e   : > { %v7965_v19 = vadd.f32 %v7964_v28, %v7950_v11  ;;  %v10727_v11 = vld [vmem:[%s15443_s6 + $0x10] sm:$0xff] }
 0x84f   : > { %8653 = vmatpush.bf16.msrb.mxu2 %v10727_v11  ;;  %v10767_v11 = vld [vmem:[%s15443_s6 + $0x150] sm:$0xff] }
 0x850   : > { %v7969_v59 = vadd.f32 %v7965_v19, %v7673_v16  ;;  %v10752_v16 = vld [vmem:[%s15443_s6 + $0xd8] sm:$0xff]  ;;  %v10763_v19 = vld [vmem:[%s15443_s6 + $0x130] sm:$0xff] }
 0x851   : > { %8466 = vmatpush.bf16.msra.mxu3 %v10752_v16  ;;  %8477 = vmatpush.bf16.msrb.mxu0 %v10763_v19  ;;  %v10737_v16 = vld [vmem:[%s15443_s6 + $0x60] sm:$0xff]  ;;  %v10748_v19 = vld [vmem:[%s15443_s6 + $0xb8] sm:$0xff] }
 0x852   : > { %v7981_v12 = vadd.f32 %v7979_v20, %v7969_v59  ;;  %v15143_v59 = vld [vmem:[#allocation7 + $0x40] sm:$0xf] }
 0x853   : > { %8654 = vmatpush.bf16.msrb.mxu2 %v10726_v29  ;;  %v10787_v29 = vld [vmem:[%s15443_s6 + $0x1f0] sm:$0xff] }
 0x854   : > { %v7983_v38 = vmax.f32 %v7981_v12, 0.0  ;;  %v10751_v12 = vld [vmem:[%s15443_s6 + $0xd0] sm:$0xff] }
 0x855   : > { %v7952_v35 = vpop.f32.mrf.mxu2  ;;  %8467 = vmatpush.bf16.msra.mxu3 %v10751_v12  ;;  %v10765_v12 = vld [vmem:[%s15443_s6 + $0x140] sm:$0xff] }
 0x856   : > { %v7987_v41 = vrot.slane %v7983_v38, 4  ;;  %v8035_v30 = vpack.c.bf16 %v7983_v38, %v7983_v38  ;;  %v7967_v21 = vadd.f32 %v7966_v23, %v7952_v35  ;;  %v8128_v38 = vshrl.u32 %v8081_v7, 16  ;;  %v10762_v23 = vld [vmem:[%s15443_s6 + $0x128] sm:$0xff]  ;;  %v10772_v35 = vld [vmem:[%s15443_s6 + $0x178] sm:$0xff]  ;;  %v10769_v7 = vld [vmem:[%s15443_s6 + $0x160] sm:$0xff] }
 0x857   : > { %8478 = vmatpush.bf16.msrb.mxu0 %v10762_v23  ;;  %8490 = vmatpush.bf16.msrb.mxu1 %v10772_v35  ;;  %v10734_v23 = vld [vmem:[%s15443_s6 + $0x48] sm:$0xff]  ;;  %v10745_v35 = vld [vmem:[%s15443_s6 + $0xa0] sm:$0xff] }
 0x858   : > { %v8036_v62 = vpack.c.bf16 %v7987_v41, %v7987_v41  ;;  %8039 = vst [vmem:[#allocation7 + $0x10] sm:$0x3] %v8035_v30  ;;  %v7970_v13 = vadd.f32 %v7967_v21, %v7675_v60  ;;  %v10725_v41 = vld [vmem:[%s15443_s6] sm:$0xff]  ;;  %v8105_v21 = vsel %vm14842_vm3, %v10182_v39, %v8104_v0  ;;  %v10766_v39 = vld [vmem:[%s15443_s6 + $0x148] sm:$0xff]  ;;  %v10735_v0 = vld [vmem:[%s15443_s6 + $0x50] sm:$0xff] }
 0x859   : > { %8655 = vmatpush.bf16.msrb.mxu2 %v10725_v41  ;;  %8468 = vmatpush.bf16.msra.mxu3 %v10750_v24  ;;  %v10785_v41 = vld [vmem:[%s15443_s6 + $0x1e0] sm:$0xff]  ;;  %v10784_v24 = vld [vmem:[%s15443_s6 + $0x1d8] sm:$0xff] }
 0x85a   : > { %8040 = vst [vmem:[#allocation7 + $0x1c] sm:$0x3] %v8036_v62  ;;  %v7982_v45 = vadd.f32 %v7979_v20, %v7970_v13  ;;  %v15134_v20 = vld [vmem:[#allocation1 + $0x1] ss:$2 sm:$0xff]  ;;  %v10185_v13 = vrot.slane %v8128_v38, 9 }
 0x85b   : > { %8491 = vmatpush.bf16.msrb.mxu1 %v10771_v46  ;;  %v8139_v3 = vshrl.u32 %v15134_v20, 16  ;;  %v10746_v38 = vld [vmem:[%s15443_s6 + $0xa8] sm:$0xff]  ;;  %v10776_v46 = vld [vmem:[%s15443_s6 + $0x198] sm:$0xff] }
 0x85c   : > { %v7984_v9 = vmax.f32 %v7982_v45, 0.0  ;;  %v10761_v45 = vld [vmem:[%s15443_s6 + $0x120] sm:$0xff] }
 0x85d   : > { %8479 = vmatpush.bf16.msrb.mxu0 %v10761_v45  ;;  %v10742_v45 = vld [vmem:[%s15443_s6 + $0x88] sm:$0xff] }
 0x85e   : > { %v7988_v26 = vrot.slane %v7984_v9, 4  ;;  %v8037_v25 = vpack.c.bf16 %v7984_v9, %v7984_v9 }
 0x85f   : > { %v15093_v2 = vld [vmem:[#allocation7 + $0x10] sm:$0xf]  ;;  %8492 = vmatpush.bf16.msrb.mxu1 %v10770_v31  ;;  %v10741_v31 = vld [vmem:[%s15443_s6 + $0x80] sm:$0xff] }
 0x860   : > { %8066 = vst.sshfl [vmem:[#allocation1 + $0x30] sm:$0xff pattern:$0x75643120] %v15093_v2  ;;  %v8038_v50 = vpack.c.bf16 %v7988_v26, %v7988_v26  ;;  %v10749_v26 = vld [vmem:[%s15443_s6 + $0xc0] sm:$0xff] }
 0x861   : > { %v15099_v43 = vld [vmem:[#allocation7 + $0x1c] sm:$0xf]  ;;  %8041 = vst [vmem:[#allocation7 + $0x28] sm:$0x3] %v8037_v25  ;;  %8469 = vmatpush.bf16.msra.mxu3 %v10749_v26  ;;  %8480 = vmatpush.bf16.msrb.mxu0 %v10760_v51 }
 0x862   : > { %8074 = vst.sshfl [vmem:[#allocation1 + $0x10] sm:$0xff pattern:$0x75643120] %v15099_v43  ;;  %v10796_v26 = vld [vmem:[%s15443_s6 + $0x238] sm:$0xff] }
 0x863   : > { %8042 = vst [vmem:[#allocation7 + $0x34] sm:$0x3] %v8038_v50  ;;  %v10740_v50 = vld [vmem:[%s15443_s6 + $0x78] sm:$0xff]  ;;  %8493 = vmatpush.bf16.msrb.mxu1 %v10769_v7  ;;  %v10782_v7 = vld [vmem:[%s15443_s6 + $0x1c8] sm:$0xff] }
 0x865   : > { %8662 = vmatpush.bf16.msrb.mxu3 %v10740_v50  ;;  %8481 = vmatpush.bf16.msrb.mxu0 %v10759_v52  ;;  %v10775_v50 = vld [vmem:[%s15443_s6 + $0x190] sm:$0xff]  ;;  %v8698_v52 = vrot.slane %v15099_v43, 2 }
 0x867   : > { %v8070_v61 = vld [vmem:[#allocation1 + $0x30] ss:$2 sm:$0xff] }
 0x868   : > { %v15114_v14 = vld [vmem:[#allocation7 + $0x28] sm:$0xf]  ;;  %v8110_v32 = vshrl.u32 %v8070_v61, 16  ;;  %v8113_v18 = vshll.u32 %v8070_v61, 16 }
 0x869   : > { %v8076_v56 = vld [vmem:[#allocation1 + $0x10] ss:$2 sm:$0xff]  ;;  %8080 = vst.sshfl [vmem:[#allocation1 + $0x30] sm:$0xff pattern:$0x75643120] %v15114_v14  ;;  %8663 = vmatpush.bf16.msrb.mxu3 %v10739_v33  ;;  %8482 = vmatpush.bf16.msrb.mxu0 %v10758_v49  ;;  %v8699_v33 = vrot.slane %v15114_v14, 2 }
 0x86a   : > { %v15120_v63 = vld [vmem:[#allocation7 + $0x34] sm:$0xf]  ;;  %v8112_v28 = vrot.slane %v8110_v32, 7  ;;  %v8121_v27 = vshrl.u32 %v8076_v56, 16  ;;  %v8124_v44 = vshll.u32 %v8076_v56, 16 }
 0x86b   : > { %8086 = vst.sshfl [vmem:[#allocation1 + $0x10] sm:$0xff pattern:$0x75643120] %v15120_v63  ;;  %v8718_v49 = vsel %vm7689_vm13, %v15114_v14, %v8699_v33 }
 0x86c   : > { %v8115_v1 = vor.u32 %v8113_v18, %v8112_v28  ;;  %v8123_v48 = vrot.slane %v8121_v27, 7  ;;  %v10186_v18 = vrot.slane %v8139_v3, 9 }
 0x86d   : > { %8664 = vmatpush.bf16.msrb.mxu3 %v10738_v8 }
 0x86e   : > { %v15138_v5 = vsel %vm14842_vm3, %v10183_v42, %v8115_v1  ;;  %v8126_v54 = vor.u32 %v8124_v44, %v8123_v48  ;;  %v10768_v42 = vld [vmem:[%s15443_s6 + $0x158] sm:$0xff]  ;;  %v10757_v1 = vld [vmem:[%s15443_s6 + $0x100] sm:$0xff]  ;;  %v10187_v44 = vrot.slane %v8150_v53, 9 }
 0x86f   : > { %8165 = vst [vmem:[#allocation1 + $0x1] ss:$4 sm:$0xff] %v15138_v5  ;;  %8494 = vmatpush.bf16.msrb.mxu1 %v10768_v42  ;;  %8483 = vmatpush.bf16.msrb.mxu0 %v10757_v1  ;;  %v10788_v48 = vld [vmem:[%s15443_s6 + $0x1f8] sm:$0xff]  ;;  %v10794_v42 = vld [vmem:[%s15443_s6 + $0x228] sm:$0xff] }
 0x870   : > { %v8082_v40 = vld [vmem:[#allocation1 + $0x30] ss:$2 sm:$0xff]  ;;  %v15157_v60 = vsel %vm14842_vm3, %v10184_v6, %v8126_v54  ;;  %9050 = vmatpush.bf16.msra.mxu2 %v10788_v48 }
 0x871   : > { %8092 = vst.sshfl [vmem:[#allocation1 + $0x30] sm:$0xff pattern:$0x75643120] %v15143_v59  ;;  %v8132_v62 = vshrl.u32 %v8082_v40, 16  ;;  %v8135_v4 = vshll.u32 %v8082_v40, 16  ;;  %8665 = vmatpush.bf16.msrb.mxu3 %v10737_v16  ;;  %v10779_v40 = vld [vmem:[%s15443_s6 + $0x1b0] sm:$0xff] }
 0x872   : > { %v8088_v30 = vld [vmem:[#allocation1 + $0x10] ss:$2 sm:$0xff]  ;;  %v8771_v16 = vshrl.u32 %v8718_v49, 16 }
 0x873   : > { %8162 = vst [vmem:[#allocation1] ss:$4 sm:$0xff] %v8105_v21  ;;  %v8134_v17 = vrot.slane %v8132_v62, 7  ;;  %v8143_v36 = vshrl.u32 %v8088_v30, 16  ;;  %v8146_v61 = vshll.u32 %v8088_v30, 16  ;;  %8495 = vmatpush.bf16.msrb.mxu1 %v10767_v11  ;;  %8676 = vmatpush.bf16.msra.mxu0 %v10748_v19  ;;  %v10733_v30 = vld [vmem:[%s15443_s6 + $0x40] sm:$0xff] }
 0x874   : > { %8168 = vst [vmem:[#allocation1 + $0x2] ss:$4 sm:$0xff] %v15157_v60  ;;  %9051 = vmatpush.bf16.msra.mxu2 %v10787_v29  ;;  %v10744_v21 = vld [vmem:[%s15443_s6 + $0x98] sm:$0xff]  ;;  %v10778_v62 = vld [vmem:[%s15443_s6 + $0x1a8] sm:$0xff]  ;;  %v10773_v11 = vld [vmem:[%s15443_s6 + $0x180] sm:$0xff]  ;;  %v8774_v19 = vshll.u32 %v8718_v49, 16 }
 0x875   : > { %v8137_v9 = vor.u32 %v8135_v4, %v8134_v17  ;;  %v8145_v47 = vrot.slane %v8143_v36, 7  ;;  %8666 = vmatpush.bf16.msrb.mxu3 %v10736_v55  ;;  %v10743_v17 = vld [vmem:[%s15443_s6 + $0x90] sm:$0xff]  ;;  %v10777_v4 = vld [vmem:[%s15443_s6 + $0x1a0] sm:$0xff] }
 0x876   : > { %v10783_v36 = vld [vmem:[%s15443_s6 + $0x1d0] sm:$0xff] }
 0x877   : > { %v8138_v25 = vsel %vm14842_vm3, %v10185_v13, %v8137_v9  ;;  %v8148_v15 = vor.u32 %v8146_v61, %v8145_v47  ;;  %8496 = vmatpush.bf16.msrb.mxu1 %v10766_v39  ;;  %v8696_v9 = vrot.slane %v14995_v37, 2  ;;  %v8714_v39 = vsel %vm7692_vm5, %v15099_v43, %v8698_v52 }
 0x878   : > { %8171 = vst [vmem:[#allocation1 + $0x3] ss:$4 sm:$0xff] %v8138_v25  ;;  %v8094_v22 = vld [vmem:[#allocation1 + $0x30] ss:$2 sm:$0xff] }
 0x879   : > { %v8154_v32 = vshrl.u32 %v8094_v22, 16  ;;  %v8149_v28 = vsel %vm14842_vm3, %v10186_v18, %v8148_v15  ;;  %v8157_v27 = vshll.u32 %v8094_v22, 16  ;;  %8667 = vmatpush.bf16.msrb.mxu3 %v10735_v0  ;;  %v8703_v47 = vsel %vm7689_vm13, %v14995_v37, %v8696_v9  ;;  %v10795_v22 = vld [vmem:[%s15443_s6 + $0x230] sm:$0xff] }
 0x87a   : > { %v8704_v3 = vsel %vm7692_vm5, %v14995_v37, %v8696_v9  ;;  %v8732_v61 = vshrl.u32 %v8703_v47, 16  ;;  %v8735_v10 = vshll.u32 %v8703_v47, 16 }
 0x87b   : > { %v8156_v58 = vrot.slane %v8154_v32, 7  ;;  %8497 = vmatpush.bf16.msrb.mxu1 %v10765_v12  ;;  %v10774_v32 = vld [vmem:[%s15443_s6 + $0x188] sm:$0xff]  ;;  %v8706_v18 = vrot.slane %v8704_v3, 2 }
 0x87c   : > { %v8734_v53 = vrot.slane %v8732_v61, 6 }
 0x87d   : > { %v8159_v20 = vor.u32 %v8157_v27, %v8156_v58  ;;  %8668 = vmatpush.bf16.msrb.mxu3 %v10734_v23  ;;  %v8737_v27 = vrot.slane %v8735_v10, 7  ;;  %v8773_v23 = vrot.slane %v8771_v16, 6 }
 0x87f   : > { %v8172_v56 = vld.sshfl [vmem:[#allocation1] sm:$0xff pattern:$0x73625140]  ;;  %v8160_v54 = vsel %vm14842_vm3, %v10187_v44, %v8159_v20  ;;  %9036 = vmatpush.bf16.msra.mxu1 %v10780_v57  ;;  %v8741_v20 = vshll.u32 %v8706_v18, 16  ;;  %v8700_v57 = vrot.slane %v15120_v63, 2 }
 0x880   : > { %8174 = vst [vmem:[#allocation1] ss:$4 sm:$0xff] %v15138_v5  ;;  %8656 = vmatmul.bf16.vlgmr.msrb.gmra.mxu2 %v8172_v56  ;;  %v10747_v5 = vld [vmem:[%s15443_s6 + $0xb0] sm:$0xff]  ;;  %v8713_v56 = vsel %vm7689_vm13, %v15099_v43, %v8698_v52  ;;  %v10793_v44 = vld [vmem:[%s15443_s6 + $0x220] sm:$0xff]  ;;  %v8701_v52 = vrot.slane %v15143_v59, 2 }
 0x881   : > { %8176 = vst [vmem:[#allocation1 + $0x1] ss:$4 sm:$0xff] %v15157_v60  ;;  %8677 = vmatpush.bf16.msra.mxu0 %v10747_v5  ;;  %8669 = vmatpush.bf16.msrb.mxu3 %v10733_v30  ;;  %v8758_v58 = vshrl.u32 %v8713_v56, 16  ;;  %v8761_v1 = vshll.u32 %v8713_v56, 16  ;;  %v10789_v18 = vld [vmem:[%s15443_s6 + $0x200] sm:$0xff] }
 0x882   : > { %8178 = vst [vmem:[#allocation1 + $0x2] ss:$4 sm:$0xff] %v8138_v25 }
 0x883   : > { %8181 = vst [vmem:[#allocation1 + $0x3] ss:$4 sm:$0xff] %v8149_v28  ;;  %9037 = vmatpush.bf16.msra.mxu1 %v10779_v40  ;;  %v8760_v12 = vrot.slane %v8758_v58, 6  ;;  %v8763_v0 = vrot.slane %v8761_v1, 7  ;;  %v8716_v40 = vrot.slane %v8714_v39, 2 }
 0x885   : > { %8678 = vmatpush.bf16.msra.mxu0 %v10746_v38  ;;  %v8719_v38 = vsel %vm7692_vm5, %v15114_v14, %v8699_v33 }
 0x886   : > { %v8721_v30 = vrot.slane %v8719_v38, 2 }
 0x887   : > { %9038 = vmatpush.bf16.msra.mxu1 %v10778_v62  ;;  %v8764_v62 = vor.u32 %v8763_v0, %v8760_v12 }
 0x888   : > { %v8780_v9 = vshll.u32 %v8721_v30, 16 }
 0x889   : > { %8679 = vmatpush.bf16.msra.mxu0 %v10745_v35  ;;  %v8776_v35 = vrot.slane %v8774_v19, 7 }
 0x88a   : > { %v15239_v6 = vld.sshfl [vmem:[#allocation1] sm:$0xff pattern:$0x73625140]  ;;  %v8782_v3 = vrot.slane %v8780_v9, 7 }
 0x88b   : > { %8184 = vst [vmem:[#allocation1] ss:$4 sm:$0xff] %v15157_v60  ;;  %v10786_v60 = vld [vmem:[%s15443_s6 + $0x1e8] sm:$0xff]  ;;  %9039 = vmatpush.bf16.msra.mxu1 %v10777_v4  ;;  %v8723_v4 = vsel %vm7689_vm13, %v15120_v63, %v8700_v57 }
 0x88c   : > { %8186 = vst [vmem:[#allocation1 + $0x1] ss:$4 sm:$0xff] %v8138_v25  ;;  %9052 = vmatpush.bf16.msra.mxu2 %v10786_v60  ;;  %v8697_v25 = vrot.slane %v15093_v2, 2  ;;  %v10792_v60 = vld [vmem:[%s15443_s6 + $0x218] sm:$0xff] }
 0x88d   : > { %8188 = vst [vmem:[#allocation1 + $0x2] ss:$4 sm:$0xff] %v8149_v28  ;;  %8680 = vmatpush.bf16.msra.mxu0 %v10744_v21  ;;  %v8743_v21 = vrot.slane %v8741_v20, 7 }
 0x88e   : > { %8191 = vst [vmem:[#allocation1 + $0x3] ss:$4 sm:$0xff] %v8160_v54  ;;  %v8708_v15 = vsel %vm7689_vm13, %v15093_v2, %v8697_v25  ;;  %v8709_v48 = vsel %vm7692_vm5, %v15093_v2, %v8697_v25  ;;  %v8738_v54 = vor.u32 %v8737_v27, %v8734_v53  ;;  %v8784_v25 = vshrl.u32 %v8723_v4, 16 }
 0x88f   : > { %9040 = vmatpush.bf16.msra.mxu1 %v10776_v46  ;;  %v8745_v8 = vshrl.u32 %v8708_v15, 16  ;;  %v8748_v28 = vshll.u32 %v8708_v15, 16  ;;  %v8729_v27 = vsel %vm7692_vm5, %v15143_v59, %v8701_v52 }
 0x890   : > { %9053 = vmatpush.bf16.msra.mxu2 %v10785_v41  ;;  %v8786_v10 = vrot.slane %v8784_v25, 6 }
 0x891   : > { %8681 = vmatpush.bf16.msra.mxu0 %v10743_v17  ;;  %v8747_v55 = vrot.slane %v8745_v8, 6  ;;  %v8750_v5 = vrot.slane %v8748_v28, 7 }
 0x893   : > { %9041 = vmatpush.bf16.msra.mxu1 %v10775_v50  ;;  %v8751_v41 = vor.u32 %v8750_v5, %v8747_v55 }
 0x894   : > { %9054 = vmatpush.bf16.msra.mxu2 %v10784_v24  ;;  %v8767_v24 = vshll.u32 %v8716_v40, 16 }
 0x895   : > { %v15280_v13 = vld.sshfl [vmem:[#allocation1] sm:$0xff pattern:$0x73625140]  ;;  %8682 = vmatpush.bf16.msra.mxu0 %v10742_v45  ;;  %v10791_v45 = vld [vmem:[%s15443_s6 + $0x210] sm:$0xff]  ;;  %v8752_v46 = vrot.slane %v8751_v41, 2 }
 0x896   : > { %8242 = vst [vmem:[#allocation1] ss:$4 sm:$0xff] %v14995_v37  ;;  %v10781_v37 = vld [vmem:[%s15443_s6 + $0x1c0] sm:$0xff]  ;;  %v8769_v47 = vrot.slane %v8767_v24, 7 }
 0x897   : > { %8244 = vst [vmem:[#allocation1 + $0x1] ss:$4 sm:$0xff] %v15093_v2  ;;  %9042 = vmatpush.bf16.msra.mxu1 %v10774_v32  ;;  %v9080_v32 = vld [vmem:[%s15444_s7 + $0x2] sm:$0x3] }
 0x898   : > { %8246 = vst [vmem:[#allocation1 + $0x2] ss:$4 sm:$0xff] %v15099_v43  ;;  %9055 = vmatpush.bf16.msra.mxu2 %v10783_v36  ;;  %v9083_v49 = vperm.slane %v9080_v32, 1 }
 0x899   : > { %8248 = vst [vmem:[#allocation1 + $0x3] ss:$4 sm:$0xff] %v15114_v14  ;;  %8683 = vmatpush.bf16.msra.mxu0 %v10741_v31 }
 0x89a   : > { %9086 = vrot.lane.b32.xlu2 %v9083_v49, %s10943_s21 }
 0x89b   : > { %9043 = vmatpush.bf16.msra.mxu1 %v10773_v11  ;;  %v8731_v11 = vrot.slane %v8729_v27, 2 }
 0x89c   : > { %9056 = vmatpush.bf16.msra.mxu2 %v10782_v7  ;;  %v10790_v7 = vld [vmem:[%s15443_s6 + $0x208] sm:$0xff] }
 0x89d   : > { %v8806_v39 = vshll.u32 %v8731_v11, 16 }
 0x8a0   : > { %v8249_v51 = vld.sshfl [vmem:[#allocation1] sm:$0xff pattern:$0x73625140]  ;;  %9057 = vmatpush.bf16.msra.mxu2 %v10781_v37  ;;  %v9082_v37 = vperm.slane %v9080_v32, 0 }
 0x8a1   : > { %8255 = vst [vmem:[#allocation1 + $0x2] ss:$4 sm:$0xff] %v15114_v14  ;;  %8470 = vmatmul.bf16.vlgmr.msra.gmra.mxu3 %v8249_v51  ;;  %v8787_v51 = vshll.u32 %v8723_v4, 16 }
 0x8a2   : > { %8257 = vst [vmem:[#allocation1 + $0x3] ss:$4 sm:$0xff] %v15120_v63  ;;  %9064 = vmatpush.bf16.msra.mxu3 %v10796_v26  ;;  %v8765_v26 = vrot.slane %v8764_v62, 2  ;;  %9084 = vrot.lane.b32.xlu1 %v9082_v37, %s10943_s21  ;;  %s296_s21 = sand.u32 1, %s10929_s28  }
 0x8a3   : > { %8251 = vst [vmem:[#allocation1] ss:$4 sm:$0xff] %v15093_v2  ;;  %v8711_v2 = vrot.slane %v8709_v48, 2  ;;  %v8789_v15 = vrot.slane %v8787_v51, 7  ;;  %s9178_s24 = sshll.u32 %s296_s21, 4  ;;  %s9097_s9 = scalar_lea.sflag [#allocation9], %s296_s21 }
 0x8a4   : > { %8253 = vst [vmem:[#allocation1 + $0x1] ss:$4 sm:$0xff] %v15099_v43  ;;  %v8770_v61 = vsel %vm14943_vm2, %v8765_v26, %v8769_v47  ;;  %s298_s26 = scalar_lea.vmem [#allocation8], %s9178_s24 }
 0x8a5   : > { %v8754_v17 = vshll.u32 %v8711_v2, 16  ;;  %v8790_v8 = vor.u32 %v8789_v15, %v8786_v10  ;;  %s9109_s13 = sshll.u32 %s298_s26, 4  ;;  %s9110_s13 = int_to_ptr.vmem [resolvable:$true] %s9109_s13 }
 0x8a6   : > { %9065 = vmatpush.bf16.msra.mxu3 %v10795_v22  ;;  %v8724_v22 = vsel %vm7692_vm5, %v15120_v63, %v8700_v57 }
 0x8a7   : > { %v8756_v31 = vrot.slane %v8754_v17, 7  ;;  %v8791_v1 = vrot.slane %v8790_v8, 2 }
 0x8a9   : > { %v8757_v33 = vsel %vm14943_vm2, %v8752_v46, %v8756_v31 }
 0x8aa   : > { %9066 = vmatpush.bf16.msra.mxu3 %v10794_v42  ;;  %v8728_v42 = vsel %vm7689_vm13, %v15143_v59, %v8701_v52 }
 0x8ab   : > { %v8258_v29 = vld.sshfl [vmem:[#allocation1] sm:$0xff pattern:$0x73625140]  ;;  %v8797_v28 = vshrl.u32 %v8728_v42, 16  ;;  %v8800_v53 = vshll.u32 %v8728_v42, 16 }
 0x8ac   : > { %8484 = vmatmul.bf16.vlgmr.msrb.gmra.mxu0 %v8258_v29  ;;  %8260 = vst [vmem:[#allocation1] ss:$4 sm:$0xff] %v15099_v43  ;;  %v8739_v43 = vrot.slane %v8738_v54, 2 }
 0x8ad   : > { %8262 = vst [vmem:[#allocation1 + $0x1] ss:$4 sm:$0xff] %v15114_v14  ;;  %v8777_v14 = vor.u32 %v8776_v35, %v8773_v23  ;;  %v8799_v16 = vrot.slane %v8797_v28, 6  ;;  %v8802_v19 = vrot.slane %v8800_v53, 7 }
 0x8ae   : > { %8264 = vst [vmem:[#allocation1 + $0x2] ss:$4 sm:$0xff] %v15120_v63  ;;  %9067 = vmatpush.bf16.msra.mxu3 %v10793_v44  ;;  %v8744_v36 = vsel %vm14943_vm2, %v8739_v43, %v8743_v21  ;;  %v8726_v63 = vrot.slane %v8724_v22, 2 }
 0x8af   : > { %8266 = vst [vmem:[#allocation1 + $0x3] ss:$4 sm:$0xff] %v15143_v59  ;;  %v8778_v50 = vrot.slane %v8777_v14, 2  ;;  %v8808_v59 = vrot.slane %v8806_v39, 7 }
 0x8b0   : > { %v8793_v58 = vshll.u32 %v8726_v63, 16 }
 0x8b1   : > { %8670 = vmatmul.bf16.vlgmr.msrb.gmra.mxu3 %v15239_v6  ;;  %v8783_v56 = vsel %vm14943_vm2, %v8778_v50, %v8782_v3 }
 0x8b2   : > { %9068 = vmatpush.bf16.msra.mxu3 %v10792_v60  ;;  %v8795_v44 = vrot.slane %v8793_v58, 7 }
 0x8b4   : > { %v8796_v20 = vsel %vm14943_vm2, %v8791_v1, %v8795_v44 }
 0x8b6   : > { %v8267_v6 = vld.sshfl [vmem:[#allocation1] sm:$0xff pattern:$0x73625140]  ;;  %9069 = vmatpush.bf16.msra.mxu3 %v10791_v45 }
 0x8b7   : > { %8498 = vmatmul.bf16.vlgmr.msrb.gmra.mxu1 %v8267_v6  ;;  %8811 = vst [vmem:[#allocation1] ss:$4 sm:$0xff] %v8744_v36 }
 0x8b8   : > { %8814 = vst [vmem:[#allocation1 + $0x1] ss:$4 sm:$0xff] %v8757_v33 }
 0x8b9   : > { %8817 = vst [vmem:[#allocation1 + $0x2] ss:$4 sm:$0xff] %v8770_v61 }
 0x8ba   : > { %8820 = vst [vmem:[#allocation1 + $0x3] ss:$4 sm:$0xff] %v8783_v56  ;;  %9070 = vmatpush.bf16.msra.mxu3 %v10790_v7 }
 0x8bc   : > { %8684 = vmatmul.bf16.vlgmr.msra.gmra.mxu0 %v15280_v13  ;;  %v8803_v13 = vor.u32 %v8802_v19, %v8799_v16 }
 0x8be   : > { %9071 = vmatpush.bf16.msra.mxu3 %v10789_v18  ;;  %v8804_v55 = vrot.slane %v8803_v13, 2 }
 0x8c0   : > { %v8809_v29 = vsel %vm14943_vm2, %v8804_v55, %v8808_v59 }
 0x8c1   : > { %v8821_v48 = vld.sshfl [vmem:[#allocation1] sm:$0xff pattern:$0x73625140] }
 0x8c2   : > { %8823 = vst [vmem:[#allocation1] ss:$4 sm:$0xff] %v8757_v33 }
 0x8c3   : > { %8825 = vst [vmem:[#allocation1 + $0x1] ss:$4 sm:$0xff] %v8770_v61 }
 0x8c4   : > { %8827 = vst [vmem:[#allocation1 + $0x2] ss:$4 sm:$0xff] %v8783_v56 }
 0x8c5   : > { %8830 = vst [vmem:[#allocation1 + $0x3] ss:$4 sm:$0xff] %v8796_v20 }
 0x8c7   : > { %9044 = vmatmul.bf16.vlgmr.msra.gmra.mxu1 %v8821_v48 }
 0x8cc   : > { %v8831_v5 = vld.sshfl [vmem:[#allocation1] sm:$0xff pattern:$0x73625140] }
 0x8cd   : > { %9058 = vmatmul.bf16.vlgmr.msra.gmra.mxu2 %v8831_v5  ;;  %8833 = vst [vmem:[#allocation1] ss:$4 sm:$0xff] %v8770_v61 }
 0x8ce   : > { %8835 = vst [vmem:[#allocation1 + $0x1] ss:$4 sm:$0xff] %v8783_v56 }
 0x8cf   : > { %8837 = vst [vmem:[#allocation1 + $0x2] ss:$4 sm:$0xff] %v8796_v20 }
 0x8d0   : > { %8840 = vst [vmem:[#allocation1 + $0x3] ss:$4 sm:$0xff] %v8809_v29 }
 0x8d7   : > { %v8841_v54 = vld.sshfl [vmem:[#allocation1] sm:$0xff pattern:$0x73625140] }
 0x8d8   : > { %9072 = vmatmul.bf16.vlgmr.msra.gmra.mxu3 %v8841_v54 }
 0x8f4   : > { %v9087_v46 = vpop.permute.xlu2 %9086 }
 0x903   : > { %v8657_v38 = vpop.f32.mrf.mxu2 }
 0x90b   : > { %v8659_v35 = vpop.f32.mrf.mxu2 }
 0x914   : > { %v9085_v9 = vpop.permute.xlu1 %9084 }
 0x915   : > { %v9088_v51 = vsel %vm3194_vm10, %v9085_v9, %v9087_v46 }
 0x924   : > { %v8471_v12 = vpop.f32.mrf.mxu3 }
 0x929   : > { %v8485_v2 = vpop.f32.mrf.mxu0 }
 0x92a   : > { %v8486_v41 = vadd.f32 %v8485_v2, %v8471_v12 }
 0x92c   : > { %v8473_v0 = vpop.f32.mrf.mxu3 }
 0x931   : > { %v8487_v40 = vpop.f32.mrf.mxu0 }
 0x932   : > { %v8488_v4 = vadd.f32 %v8487_v40, %v8473_v0 }
 0x934   : > { %v8499_v57 = vpop.f32.mrf.mxu1  ;;  %v8671_v23 = vpop.f32.mrf.mxu3 }
 0x935   : > { %v8500_v34 = vadd.f32 %v8499_v57, %v8486_v41 }
 0x937   : > { %v8658_v21 = vadd.f32 %v8657_v38, %v8500_v34 }
 0x939   : > { %v8685_v62 = vpop.f32.mrf.mxu0  ;;  %v8672_v14 = vadd.f32 %v8671_v23, %v8658_v21 }
 0x93b   : > { %v8686_v26 = vadd.f32 %v8685_v62, %v8672_v14 }
 0x93c   : > { %v8501_v60 = vpop.f32.mrf.mxu1  ;;  %v8673_v30 = vpop.f32.mrf.mxu3 }
 0x93d   : > { %v8502_v24 = vadd.f32 %v8501_v60, %v8488_v4 }
 0x93f   : > { %v8660_v31 = vadd.f32 %v8659_v35, %v8502_v24 }
 0x941   : > { %v8674_v52 = vadd.f32 %v8673_v30, %v8660_v31  ;;  %v8687_v7 = vpop.f32.mrf.mxu0 }
 0x943   : > { %v8688_v10 = vadd.f32 %v8687_v7, %v8674_v52 }
 0x944   : > { %v9045_v17 = vpop.f32.mrf.mxu1 }
 0x94c   : > { %v9047_v33 = vpop.f32.mrf.mxu1 }
 0x950   : > { %v9059_v43 = vpop.f32.mrf.mxu2 }
 0x951   : > { %v9060_v45 = vadd.f32 %v9059_v43, %v9045_v17 }
 0x958   : > { %v9061_v47 = vpop.f32.mrf.mxu2 }
 0x959   : > { %v9062_v22 = vadd.f32 %v9061_v47, %v9047_v33 }
 0x95b   : > { %v9073_v36 = vpop.f32.mrf.mxu3 }
 0x95c   : > { %v9074_v25 = vadd.f32 %v9073_v36, %v9060_v45 }
 0x95e   : > { %v9078_v50 = vadd.f32 %v9074_v25, %v8686_v26 }
 0x960   : > { %v9090_v6 = vadd.f32 %v9088_v51, %v9078_v50 }
 0x962   : > { %v9092_v3 = vmax.f32 %v9090_v6, 0.0 }
 0x963   : > { %v9075_v61 = vpop.f32.mrf.mxu3 }
 0x964   : > { %9094 = vst [vmem:[%s298_s26] sm:$0xff] %v9092_v3  ;;  %v9076_v15 = vadd.f32 %v9075_v61, %v9062_v22 }
 0x966   : > { %v9079_v32 = vadd.f32 %v9076_v15, %v8688_v10 }
 0x968   : > { %v9091_v56 = vadd.f32 %v9088_v51, %v9079_v32 }
 0x96a   : > { %v9093_v37 = vmax.f32 %v9091_v56, 0.0 }
 0x96c   : > { %9095 = vst [vmem:[%s298_s26 + $0x8] sm:$0xff] %v9093_v37 }
 0x96d   : > { %10902 = shalt.err (!%p10899_p3)
}
 0x96e   : > { %s10945_s21 = smov 128  }
 0x96f   : > { %10798 = dma.vmem_to_hbm [thread:$0]  (%p11029_p5), %s9110_s13, 256, %s9112_s17, %s9097_s9, %s10945_s21, %s10945_s21, %s10940_s23  }
 0x970 PF: > { %p10804_p4 = scmp.ge.s32.totalorder %s10937_s30, 2  ;;  %s9126_s26 = sand.u32 1, %s10925_s27  }
 0x971   : > { %s9127_s12 = scalar_lea.sflag [#allocation9], %s9126_s26 }
 0x972   : > { %p10801_p7 = pnand %p10804_p4, %p11033_p6 }
 0x974   : > { %p10802_p8 = pneg %p10801_p7 }
 0x976   : > { %10920 = dma.done.wait (%p10802_p8), %s9127_s12, 256  }
 0x977   : > { %10922 = vsyncadd (%p10802_p8), %s9127_s12, 4294967040  ;;  %p18_p9 = scmp.ge.s32.totalorder %s11016_s11, 4   ;;  %s15514_s27 = smov %s10929_s28 }
 0x978   : > { %s15515_s28 = smov %s10933_s29  ;;  %s15516_s29 = smov %s11027_s14 }
 0x979   : > { %s15517_s30 = smov %s11016_s11  ;;  %20 = sbr.rel (!%p18_p9) target bundleno = 3 (0x3), region = 173 }
 0x97e   :  { %9133 = vsyncpa [#allocation9], 1 }
 0x97f   :  { %9135 = vsyncpa [#allocation9 + $0x1], 1 }

</bundles_post_ra>
